<compile_context>
chip_gen: v7x
topology: tpu7x:2x2x1
jax: 0.10.0
libtpu: 0.0.40
codegen_flags: <defaults>
</compile_context>

<pallas_src>
import functools

import jax
import jax.numpy as jnp
from jax.experimental import pallas as pl
from jax.experimental.pallas import tpu as pltpu

IN_FEATURES = 128 * 3 * 3   # 1152
HIDDEN = 1024
OUT = 2
OUT_PADDED = 128            # lane-dense padded logits
EPS = 1e-5
DROP_P = 0.5
NEG_INF = -1e30


def _keep_mask(shape, seed_u32, salt):
    """Stateless lowbias32-style hash -> per-element keep mask (p_keep = 0.5).

    Pure 32-bit integer VPU ops, so it lowers on Mosaic and in interpret mode
    alike (pltpu.prng_random_bits has no CPU/interpret lowering).
    """
    r = jax.lax.broadcasted_iota(jnp.uint32, shape, 0) * jnp.uint32(shape[1])
    r = r + jax.lax.broadcasted_iota(jnp.uint32, shape, 1)
    r = r + seed_u32 * jnp.uint32(0x9E3779B1) + jnp.uint32(salt)
    r = r ^ (r >> 16)
    r = r * jnp.uint32(0x7FEB352D)
    r = r ^ (r >> 15)
    r = r * jnp.uint32(0x846CA68B)
    r = r ^ (r >> 16)
    return (r >> 31) == jnp.uint32(1)      # top bit -> keep with prob 0.5


def _bn_relu_dropout(h, gamma, beta, seed_u32, salt, inv_b):
    """Fused BatchNorm1d(training) + ReLU + dropout(p=0.5).

    One reduction pass (sum and sum-of-squares), var = E[x^2] - mean^2, then
    the per-element work is a single FMA: the dropout 1/(1-p)=2 factor is
    folded into the BN scale/shift (relu(2x) == 2*relu(x)).
    """
    s1 = jnp.sum(h, axis=0, keepdims=True)
    s2 = jnp.sum(h * h, axis=0, keepdims=True)
    mean = s1 * inv_b
    var = s2 * inv_b - mean * mean
    scale = gamma * jax.lax.rsqrt(var + EPS)
    scale2 = scale + scale
    shift2 = (beta - mean * scale) * 2.0
    hn = h * scale2 + shift2
    keep = _keep_mask(h.shape, seed_u32, salt)
    return jnp.where(keep, jnp.maximum(hn, 0.0), 0.0)


def domain_classifier_kernel(seed_ref, x_ref,
                             w1_ref, b1_ref, g1_ref, be1_ref,
                             w2_ref, b2_ref, g2_ref, be2_ref,
                             w3_ref, b3_ref,
                             out_ref, *, inv_b):
    seed_u32 = seed_ref[0].astype(jnp.uint32)

    # GradReverse is identity in the forward pass.
    x = x_ref[...]

    # fc1 (bf16 weights, f32 accumulate) -> bn1 -> relu -> dropout.
    h = jnp.dot(x.astype(jnp.bfloat16), w1_ref[...],
                preferred_element_type=jnp.float32) + b1_ref[...]
    h = _bn_relu_dropout(h, g1_ref[...], be1_ref[...], seed_u32, 0x1234, inv_b)

    # fc2 -> bn2 -> relu -> dropout.
    h = jnp.dot(h.astype(jnp.bfloat16), w2_ref[...],
                preferred_element_type=jnp.float32) + b2_ref[...]
    h = _bn_relu_dropout(h, g2_ref[...], be2_ref[...], seed_u32, 0x5678, inv_b)

    # fc3 on lane-padded (1024, 128) weights; padded lanes carry a ~-inf bias
    # so they vanish in the softmax.  Real logits live in columns [0, OUT).
    z = jnp.dot(h.astype(jnp.bfloat16), w3_ref[...],
                preferred_element_type=jnp.float32) + b3_ref[...]
    m = jnp.max(z, axis=1, keepdims=True)
    lse = jnp.log(jnp.sum(jnp.exp(z - m), axis=1, keepdims=True)) + m
    out_ref[...] = z - lse


def svhn_domain_classifier(x, params, constant=1.0, seed=0):
    """Forward pass. `constant` only affects gradients in the original module."""
    del constant  # identity in the forward pass (gradient reversal only)
    B = x.shape[0]
    seed_arr = jnp.asarray([seed], dtype=jnp.int32)

    vmem = pl.BlockSpec(memory_space=pltpu.MemorySpace.VMEM)
    smem = pl.BlockSpec(memory_space=pltpu.MemorySpace.SMEM)

    kernel = functools.partial(domain_classifier_kernel, inv_b=1.0 / B)
    padded = pl.pallas_call(
        kernel,
        out_shape=jax.ShapeDtypeStruct((B, OUT_PADDED), jnp.float32),
        in_specs=[smem] + [vmem] * 11,
        out_specs=vmem,
        # ~4.3 MiB of bf16 weights + activations; leave headroom on v7x's
        # 64 MiB/TC instead of requesting the whole physical VMEM.
        compiler_params=pltpu.CompilerParams(vmem_limit_bytes=32 << 20),
    )(seed_arr, x,
      params["w1"], params["b1"], params["g1"], params["be1"],
      params["w2"], params["b2"], params["g2"], params["be2"],
      params["w3"], params["b3"])
    return padded[:, :OUT]


def init_params(key):
    """Deterministic PyTorch-style uniform(-1/sqrt(fan_in), +...) init."""
    k1, k2, k3 = jax.random.split(key, 3)

    def linear(k, fan_in, fan_out):
        bound = 1.0 / (fan_in ** 0.5)
        kw, kb = jax.random.split(k)
        w = jax.random.uniform(kw, (fan_in, fan_out), jnp.float32, -bound, bound)
        b = jax.random.uniform(kb, (1, fan_out), jnp.float32, -bound, bound)
        return w, b

    w1, b1 = linear(k1, IN_FEATURES, HIDDEN)
    w2, b2 = linear(k2, HIDDEN, HIDDEN)
    w3, b3 = linear(k3, HIDDEN, OUT)

    # Pad fc3 to 128 output lanes: zero weights + ~-inf bias in padded lanes
    # so they drop out of the log_softmax; keeps the MXU op and the output
    # store lane-dense instead of a degenerate N=2 shape.
    w3p = jnp.zeros((HIDDEN, OUT_PADDED), jnp.float32).at[:, :OUT].set(w3)
    b3p = jnp.full((1, OUT_PADDED), NEG_INF, jnp.float32).at[:, :OUT].set(b3)

    return dict(
        # bf16 weight storage halves the dominant HBM traffic; f32 accumulate.
        w1=w1.astype(jnp.bfloat16), b1=b1,
        g1=jnp.ones((1, HIDDEN), jnp.float32),
        be1=jnp.zeros((1, HIDDEN), jnp.float32),
        w2=w2.astype(jnp.bfloat16), b2=b2,
        g2=jnp.ones((1, HIDDEN), jnp.float32),
        be2=jnp.zeros((1, HIDDEN), jnp.float32),
        w3=w3p.astype(jnp.bfloat16), b3=b3p,
    )


if __name__ == "__main__":
    key = jax.random.PRNGKey(0)
    kx, kp = jax.random.split(key)

    B = 8  # small batch; BatchNorm (training mode) needs B >= 2
    x = jax.random.normal(kx, (B, IN_FEATURES), dtype=jnp.float32)
    params = init_params(kp)

    out = svhn_domain_classifier(x, params, constant=0.5, seed=0)
    out = jax.block_until_ready(out)

    assert out.shape == (B, OUT)
    assert bool(jnp.all(jnp.isfinite(out)))
    # log_softmax rows should sum to ~1 in probability space.
    row_sums = jnp.sum(jnp.exp(out), axis=1)
    assert bool(jnp.all(jnp.abs(row_sums - 1.0) < 1e-3))
    print("KERNEL_OK")
</pallas_src>

<mosaic_0001>
module attributes {stable_mosaic.version = 11 : i64} {
  func.func @domain_classifier_kernel(%arg0: memref<1xi32, #tpu.memory_space<smem>>, %arg1: memref<8x1152xf32, #tpu.memory_space<vmem>>, %arg2: memref<1152x1024xbf16, #tpu.memory_space<vmem>>, %arg3: memref<1x1024xf32, #tpu.memory_space<vmem>>, %arg4: memref<1x1024xf32, #tpu.memory_space<vmem>>, %arg5: memref<1x1024xf32, #tpu.memory_space<vmem>>, %arg6: memref<1024x1024xbf16, #tpu.memory_space<vmem>>, %arg7: memref<1x1024xf32, #tpu.memory_space<vmem>>, %arg8: memref<1x1024xf32, #tpu.memory_space<vmem>>, %arg9: memref<1x1024xf32, #tpu.memory_space<vmem>>, %arg10: memref<1024x128xbf16, #tpu.memory_space<vmem>>, %arg11: memref<1x128xf32, #tpu.memory_space<vmem>>, %arg12: memref<8x128xf32, #tpu.memory_space<vmem>>) attributes {dimension_semantics = [], scalar_prefetch = 0 : i64, scratch_operands = 0 : i64, tpu.core_type = #tpu.core_type<tc>} {
    %c0 = arith.constant 0 : index
    %0 = memref.load %arg0[%c0] : memref<1xi32, #tpu.memory_space<smem>>
    %c0_0 = arith.constant 0 : index
    %c0_1 = arith.constant 0 : index
    %1 = vector.load %arg1[%c0_0, %c0_1] : memref<8x1152xf32, #tpu.memory_space<vmem>>, vector<8x1152xf32>
    %2 = arith.truncf %1 : vector<8x1152xf32> to vector<8x1152xbf16>
    %c0_2 = arith.constant 0 : index
    %c0_3 = arith.constant 0 : index
    %3 = vector.load %arg2[%c0_2, %c0_3] : memref<1152x1024xbf16, #tpu.memory_space<vmem>>, vector<1152x1024xbf16>
    %cst = arith.constant dense<0.000000e+00> : vector<8x1024xf32>
    %4 = tpu.matmul %2, %3, %cst {dimension_numbers = #tpu.dot_dimension_numbers<[1], [0], [0], [1], [0, 0, 1, 1], [], []>} : vector<8x1152xbf16>, vector<1152x1024xbf16>, vector<8x1024xf32> -> vector<8x1024xf32>
    %c0_4 = arith.constant 0 : index
    %c0_5 = arith.constant 0 : index
    %5 = vector.load %arg3[%c0_4, %c0_5] : memref<1x1024xf32, #tpu.memory_space<vmem>>, vector<1x1024xf32>
    %6 = vector.broadcast %5 : vector<1x1024xf32> to vector<8x1024xf32>
    %7 = arith.addf %4, %6 : vector<8x1024xf32>
    %c0_6 = arith.constant 0 : index
    %c0_7 = arith.constant 0 : index
    %8 = vector.load %arg4[%c0_6, %c0_7] : memref<1x1024xf32, #tpu.memory_space<vmem>>, vector<1x1024xf32>
    %c0_8 = arith.constant 0 : index
    %c0_9 = arith.constant 0 : index
    %9 = vector.load %arg5[%c0_8, %c0_9] : memref<1x1024xf32, #tpu.memory_space<vmem>>, vector<1x1024xf32>
    %cst_10 = arith.constant dense<0.000000e+00> : vector<1024xf32>
    %10 = vector.multi_reduction <add>, %7, %cst_10 [0] : vector<8x1024xf32> to vector<1024xf32>
    %11 = vector.shape_cast %10 : vector<1024xf32> to vector<1x1024xf32>
    %12 = arith.mulf %7, %7 : vector<8x1024xf32>
    %cst_11 = arith.constant dense<0.000000e+00> : vector<1024xf32>
    %13 = vector.multi_reduction <add>, %12, %cst_11 [0] : vector<8x1024xf32> to vector<1024xf32>
    %14 = vector.shape_cast %13 : vector<1024xf32> to vector<1x1024xf32>
    %cst_12 = arith.constant 1.250000e-01 : f32
    %15 = vector.broadcast %cst_12 : f32 to vector<1x1024xf32>
    %16 = arith.mulf %11, %15 : vector<1x1024xf32>
    %cst_13 = arith.constant 1.250000e-01 : f32
    %17 = vector.broadcast %cst_13 : f32 to vector<1x1024xf32>
    %18 = arith.mulf %14, %17 : vector<1x1024xf32>
    %19 = arith.mulf %16, %16 : vector<1x1024xf32>
    %20 = arith.subf %18, %19 : vector<1x1024xf32>
    %cst_14 = arith.constant 9.99999974E-6 : f32
    %21 = vector.broadcast %cst_14 : f32 to vector<1x1024xf32>
    %22 = arith.addf %20, %21 : vector<1x1024xf32>
    %23 = math.rsqrt %22 : vector<1x1024xf32>
    %24 = arith.mulf %8, %23 : vector<1x1024xf32>
    %25 = arith.addf %24, %24 : vector<1x1024xf32>
    %26 = arith.mulf %16, %24 : vector<1x1024xf32>
    %27 = arith.subf %9, %26 : vector<1x1024xf32>
    %cst_15 = arith.constant 2.000000e+00 : f32
    %28 = vector.broadcast %cst_15 : f32 to vector<1x1024xf32>
    %29 = arith.mulf %27, %28 : vector<1x1024xf32>
    %30 = vector.broadcast %25 : vector<1x1024xf32> to vector<8x1024xf32>
    %31 = arith.mulf %7, %30 : vector<8x1024xf32>
    %32 = vector.broadcast %29 : vector<1x1024xf32> to vector<8x1024xf32>
    %33 = arith.addf %31, %32 : vector<8x1024xf32>
    %34 = tpu.iota {dimensions = array<i32: 0>} : vector<8x1024xi32>
    %c1024_i32 = arith.constant 1024 : i32
    %35 = vector.broadcast %c1024_i32 : i32 to vector<8x1024xi32>
    %36 = arith.muli %34, %35 : vector<8x1024xi32>
    %37 = tpu.iota {dimensions = array<i32: 1>} : vector<8x1024xi32>
    %38 = arith.addi %36, %37 : vector<8x1024xi32>
    %c-1640531535_i32 = arith.constant -1640531535 : i32
    %39 = arith.muli %0, %c-1640531535_i32 : i32
    %40 = vector.broadcast %39 : i32 to vector<8x1024xi32>
    %41 = arith.addi %38, %40 : vector<8x1024xi32>
    %c4660_i32 = arith.constant 4660 : i32
    %42 = vector.broadcast %c4660_i32 : i32 to vector<8x1024xi32>
    %43 = arith.addi %41, %42 : vector<8x1024xi32>
    %c16_i32 = arith.constant 16 : i32
    %44 = vector.broadcast %c16_i32 : i32 to vector<8x1024xi32>
    %45 = arith.shrui %43, %44 : vector<8x1024xi32>
    %46 = arith.xori %43, %45 : vector<8x1024xi32>
    %c2146121005_i32 = arith.constant 2146121005 : i32
    %47 = vector.broadcast %c2146121005_i32 : i32 to vector<8x1024xi32>
    %48 = arith.muli %46, %47 : vector<8x1024xi32>
    %c15_i32 = arith.constant 15 : i32
    %49 = vector.broadcast %c15_i32 : i32 to vector<8x1024xi32>
    %50 = arith.shrui %48, %49 : vector<8x1024xi32>
    %51 = arith.xori %48, %50 : vector<8x1024xi32>
    %c-2073254261_i32 = arith.constant -2073254261 : i32
    %52 = vector.broadcast %c-2073254261_i32 : i32 to vector<8x1024xi32>
    %53 = arith.muli %51, %52 : vector<8x1024xi32>
    %c16_i32_16 = arith.constant 16 : i32
    %54 = vector.broadcast %c16_i32_16 : i32 to vector<8x1024xi32>
    %55 = arith.shrui %53, %54 : vector<8x1024xi32>
    %56 = arith.xori %53, %55 : vector<8x1024xi32>
    %c31_i32 = arith.constant 31 : i32
    %57 = vector.broadcast %c31_i32 : i32 to vector<8x1024xi32>
    %58 = arith.shrui %56, %57 : vector<8x1024xi32>
    %c1_i32 = arith.constant 1 : i32
    %59 = vector.broadcast %c1_i32 : i32 to vector<8x1024xi32>
    %60 = arith.cmpi eq, %58, %59 : vector<8x1024xi32>
    %cst_17 = arith.constant 0.000000e+00 : f32
    %61 = vector.broadcast %cst_17 : f32 to vector<8x1024xf32>
    %62 = arith.maximumf %33, %61 : vector<8x1024xf32>
    %cst_18 = arith.constant 0.000000e+00 : f32
    %63 = vector.broadcast %cst_18 : f32 to vector<8x1024xf32>
    %64 = arith.select %60, %62, %63 : vector<8x1024xi1>, vector<8x1024xf32>
    %65 = arith.truncf %64 : vector<8x1024xf32> to vector<8x1024xbf16>
    %c0_19 = arith.constant 0 : index
    %c0_20 = arith.constant 0 : index
    %66 = vector.load %arg6[%c0_19, %c0_20] : memref<1024x1024xbf16, #tpu.memory_space<vmem>>, vector<1024x1024xbf16>
    %cst_21 = arith.constant dense<0.000000e+00> : vector<8x1024xf32>
    %67 = tpu.matmul %65, %66, %cst_21 {dimension_numbers = #tpu.dot_dimension_numbers<[1], [0], [0], [1], [0, 0, 1, 1], [], []>} : vector<8x1024xbf16>, vector<1024x1024xbf16>, vector<8x1024xf32> -> vector<8x1024xf32>
    %c0_22 = arith.constant 0 : index
    %c0_23 = arith.constant 0 : index
    %68 = vector.load %arg7[%c0_22, %c0_23] : memref<1x1024xf32, #tpu.memory_space<vmem>>, vector<1x1024xf32>
    %69 = vector.broadcast %68 : vector<1x1024xf32> to vector<8x1024xf32>
    %70 = arith.addf %67, %69 : vector<8x1024xf32>
    %c0_24 = arith.constant 0 : index
    %c0_25 = arith.constant 0 : index
    %71 = vector.load %arg8[%c0_24, %c0_25] : memref<1x1024xf32, #tpu.memory_space<vmem>>, vector<1x1024xf32>
    %c0_26 = arith.constant 0 : index
    %c0_27 = arith.constant 0 : index
    %72 = vector.load %arg9[%c0_26, %c0_27] : memref<1x1024xf32, #tpu.memory_space<vmem>>, vector<1x1024xf32>
    %cst_28 = arith.constant dense<0.000000e+00> : vector<1024xf32>
    %73 = vector.multi_reduction <add>, %70, %cst_28 [0] : vector<8x1024xf32> to vector<1024xf32>
    %74 = vector.shape_cast %73 : vector<1024xf32> to vector<1x1024xf32>
    %75 = arith.mulf %70, %70 : vector<8x1024xf32>
    %cst_29 = arith.constant dense<0.000000e+00> : vector<1024xf32>
    %76 = vector.multi_reduction <add>, %75, %cst_29 [0] : vector<8x1024xf32> to vector<1024xf32>
    %77 = vector.shape_cast %76 : vector<1024xf32> to vector<1x1024xf32>
    %cst_30 = arith.constant 1.250000e-01 : f32
    %78 = vector.broadcast %cst_30 : f32 to vector<1x1024xf32>
    %79 = arith.mulf %74, %78 : vector<1x1024xf32>
    %cst_31 = arith.constant 1.250000e-01 : f32
    %80 = vector.broadcast %cst_31 : f32 to vector<1x1024xf32>
    %81 = arith.mulf %77, %80 : vector<1x1024xf32>
    %82 = arith.mulf %79, %79 : vector<1x1024xf32>
    %83 = arith.subf %81, %82 : vector<1x1024xf32>
    %cst_32 = arith.constant 9.99999974E-6 : f32
    %84 = vector.broadcast %cst_32 : f32 to vector<1x1024xf32>
    %85 = arith.addf %83, %84 : vector<1x1024xf32>
    %86 = math.rsqrt %85 : vector<1x1024xf32>
    %87 = arith.mulf %71, %86 : vector<1x1024xf32>
    %88 = arith.addf %87, %87 : vector<1x1024xf32>
    %89 = arith.mulf %79, %87 : vector<1x1024xf32>
    %90 = arith.subf %72, %89 : vector<1x1024xf32>
    %cst_33 = arith.constant 2.000000e+00 : f32
    %91 = vector.broadcast %cst_33 : f32 to vector<1x1024xf32>
    %92 = arith.mulf %90, %91 : vector<1x1024xf32>
    %93 = vector.broadcast %88 : vector<1x1024xf32> to vector<8x1024xf32>
    %94 = arith.mulf %70, %93 : vector<8x1024xf32>
    %95 = vector.broadcast %92 : vector<1x1024xf32> to vector<8x1024xf32>
    %96 = arith.addf %94, %95 : vector<8x1024xf32>
    %97 = tpu.iota {dimensions = array<i32: 0>} : vector<8x1024xi32>
    %c1024_i32_34 = arith.constant 1024 : i32
    %98 = vector.broadcast %c1024_i32_34 : i32 to vector<8x1024xi32>
    %99 = arith.muli %97, %98 : vector<8x1024xi32>
    %100 = tpu.iota {dimensions = array<i32: 1>} : vector<8x1024xi32>
    %101 = arith.addi %99, %100 : vector<8x1024xi32>
    %c-1640531535_i32_35 = arith.constant -1640531535 : i32
    %102 = arith.muli %0, %c-1640531535_i32_35 : i32
    %103 = vector.broadcast %102 : i32 to vector<8x1024xi32>
    %104 = arith.addi %101, %103 : vector<8x1024xi32>
    %c22136_i32 = arith.constant 22136 : i32
    %105 = vector.broadcast %c22136_i32 : i32 to vector<8x1024xi32>
    %106 = arith.addi %104, %105 : vector<8x1024xi32>
    %c16_i32_36 = arith.constant 16 : i32
    %107 = vector.broadcast %c16_i32_36 : i32 to vector<8x1024xi32>
    %108 = arith.shrui %106, %107 : vector<8x1024xi32>
    %109 = arith.xori %106, %108 : vector<8x1024xi32>
    %c2146121005_i32_37 = arith.constant 2146121005 : i32
    %110 = vector.broadcast %c2146121005_i32_37 : i32 to vector<8x1024xi32>
    %111 = arith.muli %109, %110 : vector<8x1024xi32>
    %c15_i32_38 = arith.constant 15 : i32
    %112 = vector.broadcast %c15_i32_38 : i32 to vector<8x1024xi32>
    %113 = arith.shrui %111, %112 : vector<8x1024xi32>
    %114 = arith.xori %111, %113 : vector<8x1024xi32>
    %c-2073254261_i32_39 = arith.constant -2073254261 : i32
    %115 = vector.broadcast %c-2073254261_i32_39 : i32 to vector<8x1024xi32>
    %116 = arith.muli %114, %115 : vector<8x1024xi32>
    %c16_i32_40 = arith.constant 16 : i32
    %117 = vector.broadcast %c16_i32_40 : i32 to vector<8x1024xi32>
    %118 = arith.shrui %116, %117 : vector<8x1024xi32>
    %119 = arith.xori %116, %118 : vector<8x1024xi32>
    %c31_i32_41 = arith.constant 31 : i32
    %120 = vector.broadcast %c31_i32_41 : i32 to vector<8x1024xi32>
    %121 = arith.shrui %119, %120 : vector<8x1024xi32>
    %c1_i32_42 = arith.constant 1 : i32
    %122 = vector.broadcast %c1_i32_42 : i32 to vector<8x1024xi32>
    %123 = arith.cmpi eq, %121, %122 : vector<8x1024xi32>
    %cst_43 = arith.constant 0.000000e+00 : f32
    %124 = vector.broadcast %cst_43 : f32 to vector<8x1024xf32>
    %125 = arith.maximumf %96, %124 : vector<8x1024xf32>
    %cst_44 = arith.constant 0.000000e+00 : f32
    %126 = vector.broadcast %cst_44 : f32 to vector<8x1024xf32>
    %127 = arith.select %123, %125, %126 : vector<8x1024xi1>, vector<8x1024xf32>
    %128 = arith.truncf %127 : vector<8x1024xf32> to vector<8x1024xbf16>
    %c0_45 = arith.constant 0 : index
    %c0_46 = arith.constant 0 : index
    %129 = vector.load %arg10[%c0_45, %c0_46] : memref<1024x128xbf16, #tpu.memory_space<vmem>>, vector<1024x128xbf16>
    %cst_47 = arith.constant dense<0.000000e+00> : vector<8x128xf32>
    %130 = tpu.matmul %128, %129, %cst_47 {dimension_numbers = #tpu.dot_dimension_numbers<[1], [0], [0], [1], [0, 0, 1, 1], [], []>} : vector<8x1024xbf16>, vector<1024x128xbf16>, vector<8x128xf32> -> vector<8x128xf32>
    %c0_48 = arith.constant 0 : index
    %c0_49 = arith.constant 0 : index
    %131 = vector.load %arg11[%c0_48, %c0_49] : memref<1x128xf32, #tpu.memory_space<vmem>>, vector<1x128xf32>
    %132 = vector.broadcast %131 : vector<1x128xf32> to vector<8x128xf32>
    %133 = arith.addf %130, %132 : vector<8x128xf32>
    %cst_50 = arith.constant dense<0xFF800000> : vector<8xf32>
    %134 = vector.multi_reduction <maximumf>, %133, %cst_50 [1] : vector<8x128xf32> to vector<8xf32>
    %135 = vector.shape_cast %134 : vector<8xf32> to vector<8x1xf32>
    %136 = vector.broadcast %135 : vector<8x1xf32> to vector<8x128xf32>
    %137 = arith.subf %133, %136 : vector<8x128xf32>
    %138 = math.exp %137 : vector<8x128xf32>
    %cst_51 = arith.constant dense<0.000000e+00> : vector<8xf32>
    %139 = vector.multi_reduction <add>, %138, %cst_51 [1] : vector<8x128xf32> to vector<8xf32>
    %140 = vector.shape_cast %139 : vector<8xf32> to vector<8x1xf32>
    %141 = math.log %140 : vector<8x1xf32>
    %142 = arith.addf %141, %135 : vector<8x1xf32>
    %143 = vector.broadcast %142 : vector<8x1xf32> to vector<8x128xf32>
    %144 = arith.subf %133, %143 : vector<8x128xf32>
    %c0_52 = arith.constant 0 : index
    %c0_53 = arith.constant 0 : index
    %145 = vector.load %arg12[%c0_52, %c0_53] : memref<8x128xf32, #tpu.memory_space<vmem>>, vector<8x128xf32>
    tpu.vector_store %arg12[%c0_52, %c0_53], %144 {strides = array<i32>} : memref<8x128xf32, #tpu.memory_space<vmem>>, vector<8x128xf32>,
    return
  }
}

</mosaic_0001>

<bundles_post_ra>
// kernel: tpu_custom_call.1
= control target key start
LH: loop header
LB: loop body
LE: loop exit
PB: predicated region body
PF: predicated region fallthrough
CT: control target
= control target key end

     0   :  { %18 = vsyncpa [#allocation4], 0  ;;  %s13264_s0 = inlined_call_operand.<no memory space> [shape: s32[1], index: 0, kind: input, shape index: {}]   ;;  %s13265_s1 = inlined_call_operand.hbm [shape: f32[8,1152], index: 1, kind: input, shape index: {}]   ;;  %s13266_s2 = inlined_call_operand.hbm [shape: bf16[1152,1024], index: 2, kind: input, shape index: {}]   ;;  %s13267_s3 = inlined_call_operand.hbm [shape: f32[1,1024], index: 3, kind: input, shape index: {}]   ;;  %s13268_s4 = inlined_call_operand.hbm [shape: f32[1,1024], index: 4, kind: input, shape index: {}]   ;;  %s13269_s5 = inlined_call_operand.hbm [shape: f32[1,1024], index: 5, kind: input, shape index: {}]   ;;  %s13270_s6 = inlined_call_operand.hbm [shape: bf16[1024,1024], index: 6, kind: input, shape index: {}]   ;;  %s13271_s7 = inlined_call_operand.hbm [shape: f32[1,1024], index: 7, kind: input, shape index: {}]   ;;  %s13272_s8 = inlined_call_operand.hbm [shape: f32[1,1024], index: 8, kind: input, shape index: {}]   ;;  %s13273_s9 = inlined_call_operand.hbm [shape: f32[1,1024], index: 9, kind: input, shape index: {}]   ;;  %s13274_s10 = inlined_call_operand.hbm [shape: bf16[1024,128], index: 10, kind: input, shape index: {}]   ;;  %s13275_s11 = inlined_call_operand.hbm [shape: f32[1,128], index: 11, kind: input, shape index: {}]   ;;  %s13276_s12 = inlined_call_operand.hbm [shape: f32[8,128], index: 12, kind: output, shape index: {}]  }
   0x1   :  { %19 = vsyncpa [#allocation7], 0 }
   0x2   :  { %20 = vsyncpa [#allocation10], 0 }
   0x3   :  { %21 = vsyncpa [#allocation13], 0 }
   0x4   :  { %22 = vsyncpa [#allocation16], 0 }
   0x5   :  { %23 = vsyncpa [#allocation19], 0 }
   0x6   :  { %24 = vsyncpa [#allocation5], 0  ;;  %s11977_s21 = smov [#allocation6]   ;;  %s11699_s25 = scalar_lea.hbm %s13266_s2, 73728 }
   0x7   :  { %s42_s22 = sshll.u32 %s11977_s21, 4  ;;  %p11700_p0 = scmp.ne.s32.totalorder %s13266_s2, %s11699_s25  ;;  %s43_s22 = int_to_ptr.vmem [resolvable:$true] %s42_s22 }
   0x8   :  { %p11703_p1 = scmp.lt.u32.totalorder %s11699_s25, %s13266_s2 }
   0xa   :  { %p11705_p2 = pnand %p11703_p1, %p11700_p0 }
   0xc   :  { %11708 = shalt.err (!%p11705_p2)
}
   0xd   :  { %s11709_s30 = scalar_lea.vmem %s43_s22, 73728  ;;  %p11714_p4 = scmp.lt.s32.totalorder %s43_s22, %s43_s22 }
   0xe   :  { %p11710_p3 = scmp.ne.s32.totalorder %s43_s22, %s11709_s30  ;;  %p11715_p5 = scmp.lt.s32.totalorder %s11709_s30, %s11709_s30 }
  0x10   :  { %p11716_p6 = por %p11715_p5, %p11714_p4 }
  0x12   :  { %p11717_p7 = pnand %p11716_p6, %p11710_p3 }
  0x14   :  { %11720 = shalt.err (!%p11717_p7)
}
  0x15   :  { %s11978_s13 = smov 512   ;;  %s11979_s14 = smov 32  }
  0x16   :  { %48 = dma.hbm_to_vmem [thread:$0]  %s13266_s2, 73728, %s43_s22, [#allocation7], %s11978_s13, %s11978_s13, %s11979_s14  }
  0x17   :  { %s11980_s17 = smov [#allocation9]   ;;  %s11981_s19 = smov [#allocation12]  }
  0x18   :  { %s65_s18 = sshll.u32 %s11980_s17, 4  ;;  %s84_s20 = sshll.u32 %s11981_s19, 4  ;;  %s66_s18 = int_to_ptr.vmem [resolvable:$true] %s65_s18  ;;  %s85_s20 = int_to_ptr.vmem [resolvable:$true] %s84_s20 }
  0x19   :  { %s11721_s24 = scalar_lea.hbm %s13268_s4, 128 }
  0x1a   :  { %p11722_p8 = scmp.ne.s32.totalorder %s13268_s4, %s11721_s24  ;;  %p11725_p9 = scmp.lt.u32.totalorder %s11721_s24, %s13268_s4 }
  0x1c   :  { %p11727_p10 = pnand %p11725_p9, %p11722_p8 }
  0x1e   :  { %11730 = shalt.err (!%p11727_p10)
}
  0x1f   :  { %s11731_s2 = scalar_lea.vmem %s66_s18, 128  ;;  %p11736_p12 = scmp.lt.s32.totalorder %s66_s18, %s66_s18 }
  0x20   :  { %p11732_p11 = scmp.ne.s32.totalorder %s66_s18, %s11731_s2  ;;  %p11737_p13 = scmp.lt.s32.totalorder %s11731_s2, %s11731_s2 }
  0x22   :  { %p11738_p0 = por %p11737_p13, %p11736_p12 }
  0x24   :  { %p11739_p1 = pnand %p11738_p0, %p11732_p11 }
  0x26   :  { %11742 = shalt.err (!%p11739_p1)
}
  0x27   :  { %68 = dma.hbm_to_vmem [thread:$0]  %s13268_s4, 128, %s66_s18, [#allocation10]  }
  0x28   :  { %s11743_s16 = scalar_lea.hbm %s13270_s6, 65536 }
  0x29   :  { %p11744_p2 = scmp.ne.s32.totalorder %s13270_s6, %s11743_s16  ;;  %p11747_p3 = scmp.lt.u32.totalorder %s11743_s16, %s13270_s6 }
  0x2b   :  { %p11749_p4 = pnand %p11747_p3, %p11744_p2 }
  0x2d   :  { %11752 = shalt.err (!%p11749_p4)
}
  0x2e   :  { %s11753_s24 = scalar_lea.vmem %s85_s20, 65536  ;;  %p11758_p6 = scmp.lt.s32.totalorder %s85_s20, %s85_s20 }
  0x2f   :  { %p11754_p5 = scmp.ne.s32.totalorder %s85_s20, %s11753_s24  ;;  %p11759_p7 = scmp.lt.s32.totalorder %s11753_s24, %s11753_s24 }
  0x31   :  { %p11760_p8 = por %p11759_p7, %p11758_p6 }
  0x33   :  { %p11761_p9 = pnand %p11760_p8, %p11754_p5 }
  0x35   :  { %11764 = shalt.err (!%p11761_p9)
}
  0x36   :  { %90 = dma.hbm_to_vmem [thread:$0]  %s13270_s6, 65536, %s85_s20, [#allocation13], %s11978_s13, %s11978_s13, %s11979_s14  }
  0x37   :  { %s11982_s25 = smov [#allocation15]   ;;  %s11983_s27 = smov [#allocation18]  }
  0x38   :  { %s107_s26 = sshll.u32 %s11982_s25, 4  ;;  %s126_s28 = sshll.u32 %s11983_s27, 4  ;;  %s108_s26 = int_to_ptr.vmem [resolvable:$true] %s107_s26  ;;  %s127_s28 = int_to_ptr.vmem [resolvable:$true] %s126_s28 }
  0x39   :  { %s11765_s29 = scalar_lea.hbm %s13272_s8, 128 }
  0x3a   :  { %p11766_p10 = scmp.ne.s32.totalorder %s13272_s8, %s11765_s29  ;;  %p11769_p11 = scmp.lt.u32.totalorder %s11765_s29, %s13272_s8 }
  0x3c   :  { %p11771_p12 = pnand %p11769_p11, %p11766_p10 }
  0x3e   :  { %11774 = shalt.err (!%p11771_p12)
}
  0x3f   :  { %s11775_s6 = scalar_lea.vmem %s108_s26, 128  ;;  %p11780_p0 = scmp.lt.s32.totalorder %s108_s26, %s108_s26 }
  0x40   :  { %p11776_p13 = scmp.ne.s32.totalorder %s108_s26, %s11775_s6  ;;  %p11781_p1 = scmp.lt.s32.totalorder %s11775_s6, %s11775_s6 }
  0x42   :  { %p11782_p2 = por %p11781_p1, %p11780_p0 }
  0x44   :  { %p11783_p3 = pnand %p11782_p2, %p11776_p13 }
  0x46   :  { %11786 = shalt.err (!%p11783_p3)
}
  0x47   :  { %110 = dma.hbm_to_vmem [thread:$0]  %s13272_s8, 128, %s108_s26, [#allocation16]  }
  0x48   :  { %s11787_s21 = scalar_lea.hbm %s13274_s10, 8192 }
  0x49   :  { %p11788_p4 = scmp.ne.s32.totalorder %s13274_s10, %s11787_s21  ;;  %p11791_p5 = scmp.lt.u32.totalorder %s11787_s21, %s13274_s10 }
  0x4b   :  { %p11793_p6 = pnand %p11791_p5, %p11788_p4 }
  0x4d   :  { %11796 = shalt.err (!%p11793_p6)
}
  0x4e   :  { %s11797_s25 = scalar_lea.vmem %s127_s28, 8192  ;;  %p11802_p8 = scmp.lt.s32.totalorder %s127_s28, %s127_s28 }
  0x4f   :  { %p11798_p7 = scmp.ne.s32.totalorder %s127_s28, %s11797_s25  ;;  %p11803_p9 = scmp.lt.s32.totalorder %s11797_s25, %s11797_s25 }
  0x51   :  { %p11804_p10 = por %p11803_p9, %p11802_p8 }
  0x53   :  { %p11805_p11 = pnand %p11804_p10, %p11798_p7 }
  0x55   :  { %11808 = shalt.err (!%p11805_p11)
}
  0x56   :  { %s11984_s8 = smov 64   ;;  %s11985_s26 = smov 4  }
  0x57   :  { %132 = dma.hbm_to_vmem [thread:$0]  %s13274_s10, 8192, %s127_s28, [#allocation19], %s11984_s8, %s11984_s8, %s11985_s26  }
  0x58   :  { %s11986_s22 = smov [#allocation3]   ;;  %s11987_s30 = smov [#allocation8]  }
  0x59   :  { %s33_s29 = sshll.u32 %s11986_s22, 4  ;;  %s55_s15 = sshll.u32 %s11987_s30, 4  ;;  %s34_s29 = int_to_ptr.vmem [resolvable:$true] %s33_s29  ;;  %s56_s15 = int_to_ptr.vmem [resolvable:$true] %s55_s15 }
  0x5a   :  { %s11809_s6 = scalar_lea.hbm %s13265_s1, 1152 }
  0x5b   :  { %p11810_p12 = scmp.ne.s32.totalorder %s13265_s1, %s11809_s6  ;;  %p11813_p13 = scmp.lt.u32.totalorder %s11809_s6, %s13265_s1 }
  0x5d   :  { %p11815_p0 = pnand %p11813_p13, %p11810_p12 }
  0x5f   :  { %11818 = shalt.err (!%p11815_p0)
}
  0x60   :  { %s11819_s10 = scalar_lea.vmem %s34_s29, 1152  ;;  %p11824_p2 = scmp.lt.s32.totalorder %s34_s29, %s34_s29 }
  0x61   :  { %p11820_p1 = scmp.ne.s32.totalorder %s34_s29, %s11819_s10  ;;  %p11825_p3 = scmp.lt.s32.totalorder %s11819_s10, %s11819_s10 }
  0x63   :  { %p11826_p4 = por %p11825_p3, %p11824_p2 }
  0x65   :  { %p11827_p5 = pnand %p11826_p4, %p11820_p1 }
  0x67   :  { %11830 = shalt.err (!%p11827_p5)
}
  0x68   :  { %36 = dma.hbm_to_vmem [thread:$0]  %s13265_s1, 1152, %s34_s29, [#allocation4]  }
  0x69   :  { %s11831_s4 = scalar_lea.hbm %s13267_s3, 128 }
  0x6a   :  { %p11832_p6 = scmp.ne.s32.totalorder %s13267_s3, %s11831_s4  ;;  %p11835_p7 = scmp.lt.u32.totalorder %s11831_s4, %s13267_s3 }
  0x6c   :  { %p11837_p8 = pnand %p11835_p7, %p11832_p6 }
  0x6e   :  { %11840 = shalt.err (!%p11837_p8)
}
  0x6f   :  { %s11841_s27 = scalar_lea.vmem %s56_s15, 128  ;;  %p11846_p10 = scmp.lt.s32.totalorder %s56_s15, %s56_s15 }
  0x70   :  { %p11842_p9 = scmp.ne.s32.totalorder %s56_s15, %s11841_s27  ;;  %p11847_p11 = scmp.lt.s32.totalorder %s11841_s27, %s11841_s27 }
  0x72   :  { %p11848_p12 = por %p11847_p11, %p11846_p10 }
  0x74   :  { %p11849_p13 = pnand %p11848_p12, %p11842_p9 }
  0x76   :  { %11852 = shalt.err (!%p11849_p13)
}
  0x77   :  { %58 = dma.hbm_to_vmem [thread:$0]  %s13267_s3, 128, %s56_s15, [#allocation7]  }
  0x78   :  { %s11988_s22 = smov [#allocation11]   ;;  %s11989_s30 = smov [#allocation14]  }
  0x79   :  { %s75_s29 = sshll.u32 %s11988_s22, 4  ;;  %s97_s16 = sshll.u32 %s11989_s30, 4  ;;  %s76_s29 = int_to_ptr.vmem [resolvable:$true] %s75_s29  ;;  %s98_s16 = int_to_ptr.vmem [resolvable:$true] %s97_s16 }
  0x7a   :  { %s11853_s13 = scalar_lea.hbm %s13269_s5, 128 }
  0x7b   :  { %p11854_p0 = scmp.ne.s32.totalorder %s13269_s5, %s11853_s13  ;;  %p11857_p1 = scmp.lt.u32.totalorder %s11853_s13, %s13269_s5 }
  0x7d   :  { %p11859_p2 = pnand %p11857_p1, %p11854_p0 }
  0x7f   :  { %11862 = shalt.err (!%p11859_p2)
}
  0x80   :  { %s11863_s3 = scalar_lea.vmem %s76_s29, 128  ;;  %p11868_p4 = scmp.lt.s32.totalorder %s76_s29, %s76_s29 }
  0x81   :  { %p11864_p3 = scmp.ne.s32.totalorder %s76_s29, %s11863_s3  ;;  %p11869_p5 = scmp.lt.s32.totalorder %s11863_s3, %s11863_s3 }
  0x83   :  { %p11870_p6 = por %p11869_p5, %p11868_p4 }
  0x85   :  { %p11871_p7 = pnand %p11870_p6, %p11864_p3 }
  0x87   :  { %11874 = shalt.err (!%p11871_p7)
}
  0x88   :  { %78 = dma.hbm_to_vmem [thread:$0]  %s13269_s5, 128, %s76_s29, [#allocation10]  }
  0x89   :  { %s11875_s24 = scalar_lea.hbm %s13271_s7, 128 }
  0x8a   :  { %p11876_p8 = scmp.ne.s32.totalorder %s13271_s7, %s11875_s24  ;;  %p11879_p9 = scmp.lt.u32.totalorder %s11875_s24, %s13271_s7 }
  0x8c   :  { %p11881_p10 = pnand %p11879_p9, %p11876_p8 }
  0x8e   :  { %11884 = shalt.err (!%p11881_p10)
}
  0x8f   :  { %s11885_s26 = scalar_lea.vmem %s98_s16, 128  ;;  %p11890_p12 = scmp.lt.s32.totalorder %s98_s16, %s98_s16 }
  0x90   :  { %p11886_p11 = scmp.ne.s32.totalorder %s98_s16, %s11885_s26  ;;  %p11891_p13 = scmp.lt.s32.totalorder %s11885_s26, %s11885_s26 }
  0x92   :  { %p11892_p0 = por %p11891_p13, %p11890_p12 }
  0x94   :  { %p11893_p1 = pnand %p11892_p0, %p11886_p11 }
  0x96   :  { %11896 = shalt.err (!%p11893_p1)
}
  0x97   :  { %100 = dma.hbm_to_vmem [thread:$0]  %s13271_s7, 128, %s98_s16, [#allocation13]  }
  0x98   :  { %s11990_s1 = smov [#allocation17]   ;;  %s11991_s22 = smov [#allocation20]  }
  0x99   :  { %s117_s2 = sshll.u32 %s11990_s1, 4  ;;  %s139_s29 = sshll.u32 %s11991_s22, 4  ;;  %s118_s2 = int_to_ptr.vmem [resolvable:$true] %s117_s2  ;;  %s140_s29 = int_to_ptr.vmem [resolvable:$true] %s139_s29 }
  0x9a   :  { %s11897_s6 = scalar_lea.hbm %s13273_s9, 128 }
  0x9b   :  { %p11898_p2 = scmp.ne.s32.totalorder %s13273_s9, %s11897_s6  ;;  %p11901_p3 = scmp.lt.u32.totalorder %s11897_s6, %s13273_s9 }
  0x9d   :  { %p11903_p4 = pnand %p11901_p3, %p11898_p2 }
  0x9f   :  { %11906 = shalt.err (!%p11903_p4)
}
  0xa0   :  { %s11907_s7 = scalar_lea.vmem %s118_s2, 128  ;;  %p11912_p6 = scmp.lt.s32.totalorder %s118_s2, %s118_s2 }
  0xa1   :  { %p11908_p5 = scmp.ne.s32.totalorder %s118_s2, %s11907_s7  ;;  %p11913_p7 = scmp.lt.s32.totalorder %s11907_s7, %s11907_s7 }
  0xa3   :  { %p11914_p8 = por %p11913_p7, %p11912_p6 }
  0xa5   :  { %p11915_p9 = pnand %p11914_p8, %p11908_p5 }
  0xa7   :  { %11918 = shalt.err (!%p11915_p9)
}
  0xa8   :  { %120 = dma.hbm_to_vmem [thread:$0]  %s13273_s9, 128, %s118_s2, [#allocation16]  }
  0xa9   :  { %s11919_s28 = scalar_lea.hbm %s13275_s11, 16 }
  0xaa   :  { %p11920_p10 = scmp.ne.s32.totalorder %s13275_s11, %s11919_s28  ;;  %p11923_p11 = scmp.lt.u32.totalorder %s11919_s28, %s13275_s11 }
  0xac   :  { %p11925_p12 = pnand %p11923_p11, %p11920_p10 }
  0xae   :  { %11928 = shalt.err (!%p11925_p12)
}
  0xaf   :  { %s11929_s18 = scalar_lea.vmem %s140_s29, 16  ;;  %s11933_s25 = scalar_lea.vmem %s140_s29, 32 }
  0xb0   :  { %p11930_p13 = scmp.ne.s32.totalorder %s140_s29, %s11929_s18  ;;  %p11934_p0 = scmp.lt.s32.totalorder %s140_s29, %s140_s29 }
  0xb1   :  { %p11935_p1 = scmp.lt.s32.totalorder %s11933_s25, %s11929_s18 }
  0xb3   :  { %p11936_p2 = por %p11935_p1, %p11934_p0 }
  0xb5   :  { %p11937_p3 = pnand %p11936_p2, %p11930_p13 }
  0xb7   :  { %11940 = shalt.err (!%p11937_p3)
}
  0xb8   :  { %142 = dma.hbm_to_vmem [thread:$0]  %s13275_s11, 16, %s140_s29, [#allocation19]  }
  0xb9   :  { %11963 = dma.done.wait [#allocation4], 1152  }
  0xba   :  { %11964 = vsyncadd [#allocation4], 4294966144 }
  0xbb   :  { %11965 = dma.done.wait [#allocation7], 73856  }
  0xbc   :  { %11966 = vsyncadd [#allocation7], 4294893440 }
  0xbd   :  { %11967 = dma.done.wait [#allocation10], 256  }
  0xbe   :  { %11968 = vsyncadd [#allocation10], 4294967040 }
  0xbf   :  { %11969 = dma.done.wait [#allocation13], 65664  }
  0xc0   :  { %11970 = vsyncadd [#allocation13], 4294901632 }
  0xc1   :  { %11971 = dma.done.wait [#allocation16], 256  }
  0xc2   :  { %11972 = vsyncadd [#allocation16], 4294967040 }
  0xc3   :  { %11973 = dma.done.wait [#allocation19], 8208  }
  0xc4   :  { %11974 = vsyncadd [#allocation19], 4294959088  ;;  %v196_v0 = vld [vmem:[#allocation6] sm:$0xff]  ;;  %v197_v2 = vld [vmem:[#allocation6 + $0x8] sm:$0xff]  ;;  %s4955_s5 = smul.u32 2654435761, %s13264_s0 }
  0xc5   :  { %v200_v1 = vld [vmem:[#allocation6 + $0x20] sm:$0xff]  ;;  %v201_v4 = vld [vmem:[#allocation6 + $0x28] sm:$0xff]  ;;  %s11994_s0 = smov [#allocation21]  }
  0xc6   :  { %v10092_v3 = vcombine.high %v196_v0, %v200_v1  ;;  %v10091_v5 = vcombine.low %v196_v0, %v200_v1  ;;  %v204_v6 = vld [vmem:[#allocation6 + $0x40] sm:$0xff]  ;;  %v10094_v8 = vcombine.high %v197_v2, %v201_v4  ;;  %v10093_v9 = vcombine.low %v197_v2, %v201_v4  ;;  %v205_v11 = vld [vmem:[#allocation6 + $0x48] sm:$0xff]  ;;  %s10077_s27 = sshll.u32 %s11994_s0, 4  ;;  %s10078_s27 = int_to_ptr.vmem [resolvable:$true] %s10077_s27 }
  0xc7   :  { %v208_v7 = vld [vmem:[#allocation6 + $0x60] sm:$0xff]  ;;  %v209_v12 = vld [vmem:[#allocation6 + $0x68] sm:$0xff]  ;;  %s11941_s1 = scalar_lea.vmem %s10078_s27, 128  ;;  %p11946_p5 = scmp.lt.s32.totalorder %s10078_s27, %s10078_s27 }
  0xc8   :  { %v10100_v10 = vcombine.high %v204_v6, %v208_v7  ;;  %v212_v13 = vld [vmem:[#allocation6 + $0x80] sm:$0xff]  ;;  %3694 = vmatprep.subr.bf16.mxu0 %v10092_v3  ;;  %v10102_v14 = vcombine.high %v205_v11, %v209_v12  ;;  %v213_v16 = vld [vmem:[#allocation6 + $0x88] sm:$0xff]  ;;  %3899 = vmatprep.subr.bf16.mxu1 %v10094_v8  ;;  %v10099_v18 = vcombine.low %v204_v6, %v208_v7  ;;  %p11942_p4 = scmp.ne.s32.totalorder %s10078_s27, %s11941_s1  ;;  %p11947_p6 = scmp.lt.s32.totalorder %s11941_s1, %s11941_s1 }
  0xc9   :  { %v216_v15 = vld [vmem:[#allocation6 + $0xa0] sm:$0xff]  ;;  %v217_v17 = vld [vmem:[#allocation6 + $0xa8] sm:$0xff]  ;;  %3695 = vmatpush1.bf16.msra.mxu0 %v10091_v5  ;;  %3900 = vmatpush1.bf16.msra.mxu1 %v10093_v9  ;;  %v10101_v19 = vcombine.low %v205_v11, %v209_v12 }
  0xca   :  { %3696 = vmatprep.subr.bf16.mxu0 %v10100_v10  ;;  %v10108_v20 = vcombine.high %v212_v13, %v216_v15  ;;  %3901 = vmatprep.subr.bf16.mxu1 %v10102_v14  ;;  %v10110_v21 = vcombine.high %v213_v16, %v217_v17  ;;  %v220_v22 = vld [vmem:[#allocation6 + $0xc0] sm:$0xff]  ;;  %v221_v24 = vld [vmem:[#allocation6 + $0xc8] sm:$0xff]  ;;  %v10107_v26 = vcombine.low %v212_v13, %v216_v15  ;;  %p11948_p7 = por %p11947_p6, %p11946_p5 }
  0xcb   :  { %v224_v23 = vld [vmem:[#allocation6 + $0xe0] sm:$0xff]  ;;  %v225_v25 = vld [vmem:[#allocation6 + $0xe8] sm:$0xff]  ;;  %v10109_v27 = vcombine.low %v213_v16, %v217_v17 }
  0xcc   :  { %v10116_v28 = vcombine.high %v220_v22, %v224_v23  ;;  %v10118_v29 = vcombine.high %v221_v24, %v225_v25  ;;  %v228_v30 = vld [vmem:[#allocation6 + $0x100] sm:$0xff]  ;;  %v229_v32 = vld [vmem:[#allocation6 + $0x108] sm:$0xff]  ;;  %v10115_v34 = vcombine.low %v220_v22, %v224_v23  ;;  %v10117_v35 = vcombine.low %v221_v24, %v225_v25  ;;  %p11949_p8 = pnand %p11948_p7, %p11942_p4 }
  0xcd   :  { %3697 = vmatpush1.bf16.msra.mxu0 %v10099_v18  ;;  %3902 = vmatpush1.bf16.msra.mxu1 %v10101_v19  ;;  %v232_v31 = vld [vmem:[#allocation6 + $0x120] sm:$0xff]  ;;  %v233_v33 = vld [vmem:[#allocation6 + $0x128] sm:$0xff] }
  0xce   :  { %3698 = vmatprep.subr.bf16.mxu0 %v10108_v20  ;;  %3903 = vmatprep.subr.bf16.mxu1 %v10110_v21  ;;  %v10124_v36 = vcombine.high %v228_v30, %v232_v31  ;;  %v10126_v37 = vcombine.high %v229_v32, %v233_v33  ;;  %v236_v38 = vld [vmem:[#allocation6 + $0x140] sm:$0xff]  ;;  %v237_v40 = vld [vmem:[#allocation6 + $0x148] sm:$0xff]  ;;  %v10123_v42 = vcombine.low %v228_v30, %v232_v31 }
  0xcf   :  { %v240_v39 = vld [vmem:[#allocation6 + $0x160] sm:$0xff]  ;;  %v241_v41 = vld [vmem:[#allocation6 + $0x168] sm:$0xff]  ;;  %v10125_v43 = vcombine.low %v229_v32, %v233_v33 }
  0xd0   :  { %v10132_v44 = vcombine.high %v236_v38, %v240_v39  ;;  %v10134_v45 = vcombine.high %v237_v40, %v241_v41  ;;  %v244_v46 = vld [vmem:[#allocation6 + $0x180] sm:$0xff]  ;;  %v245_v48 = vld [vmem:[#allocation6 + $0x188] sm:$0xff]  ;;  %v10131_v50 = vcombine.low %v236_v38, %v240_v39  ;;  %v10133_v51 = vcombine.low %v237_v40, %v241_v41 }
  0xd1   :  { %3699 = vmatpush1.bf16.msra.mxu0 %v10107_v26  ;;  %3904 = vmatpush1.bf16.msra.mxu1 %v10109_v27  ;;  %v248_v47 = vld [vmem:[#allocation6 + $0x1a0] sm:$0xff]  ;;  %v249_v49 = vld [vmem:[#allocation6 + $0x1a8] sm:$0xff] }
  0xd2   :  { %3700 = vmatprep.subr.bf16.mxu0 %v10116_v28  ;;  %3905 = vmatprep.subr.bf16.mxu1 %v10118_v29  ;;  %v10140_v52 = vcombine.high %v244_v46, %v248_v47  ;;  %v179_v53 = vld [vmem:[#allocation3 + $0x8] sm:$0xff]  ;;  %v10142_v54 = vcombine.high %v245_v48, %v249_v49  ;;  %v253_v58 = vld [vmem:[#allocation6 + $0x1c8] sm:$0xff]  ;;  %v10139_v60 = vcombine.low %v244_v46, %v248_v47 }
  0xd3   :  { %v252_v55 = vld [vmem:[#allocation6 + $0x1c0] sm:$0xff]  ;;  %v12198_v57 = vpack.c.bf16 %v179_v53, %v179_v53  ;;  %v257_v59 = vld [vmem:[#allocation6 + $0x1e8] sm:$0xff]  ;;  %v10141_v61 = vcombine.low %v245_v48, %v249_v49 }
  0xd4   :  { %v256_v56 = vld [vmem:[#allocation6 + $0x1e0] sm:$0xff]  ;;  %v10150_v63 = vcombine.high %v253_v58, %v257_v59  ;;  %v261_v2 = vld [vmem:[#allocation6 + $0x208] sm:$0xff]  ;;  %v10149_v5 = vcombine.low %v253_v58, %v257_v59 }
  0xd5   :  { %3701 = vmatpush1.bf16.msra.mxu0 %v10115_v34  ;;  %3906 = vmatpush1.bf16.msra.mxu1 %v10117_v35  ;;  %v10148_v62 = vcombine.high %v252_v55, %v256_v56  ;;  %v260_v0 = vld [vmem:[#allocation6 + $0x200] sm:$0xff]  ;;  %v265_v3 = vld [vmem:[#allocation6 + $0x228] sm:$0xff]  ;;  %v10147_v4 = vcombine.low %v252_v55, %v256_v56 }
  0xd6   :  { %3702 = vmatprep.subr.bf16.mxu0 %v10124_v36  ;;  %3907 = vmatprep.subr.bf16.mxu1 %v10126_v37  ;;  %v264_v1 = vld [vmem:[#allocation6 + $0x220] sm:$0xff]  ;;  %v10158_v7 = vcombine.high %v261_v2, %v265_v3  ;;  %v269_v10 = vld [vmem:[#allocation6 + $0x248] sm:$0xff]  ;;  %v10157_v13 = vcombine.low %v261_v2, %v265_v3 }
  0xd7   :  { %3726 = vmatprep.mubr.bf16.mxu0 %v12198_v57  ;;  %3931 = vmatprep.mubr.bf16.mxu1 %v12198_v57  ;;  %v10156_v6 = vcombine.high %v260_v0, %v264_v1  ;;  %v268_v8 = vld [vmem:[#allocation6 + $0x240] sm:$0xff]  ;;  %v273_v11 = vld [vmem:[#allocation6 + $0x268] sm:$0xff]  ;;  %v10155_v12 = vcombine.low %v260_v0, %v264_v1 }
  0xd8   :  { %v272_v9 = vld [vmem:[#allocation6 + $0x260] sm:$0xff]  ;;  %v10166_v15 = vcombine.high %v269_v10, %v273_v11  ;;  %v277_v18 = vld [vmem:[#allocation6 + $0x288] sm:$0xff]  ;;  %v10165_v21 = vcombine.low %v269_v10, %v273_v11 }
  0xd9   :  { %3703 = vmatpush1.bf16.msra.mxu0 %v10123_v42  ;;  %3908 = vmatpush1.bf16.msra.mxu1 %v10125_v43  ;;  %v10164_v14 = vcombine.high %v268_v8, %v272_v9  ;;  %v276_v16 = vld [vmem:[#allocation6 + $0x280] sm:$0xff]  ;;  %v281_v19 = vld [vmem:[#allocation6 + $0x2a8] sm:$0xff]  ;;  %v10163_v20 = vcombine.low %v268_v8, %v272_v9 }
  0xda   :  { %3704 = vmatprep.subr.bf16.mxu0 %v10132_v44  ;;  %3909 = vmatprep.subr.bf16.mxu1 %v10134_v45  ;;  %v280_v17 = vld [vmem:[#allocation6 + $0x2a0] sm:$0xff]  ;;  %v10174_v23 = vcombine.high %v277_v18, %v281_v19  ;;  %v285_v26 = vld [vmem:[#allocation6 + $0x2c8] sm:$0xff]  ;;  %v10173_v29 = vcombine.low %v277_v18, %v281_v19 }
  0xdb   :  { %v10172_v22 = vcombine.high %v276_v16, %v280_v17  ;;  %v284_v24 = vld [vmem:[#allocation6 + $0x2c0] sm:$0xff]  ;;  %v289_v27 = vld [vmem:[#allocation6 + $0x2e8] sm:$0xff]  ;;  %v10171_v28 = vcombine.low %v276_v16, %v280_v17 }
  0xdc   :  { %v288_v25 = vld [vmem:[#allocation6 + $0x2e0] sm:$0xff]  ;;  %v10182_v31 = vcombine.high %v285_v26, %v289_v27  ;;  %v293_v34 = vld [vmem:[#allocation6 + $0x308] sm:$0xff]  ;;  %v10181_v37 = vcombine.low %v285_v26, %v289_v27 }
  0xdd   :  { %3705 = vmatpush1.bf16.msra.mxu0 %v10131_v50  ;;  %3910 = vmatpush1.bf16.msra.mxu1 %v10133_v51  ;;  %v10180_v30 = vcombine.high %v284_v24, %v288_v25  ;;  %v292_v32 = vld [vmem:[#allocation6 + $0x300] sm:$0xff]  ;;  %v297_v35 = vld [vmem:[#allocation6 + $0x328] sm:$0xff]  ;;  %v10179_v36 = vcombine.low %v284_v24, %v288_v25 }
  0xde   :  { %3706 = vmatprep.subr.bf16.mxu0 %v10140_v52  ;;  %3911 = vmatprep.subr.bf16.mxu1 %v10142_v54  ;;  %v296_v33 = vld [vmem:[#allocation6 + $0x320] sm:$0xff]  ;;  %v10190_v39 = vcombine.high %v293_v34, %v297_v35  ;;  %v301_v42 = vld [vmem:[#allocation6 + $0x348] sm:$0xff]  ;;  %v10189_v45 = vcombine.low %v293_v34, %v297_v35 }
  0xdf   :  { %v10188_v38 = vcombine.high %v292_v32, %v296_v33  ;;  %v300_v40 = vld [vmem:[#allocation6 + $0x340] sm:$0xff]  ;;  %v305_v43 = vld [vmem:[#allocation6 + $0x368] sm:$0xff]  ;;  %v10187_v44 = vcombine.low %v292_v32, %v296_v33 }
  0xe0   :  { %v304_v41 = vld [vmem:[#allocation6 + $0x360] sm:$0xff]  ;;  %v10198_v47 = vcombine.high %v301_v42, %v305_v43  ;;  %v309_v50 = vld [vmem:[#allocation6 + $0x388] sm:$0xff]  ;;  %v10197_v53 = vcombine.low %v301_v42, %v305_v43 }
  0xe1   :  { %3707 = vmatpush1.bf16.msra.mxu0 %v10139_v60  ;;  %3912 = vmatpush1.bf16.msra.mxu1 %v10141_v61  ;;  %v10196_v46 = vcombine.high %v300_v40, %v304_v41  ;;  %v308_v48 = vld [vmem:[#allocation6 + $0x380] sm:$0xff]  ;;  %v313_v51 = vld [vmem:[#allocation6 + $0x3a8] sm:$0xff]  ;;  %v10195_v52 = vcombine.low %v300_v40, %v304_v41 }
  0xe2   :  { %3708 = vmatprep.subr.bf16.mxu0 %v10148_v62  ;;  %3913 = vmatprep.subr.bf16.mxu1 %v10150_v63  ;;  %v312_v49 = vld [vmem:[#allocation6 + $0x3a0] sm:$0xff]  ;;  %v10206_v55 = vcombine.high %v309_v50, %v313_v51  ;;  %v317_v59 = vld [vmem:[#allocation6 + $0x3c8] sm:$0xff]  ;;  %v10205_v62 = vcombine.low %v309_v50, %v313_v51 }
  0xe3   :  { %v10204_v54 = vcombine.high %v308_v48, %v312_v49  ;;  %v316_v56 = vld [vmem:[#allocation6 + $0x3c0] sm:$0xff]  ;;  %v321_v60 = vld [vmem:[#allocation6 + $0x3e8] sm:$0xff]  ;;  %v10203_v61 = vcombine.low %v308_v48, %v312_v49 }
  0xe4   :  { %v320_v58 = vld [vmem:[#allocation6 + $0x3e0] sm:$0xff]  ;;  %v10214_v0 = vcombine.high %v317_v59, %v321_v60  ;;  %v325_v3 = vld [vmem:[#allocation6 + $0x408] sm:$0xff] }
  0xe5   :  { %3709 = vmatpush1.bf16.msra.mxu0 %v10147_v4  ;;  %3914 = vmatpush1.bf16.msra.mxu1 %v10149_v5  ;;  %v10212_v63 = vcombine.high %v316_v56, %v320_v58  ;;  %v324_v1 = vld [vmem:[#allocation6 + $0x400] sm:$0xff]  ;;  %v329_v4 = vld [vmem:[#allocation6 + $0x428] sm:$0xff]  ;;  %v10211_v5 = vcombine.low %v316_v56, %v320_v58 }
  0xe6   :  { %3710 = vmatprep.subr.bf16.mxu0 %v10156_v6  ;;  %3915 = vmatprep.subr.bf16.mxu1 %v10158_v7  ;;  %v328_v2 = vld [vmem:[#allocation6 + $0x420] sm:$0xff]  ;;  %v178_v6 = vld [vmem:[#allocation3] sm:$0xff]  ;;  %v10213_v7 = vcombine.low %v317_v59, %v321_v60  ;;  %v10222_v9 = vcombine.high %v325_v3, %v329_v4  ;;  %v10221_v17 = vcombine.low %v325_v3, %v329_v4  ;;  %v345_v24 = vld [vmem:[#allocation6 + $0x4a8] sm:$0xff] }
  0xe7   :  { %v10220_v8 = vcombine.high %v324_v1, %v328_v2  ;;  %v332_v10 = vld [vmem:[#allocation6 + $0x440] sm:$0xff]  ;;  %v10219_v16 = vcombine.low %v324_v1, %v328_v2  ;;  %v353_v32 = vld [vmem:[#allocation6 + $0x4e8] sm:$0xff] }
  0xe8   :  { %v336_v11 = vld [vmem:[#allocation6 + $0x460] sm:$0xff]  ;;  %v361_v40 = vld [vmem:[#allocation6 + $0x528] sm:$0xff] }
  0xe9   :  { %3711 = vmatpush1.bf16.msra.mxu0 %v10155_v12  ;;  %3916 = vmatpush1.bf16.msra.mxu1 %v10157_v13  ;;  %v12202_v12 = vpack.c.bf16 %v178_v6, %v178_v6  ;;  %v333_v13 = vld [vmem:[#allocation6 + $0x448] sm:$0xff]  ;;  %v10228_v18 = vcombine.high %v332_v10, %v336_v11  ;;  %v10227_v25 = vcombine.low %v332_v10, %v336_v11  ;;  %v392_v6 = vld [vmem:[#allocation6 + $0x620] sm:$0xff] }
  0xea   :  { %3712 = vmatprep.subr.bf16.mxu0 %v10164_v14  ;;  %3917 = vmatprep.subr.bf16.mxu1 %v10166_v15  ;;  %v337_v14 = vld [vmem:[#allocation6 + $0x468] sm:$0xff]  ;;  %v181_v15 = vld [vmem:[#allocation3 + $0x18] sm:$0xff] }
  0xeb   :  { %v10230_v19 = vcombine.high %v333_v13, %v337_v14  ;;  %v10229_v26 = vcombine.low %v333_v13, %v337_v14  ;;  %v369_v48 = vld [vmem:[#allocation6 + $0x568] sm:$0xff]  ;;  %v396_v14 = vld [vmem:[#allocation6 + $0x640] sm:$0xff] }
  0xec   :  { %v377_v56 = vld [vmem:[#allocation6 + $0x5a8] sm:$0xff] }
  0xed   :  { %3713 = vmatpush1.bf16.msra.mxu0 %v10163_v20  ;;  %3918 = vmatpush1.bf16.msra.mxu1 %v10165_v21  ;;  %v340_v20 = vld [vmem:[#allocation6 + $0x480] sm:$0xff]  ;;  %v385_v1 = vld [vmem:[#allocation6 + $0x5e8] sm:$0xff] }
  0xee   :  { %3714 = vmatprep.subr.bf16.mxu0 %v10172_v22  ;;  %3919 = vmatprep.subr.bf16.mxu1 %v10174_v23  ;;  %v344_v21 = vld [vmem:[#allocation6 + $0x4a0] sm:$0xff]  ;;  %v341_v22 = vld [vmem:[#allocation6 + $0x488] sm:$0xff]  ;;  %v12204_v23 = vpack.c.bf16 %v181_v15, %v181_v15 }
  0xef   :  { %v10236_v27 = vcombine.high %v340_v20, %v344_v21  ;;  %v10235_v33 = vcombine.low %v340_v20, %v344_v21  ;;  %v10237_v34 = vcombine.low %v341_v22, %v345_v24  ;;  %v400_v15 = vld [vmem:[#allocation6 + $0x660] sm:$0xff] }
  0xf0   :  { %v10292_v21 = vcombine.high %v396_v14, %v400_v15 }
  0xf1   :  { %3715 = vmatpush1.bf16.msra.mxu0 %v10171_v28  ;;  %3920 = vmatpush1.bf16.msra.mxu1 %v10173_v29  ;;  %v348_v28 = vld [vmem:[#allocation6 + $0x4c0] sm:$0xff] }
  0xf2   :  { %3716 = vmatprep.subr.bf16.mxu0 %v10180_v30  ;;  %3921 = vmatprep.subr.bf16.mxu1 %v10182_v31  ;;  %v352_v29 = vld [vmem:[#allocation6 + $0x4e0] sm:$0xff]  ;;  %v349_v30 = vld [vmem:[#allocation6 + $0x4c8] sm:$0xff]  ;;  %v10238_v31 = vcombine.high %v341_v22, %v345_v24 }
  0xf3   :  { %v10244_v35 = vcombine.high %v348_v28, %v352_v29  ;;  %v10243_v41 = vcombine.low %v348_v28, %v352_v29  ;;  %v10245_v42 = vcombine.low %v349_v30, %v353_v32  ;;  %v404_v22 = vld [vmem:[#allocation6 + $0x680] sm:$0xff]  ;;  %v10291_v28 = vcombine.low %v396_v14, %v400_v15  ;;  %v180_v14 = vld [vmem:[#allocation3 + $0x10] sm:$0xff] }
  0xf4   :  { %v408_v24 = vld [vmem:[#allocation6 + $0x6a0] sm:$0xff] }
  0xf5   :  { %3717 = vmatpush1.bf16.msra.mxu0 %v10179_v36  ;;  %3922 = vmatpush1.bf16.msra.mxu1 %v10181_v37  ;;  %v356_v36 = vld [vmem:[#allocation6 + $0x500] sm:$0xff] }
  0xf6   :  { %3718 = vmatprep.subr.bf16.mxu0 %v10188_v38  ;;  %3923 = vmatprep.subr.bf16.mxu1 %v10190_v39  ;;  %v360_v37 = vld [vmem:[#allocation6 + $0x520] sm:$0xff]  ;;  %v357_v38 = vld [vmem:[#allocation6 + $0x508] sm:$0xff]  ;;  %v10246_v39 = vcombine.high %v349_v30, %v353_v32  ;;  %v10300_v30 = vcombine.high %v404_v22, %v408_v24 }
  0xf7   :  { %v10252_v43 = vcombine.high %v356_v36, %v360_v37  ;;  %v10251_v49 = vcombine.low %v356_v36, %v360_v37  ;;  %v10253_v50 = vcombine.low %v357_v38, %v361_v40  ;;  %v416_v32 = vld [vmem:[#allocation6 + $0x6e0] sm:$0xff]  ;;  %v10299_v36 = vcombine.low %v404_v22, %v408_v24 }
  0xf8   :  { %v183_v24 = vld [vmem:[#allocation3 + $0x28] sm:$0xff] }
  0xf9   :  { %3719 = vmatpush1.bf16.msra.mxu0 %v10187_v44  ;;  %3924 = vmatpush1.bf16.msra.mxu1 %v10189_v45  ;;  %v364_v44 = vld [vmem:[#allocation6 + $0x540] sm:$0xff] }
  0xfa   :  { %3720 = vmatprep.subr.bf16.mxu0 %v10196_v46  ;;  %3925 = vmatprep.subr.bf16.mxu1 %v10198_v47  ;;  %v368_v45 = vld [vmem:[#allocation6 + $0x560] sm:$0xff]  ;;  %v365_v46 = vld [vmem:[#allocation6 + $0x548] sm:$0xff]  ;;  %v10254_v47 = vcombine.high %v357_v38, %v361_v40 }
  0xfb   :  { %v10260_v51 = vcombine.high %v364_v44, %v368_v45  ;;  %v10259_v58 = vcombine.low %v364_v44, %v368_v45  ;;  %v10261_v59 = vcombine.low %v365_v46, %v369_v48  ;;  %v424_v40 = vld [vmem:[#allocation6 + $0x720] sm:$0xff] }
  0xfd   :  { %3721 = vmatpush1.bf16.msra.mxu0 %v10195_v52  ;;  %3926 = vmatpush1.bf16.msra.mxu1 %v10197_v53  ;;  %v372_v52 = vld [vmem:[#allocation6 + $0x580] sm:$0xff] }
  0xfe   :  { %3722 = vmatprep.subr.bf16.mxu0 %v10204_v54  ;;  %3927 = vmatprep.subr.bf16.mxu1 %v10206_v55  ;;  %v376_v53 = vld [vmem:[#allocation6 + $0x5a0] sm:$0xff]  ;;  %v373_v54 = vld [vmem:[#allocation6 + $0x588] sm:$0xff]  ;;  %v10262_v55 = vcombine.high %v365_v46, %v369_v48 }
  0xff   :  { %v10268_v60 = vcombine.high %v372_v52, %v376_v53  ;;  %v10267_v2 = vcombine.low %v372_v52, %v376_v53  ;;  %v10269_v3 = vcombine.low %v373_v54, %v377_v56  ;;  %v432_v48 = vld [vmem:[#allocation6 + $0x760] sm:$0xff] }
 0x101   :  { %3723 = vmatpush1.bf16.msra.mxu0 %v10203_v61  ;;  %3928 = vmatpush1.bf16.msra.mxu1 %v10205_v62  ;;  %v380_v61 = vld [vmem:[#allocation6 + $0x5c0] sm:$0xff] }
 0x102   :  { %3724 = vmatprep.subr.bf16.mxu0 %v10212_v63  ;;  %3929 = vmatprep.subr.bf16.mxu1 %v10214_v0  ;;  %v384_v62 = vld [vmem:[#allocation6 + $0x5e0] sm:$0xff]  ;;  %v381_v63 = vld [vmem:[#allocation6 + $0x5c8] sm:$0xff]  ;;  %v10270_v0 = vcombine.high %v373_v54, %v377_v56 }
 0x103   :  { %v10276_v4 = vcombine.high %v380_v61, %v384_v62  ;;  %v10275_v10 = vcombine.low %v380_v61, %v384_v62  ;;  %v10277_v11 = vcombine.low %v381_v63, %v385_v1  ;;  %v440_v56 = vld [vmem:[#allocation6 + $0x7a0] sm:$0xff] }
 0x105   :  { %3725 = vmatpush1.bf16.msra.mxu0 %v10211_v5  ;;  %3930 = vmatpush1.bf16.msra.mxu1 %v10213_v7  ;;  %v388_v5 = vld [vmem:[#allocation6 + $0x600] sm:$0xff]  ;;  %v389_v7 = vld [vmem:[#allocation6 + $0x608] sm:$0xff] }
 0x106   :  { %3735 = vmatprep.subr.bf16.mxu0 %v10220_v8  ;;  %3940 = vmatprep.subr.bf16.mxu1 %v10222_v9  ;;  %v10278_v8 = vcombine.high %v381_v63, %v385_v1  ;;  %v393_v9 = vld [vmem:[#allocation6 + $0x628] sm:$0xff]  ;;  %v10284_v13 = vcombine.high %v388_v5, %v392_v6  ;;  %v448_v1 = vld [vmem:[#allocation6 + $0x7e0] sm:$0xff] }
 0x107   :  { %v10285_v20 = vcombine.low %v389_v7, %v393_v9 }
 0x108   :  { %3727 = vmatmul.mubr.bf16.vlgmr.msra.gmra.mrb[0].mxu0 %v12202_v12  ;;  %3932 = vmatmul.mubr.bf16.vlgmr.msra.gmra.mrb[0].mxu1 %v12202_v12 }
 0x109   :  { %3736 = vmatpush1.bf16.msra.mxu0 %v10219_v16  ;;  %3941 = vmatpush1.bf16.msra.mxu1 %v10221_v17  ;;  %v397_v16 = vld [vmem:[#allocation6 + $0x648] sm:$0xff]  ;;  %v10286_v17 = vcombine.high %v389_v7, %v393_v9  ;;  %v456_v9 = vld [vmem:[#allocation6 + $0x820] sm:$0xff] }
 0x10a   :  { %3737 = vmatprep.subr.bf16.mxu0 %v10228_v18  ;;  %3942 = vmatprep.subr.bf16.mxu1 %v10230_v19  ;;  %v401_v18 = vld [vmem:[#allocation6 + $0x668] sm:$0xff]  ;;  %v10283_v19 = vcombine.low %v388_v5, %v392_v6  ;;  %v452_v6 = vld [vmem:[#allocation6 + $0x800] sm:$0xff] }
 0x10b   :  { %3767 = vmatprep.mubr.bf16.mxu0 %v12204_v23  ;;  %3972 = vmatprep.mubr.bf16.mxu1 %v12204_v23  ;;  %v10293_v29 = vcombine.low %v397_v16, %v401_v18 }
 0x10d   :  { %3738 = vmatpush1.bf16.msra.mxu0 %v10227_v25  ;;  %3943 = vmatpush1.bf16.msra.mxu1 %v10229_v26  ;;  %v405_v25 = vld [vmem:[#allocation6 + $0x688] sm:$0xff]  ;;  %v10294_v26 = vcombine.high %v397_v16, %v401_v18  ;;  %v460_v16 = vld [vmem:[#allocation6 + $0x840] sm:$0xff]  ;;  %v10348_v18 = vcombine.high %v452_v6, %v456_v9 }
 0x10e   :  { %3739 = vmatprep.subr.bf16.mxu0 %v10236_v27  ;;  %3944 = vmatprep.subr.bf16.mxu1 %v10238_v31  ;;  %v409_v27 = vld [vmem:[#allocation6 + $0x6a8] sm:$0xff]  ;;  %v412_v31 = vld [vmem:[#allocation6 + $0x6c0] sm:$0xff] }
 0x10f   :  { %v10301_v37 = vcombine.low %v405_v25, %v409_v27  ;;  %v10308_v38 = vcombine.high %v412_v31, %v416_v32  ;;  %v10307_v44 = vcombine.low %v412_v31, %v416_v32  ;;  %v472_v31 = vld [vmem:[#allocation6 + $0x8a0] sm:$0xff]  ;;  %v469_v32 = vld [vmem:[#allocation6 + $0x888] sm:$0xff] }
 0x111   :  { %3740 = vmatpush1.bf16.msra.mxu0 %v10235_v33  ;;  %3945 = vmatpush1.bf16.msra.mxu1 %v10237_v34  ;;  %v413_v33 = vld [vmem:[#allocation6 + $0x6c8] sm:$0xff]  ;;  %v10302_v34 = vcombine.high %v405_v25, %v409_v27  ;;  %v12210_v25 = vpack.c.bf16 %v180_v14, %v180_v14 }
 0x112   :  { %3741 = vmatprep.subr.bf16.mxu0 %v10244_v35  ;;  %3946 = vmatprep.subr.bf16.mxu1 %v10246_v39  ;;  %v417_v35 = vld [vmem:[#allocation6 + $0x6e8] sm:$0xff]  ;;  %v420_v39 = vld [vmem:[#allocation6 + $0x700] sm:$0xff] }
 0x113   :  { %v10309_v45 = vcombine.low %v413_v33, %v417_v35  ;;  %v10316_v46 = vcombine.high %v420_v39, %v424_v40  ;;  %v10315_v52 = vcombine.low %v420_v39, %v424_v40  ;;  %v476_v39 = vld [vmem:[#allocation6 + $0x8c0] sm:$0xff] }
 0x114   :  { %v480_v40 = vld [vmem:[#allocation6 + $0x8e0] sm:$0xff] }
 0x115   :  { %3742 = vmatpush1.bf16.msra.mxu0 %v10243_v41  ;;  %3947 = vmatpush1.bf16.msra.mxu1 %v10245_v42  ;;  %v421_v41 = vld [vmem:[#allocation6 + $0x708] sm:$0xff]  ;;  %v10310_v42 = vcombine.high %v413_v33, %v417_v35 }
 0x116   :  { %3743 = vmatprep.subr.bf16.mxu0 %v10252_v43  ;;  %3948 = vmatprep.subr.bf16.mxu1 %v10254_v47  ;;  %v425_v43 = vld [vmem:[#allocation6 + $0x728] sm:$0xff]  ;;  %v428_v47 = vld [vmem:[#allocation6 + $0x740] sm:$0xff] }
 0x117   :  { %v10317_v53 = vcombine.low %v421_v41, %v425_v43  ;;  %v10324_v54 = vcombine.high %v428_v47, %v432_v48  ;;  %v10323_v61 = vcombine.low %v428_v47, %v432_v48  ;;  %v473_v33 = vld [vmem:[#allocation6 + $0x8a8] sm:$0xff]  ;;  %v484_v47 = vld [vmem:[#allocation6 + $0x900] sm:$0xff] }
 0x118   :  { %v488_v48 = vld [vmem:[#allocation6 + $0x920] sm:$0xff] }
 0x119   :  { %3744 = vmatpush1.bf16.msra.mxu0 %v10251_v49  ;;  %3949 = vmatpush1.bf16.msra.mxu1 %v10253_v50  ;;  %v429_v49 = vld [vmem:[#allocation6 + $0x748] sm:$0xff]  ;;  %v10318_v50 = vcombine.high %v421_v41, %v425_v43 }
 0x11a   :  { %3745 = vmatprep.subr.bf16.mxu0 %v10260_v51  ;;  %3950 = vmatprep.subr.bf16.mxu1 %v10262_v55  ;;  %v433_v51 = vld [vmem:[#allocation6 + $0x768] sm:$0xff]  ;;  %v436_v55 = vld [vmem:[#allocation6 + $0x780] sm:$0xff] }
 0x11b   :  { %v10325_v62 = vcombine.low %v429_v49, %v433_v51  ;;  %v10332_v63 = vcombine.high %v436_v55, %v440_v56  ;;  %v10331_v5 = vcombine.low %v436_v55, %v440_v56  ;;  %v477_v41 = vld [vmem:[#allocation6 + $0x8c8] sm:$0xff]  ;;  %v492_v55 = vld [vmem:[#allocation6 + $0x940] sm:$0xff] }
 0x11c   :  { %v496_v56 = vld [vmem:[#allocation6 + $0x960] sm:$0xff] }
 0x11d   :  { %3746 = vmatpush1.bf16.msra.mxu0 %v10259_v58  ;;  %3951 = vmatpush1.bf16.msra.mxu1 %v10261_v59  ;;  %v437_v58 = vld [vmem:[#allocation6 + $0x788] sm:$0xff]  ;;  %v10326_v59 = vcombine.high %v429_v49, %v433_v51  ;;  %v10371_v51 = vcombine.low %v476_v39, %v480_v40 }
 0x11e   :  { %3747 = vmatprep.subr.bf16.mxu0 %v10268_v60  ;;  %3952 = vmatprep.subr.bf16.mxu1 %v10270_v0  ;;  %v441_v60 = vld [vmem:[#allocation6 + $0x7a8] sm:$0xff]  ;;  %v444_v0 = vld [vmem:[#allocation6 + $0x7c0] sm:$0xff] }
 0x11f   :  { %v10333_v7 = vcombine.low %v437_v58, %v441_v60  ;;  %v10339_v15 = vcombine.low %v444_v0, %v448_v1  ;;  %v485_v49 = vld [vmem:[#allocation6 + $0x908] sm:$0xff] }
 0x121   :  { %3748 = vmatpush1.bf16.msra.mxu0 %v10267_v2  ;;  %3953 = vmatpush1.bf16.msra.mxu1 %v10269_v3  ;;  %v445_v2 = vld [vmem:[#allocation6 + $0x7c8] sm:$0xff]  ;;  %v10334_v3 = vcombine.high %v437_v58, %v441_v60  ;;  %v10379_v60 = vcombine.low %v484_v47, %v488_v48 }
 0x122   :  { %3749 = vmatprep.subr.bf16.mxu0 %v10276_v4  ;;  %3954 = vmatprep.subr.bf16.mxu1 %v10278_v8  ;;  %v449_v4 = vld [vmem:[#allocation6 + $0x7e8] sm:$0xff]  ;;  %v10340_v8 = vcombine.high %v444_v0, %v448_v1  ;;  %v500_v0 = vld [vmem:[#allocation6 + $0x980] sm:$0xff] }
 0x123   :  { %v493_v58 = vld [vmem:[#allocation6 + $0x948] sm:$0xff]  ;;  %v504_v1 = vld [vmem:[#allocation6 + $0x9a0] sm:$0xff] }
 0x125   :  { %3750 = vmatpush1.bf16.msra.mxu0 %v10275_v10  ;;  %3955 = vmatpush1.bf16.msra.mxu1 %v10277_v11  ;;  %v453_v10 = vld [vmem:[#allocation6 + $0x808] sm:$0xff] }
 0x126   :  { %3751 = vmatprep.subr.bf16.mxu0 %v10284_v13  ;;  %3956 = vmatprep.subr.bf16.mxu1 %v10286_v17  ;;  %v457_v11 = vld [vmem:[#allocation6 + $0x828] sm:$0xff]  ;;  %v10342_v13 = vcombine.high %v445_v2, %v449_v4  ;;  %v10341_v17 = vcombine.low %v445_v2, %v449_v4  ;;  %v10387_v4 = vcombine.low %v492_v55, %v496_v56 }
 0x127   :  { %v10350_v22 = vcombine.high %v453_v10, %v457_v11  ;;  %v10349_v27 = vcombine.low %v453_v10, %v457_v11  ;;  %v501_v2 = vld [vmem:[#allocation6 + $0x988] sm:$0xff] }
 0x128   :  { %v509_v10 = vld [vmem:[#allocation6 + $0x9c8] sm:$0xff] }
 0x129   :  { %3752 = vmatpush1.bf16.msra.mxu0 %v10283_v19  ;;  %3957 = vmatpush1.bf16.msra.mxu1 %v10285_v20  ;;  %v464_v19 = vld [vmem:[#allocation6 + $0x860] sm:$0xff]  ;;  %v461_v20 = vld [vmem:[#allocation6 + $0x848] sm:$0xff] }
 0x12a   :  { %3753 = vmatprep.subr.bf16.mxu0 %v10292_v21  ;;  %3958 = vmatprep.subr.bf16.mxu1 %v10294_v26  ;;  %v465_v21 = vld [vmem:[#allocation6 + $0x868] sm:$0xff]  ;;  %v10347_v26 = vcombine.low %v452_v6, %v456_v9  ;;  %v10355_v35 = vcombine.low %v460_v16, %v464_v19  ;;  %v10396_v6 = vcombine.high %v500_v0, %v504_v1  ;;  %v512_v9 = vld [vmem:[#allocation6 + $0x9e0] sm:$0xff] }
 0x12b   :  { %v513_v11 = vld [vmem:[#allocation6 + $0x9e8] sm:$0xff] }
 0x12d   :  { %3754 = vmatpush1.bf16.msra.mxu0 %v10291_v28  ;;  %3959 = vmatpush1.bf16.msra.mxu1 %v10293_v29  ;;  %v10356_v28 = vcombine.high %v460_v16, %v464_v19  ;;  %v468_v29 = vld [vmem:[#allocation6 + $0x880] sm:$0xff]  ;;  %v10406_v16 = vcombine.high %v509_v10, %v513_v11  ;;  %v517_v19 = vld [vmem:[#allocation6 + $0xa08] sm:$0xff] }
 0x12e   :  { %3755 = vmatprep.subr.bf16.mxu0 %v10300_v30  ;;  %3960 = vmatprep.subr.bf16.mxu1 %v10302_v34  ;;  %v10358_v30 = vcombine.high %v461_v20, %v465_v21  ;;  %v12212_v34 = vpack.c.bf16 %v183_v24, %v183_v24  ;;  %v10363_v43 = vcombine.low %v468_v29, %v472_v31 }
 0x131   :  { %3756 = vmatpush1.bf16.msra.mxu0 %v10299_v36  ;;  %3961 = vmatpush1.bf16.msra.mxu1 %v10301_v37  ;;  %v10357_v36 = vcombine.low %v461_v20, %v465_v21  ;;  %v10364_v37 = vcombine.high %v468_v29, %v472_v31  ;;  %v521_v20 = vld [vmem:[#allocation6 + $0xa28] sm:$0xff] }
 0x132   :  { %3757 = vmatprep.subr.bf16.mxu0 %v10308_v38  ;;  %3962 = vmatprep.subr.bf16.mxu1 %v10310_v42  ;;  %v10366_v38 = vcombine.high %v469_v32, %v473_v33  ;;  %v481_v42 = vld [vmem:[#allocation6 + $0x8e8] sm:$0xff] }
 0x133   :  { %v525_v29 = vld [vmem:[#allocation6 + $0xa48] sm:$0xff] }
 0x135   :  { %3758 = vmatpush1.bf16.msra.mxu0 %v10307_v44  ;;  %3963 = vmatpush1.bf16.msra.mxu1 %v10309_v45  ;;  %v10365_v44 = vcombine.low %v469_v32, %v473_v33  ;;  %v10372_v45 = vcombine.high %v476_v39, %v480_v40  ;;  %v10413_v32 = vcombine.low %v517_v19, %v521_v20  ;;  %v537_v39 = vld [vmem:[#allocation6 + $0xaa8] sm:$0xff] }
 0x136   :  { %3759 = vmatprep.subr.bf16.mxu0 %v10316_v46  ;;  %3964 = vmatprep.subr.bf16.mxu1 %v10318_v50  ;;  %v10374_v46 = vcombine.high %v477_v41, %v481_v42  ;;  %v489_v50 = vld [vmem:[#allocation6 + $0x928] sm:$0xff] }
 0x139   :  { %3760 = vmatpush1.bf16.msra.mxu0 %v10315_v52  ;;  %3965 = vmatpush1.bf16.msra.mxu1 %v10317_v53  ;;  %v10373_v52 = vcombine.low %v477_v41, %v481_v42  ;;  %v10380_v53 = vcombine.high %v484_v47, %v488_v48  ;;  %v545_v47 = vld [vmem:[#allocation6 + $0xae8] sm:$0xff] }
 0x13a   :  { %3761 = vmatprep.subr.bf16.mxu0 %v10324_v54  ;;  %3966 = vmatprep.subr.bf16.mxu1 %v10326_v59  ;;  %v10382_v54 = vcombine.high %v485_v49, %v489_v50  ;;  %v497_v59 = vld [vmem:[#allocation6 + $0x968] sm:$0xff] }
 0x13d   :  { %3762 = vmatpush1.bf16.msra.mxu0 %v10323_v61  ;;  %3967 = vmatpush1.bf16.msra.mxu1 %v10325_v62  ;;  %v10381_v61 = vcombine.low %v485_v49, %v489_v50  ;;  %v10388_v62 = vcombine.high %v492_v55, %v496_v56  ;;  %v553_v55 = vld [vmem:[#allocation6 + $0xb28] sm:$0xff] }
 0x13e   :  { %3763 = vmatprep.subr.bf16.mxu0 %v10332_v63  ;;  %3968 = vmatprep.subr.bf16.mxu1 %v10334_v3  ;;  %v10390_v63 = vcombine.high %v493_v58, %v497_v59  ;;  %v505_v3 = vld [vmem:[#allocation6 + $0x9a8] sm:$0xff] }
 0x13f   :  { %v10397_v14 = vcombine.low %v501_v2, %v505_v3 }
 0x141   :  { %3764 = vmatpush1.bf16.msra.mxu0 %v10331_v5  ;;  %3969 = vmatpush1.bf16.msra.mxu1 %v10333_v7  ;;  %v10389_v5 = vcombine.low %v493_v58, %v497_v59  ;;  %v10398_v7 = vcombine.high %v501_v2, %v505_v3 }
 0x142   :  { %3765 = vmatprep.subr.bf16.mxu0 %v10340_v8  ;;  %3970 = vmatprep.subr.bf16.mxu1 %v10342_v13  ;;  %v508_v8 = vld [vmem:[#allocation6 + $0x9c0] sm:$0xff]  ;;  %v10395_v13 = vcombine.low %v500_v0, %v504_v1  ;;  %v561_v0 = vld [vmem:[#allocation6 + $0xb68] sm:$0xff] }
 0x143   :  { %v10403_v21 = vcombine.low %v508_v8, %v512_v9 }
 0x145   :  { %3766 = vmatpush1.bf16.msra.mxu0 %v10339_v15  ;;  %3971 = vmatpush1.bf16.msra.mxu1 %v10341_v17  ;;  %v10404_v15 = vcombine.high %v508_v8, %v512_v9  ;;  %v516_v17 = vld [vmem:[#allocation6 + $0xa00] sm:$0xff]  ;;  %v569_v8 = vld [vmem:[#allocation6 + $0xba8] sm:$0xff] }
 0x146   :  { %3776 = vmatprep.subr.bf16.mxu0 %v10348_v18  ;;  %3981 = vmatprep.subr.bf16.mxu1 %v10350_v22  ;;  %v520_v18 = vld [vmem:[#allocation6 + $0xa20] sm:$0xff]  ;;  %v10405_v22 = vcombine.low %v509_v10, %v513_v11 }
 0x147   :  { %v10412_v24 = vcombine.high %v516_v17, %v520_v18  ;;  %v10411_v31 = vcombine.low %v516_v17, %v520_v18  ;;  %v577_v17 = vld [vmem:[#allocation6 + $0xbe8] sm:$0xff] }
 0x148   :  { %3768 = vmatmul.mubr.bf16.vlgmr.msra.gmra.mrb[0].mxu0 %v12210_v25  ;;  %3973 = vmatmul.mubr.bf16.vlgmr.msra.gmra.mrb[0].mxu1 %v12210_v25 }
 0x149   :  { %3777 = vmatpush1.bf16.msra.mxu0 %v10347_v26  ;;  %3982 = vmatpush1.bf16.msra.mxu1 %v10349_v27  ;;  %v10414_v26 = vcombine.high %v517_v19, %v521_v20  ;;  %v524_v27 = vld [vmem:[#allocation6 + $0xa40] sm:$0xff] }
 0x14a   :  { %3778 = vmatprep.subr.bf16.mxu0 %v10356_v28  ;;  %3983 = vmatprep.subr.bf16.mxu1 %v10358_v30  ;;  %v528_v28 = vld [vmem:[#allocation6 + $0xa60] sm:$0xff]  ;;  %v529_v30 = vld [vmem:[#allocation6 + $0xa68] sm:$0xff] }
 0x14b   :  { %3808 = vmatprep.mubr.bf16.mxu0 %v12212_v34  ;;  %4013 = vmatprep.mubr.bf16.mxu1 %v12212_v34  ;;  %v10420_v33 = vcombine.high %v524_v27, %v528_v28  ;;  %v10419_v40 = vcombine.low %v524_v27, %v528_v28  ;;  %v10421_v41 = vcombine.low %v525_v29, %v529_v30  ;;  %v585_v27 = vld [vmem:[#allocation6 + $0xc28] sm:$0xff] }
 0x14d   :  { %3779 = vmatpush1.bf16.msra.mxu0 %v10355_v35  ;;  %3984 = vmatpush1.bf16.msra.mxu1 %v10357_v36  ;;  %v10422_v35 = vcombine.high %v525_v29, %v529_v30  ;;  %v532_v36 = vld [vmem:[#allocation6 + $0xa80] sm:$0xff]  ;;  %v182_v29 = vld [vmem:[#allocation3 + $0x20] sm:$0xff] }
 0x14e   :  { %3780 = vmatprep.subr.bf16.mxu0 %v10364_v37  ;;  %3985 = vmatprep.subr.bf16.mxu1 %v10366_v38  ;;  %v536_v37 = vld [vmem:[#allocation6 + $0xaa0] sm:$0xff]  ;;  %v533_v38 = vld [vmem:[#allocation6 + $0xa88] sm:$0xff] }
 0x14f   :  { %v10428_v42 = vcombine.high %v532_v36, %v536_v37  ;;  %v10427_v48 = vcombine.low %v532_v36, %v536_v37  ;;  %v10429_v49 = vcombine.low %v533_v38, %v537_v39  ;;  %v12218_v36 = vpack.c.bf16 %v182_v29, %v182_v29  ;;  %v589_v37 = vld [vmem:[#allocation6 + $0xc48] sm:$0xff] }
 0x151   :  { %3781 = vmatpush1.bf16.msra.mxu0 %v10363_v43  ;;  %3986 = vmatpush1.bf16.msra.mxu1 %v10365_v44  ;;  %v10430_v43 = vcombine.high %v533_v38, %v537_v39  ;;  %v540_v44 = vld [vmem:[#allocation6 + $0xac0] sm:$0xff]  ;;  %v593_v38 = vld [vmem:[#allocation6 + $0xc68] sm:$0xff]  ;;  %v185_v39 = vld [vmem:[#allocation3 + $0x38] sm:$0xff] }
 0x152   :  { %3782 = vmatprep.subr.bf16.mxu0 %v10372_v45  ;;  %3987 = vmatprep.subr.bf16.mxu1 %v10374_v46  ;;  %v544_v45 = vld [vmem:[#allocation6 + $0xae0] sm:$0xff]  ;;  %v541_v46 = vld [vmem:[#allocation6 + $0xac8] sm:$0xff] }
 0x153   :  { %v10436_v50 = vcombine.high %v540_v44, %v544_v45  ;;  %v10435_v56 = vcombine.low %v540_v44, %v544_v45  ;;  %v10437_v58 = vcombine.low %v541_v46, %v545_v47  ;;  %v596_v44 = vld [vmem:[#allocation6 + $0xc80] sm:$0xff] }
 0x154   :  { %v600_v45 = vld [vmem:[#allocation6 + $0xca0] sm:$0xff] }
 0x155   :  { %3783 = vmatpush1.bf16.msra.mxu0 %v10371_v51  ;;  %3988 = vmatpush1.bf16.msra.mxu1 %v10373_v52  ;;  %v10438_v51 = vcombine.high %v541_v46, %v545_v47  ;;  %v548_v52 = vld [vmem:[#allocation6 + $0xb00] sm:$0xff]  ;;  %v12220_v46 = vpack.c.bf16 %v185_v39, %v185_v39  ;;  %v597_v47 = vld [vmem:[#allocation6 + $0xc88] sm:$0xff] }
 0x156   :  { %3784 = vmatprep.subr.bf16.mxu0 %v10380_v53  ;;  %3989 = vmatprep.subr.bf16.mxu1 %v10382_v54  ;;  %v552_v53 = vld [vmem:[#allocation6 + $0xb20] sm:$0xff]  ;;  %v549_v54 = vld [vmem:[#allocation6 + $0xb08] sm:$0xff] }
 0x157   :  { %v10444_v59 = vcombine.high %v548_v52, %v552_v53  ;;  %v10443_v1 = vcombine.low %v548_v52, %v552_v53  ;;  %v10445_v2 = vcombine.low %v549_v54, %v553_v55  ;;  %v604_v53 = vld [vmem:[#allocation6 + $0xcc0] sm:$0xff] }
 0x159   :  { %3785 = vmatpush1.bf16.msra.mxu0 %v10379_v60  ;;  %3990 = vmatpush1.bf16.msra.mxu1 %v10381_v61  ;;  %v10446_v60 = vcombine.high %v549_v54, %v553_v55  ;;  %v556_v61 = vld [vmem:[#allocation6 + $0xb40] sm:$0xff]  ;;  %v605_v55 = vld [vmem:[#allocation6 + $0xcc8] sm:$0xff] }
 0x15a   :  { %3786 = vmatprep.subr.bf16.mxu0 %v10388_v62  ;;  %3991 = vmatprep.subr.bf16.mxu1 %v10390_v63  ;;  %v560_v62 = vld [vmem:[#allocation6 + $0xb60] sm:$0xff]  ;;  %v557_v63 = vld [vmem:[#allocation6 + $0xb48] sm:$0xff] }
 0x15b   :  { %v10452_v3 = vcombine.high %v556_v61, %v560_v62  ;;  %v10451_v9 = vcombine.low %v556_v61, %v560_v62  ;;  %v10453_v10 = vcombine.low %v557_v63, %v561_v0  ;;  %v608_v54 = vld [vmem:[#allocation6 + $0xce0] sm:$0xff] }
 0x15c   :  { %v612_v62 = vld [vmem:[#allocation6 + $0xd00] sm:$0xff] }
 0x15d   :  { %3787 = vmatpush1.bf16.msra.mxu0 %v10387_v4  ;;  %3992 = vmatpush1.bf16.msra.mxu1 %v10389_v5  ;;  %v10454_v4 = vcombine.high %v557_v63, %v561_v0  ;;  %v564_v5 = vld [vmem:[#allocation6 + $0xb80] sm:$0xff]  ;;  %v613_v0 = vld [vmem:[#allocation6 + $0xd08] sm:$0xff] }
 0x15e   :  { %3788 = vmatprep.subr.bf16.mxu0 %v10396_v6  ;;  %3993 = vmatprep.subr.bf16.mxu1 %v10398_v7  ;;  %v568_v6 = vld [vmem:[#allocation6 + $0xba0] sm:$0xff]  ;;  %v565_v7 = vld [vmem:[#allocation6 + $0xb88] sm:$0xff] }
 0x15f   :  { %v10460_v11 = vcombine.high %v564_v5, %v568_v6  ;;  %v10459_v18 = vcombine.low %v564_v5, %v568_v6  ;;  %v10461_v19 = vcombine.low %v565_v7, %v569_v8  ;;  %v616_v63 = vld [vmem:[#allocation6 + $0xd20] sm:$0xff] }
 0x160   :  { %v620_v6 = vld [vmem:[#allocation6 + $0xd40] sm:$0xff] }
 0x161   :  { %3789 = vmatpush1.bf16.msra.mxu0 %v10395_v13  ;;  %3994 = vmatpush1.bf16.msra.mxu1 %v10397_v14  ;;  %v10462_v13 = vcombine.high %v565_v7, %v569_v8  ;;  %v572_v14 = vld [vmem:[#allocation6 + $0xbc0] sm:$0xff]  ;;  %v621_v8 = vld [vmem:[#allocation6 + $0xd48] sm:$0xff] }
 0x162   :  { %3790 = vmatprep.subr.bf16.mxu0 %v10404_v15  ;;  %3995 = vmatprep.subr.bf16.mxu1 %v10406_v16  ;;  %v576_v15 = vld [vmem:[#allocation6 + $0xbe0] sm:$0xff]  ;;  %v573_v16 = vld [vmem:[#allocation6 + $0xbc8] sm:$0xff] }
 0x163   :  { %v10468_v20 = vcombine.high %v572_v14, %v576_v15  ;;  %v10467_v28 = vcombine.low %v572_v14, %v576_v15  ;;  %v10469_v30 = vcombine.low %v573_v16, %v577_v17  ;;  %v624_v7 = vld [vmem:[#allocation6 + $0xd60] sm:$0xff] }
 0x164   :  { %v628_v15 = vld [vmem:[#allocation6 + $0xd80] sm:$0xff] }
 0x165   :  { %3791 = vmatpush1.bf16.msra.mxu0 %v10403_v21  ;;  %3996 = vmatpush1.bf16.msra.mxu1 %v10405_v22  ;;  %v10470_v21 = vcombine.high %v573_v16, %v577_v17  ;;  %v580_v22 = vld [vmem:[#allocation6 + $0xc00] sm:$0xff]  ;;  %v629_v17 = vld [vmem:[#allocation6 + $0xd88] sm:$0xff] }
 0x166   :  { %3792 = vmatprep.subr.bf16.mxu0 %v10412_v24  ;;  %3997 = vmatprep.subr.bf16.mxu1 %v10414_v26  ;;  %v584_v24 = vld [vmem:[#allocation6 + $0xc20] sm:$0xff]  ;;  %v581_v26 = vld [vmem:[#allocation6 + $0xc08] sm:$0xff] }
 0x167   :  { %v632_v16 = vld [vmem:[#allocation6 + $0xda0] sm:$0xff] }
 0x168   :  { %v10523_v29 = vcombine.low %v628_v15, %v632_v16 }
 0x169   :  { %3793 = vmatpush1.bf16.msra.mxu0 %v10411_v31  ;;  %3998 = vmatpush1.bf16.msra.mxu1 %v10413_v32  ;;  %v10476_v31 = vcombine.high %v580_v22, %v584_v24  ;;  %v10478_v32 = vcombine.high %v581_v26, %v585_v27 }
 0x16a   :  { %3794 = vmatprep.subr.bf16.mxu0 %v10420_v33  ;;  %3999 = vmatprep.subr.bf16.mxu1 %v10422_v35  ;;  %v588_v33 = vld [vmem:[#allocation6 + $0xc40] sm:$0xff] }
 0x16b   :  { %v592_v35 = vld [vmem:[#allocation6 + $0xc60] sm:$0xff] }
 0x16d   :  { %3795 = vmatpush1.bf16.msra.mxu0 %v10419_v40  ;;  %4000 = vmatpush1.bf16.msra.mxu1 %v10421_v41  ;;  %v10475_v40 = vcombine.low %v580_v22, %v584_v24  ;;  %v10477_v41 = vcombine.low %v581_v26, %v585_v27  ;;  %v636_v24 = vld [vmem:[#allocation6 + $0xdc0] sm:$0xff]  ;;  %v637_v27 = vld [vmem:[#allocation6 + $0xdc8] sm:$0xff] }
 0x16e   :  { %3796 = vmatprep.subr.bf16.mxu0 %v10428_v42  ;;  %4001 = vmatprep.subr.bf16.mxu1 %v10430_v43  ;;  %v10484_v42 = vcombine.high %v588_v33, %v592_v35  ;;  %v10486_v43 = vcombine.high %v589_v37, %v593_v38  ;;  %v640_v26 = vld [vmem:[#allocation6 + $0xde0] sm:$0xff] }
 0x16f   :  { %v10531_v39 = vcombine.low %v636_v24, %v640_v26 }
 0x171   :  { %3797 = vmatpush1.bf16.msra.mxu0 %v10427_v48  ;;  %4002 = vmatpush1.bf16.msra.mxu1 %v10429_v49  ;;  %v601_v48 = vld [vmem:[#allocation6 + $0xca8] sm:$0xff]  ;;  %v10483_v49 = vcombine.low %v588_v33, %v592_v35  ;;  %v644_v33 = vld [vmem:[#allocation6 + $0xe00] sm:$0xff] }
 0x172   :  { %3798 = vmatprep.subr.bf16.mxu0 %v10436_v50  ;;  %4003 = vmatprep.subr.bf16.mxu1 %v10438_v51  ;;  %v10485_v50 = vcombine.low %v589_v37, %v593_v38  ;;  %v10492_v51 = vcombine.high %v596_v44, %v600_v45  ;;  %v10494_v52 = vcombine.high %v597_v47, %v601_v48  ;;  %v648_v35 = vld [vmem:[#allocation6 + $0xe20] sm:$0xff]  ;;  %v645_v37 = vld [vmem:[#allocation6 + $0xe08] sm:$0xff] }
 0x173   :  { %v649_v38 = vld [vmem:[#allocation6 + $0xe28] sm:$0xff] }
 0x175   :  { %3799 = vmatpush1.bf16.msra.mxu0 %v10435_v56  ;;  %4004 = vmatpush1.bf16.msra.mxu1 %v10437_v58  ;;  %v609_v56 = vld [vmem:[#allocation6 + $0xce8] sm:$0xff]  ;;  %v10491_v58 = vcombine.low %v596_v44, %v600_v45  ;;  %v656_v44 = vld [vmem:[#allocation6 + $0xe60] sm:$0xff] }
 0x176   :  { %3800 = vmatprep.subr.bf16.mxu0 %v10444_v59  ;;  %4005 = vmatprep.subr.bf16.mxu1 %v10446_v60  ;;  %v10493_v59 = vcombine.low %v597_v47, %v601_v48  ;;  %v10500_v60 = vcombine.high %v604_v53, %v608_v54  ;;  %v10502_v61 = vcombine.high %v605_v55, %v609_v56  ;;  %v653_v45 = vld [vmem:[#allocation6 + $0xe48] sm:$0xff] }
 0x177   :  { %v657_v47 = vld [vmem:[#allocation6 + $0xe68] sm:$0xff]  ;;  %v10539_v48 = vcombine.low %v644_v33, %v648_v35 }
 0x179   :  { %3801 = vmatpush1.bf16.msra.mxu0 %v10443_v1  ;;  %4006 = vmatpush1.bf16.msra.mxu1 %v10445_v2  ;;  %v617_v1 = vld [vmem:[#allocation6 + $0xd28] sm:$0xff]  ;;  %v10499_v2 = vcombine.low %v604_v53, %v608_v54  ;;  %v664_v53 = vld [vmem:[#allocation6 + $0xea0] sm:$0xff] }
 0x17a   :  { %3802 = vmatprep.subr.bf16.mxu0 %v10452_v3  ;;  %4007 = vmatprep.subr.bf16.mxu1 %v10454_v4  ;;  %v10501_v3 = vcombine.low %v605_v55, %v609_v56  ;;  %v10508_v4 = vcombine.high %v612_v62, %v616_v63  ;;  %v10510_v5 = vcombine.high %v613_v0, %v617_v1  ;;  %v661_v54 = vld [vmem:[#allocation6 + $0xe88] sm:$0xff] }
 0x17b   :  { %v665_v55 = vld [vmem:[#allocation6 + $0xea8] sm:$0xff] }
 0x17d   :  { %3803 = vmatpush1.bf16.msra.mxu0 %v10451_v9  ;;  %4008 = vmatpush1.bf16.msra.mxu1 %v10453_v10  ;;  %v625_v9 = vld [vmem:[#allocation6 + $0xd68] sm:$0xff]  ;;  %v10507_v10 = vcombine.low %v612_v62, %v616_v63  ;;  %v672_v62 = vld [vmem:[#allocation6 + $0xee0] sm:$0xff] }
 0x17e   :  { %3804 = vmatprep.subr.bf16.mxu0 %v10460_v11  ;;  %4009 = vmatprep.subr.bf16.mxu1 %v10462_v13  ;;  %v10509_v11 = vcombine.low %v613_v0, %v617_v1  ;;  %v10516_v13 = vcombine.high %v620_v6, %v624_v7  ;;  %v10518_v14 = vcombine.high %v621_v8, %v625_v9  ;;  %v669_v63 = vld [vmem:[#allocation6 + $0xec8] sm:$0xff] }
 0x17f   :  { %v673_v0 = vld [vmem:[#allocation6 + $0xee8] sm:$0xff] }
 0x181   :  { %3805 = vmatpush1.bf16.msra.mxu0 %v10459_v18  ;;  %4010 = vmatpush1.bf16.msra.mxu1 %v10461_v19  ;;  %v633_v18 = vld [vmem:[#allocation6 + $0xda8] sm:$0xff]  ;;  %v10515_v19 = vcombine.low %v620_v6, %v624_v7  ;;  %v680_v6 = vld [vmem:[#allocation6 + $0xf20] sm:$0xff] }
 0x182   :  { %3806 = vmatprep.subr.bf16.mxu0 %v10468_v20  ;;  %4011 = vmatprep.subr.bf16.mxu1 %v10470_v21  ;;  %v10517_v20 = vcombine.low %v621_v8, %v625_v9  ;;  %v10524_v21 = vcombine.high %v628_v15, %v632_v16  ;;  %v10526_v22 = vcombine.high %v629_v17, %v633_v18  ;;  %v677_v7 = vld [vmem:[#allocation6 + $0xf08] sm:$0xff]  ;;  %v688_v15 = vld [vmem:[#allocation6 + $0xf60] sm:$0xff] }
 0x183   :  { %v681_v8 = vld [vmem:[#allocation6 + $0xf28] sm:$0xff] }
 0x184   :  { %v685_v16 = vld [vmem:[#allocation6 + $0xf48] sm:$0xff] }
 0x185   :  { %3807 = vmatpush1.bf16.msra.mxu0 %v10467_v28  ;;  %4012 = vmatpush1.bf16.msra.mxu1 %v10469_v30  ;;  %v641_v28 = vld [vmem:[#allocation6 + $0xde8] sm:$0xff]  ;;  %v10525_v30 = vcombine.low %v629_v17, %v633_v18 }
 0x186   :  { %3817 = vmatprep.subr.bf16.mxu0 %v10476_v31  ;;  %4022 = vmatprep.subr.bf16.mxu1 %v10478_v32  ;;  %v10532_v31 = vcombine.high %v636_v24, %v640_v26  ;;  %v10534_v32 = vcombine.high %v637_v27, %v641_v28  ;;  %v689_v17 = vld [vmem:[#allocation6 + $0xf68] sm:$0xff]  ;;  %v696_v24 = vld [vmem:[#allocation6 + $0xfa0] sm:$0xff] }
 0x187   :  { %v693_v26 = vld [vmem:[#allocation6 + $0xf88] sm:$0xff] }
 0x188   :  { %3809 = vmatmul.mubr.bf16.vlgmr.msra.gmra.mrb[0].mxu0 %v12218_v36  ;;  %4014 = vmatmul.mubr.bf16.vlgmr.msra.gmra.mrb[0].mxu1 %v12218_v36 }
 0x189   :  { %3818 = vmatpush1.bf16.msra.mxu0 %v10475_v40  ;;  %4023 = vmatpush1.bf16.msra.mxu1 %v10477_v41  ;;  %v10533_v40 = vcombine.low %v637_v27, %v641_v28  ;;  %v10540_v41 = vcombine.high %v644_v33, %v648_v35  ;;  %v697_v27 = vld [vmem:[#allocation6 + $0xfa8] sm:$0xff]  ;;  %v704_v33 = vld [vmem:[#allocation6 + $0xfe0] sm:$0xff] }
 0x18a   :  { %3819 = vmatprep.subr.bf16.mxu0 %v10484_v42  ;;  %4024 = vmatprep.subr.bf16.mxu1 %v10486_v43  ;;  %v10542_v42 = vcombine.high %v645_v37, %v649_v38  ;;  %v652_v43 = vld [vmem:[#allocation6 + $0xe40] sm:$0xff]  ;;  %v701_v35 = vld [vmem:[#allocation6 + $0xfc8] sm:$0xff] }
 0x18b   :  { %3849 = vmatprep.mubr.bf16.mxu0 %v12220_v46  ;;  %4054 = vmatprep.mubr.bf16.mxu1 %v12220_v46  ;;  %v10547_v56 = vcombine.low %v652_v43, %v656_v44 }
 0x18d   :  { %3820 = vmatpush1.bf16.msra.mxu0 %v10483_v49  ;;  %4025 = vmatpush1.bf16.msra.mxu1 %v10485_v50  ;;  %v10541_v49 = vcombine.low %v645_v37, %v649_v38  ;;  %v10548_v50 = vcombine.high %v652_v43, %v656_v44  ;;  %v705_v37 = vld [vmem:[#allocation6 + $0xfe8] sm:$0xff]  ;;  %v712_v43 = vld [vmem:[#allocation6 + $0x1020] sm:$0xff] }
 0x18e   :  { %3821 = vmatprep.subr.bf16.mxu0 %v10492_v51  ;;  %4026 = vmatprep.subr.bf16.mxu1 %v10494_v52  ;;  %v10550_v51 = vcombine.high %v653_v45, %v657_v47  ;;  %v660_v52 = vld [vmem:[#allocation6 + $0xe80] sm:$0xff]  ;;  %v709_v44 = vld [vmem:[#allocation6 + $0x1008] sm:$0xff] }
 0x18f   :  { %v10555_v1 = vcombine.low %v660_v52, %v664_v53 }
 0x191   :  { %3822 = vmatpush1.bf16.msra.mxu0 %v10491_v58  ;;  %4027 = vmatpush1.bf16.msra.mxu1 %v10493_v59  ;;  %v10549_v58 = vcombine.low %v653_v45, %v657_v47  ;;  %v10556_v59 = vcombine.high %v660_v52, %v664_v53  ;;  %v713_v45 = vld [vmem:[#allocation6 + $0x1028] sm:$0xff]  ;;  %v716_v52 = vld [vmem:[#allocation6 + $0x1040] sm:$0xff] }
 0x192   :  { %3823 = vmatprep.subr.bf16.mxu0 %v10500_v60  ;;  %4028 = vmatprep.subr.bf16.mxu1 %v10502_v61  ;;  %v10558_v60 = vcombine.high %v661_v54, %v665_v55  ;;  %v668_v61 = vld [vmem:[#allocation6 + $0xec0] sm:$0xff] }
 0x193   :  { %v10563_v9 = vcombine.low %v668_v61, %v672_v62  ;;  %v720_v53 = vld [vmem:[#allocation6 + $0x1060] sm:$0xff] }
 0x195   :  { %3824 = vmatpush1.bf16.msra.mxu0 %v10499_v2  ;;  %4029 = vmatpush1.bf16.msra.mxu1 %v10501_v3  ;;  %v10557_v2 = vcombine.low %v661_v54, %v665_v55  ;;  %v10564_v3 = vcombine.high %v668_v61, %v672_v62  ;;  %v717_v55 = vld [vmem:[#allocation6 + $0x1048] sm:$0xff]  ;;  %v724_v62 = vld [vmem:[#allocation6 + $0x1080] sm:$0xff] }
 0x196   :  { %3825 = vmatprep.subr.bf16.mxu0 %v10508_v4  ;;  %4030 = vmatprep.subr.bf16.mxu1 %v10510_v5  ;;  %v10566_v4 = vcombine.high %v669_v63, %v673_v0  ;;  %v676_v5 = vld [vmem:[#allocation6 + $0xf00] sm:$0xff] }
 0x197   :  { %v10571_v18 = vcombine.low %v676_v5, %v680_v6 }
 0x199   :  { %3826 = vmatpush1.bf16.msra.mxu0 %v10507_v10  ;;  %4031 = vmatpush1.bf16.msra.mxu1 %v10509_v11  ;;  %v10565_v10 = vcombine.low %v669_v63, %v673_v0  ;;  %v10572_v11 = vcombine.high %v676_v5, %v680_v6  ;;  %v728_v63 = vld [vmem:[#allocation6 + $0x10a0] sm:$0xff]  ;;  %v725_v0 = vld [vmem:[#allocation6 + $0x1088] sm:$0xff] }
 0x19a   :  { %3827 = vmatprep.subr.bf16.mxu0 %v10516_v13  ;;  %4032 = vmatprep.subr.bf16.mxu1 %v10518_v14  ;;  %v10574_v13 = vcombine.high %v677_v7, %v681_v8  ;;  %v684_v14 = vld [vmem:[#allocation6 + $0xf40] sm:$0xff] }
 0x19b   :  { %v10579_v28 = vcombine.low %v684_v14, %v688_v15  ;;  %v732_v6 = vld [vmem:[#allocation6 + $0x10c0] sm:$0xff] }
 0x19d   :  { %3828 = vmatpush1.bf16.msra.mxu0 %v10515_v19  ;;  %4033 = vmatpush1.bf16.msra.mxu1 %v10517_v20  ;;  %v10573_v19 = vcombine.low %v677_v7, %v681_v8  ;;  %v10580_v20 = vcombine.high %v684_v14, %v688_v15  ;;  %v736_v7 = vld [vmem:[#allocation6 + $0x10e0] sm:$0xff]  ;;  %v13278_v8 = vmov 0  }
 0x19e   :  { %3829 = vmatprep.subr.bf16.mxu0 %v10524_v21  ;;  %4034 = vmatprep.subr.bf16.mxu1 %v10526_v22  ;;  %v10582_v21 = vcombine.high %v685_v16, %v689_v17  ;;  %v692_v22 = vld [vmem:[#allocation6 + $0xf80] sm:$0xff]  ;;  %v10628_v14 = vcombine.high %v732_v6, %v736_v7 }
 0x19f   :  { %v10587_v38 = vcombine.low %v692_v22, %v696_v24 }
 0x1a1   :  { %3830 = vmatpush1.bf16.msra.mxu0 %v10523_v29  ;;  %4035 = vmatpush1.bf16.msra.mxu1 %v10525_v30  ;;  %v10581_v29 = vcombine.low %v685_v16, %v689_v17  ;;  %v10588_v30 = vcombine.high %v692_v22, %v696_v24  ;;  %v740_v16 = vld [vmem:[#allocation6 + $0x1100] sm:$0xff] }
 0x1a2   :  { %3831 = vmatprep.subr.bf16.mxu0 %v10532_v31  ;;  %4036 = vmatprep.subr.bf16.mxu1 %v10534_v32  ;;  %v10590_v31 = vcombine.high %v693_v26, %v697_v27  ;;  %v700_v32 = vld [vmem:[#allocation6 + $0xfc0] sm:$0xff] }
 0x1a3   :  { %v10595_v47 = vcombine.low %v700_v32, %v704_v33  ;;  %v744_v17 = vld [vmem:[#allocation6 + $0x1120] sm:$0xff] }
 0x1a4   :  { %v10636_v22 = vcombine.high %v740_v16, %v744_v17 }
 0x1a5   :  { %3832 = vmatpush1.bf16.msra.mxu0 %v10531_v39  ;;  %4037 = vmatpush1.bf16.msra.mxu1 %v10533_v40  ;;  %v10589_v39 = vcombine.low %v693_v26, %v697_v27  ;;  %v10596_v40 = vcombine.high %v700_v32, %v704_v33  ;;  %v748_v26 = vld [vmem:[#allocation6 + $0x1140] sm:$0xff] }
 0x1a6   :  { %3833 = vmatprep.subr.bf16.mxu0 %v10540_v41  ;;  %4038 = vmatprep.subr.bf16.mxu1 %v10542_v42  ;;  %v10598_v41 = vcombine.high %v701_v35, %v705_v37  ;;  %v708_v42 = vld [vmem:[#allocation6 + $0x1000] sm:$0xff] }
 0x1a7   :  { %v752_v27 = vld [vmem:[#allocation6 + $0x1160] sm:$0xff] }
 0x1a8   :  { %v10644_v32 = vcombine.high %v748_v26, %v752_v27 }
 0x1a9   :  { %3834 = vmatpush1.bf16.msra.mxu0 %v10539_v48  ;;  %4039 = vmatpush1.bf16.msra.mxu1 %v10541_v49  ;;  %v184_v48 = vld [vmem:[#allocation3 + $0x30] sm:$0xff]  ;;  %v10597_v49 = vcombine.low %v701_v35, %v705_v37  ;;  %v756_v35 = vld [vmem:[#allocation6 + $0x1180] sm:$0xff] }
 0x1aa   :  { %3835 = vmatprep.subr.bf16.mxu0 %v10548_v50  ;;  %4040 = vmatprep.subr.bf16.mxu1 %v10550_v51  ;;  %v10604_v50 = vcombine.high %v708_v42, %v712_v43  ;;  %v10606_v51 = vcombine.high %v709_v44, %v713_v45  ;;  %v12226_v54 = vpack.c.bf16 %v184_v48, %v184_v48  ;;  %v760_v37 = vld [vmem:[#allocation6 + $0x11a0] sm:$0xff]  ;;  %v769_v48 = vld [vmem:[#allocation6 + $0x11e8] sm:$0xff] }
 0x1ad   :  { %3836 = vmatpush1.bf16.msra.mxu0 %v10547_v56  ;;  %4041 = vmatpush1.bf16.msra.mxu1 %v10549_v58  ;;  %v721_v56 = vld [vmem:[#allocation6 + $0x1068] sm:$0xff]  ;;  %v10603_v58 = vcombine.low %v708_v42, %v712_v43  ;;  %v10652_v42 = vcombine.high %v756_v35, %v760_v37 }
 0x1ae   :  { %3837 = vmatprep.subr.bf16.mxu0 %v10556_v59  ;;  %4042 = vmatprep.subr.bf16.mxu1 %v10558_v60  ;;  %v10605_v59 = vcombine.low %v709_v44, %v713_v45  ;;  %v10612_v60 = vcombine.high %v716_v52, %v720_v53  ;;  %v10614_v61 = vcombine.high %v717_v55, %v721_v56  ;;  %v764_v44 = vld [vmem:[#allocation6 + $0x11c0] sm:$0xff] }
 0x1af   :  { %v768_v45 = vld [vmem:[#allocation6 + $0x11e0] sm:$0xff] }
 0x1b1   :  { %3838 = vmatpush1.bf16.msra.mxu0 %v10555_v1  ;;  %4043 = vmatpush1.bf16.msra.mxu1 %v10557_v2  ;;  %v729_v1 = vld [vmem:[#allocation6 + $0x10a8] sm:$0xff]  ;;  %v10611_v2 = vcombine.low %v716_v52, %v720_v53  ;;  %v198_v53 = vld [vmem:[#allocation6 + $0x10] sm:$0xff] }
 0x1b2   :  { %3839 = vmatprep.subr.bf16.mxu0 %v10564_v3  ;;  %4044 = vmatprep.subr.bf16.mxu1 %v10566_v4  ;;  %v10613_v3 = vcombine.low %v717_v55, %v721_v56  ;;  %v10620_v4 = vcombine.high %v724_v62, %v728_v63  ;;  %v10622_v5 = vcombine.high %v725_v0, %v729_v1  ;;  %v202_v55 = vld [vmem:[#allocation6 + $0x30] sm:$0xff]  ;;  %v199_v56 = vld [vmem:[#allocation6 + $0x18] sm:$0xff] }
 0x1b5   :  { %3840 = vmatpush1.bf16.msra.mxu0 %v10563_v9  ;;  %4045 = vmatpush1.bf16.msra.mxu1 %v10565_v10  ;;  %v733_v9 = vld [vmem:[#allocation6 + $0x10c8] sm:$0xff] }
 0x1b6   :  { %3841 = vmatprep.subr.bf16.mxu0 %v10572_v11  ;;  %4046 = vmatprep.subr.bf16.mxu1 %v10574_v13  ;;  %v737_v10 = vld [vmem:[#allocation6 + $0x10e8] sm:$0xff]  ;;  %v10619_v11 = vcombine.low %v724_v62, %v728_v63  ;;  %v10621_v13 = vcombine.low %v725_v0, %v729_v1  ;;  %v10096_v62 = vcombine.high %v198_v53, %v202_v55  ;;  %v206_v0 = vld [vmem:[#allocation6 + $0x50] sm:$0xff] }
 0x1b7   :  { %v10630_v15 = vcombine.high %v733_v9, %v737_v10  ;;  %v210_v1 = vld [vmem:[#allocation6 + $0x70] sm:$0xff] }
 0x1b9   :  { %3842 = vmatpush1.bf16.msra.mxu0 %v10571_v18  ;;  %4047 = vmatpush1.bf16.msra.mxu1 %v10573_v19  ;;  %v741_v18 = vld [vmem:[#allocation6 + $0x1108] sm:$0xff] }
 0x1ba   :  { %3843 = vmatprep.subr.bf16.mxu0 %v10580_v20  ;;  %4048 = vmatprep.subr.bf16.mxu1 %v10582_v21  ;;  %v745_v19 = vld [vmem:[#allocation6 + $0x1128] sm:$0xff]  ;;  %v10627_v20 = vcombine.low %v732_v6, %v736_v7  ;;  %v10629_v21 = vcombine.low %v733_v9, %v737_v10  ;;  %v10104_v7 = vcombine.high %v206_v0, %v210_v1  ;;  %v214_v10 = vld [vmem:[#allocation6 + $0x90] sm:$0xff] }
 0x1bb   :  { %v10638_v24 = vcombine.high %v741_v18, %v745_v19 }
 0x1bd   :  { %3844 = vmatpush1.bf16.msra.mxu0 %v10579_v28  ;;  %4049 = vmatpush1.bf16.msra.mxu1 %v10581_v29  ;;  %v749_v28 = vld [vmem:[#allocation6 + $0x1148] sm:$0xff] }
 0x1be   :  { %3845 = vmatprep.subr.bf16.mxu0 %v10588_v30  ;;  %4050 = vmatprep.subr.bf16.mxu1 %v10590_v31  ;;  %v753_v29 = vld [vmem:[#allocation6 + $0x1168] sm:$0xff]  ;;  %v10635_v30 = vcombine.low %v740_v16, %v744_v17  ;;  %v10637_v31 = vcombine.low %v741_v18, %v745_v19  ;;  %v222_v19 = vld [vmem:[#allocation6 + $0xd0] sm:$0xff] }
 0x1bf   :  { %v10646_v33 = vcombine.high %v749_v28, %v753_v29 }
 0x1c1   :  { %3846 = vmatpush1.bf16.msra.mxu0 %v10587_v38  ;;  %4051 = vmatpush1.bf16.msra.mxu1 %v10589_v39  ;;  %v757_v38 = vld [vmem:[#allocation6 + $0x1188] sm:$0xff] }
 0x1c2   :  { %3847 = vmatprep.subr.bf16.mxu0 %v10596_v40  ;;  %4052 = vmatprep.subr.bf16.mxu1 %v10598_v41  ;;  %v761_v39 = vld [vmem:[#allocation6 + $0x11a8] sm:$0xff]  ;;  %v10643_v40 = vcombine.low %v748_v26, %v752_v27  ;;  %v10645_v41 = vcombine.low %v749_v28, %v753_v29  ;;  %v230_v29 = vld [vmem:[#allocation6 + $0x110] sm:$0xff] }
 0x1c3   :  { %v10654_v43 = vcombine.high %v757_v38, %v761_v39 }
 0x1c5   :  { %3848 = vmatpush1.bf16.msra.mxu0 %v10595_v47  ;;  %4053 = vmatpush1.bf16.msra.mxu1 %v10597_v49  ;;  %v765_v47 = vld [vmem:[#allocation6 + $0x11c8] sm:$0xff]  ;;  %v10651_v49 = vcombine.low %v756_v35, %v760_v37 }
 0x1c6   :  { %3858 = vmatprep.subr.bf16.mxu0 %v10604_v50  ;;  %4063 = vmatprep.subr.bf16.mxu1 %v10606_v51  ;;  %v10653_v50 = vcombine.low %v757_v38, %v761_v39  ;;  %v10660_v51 = vcombine.high %v764_v44, %v768_v45  ;;  %v10662_v52 = vcombine.high %v765_v47, %v769_v48  ;;  %v238_v38 = vld [vmem:[#allocation6 + $0x150] sm:$0xff] }
 0x1c7   :  { %v242_v39 = vld [vmem:[#allocation6 + $0x170] sm:$0xff] }
 0x1c8   :  { %3850 = vmatmul.mubr.bf16.vlgmr.msra.gmra.mrb[0].mxu0 %v12226_v54  ;;  %4055 = vmatmul.mubr.bf16.vlgmr.msra.gmra.mrb[0].mxu1 %v12226_v54 }
 0x1c9   :  { %3859 = vmatpush1.bf16.msra.mxu0 %v10603_v58  ;;  %4064 = vmatpush1.bf16.msra.mxu1 %v10605_v59  ;;  %v203_v58 = vld [vmem:[#allocation6 + $0x38] sm:$0xff]  ;;  %v10659_v59 = vcombine.low %v764_v44, %v768_v45  ;;  %v10136_v44 = vcombine.high %v238_v38, %v242_v39 }
 0x1ca   :  { %3860 = vmatprep.subr.bf16.mxu0 %v10612_v60  ;;  %4065 = vmatprep.subr.bf16.mxu1 %v10614_v61  ;;  %v186_v60 = vld [vmem:[#allocation3 + $0x40] sm:$0xff]  ;;  %v10661_v61 = vcombine.low %v765_v47, %v769_v48  ;;  %v10098_v63 = vcombine.high %v199_v56, %v203_v58  ;;  %v10097_v6 = vcombine.low %v199_v56, %v203_v58  ;;  %v246_v47 = vld [vmem:[#allocation6 + $0x190] sm:$0xff] }
 0x1cb   :  { %3890 = vmatprep.mubr.bf16.mxu0 %v13278_v8  ;;  %4095 = vmatprep.mubr.bf16.mxu1 %v13278_v8  ;;  %v250_v48 = vld [vmem:[#allocation6 + $0x1b0] sm:$0xff] }
 0x1cc   :  { %v254_v56 = vld [vmem:[#allocation6 + $0x1d0] sm:$0xff] }
 0x1cd   :  { %3861 = vmatpush1.bf16.msra.mxu0 %v10611_v2  ;;  %4066 = vmatpush1.bf16.msra.mxu1 %v10613_v3  ;;  %v12232_v2 = vpack.c.bf16 %v186_v60, %v186_v60  ;;  %v207_v3 = vld [vmem:[#allocation6 + $0x58] sm:$0xff]  ;;  %v258_v58 = vld [vmem:[#allocation6 + $0x1f0] sm:$0xff] }
 0x1ce   :  { %3862 = vmatprep.subr.bf16.mxu0 %v10620_v4  ;;  %4067 = vmatprep.subr.bf16.mxu1 %v10622_v5  ;;  %v211_v4 = vld [vmem:[#allocation6 + $0x78] sm:$0xff]  ;;  %v10095_v5 = vcombine.low %v198_v53, %v202_v55  ;;  %v10144_v53 = vcombine.high %v246_v47, %v250_v48 }
 0x1cf   :  { %v10106_v9 = vcombine.high %v207_v3, %v211_v4  ;;  %v10105_v16 = vcombine.low %v207_v3, %v211_v4  ;;  %v259_v60 = vld [vmem:[#allocation6 + $0x1f8] sm:$0xff]  ;;  %v266_v3 = vld [vmem:[#allocation6 + $0x230] sm:$0xff] }
 0x1d0   :  { %v263_v4 = vld [vmem:[#allocation6 + $0x218] sm:$0xff] }
 0x1d1   :  { %3863 = vmatpush1.bf16.msra.mxu0 %v10619_v11  ;;  %4068 = vmatpush1.bf16.msra.mxu1 %v10621_v13  ;;  %v218_v11 = vld [vmem:[#allocation6 + $0xb0] sm:$0xff]  ;;  %v215_v13 = vld [vmem:[#allocation6 + $0x98] sm:$0xff] }
 0x1d2   :  { %3864 = vmatprep.subr.bf16.mxu0 %v10628_v14  ;;  %4069 = vmatprep.subr.bf16.mxu1 %v10630_v15  ;;  %v219_v14 = vld [vmem:[#allocation6 + $0xb8] sm:$0xff]  ;;  %v10103_v15 = vcombine.low %v206_v0, %v210_v1  ;;  %v10112_v17 = vcombine.high %v214_v10, %v218_v11  ;;  %v262_v1 = vld [vmem:[#allocation6 + $0x210] sm:$0xff] }
 0x1d3   :  { %v10114_v18 = vcombine.high %v215_v13, %v219_v14  ;;  %v10113_v26 = vcombine.low %v215_v13, %v219_v14  ;;  %v274_v13 = vld [vmem:[#allocation6 + $0x270] sm:$0xff]  ;;  %v271_v14 = vld [vmem:[#allocation6 + $0x258] sm:$0xff] }
 0x1d5   :  { %3865 = vmatpush1.bf16.msra.mxu0 %v10627_v20  ;;  %4070 = vmatpush1.bf16.msra.mxu1 %v10629_v21  ;;  %v226_v20 = vld [vmem:[#allocation6 + $0xf0] sm:$0xff]  ;;  %v223_v21 = vld [vmem:[#allocation6 + $0xd8] sm:$0xff] }
 0x1d6   :  { %3866 = vmatprep.subr.bf16.mxu0 %v10636_v22  ;;  %4071 = vmatprep.subr.bf16.mxu1 %v10638_v24  ;;  %v227_v22 = vld [vmem:[#allocation6 + $0xf8] sm:$0xff]  ;;  %v10111_v24 = vcombine.low %v214_v10, %v218_v11  ;;  %v10120_v27 = vcombine.high %v222_v19, %v226_v20  ;;  %v270_v11 = vld [vmem:[#allocation6 + $0x250] sm:$0xff] }
 0x1d7   :  { %v10122_v28 = vcombine.high %v223_v21, %v227_v22  ;;  %v10121_v35 = vcombine.low %v223_v21, %v227_v22  ;;  %v282_v21 = vld [vmem:[#allocation6 + $0x2b0] sm:$0xff]  ;;  %v279_v22 = vld [vmem:[#allocation6 + $0x298] sm:$0xff] }
 0x1d9   :  { %3867 = vmatpush1.bf16.msra.mxu0 %v10635_v30  ;;  %4072 = vmatpush1.bf16.msra.mxu1 %v10637_v31  ;;  %v234_v30 = vld [vmem:[#allocation6 + $0x130] sm:$0xff]  ;;  %v231_v31 = vld [vmem:[#allocation6 + $0x118] sm:$0xff] }
 0x1da   :  { %3868 = vmatprep.subr.bf16.mxu0 %v10644_v32  ;;  %4073 = vmatprep.subr.bf16.mxu1 %v10646_v33  ;;  %v235_v32 = vld [vmem:[#allocation6 + $0x138] sm:$0xff]  ;;  %v10119_v33 = vcombine.low %v222_v19, %v226_v20  ;;  %v10128_v37 = vcombine.high %v230_v29, %v234_v30  ;;  %v278_v20 = vld [vmem:[#allocation6 + $0x290] sm:$0xff] }
 0x1dd   :  { %3869 = vmatpush1.bf16.msra.mxu0 %v10643_v40  ;;  %4074 = vmatpush1.bf16.msra.mxu1 %v10645_v41  ;;  %v239_v40 = vld [vmem:[#allocation6 + $0x158] sm:$0xff] }
 0x1de   :  { %3870 = vmatprep.subr.bf16.mxu0 %v10652_v42  ;;  %4075 = vmatprep.subr.bf16.mxu1 %v10654_v43  ;;  %v243_v41 = vld [vmem:[#allocation6 + $0x178] sm:$0xff]  ;;  %v10127_v42 = vcombine.low %v230_v29, %v234_v30  ;;  %v10129_v43 = vcombine.low %v231_v31, %v235_v32  ;;  %v286_v30 = vld [vmem:[#allocation6 + $0x2d0] sm:$0xff] }
 0x1df   :  { %v10138_v45 = vcombine.high %v239_v40, %v243_v41 }
 0x1e1   :  { %3871 = vmatpush1.bf16.msra.mxu0 %v10651_v49  ;;  %4076 = vmatpush1.bf16.msra.mxu1 %v10653_v50  ;;  %v247_v49 = vld [vmem:[#allocation6 + $0x198] sm:$0xff] }
 0x1e2   :  { %3872 = vmatprep.subr.bf16.mxu0 %v10660_v51  ;;  %4077 = vmatprep.subr.bf16.mxu1 %v10662_v52  ;;  %v251_v50 = vld [vmem:[#allocation6 + $0x1b8] sm:$0xff]  ;;  %v10135_v51 = vcombine.low %v238_v38, %v242_v39  ;;  %v10137_v52 = vcombine.low %v239_v40, %v243_v41  ;;  %v294_v39 = vld [vmem:[#allocation6 + $0x310] sm:$0xff] }
 0x1e3   :  { %v10146_v55 = vcombine.high %v247_v49, %v251_v50  ;;  %v298_v40 = vld [vmem:[#allocation6 + $0x330] sm:$0xff]  ;;  %v295_v41 = vld [vmem:[#allocation6 + $0x318] sm:$0xff] }
 0x1e5   :  { %3873 = vmatpush1.bf16.msra.mxu0 %v10659_v59  ;;  %4078 = vmatpush1.bf16.msra.mxu1 %v10661_v61  ;;  %v255_v59 = vld [vmem:[#allocation6 + $0x1d8] sm:$0xff]  ;;  %v10143_v61 = vcombine.low %v246_v47, %v250_v48  ;;  %v302_v48 = vld [vmem:[#allocation6 + $0x350] sm:$0xff] }
 0x1e6   :  { %4104 = vmatprep.subr.bf16.mxu0 %v10096_v62  ;;  %4309 = vmatprep.subr.bf16.mxu1 %v10098_v63  ;;  %v10145_v62 = vcombine.low %v247_v49, %v251_v50  ;;  %v10152_v63 = vcombine.high %v254_v56, %v258_v58  ;;  %v10154_v0 = vcombine.high %v255_v59, %v259_v60  ;;  %v306_v49 = vld [vmem:[#allocation6 + $0x370] sm:$0xff]  ;;  %v303_v50 = vld [vmem:[#allocation6 + $0x358] sm:$0xff] }
 0x1e8   :  { %3891 = vmatmul.mubr.bf16.vlgmr.msra.gmra.mrb[0].mxu0 %v12232_v2  ;;  %4096 = vmatmul.mubr.bf16.vlgmr.msra.gmra.mrb[0].mxu1 %v12232_v2 }
 0x1e9   :  { %4105 = vmatpush1.bf16.msra.mxu0 %v10095_v5  ;;  %4310 = vmatpush1.bf16.msra.mxu1 %v10097_v6  ;;  %v267_v5 = vld [vmem:[#allocation6 + $0x238] sm:$0xff]  ;;  %v10151_v6 = vcombine.low %v254_v56, %v258_v58  ;;  %v310_v58 = vld [vmem:[#allocation6 + $0x390] sm:$0xff] }
 0x1ea   :  { %4106 = vmatprep.subr.bf16.mxu0 %v10104_v7  ;;  %4311 = vmatprep.subr.bf16.mxu1 %v10106_v9  ;;  %v10153_v7 = vcombine.low %v255_v59, %v259_v60  ;;  %v10160_v9 = vcombine.high %v262_v1, %v266_v3  ;;  %v10162_v10 = vcombine.high %v263_v4, %v267_v5  ;;  %v314_v59 = vld [vmem:[#allocation6 + $0x3b0] sm:$0xff]  ;;  %v311_v60 = vld [vmem:[#allocation6 + $0x398] sm:$0xff] }
 0x1eb   :  { %4136 = vmatprep.mubr.bf16.mxu0 %v12198_v57  ;;  %4341 = vmatprep.mubr.bf16.mxu1 %v12198_v57  ;;  %v10130_v57 = vcombine.high %v231_v31, %v235_v32  ;;  %v290_v31 = vld [vmem:[#allocation6 + $0x2f0] sm:$0xff]  ;;  %v287_v32 = vld [vmem:[#allocation6 + $0x2d8] sm:$0xff] }
 0x1ed   :  { %4107 = vmatpush1.bf16.msra.mxu0 %v10103_v15  ;;  %4312 = vmatpush1.bf16.msra.mxu1 %v10105_v16  ;;  %v275_v15 = vld [vmem:[#allocation6 + $0x278] sm:$0xff]  ;;  %v10159_v16 = vcombine.low %v262_v1, %v266_v3  ;;  %v318_v3 = vld [vmem:[#allocation6 + $0x3d0] sm:$0xff] }
 0x1ee   :  { %4108 = vmatprep.subr.bf16.mxu0 %v10112_v17  ;;  %4313 = vmatprep.subr.bf16.mxu1 %v10114_v18  ;;  %v10161_v17 = vcombine.low %v263_v4, %v267_v5  ;;  %v10168_v18 = vcombine.high %v270_v11, %v274_v13  ;;  %v10170_v19 = vcombine.high %v271_v14, %v275_v15  ;;  %v322_v4 = vld [vmem:[#allocation6 + $0x3f0] sm:$0xff]  ;;  %v319_v5 = vld [vmem:[#allocation6 + $0x3d8] sm:$0xff] }
 0x1f1   :  { %4109 = vmatpush1.bf16.msra.mxu0 %v10111_v24  ;;  %4314 = vmatpush1.bf16.msra.mxu1 %v10113_v26  ;;  %v283_v24 = vld [vmem:[#allocation6 + $0x2b8] sm:$0xff]  ;;  %v10167_v26 = vcombine.low %v270_v11, %v274_v13  ;;  %v326_v13 = vld [vmem:[#allocation6 + $0x410] sm:$0xff] }
 0x1f2   :  { %4110 = vmatprep.subr.bf16.mxu0 %v10120_v27  ;;  %4315 = vmatprep.subr.bf16.mxu1 %v10122_v28  ;;  %v10169_v27 = vcombine.low %v271_v14, %v275_v15  ;;  %v10176_v28 = vcombine.high %v278_v20, %v282_v21  ;;  %v10178_v29 = vcombine.high %v279_v22, %v283_v24  ;;  %v330_v14 = vld [vmem:[#allocation6 + $0x430] sm:$0xff]  ;;  %v327_v15 = vld [vmem:[#allocation6 + $0x418] sm:$0xff] }
 0x1f5   :  { %4111 = vmatpush1.bf16.msra.mxu0 %v10119_v33  ;;  %4316 = vmatpush1.bf16.msra.mxu1 %v10121_v35  ;;  %v291_v33 = vld [vmem:[#allocation6 + $0x2f8] sm:$0xff]  ;;  %v10175_v35 = vcombine.low %v278_v20, %v282_v21  ;;  %v334_v21 = vld [vmem:[#allocation6 + $0x450] sm:$0xff] }
 0x1f6   :  { %4112 = vmatprep.subr.bf16.mxu0 %v10128_v37  ;;  %4317 = vmatprep.subr.bf16.mxu1 %v10130_v57  ;;  %v10177_v37 = vcombine.low %v279_v22, %v283_v24  ;;  %v10184_v57 = vcombine.high %v286_v30, %v290_v31  ;;  %v10186_v38 = vcombine.high %v287_v32, %v291_v33  ;;  %v338_v22 = vld [vmem:[#allocation6 + $0x470] sm:$0xff]  ;;  %v335_v24 = vld [vmem:[#allocation6 + $0x458] sm:$0xff] }
 0x1f9   :  { %4113 = vmatpush1.bf16.msra.mxu0 %v10127_v42  ;;  %4318 = vmatpush1.bf16.msra.mxu1 %v10129_v43  ;;  %v299_v42 = vld [vmem:[#allocation6 + $0x338] sm:$0xff]  ;;  %v10183_v43 = vcombine.low %v286_v30, %v290_v31  ;;  %v342_v31 = vld [vmem:[#allocation6 + $0x490] sm:$0xff] }
 0x1fa   :  { %4114 = vmatprep.subr.bf16.mxu0 %v10136_v44  ;;  %4319 = vmatprep.subr.bf16.mxu1 %v10138_v45  ;;  %v10185_v44 = vcombine.low %v287_v32, %v291_v33  ;;  %v10192_v45 = vcombine.high %v294_v39, %v298_v40  ;;  %v10194_v47 = vcombine.high %v295_v41, %v299_v42  ;;  %v346_v32 = vld [vmem:[#allocation6 + $0x4b0] sm:$0xff]  ;;  %v343_v33 = vld [vmem:[#allocation6 + $0x498] sm:$0xff] }
 0x1fd   :  { %4115 = vmatpush1.bf16.msra.mxu0 %v10135_v51  ;;  %4320 = vmatpush1.bf16.msra.mxu1 %v10137_v52  ;;  %v307_v51 = vld [vmem:[#allocation6 + $0x378] sm:$0xff]  ;;  %v10191_v52 = vcombine.low %v294_v39, %v298_v40  ;;  %v350_v40 = vld [vmem:[#allocation6 + $0x4d0] sm:$0xff] }
 0x1fe   :  { %4116 = vmatprep.subr.bf16.mxu0 %v10144_v53  ;;  %4321 = vmatprep.subr.bf16.mxu1 %v10146_v55  ;;  %v10193_v53 = vcombine.low %v295_v41, %v299_v42  ;;  %v10200_v55 = vcombine.high %v302_v48, %v306_v49  ;;  %v10202_v56 = vcombine.high %v303_v50, %v307_v51  ;;  %v354_v41 = vld [vmem:[#allocation6 + $0x4f0] sm:$0xff]  ;;  %v351_v42 = vld [vmem:[#allocation6 + $0x4d8] sm:$0xff] }
 0x201   :  { %4117 = vmatpush1.bf16.msra.mxu0 %v10143_v61  ;;  %4322 = vmatpush1.bf16.msra.mxu1 %v10145_v62  ;;  %v315_v61 = vld [vmem:[#allocation6 + $0x3b8] sm:$0xff]  ;;  %v10199_v62 = vcombine.low %v302_v48, %v306_v49  ;;  %v358_v48 = vld [vmem:[#allocation6 + $0x510] sm:$0xff] }
 0x202   :  { %4118 = vmatprep.subr.bf16.mxu0 %v10152_v63  ;;  %4323 = vmatprep.subr.bf16.mxu1 %v10154_v0  ;;  %v10201_v63 = vcombine.low %v303_v50, %v307_v51  ;;  %v10208_v0 = vcombine.high %v310_v58, %v314_v59  ;;  %v10210_v1 = vcombine.high %v311_v60, %v315_v61  ;;  %v362_v49 = vld [vmem:[#allocation6 + $0x530] sm:$0xff]  ;;  %v359_v50 = vld [vmem:[#allocation6 + $0x518] sm:$0xff] }
 0x203   :  { %v363_v51 = vld [vmem:[#allocation6 + $0x538] sm:$0xff] }
 0x205   :  { %4119 = vmatpush1.bf16.msra.mxu0 %v10151_v6  ;;  %4324 = vmatpush1.bf16.msra.mxu1 %v10153_v7  ;;  %v323_v6 = vld [vmem:[#allocation6 + $0x3f8] sm:$0xff]  ;;  %v10207_v7 = vcombine.low %v310_v58, %v314_v59  ;;  %v370_v58 = vld [vmem:[#allocation6 + $0x570] sm:$0xff] }
 0x206   :  { %4120 = vmatprep.subr.bf16.mxu0 %v10160_v9  ;;  %4325 = vmatprep.subr.bf16.mxu1 %v10162_v10  ;;  %v10209_v9 = vcombine.low %v311_v60, %v315_v61  ;;  %v10216_v10 = vcombine.high %v318_v3, %v322_v4  ;;  %v10218_v11 = vcombine.high %v319_v5, %v323_v6  ;;  %v367_v59 = vld [vmem:[#allocation6 + $0x558] sm:$0xff] }
 0x207   :  { %v371_v60 = vld [vmem:[#allocation6 + $0x578] sm:$0xff]  ;;  %v10255_v61 = vcombine.low %v358_v48, %v362_v49 }
 0x209   :  { %4121 = vmatpush1.bf16.msra.mxu0 %v10159_v16  ;;  %4326 = vmatpush1.bf16.msra.mxu1 %v10161_v17  ;;  %v331_v16 = vld [vmem:[#allocation6 + $0x438] sm:$0xff]  ;;  %v10215_v17 = vcombine.low %v318_v3, %v322_v4  ;;  %v378_v3 = vld [vmem:[#allocation6 + $0x5b0] sm:$0xff] }
 0x20a   :  { %4122 = vmatprep.subr.bf16.mxu0 %v10168_v18  ;;  %4327 = vmatprep.subr.bf16.mxu1 %v10170_v19  ;;  %v10217_v18 = vcombine.low %v319_v5, %v323_v6  ;;  %v10224_v19 = vcombine.high %v326_v13, %v330_v14  ;;  %v10226_v20 = vcombine.high %v327_v15, %v331_v16  ;;  %v375_v4 = vld [vmem:[#allocation6 + $0x598] sm:$0xff] }
 0x20b   :  { %v379_v5 = vld [vmem:[#allocation6 + $0x5b8] sm:$0xff] }
 0x20d   :  { %4123 = vmatpush1.bf16.msra.mxu0 %v10167_v26  ;;  %4328 = vmatpush1.bf16.msra.mxu1 %v10169_v27  ;;  %v339_v26 = vld [vmem:[#allocation6 + $0x478] sm:$0xff]  ;;  %v10223_v27 = vcombine.low %v326_v13, %v330_v14  ;;  %v386_v13 = vld [vmem:[#allocation6 + $0x5f0] sm:$0xff] }
 0x20e   :  { %4124 = vmatprep.subr.bf16.mxu0 %v10176_v28  ;;  %4329 = vmatprep.subr.bf16.mxu1 %v10178_v29  ;;  %v10225_v28 = vcombine.low %v327_v15, %v331_v16  ;;  %v10232_v29 = vcombine.high %v334_v21, %v338_v22  ;;  %v10234_v30 = vcombine.high %v335_v24, %v339_v26  ;;  %v383_v14 = vld [vmem:[#allocation6 + $0x5d8] sm:$0xff] }
 0x20f   :  { %v387_v15 = vld [vmem:[#allocation6 + $0x5f8] sm:$0xff] }
 0x211   :  { %4125 = vmatpush1.bf16.msra.mxu0 %v10175_v35  ;;  %4330 = vmatpush1.bf16.msra.mxu1 %v10177_v37  ;;  %v347_v35 = vld [vmem:[#allocation6 + $0x4b8] sm:$0xff]  ;;  %v10231_v37 = vcombine.low %v334_v21, %v338_v22  ;;  %v394_v21 = vld [vmem:[#allocation6 + $0x630] sm:$0xff] }
 0x212   :  { %4126 = vmatprep.subr.bf16.mxu0 %v10184_v57  ;;  %4331 = vmatprep.subr.bf16.mxu1 %v10186_v38  ;;  %v10233_v57 = vcombine.low %v335_v24, %v339_v26  ;;  %v10240_v38 = vcombine.high %v342_v31, %v346_v32  ;;  %v10242_v39 = vcombine.high %v343_v33, %v347_v35  ;;  %v391_v22 = vld [vmem:[#allocation6 + $0x618] sm:$0xff] }
 0x213   :  { %v395_v24 = vld [vmem:[#allocation6 + $0x638] sm:$0xff] }
 0x215   :  { %4127 = vmatpush1.bf16.msra.mxu0 %v10183_v43  ;;  %4332 = vmatpush1.bf16.msra.mxu1 %v10185_v44  ;;  %v355_v43 = vld [vmem:[#allocation6 + $0x4f8] sm:$0xff]  ;;  %v10239_v44 = vcombine.low %v342_v31, %v346_v32  ;;  %v402_v31 = vld [vmem:[#allocation6 + $0x670] sm:$0xff] }
 0x216   :  { %4128 = vmatprep.subr.bf16.mxu0 %v10192_v45  ;;  %4333 = vmatprep.subr.bf16.mxu1 %v10194_v47  ;;  %v10248_v45 = vcombine.high %v350_v40, %v354_v41  ;;  %v10250_v47 = vcombine.high %v351_v42, %v355_v43  ;;  %v399_v32 = vld [vmem:[#allocation6 + $0x658] sm:$0xff] }
 0x219   :  { %4129 = vmatpush1.bf16.msra.mxu0 %v10191_v52  ;;  %4334 = vmatpush1.bf16.msra.mxu1 %v10193_v53  ;;  %v10247_v52 = vcombine.low %v350_v40, %v354_v41  ;;  %v10249_v53 = vcombine.low %v351_v42, %v355_v43  ;;  %v410_v40 = vld [vmem:[#allocation6 + $0x6b0] sm:$0xff]  ;;  %v407_v41 = vld [vmem:[#allocation6 + $0x698] sm:$0xff] }
 0x21a   :  { %4130 = vmatprep.subr.bf16.mxu0 %v10200_v55  ;;  %4335 = vmatprep.subr.bf16.mxu1 %v10202_v56  ;;  %v10256_v55 = vcombine.high %v358_v48, %v362_v49  ;;  %v366_v56 = vld [vmem:[#allocation6 + $0x550] sm:$0xff]  ;;  %v411_v42 = vld [vmem:[#allocation6 + $0x6b8] sm:$0xff] }
 0x21b   :  { %v10263_v6 = vcombine.low %v366_v56, %v370_v58  ;;  %v418_v48 = vld [vmem:[#allocation6 + $0x6f0] sm:$0xff]  ;;  %v415_v49 = vld [vmem:[#allocation6 + $0x6d8] sm:$0xff] }
 0x21d   :  { %4131 = vmatpush1.bf16.msra.mxu0 %v10199_v62  ;;  %4336 = vmatpush1.bf16.msra.mxu1 %v10201_v63  ;;  %v10257_v62 = vcombine.low %v359_v50, %v363_v51  ;;  %v10264_v63 = vcombine.high %v366_v56, %v370_v58  ;;  %v426_v56 = vld [vmem:[#allocation6 + $0x730] sm:$0xff]  ;;  %v423_v58 = vld [vmem:[#allocation6 + $0x718] sm:$0xff] }
 0x21e   :  { %4132 = vmatprep.subr.bf16.mxu0 %v10208_v0  ;;  %4337 = vmatprep.subr.bf16.mxu1 %v10210_v1  ;;  %v10266_v0 = vcombine.high %v367_v59, %v371_v60  ;;  %v374_v1 = vld [vmem:[#allocation6 + $0x590] sm:$0xff] }
 0x21f   :  { %v10271_v16 = vcombine.low %v374_v1, %v378_v3 }
 0x221   :  { %4133 = vmatpush1.bf16.msra.mxu0 %v10207_v7  ;;  %4338 = vmatpush1.bf16.msra.mxu1 %v10209_v9  ;;  %v10265_v7 = vcombine.low %v367_v59, %v371_v60  ;;  %v10272_v9 = vcombine.high %v374_v1, %v378_v3  ;;  %v427_v59 = vld [vmem:[#allocation6 + $0x738] sm:$0xff]  ;;  %v434_v1 = vld [vmem:[#allocation6 + $0x770] sm:$0xff] }
 0x222   :  { %4134 = vmatprep.subr.bf16.mxu0 %v10216_v10  ;;  %4339 = vmatprep.subr.bf16.mxu1 %v10218_v11  ;;  %v10274_v10 = vcombine.high %v375_v4, %v379_v5  ;;  %v382_v11 = vld [vmem:[#allocation6 + $0x5d0] sm:$0xff]  ;;  %v431_v3 = vld [vmem:[#allocation6 + $0x758] sm:$0xff] }
 0x223   :  { %v10279_v26 = vcombine.low %v382_v11, %v386_v13 }
 0x225   :  { %4135 = vmatpush1.bf16.msra.mxu0 %v10215_v17  ;;  %4340 = vmatpush1.bf16.msra.mxu1 %v10217_v18  ;;  %v10273_v17 = vcombine.low %v375_v4, %v379_v5  ;;  %v10280_v18 = vcombine.high %v382_v11, %v386_v13  ;;  %v435_v4 = vld [vmem:[#allocation6 + $0x778] sm:$0xff]  ;;  %v442_v11 = vld [vmem:[#allocation6 + $0x7b0] sm:$0xff] }
 0x226   :  { %4145 = vmatprep.subr.bf16.mxu0 %v10224_v19  ;;  %4350 = vmatprep.subr.bf16.mxu1 %v10226_v20  ;;  %v10282_v19 = vcombine.high %v383_v14, %v387_v15  ;;  %v390_v20 = vld [vmem:[#allocation6 + $0x610] sm:$0xff]  ;;  %v439_v13 = vld [vmem:[#allocation6 + $0x798] sm:$0xff] }
 0x228   :  { %4137 = vmatmul.mubr.bf16.vlgmr.msra.gmra.mrb[4].mxu0 %v12202_v12  ;;  %4342 = vmatmul.mubr.bf16.vlgmr.msra.gmra.mrb[4].mxu1 %v12202_v12  ;;  %v10241_v12 = vcombine.low %v343_v33, %v347_v35  ;;  %v403_v33 = vld [vmem:[#allocation6 + $0x678] sm:$0xff]  ;;  %v10287_v35 = vcombine.low %v390_v20, %v394_v21 }
 0x229   :  { %4146 = vmatpush1.bf16.msra.mxu0 %v10223_v27  ;;  %4351 = vmatpush1.bf16.msra.mxu1 %v10225_v28  ;;  %v10281_v27 = vcombine.low %v383_v14, %v387_v15  ;;  %v10288_v28 = vcombine.high %v390_v20, %v394_v21  ;;  %v443_v14 = vld [vmem:[#allocation6 + $0x7b8] sm:$0xff]  ;;  %v450_v20 = vld [vmem:[#allocation6 + $0x7f0] sm:$0xff] }
 0x22a   :  { %4147 = vmatprep.subr.bf16.mxu0 %v10232_v29  ;;  %4352 = vmatprep.subr.bf16.mxu1 %v10234_v30  ;;  %v10290_v29 = vcombine.high %v391_v22, %v395_v24  ;;  %v398_v30 = vld [vmem:[#allocation6 + $0x650] sm:$0xff]  ;;  %v447_v21 = vld [vmem:[#allocation6 + $0x7d8] sm:$0xff] }
 0x22b   :  { %4177 = vmatprep.mubr.bf16.mxu0 %v12204_v23  ;;  %4382 = vmatprep.mubr.bf16.mxu1 %v12204_v23  ;;  %v10258_v23 = vcombine.high %v359_v50, %v363_v51  ;;  %v10295_v43 = vcombine.low %v398_v30, %v402_v31  ;;  %v419_v50 = vld [vmem:[#allocation6 + $0x6f8] sm:$0xff] }
 0x22d   :  { %4148 = vmatpush1.bf16.msra.mxu0 %v10231_v37  ;;  %4353 = vmatpush1.bf16.msra.mxu1 %v10233_v57  ;;  %v10289_v37 = vcombine.low %v391_v22, %v395_v24  ;;  %v10296_v57 = vcombine.high %v398_v30, %v402_v31  ;;  %v451_v22 = vld [vmem:[#allocation6 + $0x7f8] sm:$0xff]  ;;  %v458_v30 = vld [vmem:[#allocation6 + $0x830] sm:$0xff] }
 0x22e   :  { %4149 = vmatprep.subr.bf16.mxu0 %v10240_v38  ;;  %4354 = vmatprep.subr.bf16.mxu1 %v10242_v39  ;;  %v10298_v38 = vcombine.high %v399_v32, %v403_v33  ;;  %v406_v39 = vld [vmem:[#allocation6 + $0x690] sm:$0xff]  ;;  %v455_v31 = vld [vmem:[#allocation6 + $0x818] sm:$0xff] }
 0x22f   :  { %v10303_v51 = vcombine.low %v406_v39, %v410_v40 }
 0x231   :  { %4150 = vmatpush1.bf16.msra.mxu0 %v10239_v44  ;;  %4355 = vmatpush1.bf16.msra.mxu1 %v10241_v12  ;;  %v10297_v44 = vcombine.low %v399_v32, %v403_v33  ;;  %v10304_v12 = vcombine.high %v406_v39, %v410_v40  ;;  %v459_v32 = vld [vmem:[#allocation6 + $0x838] sm:$0xff]  ;;  %v466_v39 = vld [vmem:[#allocation6 + $0x870] sm:$0xff] }
 0x232   :  { %4151 = vmatprep.subr.bf16.mxu0 %v10248_v45  ;;  %4356 = vmatprep.subr.bf16.mxu1 %v10250_v47  ;;  %v10306_v45 = vcombine.high %v407_v41, %v411_v42  ;;  %v414_v47 = vld [vmem:[#allocation6 + $0x6d0] sm:$0xff]  ;;  %v463_v40 = vld [vmem:[#allocation6 + $0x858] sm:$0xff] }
 0x233   :  { %v10311_v60 = vcombine.low %v414_v47, %v418_v48 }
 0x235   :  { %4152 = vmatpush1.bf16.msra.mxu0 %v10247_v52  ;;  %4357 = vmatpush1.bf16.msra.mxu1 %v10249_v53  ;;  %v10305_v52 = vcombine.low %v407_v41, %v411_v42  ;;  %v10312_v53 = vcombine.high %v414_v47, %v418_v48  ;;  %v467_v41 = vld [vmem:[#allocation6 + $0x878] sm:$0xff]  ;;  %v474_v47 = vld [vmem:[#allocation6 + $0x8b0] sm:$0xff] }
 0x236   :  { %4153 = vmatprep.subr.bf16.mxu0 %v10256_v55  ;;  %4358 = vmatprep.subr.bf16.mxu1 %v10258_v23  ;;  %v10314_v55 = vcombine.high %v415_v49, %v419_v50  ;;  %v422_v23 = vld [vmem:[#allocation6 + $0x710] sm:$0xff]  ;;  %v471_v48 = vld [vmem:[#allocation6 + $0x898] sm:$0xff] }
 0x237   :  { %v10319_v5 = vcombine.low %v422_v23, %v426_v56 }
 0x239   :  { %4154 = vmatpush1.bf16.msra.mxu0 %v10255_v61  ;;  %4359 = vmatpush1.bf16.msra.mxu1 %v10257_v62  ;;  %v10313_v61 = vcombine.low %v415_v49, %v419_v50  ;;  %v10320_v62 = vcombine.high %v422_v23, %v426_v56  ;;  %v475_v49 = vld [vmem:[#allocation6 + $0x8b8] sm:$0xff]  ;;  %v482_v23 = vld [vmem:[#allocation6 + $0x8f0] sm:$0xff] }
 0x23a   :  { %4155 = vmatprep.subr.bf16.mxu0 %v10264_v63  ;;  %4360 = vmatprep.subr.bf16.mxu1 %v10266_v0  ;;  %v10322_v63 = vcombine.high %v423_v58, %v427_v59  ;;  %v430_v0 = vld [vmem:[#allocation6 + $0x750] sm:$0xff]  ;;  %v479_v56 = vld [vmem:[#allocation6 + $0x8d8] sm:$0xff] }
 0x23b   :  { %v10327_v15 = vcombine.low %v430_v0, %v434_v1 }
 0x23d   :  { %4156 = vmatpush1.bf16.msra.mxu0 %v10263_v6  ;;  %4361 = vmatpush1.bf16.msra.mxu1 %v10265_v7  ;;  %v10321_v6 = vcombine.low %v423_v58, %v427_v59  ;;  %v10328_v7 = vcombine.high %v430_v0, %v434_v1  ;;  %v483_v58 = vld [vmem:[#allocation6 + $0x8f8] sm:$0xff] }
 0x23e   :  { %4157 = vmatprep.subr.bf16.mxu0 %v10272_v9  ;;  %4362 = vmatprep.subr.bf16.mxu1 %v10274_v10  ;;  %v10330_v9 = vcombine.high %v431_v3, %v435_v4  ;;  %v438_v10 = vld [vmem:[#allocation6 + $0x790] sm:$0xff]  ;;  %v487_v0 = vld [vmem:[#allocation6 + $0x918] sm:$0xff] }
 0x23f   :  { %v10335_v24 = vcombine.low %v438_v10, %v442_v11  ;;  %v491_v1 = vld [vmem:[#allocation6 + $0x938] sm:$0xff] }
 0x241   :  { %4158 = vmatpush1.bf16.msra.mxu0 %v10271_v16  ;;  %4363 = vmatpush1.bf16.msra.mxu1 %v10273_v17  ;;  %v10329_v16 = vcombine.low %v431_v3, %v435_v4  ;;  %v10336_v17 = vcombine.high %v438_v10, %v442_v11  ;;  %v10377_v4 = vcombine.low %v479_v56, %v483_v58  ;;  %v499_v10 = vld [vmem:[#allocation6 + $0x978] sm:$0xff] }
 0x242   :  { %4159 = vmatprep.subr.bf16.mxu0 %v10280_v18  ;;  %4364 = vmatprep.subr.bf16.mxu1 %v10282_v19  ;;  %v10338_v18 = vcombine.high %v439_v13, %v443_v14  ;;  %v446_v19 = vld [vmem:[#allocation6 + $0x7d0] sm:$0xff] }
 0x243   :  { %v10343_v33 = vcombine.low %v446_v19, %v450_v20 }
 0x245   :  { %4160 = vmatpush1.bf16.msra.mxu0 %v10279_v26  ;;  %4365 = vmatpush1.bf16.msra.mxu1 %v10281_v27  ;;  %v10337_v26 = vcombine.low %v439_v13, %v443_v14  ;;  %v10344_v27 = vcombine.high %v446_v19, %v450_v20  ;;  %v10385_v13 = vcombine.low %v487_v0, %v491_v1  ;;  %v507_v19 = vld [vmem:[#allocation6 + $0x9b8] sm:$0xff] }
 0x246   :  { %4161 = vmatprep.subr.bf16.mxu0 %v10288_v28  ;;  %4366 = vmatprep.subr.bf16.mxu1 %v10290_v29  ;;  %v10346_v28 = vcombine.high %v447_v21, %v451_v22  ;;  %v454_v29 = vld [vmem:[#allocation6 + $0x810] sm:$0xff] }
 0x247   :  { %v10351_v42 = vcombine.low %v454_v29, %v458_v30 }
 0x249   :  { %4162 = vmatpush1.bf16.msra.mxu0 %v10287_v35  ;;  %4367 = vmatpush1.bf16.msra.mxu1 %v10289_v37  ;;  %v10345_v35 = vcombine.low %v447_v21, %v451_v22  ;;  %v10352_v37 = vcombine.high %v454_v29, %v458_v30  ;;  %v515_v29 = vld [vmem:[#allocation6 + $0x9f8] sm:$0xff] }
 0x24a   :  { %4163 = vmatprep.subr.bf16.mxu0 %v10296_v57  ;;  %4368 = vmatprep.subr.bf16.mxu1 %v10298_v38  ;;  %v10354_v57 = vcombine.high %v455_v31, %v459_v32  ;;  %v462_v38 = vld [vmem:[#allocation6 + $0x850] sm:$0xff] }
 0x24b   :  { %v10359_v50 = vcombine.low %v462_v38, %v466_v39 }
 0x24d   :  { %4164 = vmatpush1.bf16.msra.mxu0 %v10295_v43  ;;  %4369 = vmatpush1.bf16.msra.mxu1 %v10297_v44  ;;  %v10353_v43 = vcombine.low %v455_v31, %v459_v32  ;;  %v10360_v44 = vcombine.high %v462_v38, %v466_v39  ;;  %v523_v38 = vld [vmem:[#allocation6 + $0xa38] sm:$0xff] }
 0x24e   :  { %4165 = vmatprep.subr.bf16.mxu0 %v10304_v12  ;;  %4370 = vmatprep.subr.bf16.mxu1 %v10306_v45  ;;  %v10362_v12 = vcombine.high %v463_v40, %v467_v41  ;;  %v470_v45 = vld [vmem:[#allocation6 + $0x890] sm:$0xff] }
 0x24f   :  { %v10367_v59 = vcombine.low %v470_v45, %v474_v47 }
 0x251   :  { %4166 = vmatpush1.bf16.msra.mxu0 %v10303_v51  ;;  %4371 = vmatpush1.bf16.msra.mxu1 %v10305_v52  ;;  %v10361_v51 = vcombine.low %v463_v40, %v467_v41  ;;  %v10368_v52 = vcombine.high %v470_v45, %v474_v47  ;;  %v531_v45 = vld [vmem:[#allocation6 + $0xa78] sm:$0xff] }
 0x252   :  { %4167 = vmatprep.subr.bf16.mxu0 %v10312_v53  ;;  %4372 = vmatprep.subr.bf16.mxu1 %v10314_v55  ;;  %v10370_v53 = vcombine.high %v471_v48, %v475_v49  ;;  %v478_v55 = vld [vmem:[#allocation6 + $0x8d0] sm:$0xff] }
 0x253   :  { %v10375_v3 = vcombine.low %v478_v55, %v482_v23 }
 0x255   :  { %4168 = vmatpush1.bf16.msra.mxu0 %v10311_v60  ;;  %4373 = vmatpush1.bf16.msra.mxu1 %v10313_v61  ;;  %v10376_v60 = vcombine.high %v478_v55, %v482_v23  ;;  %v10378_v61 = vcombine.high %v479_v56, %v483_v58  ;;  %v539_v55 = vld [vmem:[#allocation6 + $0xab8] sm:$0xff] }
 0x256   :  { %4169 = vmatprep.subr.bf16.mxu0 %v10320_v62  ;;  %4374 = vmatprep.subr.bf16.mxu1 %v10322_v63  ;;  %v486_v62 = vld [vmem:[#allocation6 + $0x910] sm:$0xff] }
 0x257   :  { %v490_v63 = vld [vmem:[#allocation6 + $0x930] sm:$0xff] }
 0x258   :  { %v10383_v11 = vcombine.low %v486_v62, %v490_v63 }
 0x259   :  { %4170 = vmatpush1.bf16.msra.mxu0 %v10319_v5  ;;  %4375 = vmatpush1.bf16.msra.mxu1 %v10321_v6  ;;  %v10384_v5 = vcombine.high %v486_v62, %v490_v63  ;;  %v494_v6 = vld [vmem:[#allocation6 + $0x950] sm:$0xff]  ;;  %v547_v62 = vld [vmem:[#allocation6 + $0xaf8] sm:$0xff] }
 0x25a   :  { %4171 = vmatprep.subr.bf16.mxu0 %v10328_v7  ;;  %4376 = vmatprep.subr.bf16.mxu1 %v10330_v9  ;;  %v498_v7 = vld [vmem:[#allocation6 + $0x970] sm:$0xff]  ;;  %v495_v9 = vld [vmem:[#allocation6 + $0x958] sm:$0xff] }
 0x25b   :  { %v10392_v14 = vcombine.high %v494_v6, %v498_v7  ;;  %v10391_v20 = vcombine.low %v494_v6, %v498_v7  ;;  %v10393_v21 = vcombine.low %v495_v9, %v499_v10  ;;  %v555_v6 = vld [vmem:[#allocation6 + $0xb38] sm:$0xff] }
 0x25d   :  { %4172 = vmatpush1.bf16.msra.mxu0 %v10327_v15  ;;  %4377 = vmatpush1.bf16.msra.mxu1 %v10329_v16  ;;  %v10394_v15 = vcombine.high %v495_v9, %v499_v10  ;;  %v502_v16 = vld [vmem:[#allocation6 + $0x990] sm:$0xff] }
 0x25e   :  { %4173 = vmatprep.subr.bf16.mxu0 %v10336_v17  ;;  %4378 = vmatprep.subr.bf16.mxu1 %v10338_v18  ;;  %v506_v17 = vld [vmem:[#allocation6 + $0x9b0] sm:$0xff]  ;;  %v503_v18 = vld [vmem:[#allocation6 + $0x998] sm:$0xff] }
 0x25f   :  { %v10400_v22 = vcombine.high %v502_v16, %v506_v17  ;;  %v10399_v30 = vcombine.low %v502_v16, %v506_v17  ;;  %v10401_v31 = vcombine.low %v503_v18, %v507_v19  ;;  %v563_v16 = vld [vmem:[#allocation6 + $0xb78] sm:$0xff] }
 0x261   :  { %4174 = vmatpush1.bf16.msra.mxu0 %v10335_v24  ;;  %4379 = vmatpush1.bf16.msra.mxu1 %v10337_v26  ;;  %v10402_v24 = vcombine.high %v503_v18, %v507_v19  ;;  %v510_v26 = vld [vmem:[#allocation6 + $0x9d0] sm:$0xff] }
 0x262   :  { %4175 = vmatprep.subr.bf16.mxu0 %v10344_v27  ;;  %4380 = vmatprep.subr.bf16.mxu1 %v10346_v28  ;;  %v514_v27 = vld [vmem:[#allocation6 + $0x9f0] sm:$0xff]  ;;  %v511_v28 = vld [vmem:[#allocation6 + $0x9d8] sm:$0xff] }
 0x263   :  { %v10408_v32 = vcombine.high %v510_v26, %v514_v27  ;;  %v10407_v39 = vcombine.low %v510_v26, %v514_v27  ;;  %v10409_v40 = vcombine.low %v511_v28, %v515_v29  ;;  %v571_v26 = vld [vmem:[#allocation6 + $0xbb8] sm:$0xff] }
 0x265   :  { %4176 = vmatpush1.bf16.msra.mxu0 %v10343_v33  ;;  %4381 = vmatpush1.bf16.msra.mxu1 %v10345_v35  ;;  %v10410_v33 = vcombine.high %v511_v28, %v515_v29  ;;  %v518_v35 = vld [vmem:[#allocation6 + $0xa10] sm:$0xff] }
 0x266   :  { %4186 = vmatprep.subr.bf16.mxu0 %v10352_v37  ;;  %4391 = vmatprep.subr.bf16.mxu1 %v10354_v57  ;;  %v522_v37 = vld [vmem:[#allocation6 + $0xa30] sm:$0xff]  ;;  %v519_v57 = vld [vmem:[#allocation6 + $0xa18] sm:$0xff] }
 0x267   :  { %v10416_v41 = vcombine.high %v518_v35, %v522_v37  ;;  %v10415_v47 = vcombine.low %v518_v35, %v522_v37  ;;  %v579_v35 = vld [vmem:[#allocation6 + $0xbf8] sm:$0xff] }
 0x268   :  { %4178 = vmatmul.mubr.bf16.vlgmr.msra.gmra.mrb[4].mxu0 %v12210_v25  ;;  %4383 = vmatmul.mubr.bf16.vlgmr.msra.gmra.mrb[4].mxu1 %v12210_v25  ;;  %v10369_v25 = vcombine.low %v471_v48, %v475_v49  ;;  %v10417_v48 = vcombine.low %v519_v57, %v523_v38 }
 0x269   :  { %4187 = vmatpush1.bf16.msra.mxu0 %v10351_v42  ;;  %4392 = vmatpush1.bf16.msra.mxu1 %v10353_v43  ;;  %v10418_v42 = vcombine.high %v519_v57, %v523_v38  ;;  %v526_v43 = vld [vmem:[#allocation6 + $0xa50] sm:$0xff] }
 0x26a   :  { %4188 = vmatprep.subr.bf16.mxu0 %v10360_v44  ;;  %4393 = vmatprep.subr.bf16.mxu1 %v10362_v12  ;;  %v530_v44 = vld [vmem:[#allocation6 + $0xa70] sm:$0xff]  ;;  %v527_v12 = vld [vmem:[#allocation6 + $0xa58] sm:$0xff] }
 0x26b   :  { %4218 = vmatprep.mubr.bf16.mxu0 %v12212_v34  ;;  %4423 = vmatprep.mubr.bf16.mxu1 %v12212_v34  ;;  %v10386_v34 = vcombine.high %v487_v0, %v491_v1  ;;  %v10424_v49 = vcombine.high %v526_v43, %v530_v44  ;;  %v10423_v23 = vcombine.low %v526_v43, %v530_v44  ;;  %v587_v43 = vld [vmem:[#allocation6 + $0xc38] sm:$0xff] }
 0x26c   :  { %v10425_v56 = vcombine.low %v527_v12, %v531_v45 }
 0x26d   :  { %4189 = vmatpush1.bf16.msra.mxu0 %v10359_v50  ;;  %4394 = vmatpush1.bf16.msra.mxu1 %v10361_v51  ;;  %v10426_v50 = vcombine.high %v527_v12, %v531_v45  ;;  %v534_v51 = vld [vmem:[#allocation6 + $0xa90] sm:$0xff] }
 0x26e   :  { %4190 = vmatprep.subr.bf16.mxu0 %v10368_v52  ;;  %4395 = vmatprep.subr.bf16.mxu1 %v10370_v53  ;;  %v538_v52 = vld [vmem:[#allocation6 + $0xab0] sm:$0xff]  ;;  %v535_v53 = vld [vmem:[#allocation6 + $0xa98] sm:$0xff] }
 0x26f   :  { %v10432_v58 = vcombine.high %v534_v51, %v538_v52  ;;  %v10431_v63 = vcombine.low %v534_v51, %v538_v52  ;;  %v10433_v0 = vcombine.low %v535_v53, %v539_v55  ;;  %v595_v51 = vld [vmem:[#allocation6 + $0xc78] sm:$0xff] }
 0x271   :  { %4191 = vmatpush1.bf16.msra.mxu0 %v10367_v59  ;;  %4396 = vmatpush1.bf16.msra.mxu1 %v10369_v25  ;;  %v10434_v59 = vcombine.high %v535_v53, %v539_v55  ;;  %v542_v25 = vld [vmem:[#allocation6 + $0xad0] sm:$0xff] }
 0x272   :  { %4192 = vmatprep.subr.bf16.mxu0 %v10376_v60  ;;  %4397 = vmatprep.subr.bf16.mxu1 %v10378_v61  ;;  %v546_v60 = vld [vmem:[#allocation6 + $0xaf0] sm:$0xff]  ;;  %v543_v61 = vld [vmem:[#allocation6 + $0xad8] sm:$0xff] }
 0x273   :  { %v10440_v1 = vcombine.high %v542_v25, %v546_v60  ;;  %v10439_v7 = vcombine.low %v542_v25, %v546_v60  ;;  %v10441_v9 = vcombine.low %v543_v61, %v547_v62  ;;  %v603_v25 = vld [vmem:[#allocation6 + $0xcb8] sm:$0xff] }
 0x275   :  { %4193 = vmatpush1.bf16.msra.mxu0 %v10375_v3  ;;  %4398 = vmatpush1.bf16.msra.mxu1 %v10377_v4  ;;  %v10442_v3 = vcombine.high %v543_v61, %v547_v62  ;;  %v550_v4 = vld [vmem:[#allocation6 + $0xb10] sm:$0xff] }
 0x276   :  { %4194 = vmatprep.subr.bf16.mxu0 %v10384_v5  ;;  %4399 = vmatprep.subr.bf16.mxu1 %v10386_v34  ;;  %v554_v5 = vld [vmem:[#allocation6 + $0xb30] sm:$0xff]  ;;  %v551_v34 = vld [vmem:[#allocation6 + $0xb18] sm:$0xff] }
 0x277   :  { %v10448_v10 = vcombine.high %v550_v4, %v554_v5  ;;  %v10447_v17 = vcombine.low %v550_v4, %v554_v5  ;;  %v10449_v18 = vcombine.low %v551_v34, %v555_v6  ;;  %v607_v4 = vld [vmem:[#allocation6 + $0xcd8] sm:$0xff] }
 0x278   :  { %v611_v5 = vld [vmem:[#allocation6 + $0xcf8] sm:$0xff] }
 0x279   :  { %4195 = vmatpush1.bf16.msra.mxu0 %v10383_v11  ;;  %4400 = vmatpush1.bf16.msra.mxu1 %v10385_v13  ;;  %v10450_v11 = vcombine.high %v551_v34, %v555_v6  ;;  %v558_v13 = vld [vmem:[#allocation6 + $0xb50] sm:$0xff] }
 0x27a   :  { %4196 = vmatprep.subr.bf16.mxu0 %v10392_v14  ;;  %4401 = vmatprep.subr.bf16.mxu1 %v10394_v15  ;;  %v562_v14 = vld [vmem:[#allocation6 + $0xb70] sm:$0xff]  ;;  %v559_v15 = vld [vmem:[#allocation6 + $0xb58] sm:$0xff] }
 0x27b   :  { %v10456_v19 = vcombine.high %v558_v13, %v562_v14  ;;  %v10455_v27 = vcombine.low %v558_v13, %v562_v14  ;;  %v10457_v28 = vcombine.low %v559_v15, %v563_v16  ;;  %v615_v13 = vld [vmem:[#allocation6 + $0xd18] sm:$0xff] }
 0x27c   :  { %v619_v14 = vld [vmem:[#allocation6 + $0xd38] sm:$0xff] }
 0x27d   :  { %4197 = vmatpush1.bf16.msra.mxu0 %v10391_v20  ;;  %4402 = vmatpush1.bf16.msra.mxu1 %v10393_v21  ;;  %v10458_v20 = vcombine.high %v559_v15, %v563_v16  ;;  %v566_v21 = vld [vmem:[#allocation6 + $0xb90] sm:$0xff] }
 0x27e   :  { %4198 = vmatprep.subr.bf16.mxu0 %v10400_v22  ;;  %4403 = vmatprep.subr.bf16.mxu1 %v10402_v24  ;;  %v570_v22 = vld [vmem:[#allocation6 + $0xbb0] sm:$0xff]  ;;  %v567_v24 = vld [vmem:[#allocation6 + $0xb98] sm:$0xff] }
 0x27f   :  { %v10464_v29 = vcombine.high %v566_v21, %v570_v22  ;;  %v10463_v37 = vcombine.low %v566_v21, %v570_v22  ;;  %v10465_v57 = vcombine.low %v567_v24, %v571_v26  ;;  %v10514_v21 = vcombine.high %v615_v13, %v619_v14 }
 0x281   :  { %4199 = vmatpush1.bf16.msra.mxu0 %v10399_v30  ;;  %4404 = vmatpush1.bf16.msra.mxu1 %v10401_v31  ;;  %v10466_v30 = vcombine.high %v567_v24, %v571_v26  ;;  %v574_v31 = vld [vmem:[#allocation6 + $0xbd0] sm:$0xff] }
 0x282   :  { %4200 = vmatprep.subr.bf16.mxu0 %v10408_v32  ;;  %4405 = vmatprep.subr.bf16.mxu1 %v10410_v33  ;;  %v578_v32 = vld [vmem:[#allocation6 + $0xbf0] sm:$0xff]  ;;  %v575_v33 = vld [vmem:[#allocation6 + $0xbd8] sm:$0xff] }
 0x283   :  { %v10472_v38 = vcombine.high %v574_v31, %v578_v32  ;;  %v10471_v44 = vcombine.low %v574_v31, %v578_v32  ;;  %v10473_v12 = vcombine.low %v575_v33, %v579_v35  ;;  %v12269_v26 = vld [vmem:[#allocation6 + $0xd70] sm:$0xff]  ;;  %v12279_v31 = vld [vmem:[#allocation6 + $0xd98] sm:$0xff] }
 0x285   :  { %4201 = vmatpush1.bf16.msra.mxu0 %v10407_v39  ;;  %4406 = vmatpush1.bf16.msra.mxu1 %v10409_v40  ;;  %v10474_v39 = vcombine.high %v575_v33, %v579_v35  ;;  %v582_v40 = vld [vmem:[#allocation6 + $0xc10] sm:$0xff]  ;;  %v10513_v33 = vcombine.low %v615_v13, %v619_v14  ;;  %v12281_v35 = vld [vmem:[#allocation6 + $0xdb8] sm:$0xff] }
 0x286   :  { %4202 = vmatprep.subr.bf16.mxu0 %v10416_v41  ;;  %4407 = vmatprep.subr.bf16.mxu1 %v10418_v42  ;;  %v586_v41 = vld [vmem:[#allocation6 + $0xc30] sm:$0xff]  ;;  %v583_v42 = vld [vmem:[#allocation6 + $0xc18] sm:$0xff] }
 0x287   :  { %v10480_v45 = vcombine.high %v582_v40, %v586_v41  ;;  %v10479_v52 = vcombine.low %v582_v40, %v586_v41  ;;  %v10481_v53 = vcombine.low %v583_v42, %v587_v43  ;;  %v12293_v41 = vld [vmem:[#allocation6 + $0xdd8] sm:$0xff] }
 0x289   :  { %4203 = vmatpush1.bf16.msra.mxu0 %v10415_v47  ;;  %4408 = vmatpush1.bf16.msra.mxu1 %v10417_v48  ;;  %v10482_v47 = vcombine.high %v583_v42, %v587_v43  ;;  %v590_v48 = vld [vmem:[#allocation6 + $0xc50] sm:$0xff]  ;;  %v12295_v42 = vld [vmem:[#allocation6 + $0xdf8] sm:$0xff] }
 0x28a   :  { %4204 = vmatprep.subr.bf16.mxu0 %v10424_v49  ;;  %4409 = vmatprep.subr.bf16.mxu1 %v10426_v50  ;;  %v594_v49 = vld [vmem:[#allocation6 + $0xc70] sm:$0xff]  ;;  %v591_v50 = vld [vmem:[#allocation6 + $0xc58] sm:$0xff] }
 0x28b   :  { %v10488_v55 = vcombine.high %v590_v48, %v594_v49  ;;  %v10487_v60 = vcombine.low %v590_v48, %v594_v49  ;;  %v10489_v61 = vcombine.low %v591_v50, %v595_v51  ;;  %v12297_v43 = vld [vmem:[#allocation6 + $0xe10] sm:$0xff]  ;;  %v12309_v49 = vld [vmem:[#allocation6 + $0xe18] sm:$0xff] }
 0x28c   :  { %v12307_v48 = vld [vmem:[#allocation6 + $0xe30] sm:$0xff] }
 0x28d   :  { %4205 = vmatpush1.bf16.msra.mxu0 %v10423_v23  ;;  %4410 = vmatpush1.bf16.msra.mxu1 %v10425_v56  ;;  %v10490_v23 = vcombine.high %v591_v50, %v595_v51  ;;  %v598_v56 = vld [vmem:[#allocation6 + $0xc90] sm:$0xff]  ;;  %v12311_v50 = vld [vmem:[#allocation6 + $0xe38] sm:$0xff] }
 0x28e   :  { %4206 = vmatprep.subr.bf16.mxu0 %v10432_v58  ;;  %4411 = vmatprep.subr.bf16.mxu1 %v10434_v59  ;;  %v602_v58 = vld [vmem:[#allocation6 + $0xcb0] sm:$0xff]  ;;  %v599_v59 = vld [vmem:[#allocation6 + $0xc98] sm:$0xff] }
 0x28f   :  { %v10496_v62 = vcombine.high %v598_v56, %v602_v58  ;;  %v10495_v34 = vcombine.low %v598_v56, %v602_v58  ;;  %v12323_v56 = vld [vmem:[#allocation6 + $0xe70] sm:$0xff]  ;;  %v12325_v58 = vld [vmem:[#allocation6 + $0xe58] sm:$0xff] }
 0x291   :  { %4207 = vmatpush1.bf16.msra.mxu0 %v10431_v63  ;;  %4412 = vmatpush1.bf16.msra.mxu1 %v10433_v0  ;;  %v13277_v63 = vlaneseq  ;;  %v10498_v0 = vcombine.high %v599_v59, %v603_v25 }
 0x292   :  { %4208 = vmatprep.subr.bf16.mxu0 %v10440_v1  ;;  %4413 = vmatprep.subr.bf16.mxu1 %v10442_v3  ;;  %v606_v1 = vld [vmem:[#allocation6 + $0xcd0] sm:$0xff] }
 0x293   :  { %v610_v3 = vld [vmem:[#allocation6 + $0xcf0] sm:$0xff] }
 0x294   :  { %v10504_v6 = vcombine.high %v606_v1, %v610_v3  ;;  %v10503_v15 = vcombine.low %v606_v1, %v610_v3  ;;  %v12339_v1 = vld [vmem:[#allocation6 + $0xeb0] sm:$0xff]  ;;  %v10538_v3 = vcombine.high %v12293_v41, %v12295_v42 }
 0x295   :  { %4209 = vmatpush1.bf16.msra.mxu0 %v10439_v7  ;;  %4414 = vmatpush1.bf16.msra.mxu1 %v10441_v9  ;;  %v12251_v7 = vshrl.u32 %v13277_v63, 7  ;;  %v10506_v9 = vcombine.high %v607_v4, %v611_v5 }
 0x296   :  { %4210 = vmatprep.subr.bf16.mxu0 %v10448_v10  ;;  %4415 = vmatprep.subr.bf16.mxu1 %v10450_v11  ;;  %v614_v10 = vld [vmem:[#allocation6 + $0xd10] sm:$0xff] }
 0x297   :  { %v618_v11 = vld [vmem:[#allocation6 + $0xd30] sm:$0xff]  ;;  %v12264_v22 = vsub.s32 1, %v12251_v7  ;;  %v12267_v24 = vsub.s32 3, %v12251_v7 }
 0x298   :  { %v10512_v16 = vcombine.high %v614_v10, %v618_v11  ;;  %v10511_v32 = vcombine.low %v614_v10, %v618_v11  ;;  %v10546_v10 = vcombine.high %v12309_v49, %v12311_v50 }
 0x299   :  { %4211 = vmatpush1.bf16.msra.mxu0 %v10447_v17  ;;  %4416 = vmatpush1.bf16.msra.mxu1 %v10449_v18  ;;  %v12253_v17 = vld [vmem:[#allocation8] sm:$0xff]  ;;  %v12256_v18 = vsub.s32 0, %v12251_v7  ;;  %13291 = vst [vmem:[#allocation29_spill] sm:$0xff] %v12267_v24 }
 0x29a   :  { %4212 = vmatprep.subr.bf16.mxu0 %v10456_v19  ;;  %4417 = vmatprep.subr.bf16.mxu1 %v10458_v20  ;;  %v12259_v19 = vsub.s32 2, %v12251_v7  ;;  %v12261_v20 = vld [vmem:[#allocation6 + $0xd50] sm:$0xff] }
 0x29b   :  { %v10520_v40 = vcombine.high %v12261_v20, %v12269_v26 }
 0x29d   :  { %4213 = vmatpush1.bf16.msra.mxu0 %v10455_v27  ;;  %4418 = vmatpush1.bf16.msra.mxu1 %v10457_v28  ;;  %v12271_v27 = vld [vmem:[#allocation6 + $0xd58] sm:$0xff] }
 0x29e   :  { %4214 = vmatprep.subr.bf16.mxu0 %v10464_v29  ;;  %4419 = vmatprep.subr.bf16.mxu1 %v10466_v30  ;;  %v12273_v28 = vld [vmem:[#allocation6 + $0xd78] sm:$0xff]  ;;  %v12275_v29 = vld [vmem:[#allocation6 + $0xd90] sm:$0xff] }
 0x29f   :  { %v12277_v30 = vld [vmem:[#allocation6 + $0xdb0] sm:$0xff]  ;;  %v10521_v51 = vcombine.low %v12271_v27, %v12273_v28 }
 0x2a1   :  { %4215 = vmatpush1.bf16.msra.mxu0 %v10463_v37  ;;  %4420 = vmatpush1.bf16.msra.mxu1 %v10465_v57  ;;  %v12283_v37 = vld [vmem:[#allocation6 + $0xdd0] sm:$0xff] }
 0x2a2   :  { %4216 = vmatprep.subr.bf16.mxu0 %v10472_v38  ;;  %4421 = vmatprep.subr.bf16.mxu1 %v10474_v39  ;;  %v12285_v57 = vld [vmem:[#allocation6 + $0xdf0] sm:$0xff]  ;;  %v777_v38 = vrot.slane %v12253_v17, %v12256_v18  ;;  %v785_v39 = vrot.slane %v12253_v17, %v12259_v19 }
 0x2a5   :  { %4217 = vmatpush1.bf16.msra.mxu0 %v10471_v44  ;;  %4422 = vmatpush1.bf16.msra.mxu1 %v10473_v12  ;;  %v781_v44 = vrot.slane %v12253_v17, %v12264_v22  ;;  %v789_v12 = vrot.slane %v12253_v17, %v12267_v24 }
 0x2a6   :  { %4227 = vmatprep.subr.bf16.mxu0 %v10480_v45  ;;  %4432 = vmatprep.subr.bf16.mxu1 %v10482_v47  ;;  %v10519_v45 = vcombine.low %v12261_v20, %v12269_v26  ;;  %v10522_v47 = vcombine.high %v12271_v27, %v12273_v28 }
 0x2a8   :  { %4219 = vmatmul.mubr.bf16.vlgmr.msra.gmra.mrb[4].mxu0 %v12218_v36  ;;  %4424 = vmatmul.mubr.bf16.vlgmr.msra.gmra.mrb[4].mxu1 %v12218_v36  ;;  %v10497_v36 = vcombine.low %v599_v59, %v603_v25  ;;  %v10530_v59 = vcombine.high %v12279_v31, %v12281_v35  ;;  %v10535_v25 = vcombine.low %v12283_v37, %v12285_v57 }
 0x2a9   :  { %4228 = vmatpush1.bf16.msra.mxu0 %v10479_v52  ;;  %4433 = vmatpush1.bf16.msra.mxu1 %v10481_v53  ;;  %v10527_v52 = vcombine.low %v12275_v29, %v12277_v30  ;;  %v10528_v53 = vcombine.high %v12275_v29, %v12277_v30 }
 0x2aa   :  { %4229 = vmatprep.subr.bf16.mxu0 %v10488_v55  ;;  %4434 = vmatprep.subr.bf16.mxu1 %v10490_v23  ;;  %v10529_v55 = vcombine.low %v12279_v31, %v12281_v35  ;;  %v12321_v23 = vld [vmem:[#allocation6 + $0xe50] sm:$0xff] }
 0x2ab   :  { %4259 = vmatprep.mubr.bf16.mxu0 %v12220_v46  ;;  %4464 = vmatprep.mubr.bf16.mxu1 %v12220_v46  ;;  %v10505_v46 = vcombine.low %v607_v4, %v611_v5  ;;  %v10543_v4 = vcombine.low %v12297_v43, %v12307_v48  ;;  %v10544_v5 = vcombine.high %v12297_v43, %v12307_v48  ;;  %v670_v48 = vld [vmem:[#allocation6 + $0xed0] sm:$0xff] }
 0x2ac   :  { %v10552_v13 = vcombine.high %v12321_v23, %v12323_v56 }
 0x2ad   :  { %4230 = vmatpush1.bf16.msra.mxu0 %v10487_v60  ;;  %4435 = vmatpush1.bf16.msra.mxu1 %v10489_v61  ;;  %v10536_v60 = vcombine.high %v12283_v37, %v12285_v57  ;;  %v10537_v61 = vcombine.low %v12293_v41, %v12295_v42 }
 0x2ae   :  { %4231 = vmatprep.subr.bf16.mxu0 %v10496_v62  ;;  %4436 = vmatprep.subr.bf16.mxu1 %v10498_v0  ;;  %v12335_v62 = vld [vmem:[#allocation6 + $0xe78] sm:$0xff]  ;;  %v12337_v0 = vld [vmem:[#allocation6 + $0xe90] sm:$0xff] }
 0x2af   :  { %v13292_v43 = vcombine.high %v12325_v58, %v12335_v62 }
 0x2b1   :  { %4232 = vmatpush1.bf16.msra.mxu0 %v10495_v34  ;;  %4437 = vmatpush1.bf16.msra.mxu1 %v10497_v36  ;;  %v12347_v34 = vld [vmem:[#allocation6 + $0xe98] sm:$0xff] }
 0x2b2   :  { %4233 = vmatprep.subr.bf16.mxu0 %v10504_v6  ;;  %4438 = vmatprep.subr.bf16.mxu1 %v10506_v9  ;;  %v12349_v36 = vld [vmem:[#allocation6 + $0xeb8] sm:$0xff]  ;;  %v10545_v9 = vcombine.low %v12309_v49, %v12311_v50 }
 0x2b5   :  { %4234 = vmatpush1.bf16.msra.mxu0 %v10503_v15  ;;  %4439 = vmatpush1.bf16.msra.mxu1 %v10505_v46 }
 0x2b6   :  { %4235 = vmatprep.subr.bf16.mxu0 %v10512_v16  ;;  %4440 = vmatprep.subr.bf16.mxu1 %v10514_v21 }
 0x2b9   :  { %4236 = vmatpush1.bf16.msra.mxu0 %v10511_v32  ;;  %4441 = vmatpush1.bf16.msra.mxu1 %v10513_v33 }
 0x2ba   :  { %4237 = vmatprep.subr.bf16.mxu0 %v10520_v40  ;;  %4442 = vmatprep.subr.bf16.mxu1 %v10522_v47 }
 0x2bb   :  { %v3892_v6 = vpop.f32.mrb[0].mxu0  ;;  %v4097_v15 = vpop.f32.mrb[0].mxu1 }
 0x2bc   :  { %v12359_v14 = vadd.f32 %v3892_v6, %v777_v38  ;;  %v3894_v46 = vpop.f32.mrb[1].mxu0  ;;  %v12367_v21 = vadd.f32 %v4097_v15, %v785_v39  ;;  %v4099_v27 = vpop.f32.mrb[1].mxu1 }
 0x2bd   :  { %v12369_v26 = vadd.f32 %v3894_v46, %v781_v44  ;;  %v3896_v28 = vpop.f32.mrb[2].mxu0  ;;  %4238 = vmatpush1.bf16.msra.mxu0 %v10519_v45  ;;  %v12378_v38 = vadd.f32 %v4099_v27, %v789_v12  ;;  %v4101_v39 = vpop.f32.mrb[2].mxu1  ;;  %4443 = vmatpush1.bf16.msra.mxu1 %v10521_v51 }
 0x2be   :  { %v4516_v32 = vrot.slane %v12359_v14, 4  ;;  %v4564_v33 = vmul.f32 %v12359_v14, %v12359_v14  ;;  %v3897_v40 = vpop.f32.mrb[3].mxu0  ;;  %4239 = vmatprep.subr.bf16.mxu0 %v10528_v53  ;;  %v4528_v45 = vrot.slane %v12367_v21, 4  ;;  %v4566_v47 = vmul.f32 %v12367_v21, %v12367_v21  ;;  %v4102_v46 = vpop.f32.mrb[3].mxu1  ;;  %4444 = vmatprep.subr.bf16.mxu1 %v10530_v59 }
 0x2bf   :  { %v4522_v6 = vrot.slane %v12369_v26, 4  ;;  %v4565_v15 = vmul.f32 %v12369_v26, %v12369_v26  ;;  %v4534_v53 = vrot.slane %v12378_v38, 4  ;;  %v4567_v27 = vmul.f32 %v12378_v38, %v12378_v38 }
 0x2c0   :  { %v4517_v12 = vadd.f32 %v12359_v14, %v4516_v32  ;;  %v4572_v51 = vrot.slane %v4564_v33, 4  ;;  %v4529_v28 = vadd.f32 %v12367_v21, %v4528_v45  ;;  %v4584_v39 = vrot.slane %v4566_v47, 4 }
 0x2c1   :  { %v4523_v40 = vadd.f32 %v12369_v26, %v4522_v6  ;;  %v4578_v63 = vrot.slane %v4565_v15, 4  ;;  %4240 = vmatpush1.bf16.msra.mxu0 %v10527_v52  ;;  %v4535_v46 = vadd.f32 %v12378_v38, %v4534_v53  ;;  %v4590_v59 = vrot.slane %v4567_v27, 4  ;;  %4445 = vmatpush1.bf16.msra.mxu1 %v10529_v55  ;;  %v675_v53 = vld [vmem:[#allocation6 + $0xef8] sm:$0xff] }
 0x2c2   :  { %v4518_v8 = vrot.slane %v4517_v12, 2  ;;  %v4573_v30 = vadd.f32 %v4572_v51, %v4564_v33  ;;  %4241 = vmatprep.subr.bf16.mxu0 %v10536_v60  ;;  %v4530_v32 = vrot.slane %v4529_v28, 2  ;;  %v4585_v29 = vadd.f32 %v4584_v39, %v4566_v47  ;;  %4446 = vmatprep.subr.bf16.mxu1 %v10538_v3 }
 0x2c3   :  { %v4524_v44 = vrot.slane %v4523_v40, 2  ;;  %v4579_v20 = vadd.f32 %v4578_v63, %v4565_v15  ;;  %v4536_v6 = vrot.slane %v4535_v46, 2  ;;  %v4591_v11 = vadd.f32 %v4590_v59, %v4567_v27 }
 0x2c4   :  { %v4519_v45 = vadd.f32 %v4518_v8, %v4517_v12  ;;  %v4574_v16 = vrot.slane %v4573_v30, 2  ;;  %v4531_v52 = vadd.f32 %v4530_v32, %v4529_v28  ;;  %v4586_v17 = vrot.slane %v4585_v29, 2 }
 0x2c5   :  { %v4525_v33 = vadd.f32 %v4524_v44, %v4523_v40  ;;  %v4580_v51 = vrot.slane %v4579_v20, 2  ;;  %4242 = vmatpush1.bf16.msra.mxu0 %v10535_v25  ;;  %v4537_v55 = vadd.f32 %v4536_v6, %v4535_v46  ;;  %v4592_v60 = vrot.slane %v4591_v11, 2  ;;  %4447 = vmatpush1.bf16.msra.mxu1 %v10537_v61 }
 0x2c6   :  { %v4520_v31 = vrot.slane %v4519_v45, 1  ;;  %v4575_v35 = vadd.f32 %v4574_v16, %v4573_v30  ;;  %4243 = vmatprep.subr.bf16.mxu0 %v10544_v5  ;;  %v4532_v8 = vrot.slane %v4531_v52, 1  ;;  %v4587_v63 = vadd.f32 %v4586_v17, %v4585_v29  ;;  %4448 = vmatprep.subr.bf16.mxu1 %v10546_v10 }
 0x2c7   :  { %v4526_v3 = vrot.slane %v4525_v33, 1  ;;  %v4581_v44 = vadd.f32 %v4580_v51, %v4579_v20  ;;  %v4538_v25 = vrot.slane %v4537_v55, 1  ;;  %v4593_v16 = vadd.f32 %v4592_v60, %v4591_v11 }
 0x2c8   :  { %v4521_v37 = vadd.f32 %v4520_v31, %v4519_v45  ;;  %v4576_v57 = vrot.slane %v4575_v35, 1  ;;  %v4533_v30 = vadd.f32 %v4532_v8, %v4531_v52  ;;  %v4588_v47 = vrot.slane %v4587_v63, 1 }
 0x2c9   :  { %v4527_v41 = vadd.f32 %v4526_v3, %v4525_v33  ;;  %v4582_v42 = vrot.slane %v4581_v44, 1  ;;  %4244 = vmatpush1.bf16.msra.mxu0 %v10543_v4  ;;  %v4539_v17 = vadd.f32 %v4538_v25, %v4537_v55  ;;  %v4594_v20 = vrot.slane %v4593_v16, 1  ;;  %4449 = vmatpush1.bf16.msra.mxu1 %v10545_v9  ;;  %v674_v4 = vld [vmem:[#allocation6 + $0xef0] sm:$0xff]  ;;  %v683_v3 = vld [vmem:[#allocation6 + $0xf38] sm:$0xff] }
 0x2ca   :  { %v4577_v61 = vadd.f32 %v4576_v57, %v4575_v35  ;;  %v12413_v5 = vmul.f32 0.125, %v4521_v37  ;;  %4245 = vmatprep.subr.bf16.mxu0 %v10552_v13  ;;  %v4589_v10 = vadd.f32 %v4588_v47, %v4587_v63  ;;  %v12421_v11 = vmul.f32 0.125, %v4533_v30  ;;  %4450 = vmatprep.subr.bf16.mxu1 %v13292_v43  ;;  %v671_v13 = vld [vmem:[#allocation6 + $0xed8] sm:$0xff]  ;;  %v678_v35 = vld [vmem:[#allocation6 + $0xf10] sm:$0xff] }
 0x2cb   :  { %v4583_v29 = vadd.f32 %v4582_v42, %v4581_v44  ;;  %v12423_v15 = vmul.f32 0.125, %v4527_v41  ;;  %v4595_v50 = vadd.f32 %v4594_v20, %v4593_v16  ;;  %v12430_v9 = vmul.f32 0.125, %v4539_v17  ;;  %v682_v55 = vld [vmem:[#allocation6 + $0xf30] sm:$0xff]  ;;  %v679_v63 = vld [vmem:[#allocation6 + $0xf18] sm:$0xff] }
 0x2cc   :  { %v4628_v12 = vmul.f32 0.125, %v4577_v61  ;;  %v4636_v49 = vmul.f32 %v12413_v5, %v12413_v5  ;;  %v4630_v27 = vmul.f32 0.125, %v4589_v10  ;;  %v4638_v28 = vmul.f32 %v12421_v11, %v12421_v11  ;;  %v686_v41 = vld [vmem:[#allocation6 + $0xf50] sm:$0xff]  ;;  %v687_v61 = vld [vmem:[#allocation6 + $0xf58] sm:$0xff] }
 0x2cd   :  { %v4629_v39 = vmul.f32 0.125, %v4583_v29  ;;  %v4637_v40 = vmul.f32 %v12423_v15, %v12423_v15  ;;  %v13293_v46 = vcombine.low %v12321_v23, %v12323_v56  ;;  %v4631_v32 = vmul.f32 0.125, %v4595_v50  ;;  %v690_v42 = vld [vmem:[#allocation6 + $0xf70] sm:$0xff]  ;;  %v691_v17 = vld [vmem:[#allocation6 + $0xf78] sm:$0xff] }
 0x2ce   :  { %v4644_v59 = vsub.f32 %v4628_v12, %v4636_v49  ;;  %v4639_v45 = vmul.f32 %v12430_v9, %v12430_v9  ;;  %v13294_v6 = vcombine.low %v12325_v58, %v12335_v62  ;;  %v13295_v52 = vcombine.high %v12337_v0, %v12339_v1  ;;  %v694_v29 = vld [vmem:[#allocation6 + $0xf90] sm:$0xff] }
 0x2cf   :  { %4246 = vmatpush1.bf16.msra.mxu0 %v13293_v46  ;;  %v10568_v33 = vcombine.high %v670_v48, %v674_v4  ;;  %v4646_v51 = vsub.f32 %v4630_v27, %v4638_v28  ;;  %v4645_v31 = vsub.f32 %v4629_v39, %v4637_v40  ;;  %v13296_v23 = vcombine.high %v12347_v34, %v12349_v36  ;;  %v698_v43 = vld [vmem:[#allocation6 + $0xfb0] sm:$0xff]  ;;  %v703_v40 = vld [vmem:[#allocation6 + $0xfd8] sm:$0xff] }
 0x2d0   :  { %4451 = vmatpush1.bf16.msra.mxu1 %v13294_v6  ;;  %4247 = vmatprep.subr.bf16.mxu0 %v13295_v52  ;;  %v10570_v56 = vcombine.high %v671_v13, %v675_v53  ;;  %v4652_v60 = vadd.f32 1e-05, %v4644_v59  ;;  %v4647_v8 = vsub.f32 %v4631_v32, %v4639_v45  ;;  %v13297_v44 = vcombine.low %v12337_v0, %v12339_v1  ;;  %v702_v27 = vld [vmem:[#allocation6 + $0xfd0] sm:$0xff]  ;;  %v707_v46 = vld [vmem:[#allocation6 + $0xff8] sm:$0xff] }
 0x2d1   :  { %4452 = vmatprep.subr.bf16.mxu1 %v13296_v23  ;;  %v4654_v58 = vadd.f32 1e-05, %v4646_v51  ;;  %v4653_v62 = vadd.f32 1e-05, %v4645_v31  ;;  %v10567_v37 = vcombine.low %v670_v48, %v674_v4  ;;  %v13298_v25 = vcombine.low %v12347_v34, %v12349_v36  ;;  %v695_v48 = vld [vmem:[#allocation6 + $0xf98] sm:$0xff]  ;;  %v706_v28 = vld [vmem:[#allocation6 + $0xff0] sm:$0xff] }
 0x2d2   :  { %11662 = vrsqrt.f32 %v4652_v60  ;;  %v4655_v57 = vadd.f32 1e-05, %v4647_v8  ;;  %v10569_v16 = vcombine.low %v671_v13, %v675_v53  ;;  %v10576_v30 = vcombine.high %v678_v35, %v682_v55  ;;  %v699_v4 = vld [vmem:[#allocation6 + $0xfb8] sm:$0xff] }
 0x2d3   :  { %4248 = vmatpush1.bf16.msra.mxu0 %v13297_v44  ;;  %11664 = vrsqrt.f32 %v4654_v58  ;;  %v10578_v47 = vcombine.high %v679_v63, %v683_v3  ;;  %v11993_v0 = vmov 1966171168   ;;  %v10575_v20 = vcombine.low %v678_v35, %v682_v55  ;;  %v714_v35 = vld [vmem:[#allocation6 + $0x1030] sm:$0xff]  ;;  %v711_v60 = vld [vmem:[#allocation6 + $0x1018] sm:$0xff] }
 0x2d4   :  { %4453 = vmatpush1.bf16.msra.mxu1 %v13298_v25  ;;  %4249 = vmatprep.subr.bf16.mxu0 %v10568_v33  ;;  %11666 = vrsqrt.f32 %v4653_v62  ;;  %v4681_v1 = vunpack.c.l.s4 %v11993_v0  ;;  %v10577_v34 = vcombine.low %v679_v63, %v683_v3  ;;  %v10584_v36 = vcombine.high %v686_v41, %v690_v42  ;;  %v715_v8 = vld [vmem:[#allocation6 + $0x1038] sm:$0xff]  ;;  %v722_v25 = vld [vmem:[#allocation6 + $0x1070] sm:$0xff] }
 0x2d5   :  { %4454 = vmatprep.subr.bf16.mxu1 %v10570_v56  ;;  %11668 = vrsqrt.f32 %v4655_v57  ;;  %v10586_v10 = vcombine.high %v687_v61, %v691_v17  ;;  %v10583_v49 = vcombine.low %v686_v41, %v690_v42  ;;  %v10585_v50 = vcombine.low %v687_v61, %v691_v17  ;;  %v710_v56 = vld [vmem:[#allocation6 + $0x1010] sm:$0xff] }
 0x2d6   :  { %v4682_v12 = vunpack.c.0.s8 %v4681_v1  ;;  %v10592_v13 = vcombine.high %v694_v29, %v698_v43  ;;  %v10594_v53 = vcombine.high %v695_v48, %v699_v4  ;;  %v10591_v45 = vcombine.low %v694_v29, %v698_v43  ;;  %v718_v57 = vld [vmem:[#allocation6 + $0x1050] sm:$0xff] }
 0x2d7   :  { %4250 = vmatpush1.bf16.msra.mxu0 %v10567_v37  ;;  %v10593_v52 = vcombine.low %v695_v48, %v699_v4  ;;  %v10600_v33 = vcombine.high %v702_v27, %v706_v28  ;;  %v10602_v23 = vcombine.high %v703_v40, %v707_v46  ;;  %v10599_v3 = vcombine.low %v702_v27, %v706_v28  ;;  %v726_v0 = vld [vmem:[#allocation6 + $0x1090] sm:$0xff] }
 0x2d8   :  { %4455 = vmatpush1.bf16.msra.mxu1 %v10569_v16  ;;  %4251 = vmatprep.subr.bf16.mxu0 %v10576_v30  ;;  %v12457_v32 = vsub.s32 %v4682_v12, %v12251_v7  ;;  %v10601_v62 = vcombine.low %v703_v40, %v707_v46  ;;  %v10608_v44 = vcombine.high %v710_v56, %v714_v35  ;;  %v719_v30 = vld [vmem:[#allocation6 + $0x1058] sm:$0xff]  ;;  %v730_v1 = vld [vmem:[#allocation6 + $0x10b0] sm:$0xff]  ;;  %v13299_v12 = vmov 0  }
 0x2d9   :  { %4456 = vmatprep.subr.bf16.mxu1 %v10578_v47  ;;  %v10610_v37 = vcombine.high %v711_v60, %v715_v8  ;;  %v723_v47 = vld [vmem:[#allocation6 + $0x1078] sm:$0xff]  ;;  %v10607_v41 = vcombine.low %v710_v56, %v714_v35  ;;  %v10609_v42 = vcombine.low %v711_v60, %v715_v8  ;;  %v10616_v61 = vcombine.high %v718_v57, %v722_v25  ;;  %v734_v48 = vld [vmem:[#allocation6 + $0x10d0] sm:$0xff] }
 0x2da   :  { %v10618_v17 = vcombine.high %v719_v30, %v723_v47  ;;  %v10624_v29 = vcombine.high %v726_v0, %v730_v1  ;;  %v738_v4 = vld [vmem:[#allocation6 + $0x10f0] sm:$0xff]  ;;  %v743_v40 = vld [vmem:[#allocation6 + $0x1118] sm:$0xff] }
 0x2db   :  { %4252 = vmatpush1.bf16.msra.mxu0 %v10575_v20  ;;  %v727_v20 = vld [vmem:[#allocation6 + $0x1098] sm:$0xff]  ;;  %v742_v28 = vld [vmem:[#allocation6 + $0x1110] sm:$0xff] }
 0x2dc   :  { %4457 = vmatpush1.bf16.msra.mxu1 %v10577_v34  ;;  %4253 = vmatprep.subr.bf16.mxu0 %v10584_v36  ;;  %v11663_v39 = vpop.eup %11662  ;;  %v731_v34 = vld [vmem:[#allocation6 + $0x10b8] sm:$0xff]  ;;  %v10615_v36 = vcombine.low %v718_v57, %v722_v25  ;;  %v758_v8 = vld [vmem:[#allocation6 + $0x1190] sm:$0xff] }
 0x2dd   :  { %4458 = vmatprep.subr.bf16.mxu1 %v10586_v10  ;;  %v11665_v59 = vpop.eup %11664  ;;  %v10617_v10 = vcombine.low %v719_v30, %v723_v47  ;;  %v10626_v43 = vcombine.high %v727_v20, %v731_v34  ;;  %v747_v46 = vld [vmem:[#allocation6 + $0x1138] sm:$0xff]  ;;  %v766_v47 = vld [vmem:[#allocation6 + $0x11d0] sm:$0xff] }
 0x2de   :  { %v11667_v6 = vpop.eup %11666  ;;  %v10641_v35 = vcombine.low %v743_v40, %v747_v46 }
 0x2df   :  { %4254 = vmatpush1.bf16.msra.mxu0 %v10583_v49  ;;  %v11669_v51 = vpop.eup %11668  ;;  %v4676_v31 = vcombine.low %v11663_v39, %v11667_v6  ;;  %v735_v49 = vld [vmem:[#allocation6 + $0x10d8] sm:$0xff]  ;;  %v746_v39 = vld [vmem:[#allocation6 + $0x1130] sm:$0xff] }
 0x2e0   :  { %4459 = vmatpush1.bf16.msra.mxu1 %v10585_v50  ;;  %4255 = vmatprep.subr.bf16.mxu0 %v10592_v13  ;;  %v4677_v55 = vcombine.low %v11665_v59, %v11669_v51  ;;  %v739_v50 = vld [vmem:[#allocation6 + $0x10f8] sm:$0xff]  ;;  %v10623_v13 = vcombine.low %v726_v0, %v730_v1  ;;  %v10631_v59 = vcombine.low %v734_v48, %v738_v4  ;;  %v754_v51 = vld [vmem:[#allocation6 + $0x1170] sm:$0xff] }
 0x2e1   :  { %4460 = vmatprep.subr.bf16.mxu1 %v10594_v53  ;;  %v12460_v63 = vrot.slane %v4676_v31, %v12457_v32  ;;  %v10632_v53 = vcombine.high %v734_v48, %v738_v4  ;;  %v10634_v27 = vcombine.high %v735_v49, %v739_v50  ;;  %v10640_v6 = vcombine.high %v742_v28, %v746_v39  ;;  %v751_v31 = vld [vmem:[#allocation6 + $0x1158] sm:$0xff]  ;;  %v5082_v4 = vld [vmem:[#allocation12 + $0x28] sm:$0xff] }
 0x2e2   :  { %v12463_v58 = vrot.slane %v4677_v55, %v12457_v32  ;;  %v10639_v56 = vcombine.low %v742_v28, %v746_v39  ;;  %v5090_v28 = vld [vmem:[#allocation12 + $0x68] sm:$0xff] }
 0x2e3   :  { %4256 = vmatpush1.bf16.msra.mxu0 %v10591_v45  ;;  %v10633_v45 = vcombine.low %v735_v49, %v739_v50 }
 0x2e4   :  { %4461 = vmatpush1.bf16.msra.mxu1 %v10593_v52  ;;  %4257 = vmatprep.subr.bf16.mxu0 %v10600_v33  ;;  %v10642_v52 = vcombine.high %v743_v40, %v747_v46  ;;  %v750_v33 = vld [vmem:[#allocation6 + $0x1150] sm:$0xff]  ;;  %v5093_v46 = vld [vmem:[#allocation12 + $0x80] sm:$0xff] }
 0x2e5   :  { %4462 = vmatprep.subr.bf16.mxu1 %v10602_v23  ;;  %v755_v23 = vld [vmem:[#allocation6 + $0x1178] sm:$0xff]  ;;  %v10648_v55 = vcombine.high %v750_v33, %v754_v51 }
 0x2e6   :  { %v10650_v60 = vcombine.high %v751_v31, %v755_v23  ;;  %v10649_v57 = vcombine.low %v751_v31, %v755_v23  ;;  %v5101_v23 = vld [vmem:[#allocation12 + $0xc0] sm:$0xff] }
 0x2e7   :  { %4258 = vmatpush1.bf16.msra.mxu0 %v10599_v3  ;;  %v762_v3 = vld [vmem:[#allocation6 + $0x11b0] sm:$0xff] }
 0x2e8   :  { %4463 = vmatpush1.bf16.msra.mxu1 %v10601_v62  ;;  %4268 = vmatprep.subr.bf16.mxu0 %v10608_v44  ;;  %v759_v62 = vld [vmem:[#allocation6 + $0x1198] sm:$0xff]  ;;  %v10656_v25 = vcombine.high %v758_v8, %v762_v3 }
 0x2e9   :  { %4473 = vmatprep.subr.bf16.mxu1 %v10610_v37  ;;  %v763_v44 = vld [vmem:[#allocation6 + $0x11b8] sm:$0xff]  ;;  %v10647_v37 = vcombine.low %v750_v33, %v754_v51 }
 0x2ea   :  { %4260 = vmatmul.mubr.bf16.vlgmr.msra.gmra.mrb[4].mxu0 %v12226_v54  ;;  %v10658_v30 = vcombine.high %v759_v62, %v763_v44  ;;  %v10657_v0 = vcombine.low %v759_v62, %v763_v44  ;;  %v5109_v44 = vld [vmem:[#allocation12 + $0x100] sm:$0xff] }
 0x2eb   :  { %4269 = vmatpush1.bf16.msra.mxu0 %v10607_v41  ;;  %4465 = vmatmul.mubr.bf16.vlgmr.msra.gmra.mrb[4].mxu1 %v12226_v54  ;;  %v10625_v54 = vcombine.low %v727_v20, %v731_v34  ;;  %v770_v41 = vld [vmem:[#allocation6 + $0x11f0] sm:$0xff] }
 0x2ec   :  { %4474 = vmatpush1.bf16.msra.mxu1 %v10609_v42  ;;  %4270 = vmatprep.subr.bf16.mxu0 %v10616_v61  ;;  %v767_v42 = vld [vmem:[#allocation6 + $0x11d8] sm:$0xff]  ;;  %v10664_v1 = vcombine.high %v766_v47, %v770_v41  ;;  %v10663_v34 = vcombine.low %v766_v47, %v770_v41 }
 0x2ed   :  { %4475 = vmatprep.subr.bf16.mxu1 %v10618_v17  ;;  %4300 = vmatprep.mubr.bf16.mxu0 %v13299_v12  ;;  %v771_v61 = vld [vmem:[#allocation6 + $0x11f8] sm:$0xff]  ;;  %v10655_v17 = vcombine.low %v758_v8, %v762_v3 }
 0x2ee   :  { %4505 = vmatprep.mubr.bf16.mxu1 %v13299_v12  ;;  %v10666_v20 = vcombine.high %v767_v42, %v771_v61 }
 0x2ef   :  { %4271 = vmatpush1.bf16.msra.mxu0 %v10615_v36  ;;  %v10665_v36 = vcombine.low %v767_v42, %v771_v61  ;;  %v5117_v61 = vld [vmem:[#allocation12 + $0x140] sm:$0xff] }
 0x2f0   :  { %4476 = vmatpush1.bf16.msra.mxu1 %v10617_v10  ;;  %4272 = vmatprep.subr.bf16.mxu0 %v10624_v29  ;;  %v5077_v10 = vld [vmem:[#allocation12] sm:$0xff] }
 0x2f1   :  { %4477 = vmatprep.subr.bf16.mxu1 %v10626_v43  ;;  %v5081_v29 = vld [vmem:[#allocation12 + $0x20] sm:$0xff]  ;;  %v5078_v43 = vld [vmem:[#allocation12 + $0x8] sm:$0xff] }
 0x2f2   :  { %v10668_v48 = vcombine.high %v5077_v10, %v5081_v29  ;;  %v10667_v12 = vcombine.low %v5077_v10, %v5081_v29  ;;  %v10669_v49 = vcombine.low %v5078_v43, %v5082_v4  ;;  %v10670_v50 = vcombine.high %v5078_v43, %v5082_v4  ;;  %v5125_v29 = vld [vmem:[#allocation12 + $0x180] sm:$0xff] }
 0x2f3   :  { %4273 = vmatpush1.bf16.msra.mxu0 %v10623_v13  ;;  %v5085_v13 = vld [vmem:[#allocation12 + $0x40] sm:$0xff] }
 0x2f4   :  { %4478 = vmatpush1.bf16.msra.mxu1 %v10625_v54  ;;  %4274 = vmatprep.subr.bf16.mxu0 %v10632_v53  ;;  %v5089_v54 = vld [vmem:[#allocation12 + $0x60] sm:$0xff]  ;;  %v5086_v53 = vld [vmem:[#allocation12 + $0x48] sm:$0xff] }
 0x2f5   :  { %4479 = vmatprep.subr.bf16.mxu1 %v10634_v27  ;;  %v10676_v27 = vcombine.high %v5085_v13, %v5089_v54  ;;  %v10675_v39 = vcombine.low %v5085_v13, %v5089_v54  ;;  %v10677_v40 = vcombine.low %v5086_v53, %v5090_v28  ;;  %v5129_v43 = vld [vmem:[#allocation12 + $0x1a0] sm:$0xff] }
 0x2f6   :  { %v10716_v4 = vcombine.high %v5125_v29, %v5129_v43  ;;  %v5133_v54 = vld [vmem:[#allocation12 + $0x1c0] sm:$0xff] }
 0x2f7   :  { %4275 = vmatpush1.bf16.msra.mxu0 %v10631_v59  ;;  %v5097_v59 = vld [vmem:[#allocation12 + $0xa0] sm:$0xff] }
 0x2f8   :  { %4480 = vmatpush1.bf16.msra.mxu1 %v10633_v45  ;;  %4276 = vmatprep.subr.bf16.mxu0 %v10640_v6  ;;  %v5094_v45 = vld [vmem:[#allocation12 + $0x88] sm:$0xff]  ;;  %v10684_v6 = vcombine.high %v5093_v46, %v5097_v59  ;;  %v10683_v33 = vcombine.low %v5093_v46, %v5097_v59  ;;  %v5141_v59 = vld [vmem:[#allocation12 + $0x200] sm:$0xff] }
 0x2f9   :  { %4481 = vmatprep.subr.bf16.mxu1 %v10642_v52  ;;  %v5098_v52 = vld [vmem:[#allocation12 + $0xa8] sm:$0xff] }
 0x2fa   :  { %v10685_v51 = vcombine.low %v5094_v45, %v5098_v52  ;;  %v10686_v31 = vcombine.high %v5094_v45, %v5098_v52  ;;  %v5145_v45 = vld [vmem:[#allocation12 + $0x220] sm:$0xff] }
 0x2fb   :  { %4277 = vmatpush1.bf16.msra.mxu0 %v10639_v56  ;;  %v5105_v56 = vld [vmem:[#allocation12 + $0xe0] sm:$0xff]  ;;  %v10732_v52 = vcombine.high %v5141_v59, %v5145_v45 }
 0x2fc   :  { %4482 = vmatpush1.bf16.msra.mxu1 %v10641_v35  ;;  %4278 = vmatprep.subr.bf16.mxu0 %v10648_v55  ;;  %v5102_v35 = vld [vmem:[#allocation12 + $0xc8] sm:$0xff]  ;;  %v10692_v55 = vcombine.high %v5101_v23, %v5105_v56  ;;  %v10691_v8 = vcombine.low %v5101_v23, %v5105_v56  ;;  %v5149_v56 = vld [vmem:[#allocation12 + $0x240] sm:$0xff] }
 0x2fd   :  { %4483 = vmatprep.subr.bf16.mxu1 %v10650_v60  ;;  %v5106_v60 = vld [vmem:[#allocation12 + $0xe8] sm:$0xff] }
 0x2fe   :  { %v10693_v3 = vcombine.low %v5102_v35, %v5106_v60  ;;  %v10694_v62 = vcombine.high %v5102_v35, %v5106_v60  ;;  %v5153_v35 = vld [vmem:[#allocation12 + $0x260] sm:$0xff] }
 0x2ff   :  { %4279 = vmatpush1.bf16.msra.mxu0 %v10647_v37  ;;  %v5113_v37 = vld [vmem:[#allocation12 + $0x120] sm:$0xff]  ;;  %v10740_v60 = vcombine.high %v5149_v56, %v5153_v35 }
 0x300   :  { %4484 = vmatpush1.bf16.msra.mxu1 %v10649_v57  ;;  %4280 = vmatprep.subr.bf16.mxu0 %v10656_v25  ;;  %v5110_v57 = vld [vmem:[#allocation12 + $0x108] sm:$0xff]  ;;  %v10700_v25 = vcombine.high %v5109_v44, %v5113_v37  ;;  %v10699_v47 = vcombine.low %v5109_v44, %v5113_v37  ;;  %v5157_v37 = vld [vmem:[#allocation12 + $0x280] sm:$0xff] }
 0x301   :  { %4485 = vmatprep.subr.bf16.mxu1 %v10658_v30  ;;  %v5114_v30 = vld [vmem:[#allocation12 + $0x128] sm:$0xff] }
 0x302   :  { %v10701_v41 = vcombine.low %v5110_v57, %v5114_v30  ;;  %v10702_v42 = vcombine.high %v5110_v57, %v5114_v30  ;;  %v5161_v57 = vld [vmem:[#allocation12 + $0x2a0] sm:$0xff] }
 0x303   :  { %4281 = vmatpush1.bf16.msra.mxu0 %v10655_v17  ;;  %v5121_v17 = vld [vmem:[#allocation12 + $0x160] sm:$0xff]  ;;  %v10748_v30 = vcombine.high %v5157_v37, %v5161_v57 }
 0x304   :  { %4486 = vmatpush1.bf16.msra.mxu1 %v10657_v0  ;;  %4282 = vmatprep.subr.bf16.mxu0 %v10664_v1  ;;  %v5118_v0 = vld [vmem:[#allocation12 + $0x148] sm:$0xff]  ;;  %v10708_v1 = vcombine.high %v5117_v61, %v5121_v17 }
 0x305   :  { %4487 = vmatprep.subr.bf16.mxu1 %v10666_v20  ;;  %v5122_v20 = vld [vmem:[#allocation12 + $0x168] sm:$0xff] }
 0x306   :  { %v10710_v10 = vcombine.high %v5118_v0, %v5122_v20 }
 0x307   :  { %4283 = vmatpush1.bf16.msra.mxu0 %v10663_v34  ;;  %v10707_v34 = vcombine.low %v5117_v61, %v5121_v17  ;;  %v5165_v17 = vld [vmem:[#allocation12 + $0x2c0] sm:$0xff] }
 0x308   :  { %4488 = vmatpush1.bf16.msra.mxu1 %v10665_v36  ;;  %8191 = vmatprep.subr.bf16.mxu0 %v10668_v48  ;;  %v10709_v36 = vcombine.low %v5118_v0, %v5122_v20  ;;  %v5126_v48 = vld [vmem:[#allocation12 + $0x188] sm:$0xff]  ;;  %v5169_v0 = vld [vmem:[#allocation12 + $0x2e0] sm:$0xff] }
 0x309   :  { %8355 = vmatprep.subr.bf16.mxu1 %v10670_v50  ;;  %v10756_v20 = vcombine.high %v5165_v17, %v5169_v0 }
 0x30a   :  { %4301 = vmatmul.mubr.bf16.vlgmr.msra.gmra.mrb[4].mxu0 %v12232_v2 }
 0x30b   :  { %4506 = vmatmul.mubr.bf16.vlgmr.msra.gmra.mrb[4].mxu1 %v12232_v2  ;;  %8192 = vmatpush1.bf16.msra.mxu0 %v10667_v12  ;;  %v10678_v2 = vcombine.high %v5086_v53, %v5090_v28  ;;  %v5130_v12 = vld [vmem:[#allocation12 + $0x1a8] sm:$0xff]  ;;  %v5137_v53 = vld [vmem:[#allocation12 + $0x1e0] sm:$0xff] }
 0x30c   :  { %8356 = vmatpush1.bf16.msra.mxu1 %v10669_v49  ;;  %8193 = vmatprep.subr.bf16.mxu0 %v10676_v27  ;;  %v10715_v49 = vcombine.low %v5125_v29, %v5129_v43  ;;  %v10717_v50 = vcombine.low %v5126_v48, %v5130_v12  ;;  %v10718_v13 = vcombine.high %v5126_v48, %v5130_v12  ;;  %v5134_v27 = vld [vmem:[#allocation12 + $0x1c8] sm:$0xff]  ;;  %v5173_v43 = vld [vmem:[#allocation12 + $0x300] sm:$0xff] }
 0x30d   :  { %8357 = vmatprep.subr.bf16.mxu1 %v10678_v2  ;;  %v5138_v28 = vld [vmem:[#allocation12 + $0x1e8] sm:$0xff]  ;;  %v5177_v48 = vld [vmem:[#allocation12 + $0x320] sm:$0xff] }
 0x30e   :  { %v10725_v2 = vcombine.low %v5134_v27, %v5138_v28  ;;  %v10726_v46 = vcombine.high %v5134_v27, %v5138_v28  ;;  %v10764_v12 = vcombine.high %v5173_v43, %v5177_v48  ;;  %v5185_v27 = vld [vmem:[#allocation12 + $0x360] sm:$0xff]  ;;  %v5182_v28 = vld [vmem:[#allocation12 + $0x348] sm:$0xff] }
 0x30f   :  { %8194 = vmatpush1.bf16.msra.mxu0 %v10675_v39  ;;  %v10723_v39 = vcombine.low %v5133_v54, %v5137_v53 }
 0x310   :  { %8358 = vmatpush1.bf16.msra.mxu1 %v10677_v40  ;;  %8195 = vmatprep.subr.bf16.mxu0 %v10684_v6  ;;  %v10724_v40 = vcombine.high %v5133_v54, %v5137_v53  ;;  %v5142_v6 = vld [vmem:[#allocation12 + $0x208] sm:$0xff]  ;;  %v5181_v53 = vld [vmem:[#allocation12 + $0x340] sm:$0xff] }
 0x311   :  { %8359 = vmatprep.subr.bf16.mxu1 %v10686_v31 }
 0x313   :  { %8196 = vmatpush1.bf16.msra.mxu0 %v10683_v33  ;;  %v5146_v33 = vld [vmem:[#allocation12 + $0x228] sm:$0xff] }
 0x314   :  { %8360 = vmatpush1.bf16.msra.mxu1 %v10685_v51  ;;  %8197 = vmatprep.subr.bf16.mxu0 %v10692_v55  ;;  %v10731_v51 = vcombine.low %v5141_v59, %v5145_v45  ;;  %v10733_v31 = vcombine.low %v5142_v6, %v5146_v33  ;;  %v10734_v23 = vcombine.high %v5142_v6, %v5146_v33  ;;  %v5150_v55 = vld [vmem:[#allocation12 + $0x248] sm:$0xff]  ;;  %v5189_v45 = vld [vmem:[#allocation12 + $0x380] sm:$0xff] }
 0x315   :  { %8361 = vmatprep.subr.bf16.mxu1 %v10694_v62  ;;  %v5193_v6 = vld [vmem:[#allocation12 + $0x3a0] sm:$0xff] }
 0x316   :  { %v10779_v33 = vcombine.low %v5189_v45, %v5193_v6 }
 0x317   :  { %8198 = vmatpush1.bf16.msra.mxu0 %v10691_v8  ;;  %v5154_v8 = vld [vmem:[#allocation12 + $0x268] sm:$0xff] }
 0x318   :  { %8362 = vmatpush1.bf16.msra.mxu1 %v10693_v3  ;;  %8199 = vmatprep.subr.bf16.mxu0 %v10700_v25  ;;  %v10739_v3 = vcombine.low %v5149_v56, %v5153_v35  ;;  %v10741_v62 = vcombine.low %v5150_v55, %v5154_v8  ;;  %v10742_v44 = vcombine.high %v5150_v55, %v5154_v8  ;;  %v5158_v25 = vld [vmem:[#allocation12 + $0x288] sm:$0xff]  ;;  %v5201_v56 = vld [vmem:[#allocation12 + $0x3e0] sm:$0xff] }
 0x319   :  { %8363 = vmatprep.subr.bf16.mxu1 %v10702_v42  ;;  %v5198_v8 = vld [vmem:[#allocation12 + $0x3c8] sm:$0xff] }
 0x31b   :  { %8200 = vmatpush1.bf16.msra.mxu0 %v10699_v47  ;;  %v5162_v47 = vld [vmem:[#allocation12 + $0x2a8] sm:$0xff] }
 0x31c   :  { %8364 = vmatpush1.bf16.msra.mxu1 %v10701_v41  ;;  %8201 = vmatprep.subr.bf16.mxu0 %v10708_v1  ;;  %v10747_v41 = vcombine.low %v5157_v37, %v5161_v57  ;;  %v10749_v42 = vcombine.low %v5158_v25, %v5162_v47  ;;  %v10750_v61 = vcombine.high %v5158_v25, %v5162_v47  ;;  %v5166_v1 = vld [vmem:[#allocation12 + $0x2c8] sm:$0xff]  ;;  %v12473_v57 = vld [vmem:[#allocation12 + $0x400] sm:$0xff] }
 0x31d   :  { %8365 = vmatprep.subr.bf16.mxu1 %v10710_v10  ;;  %v12475_v25 = vld [vmem:[#allocation12 + $0x420] sm:$0xff] }
 0x31e   :  { %v10796_v47 = vcombine.high %v12473_v57, %v12475_v25 }
 0x31f   :  { %8202 = vmatpush1.bf16.msra.mxu0 %v10707_v34  ;;  %v5170_v34 = vld [vmem:[#allocation12 + $0x2e8] sm:$0xff] }
 0x320   :  { %8366 = vmatpush1.bf16.msra.mxu1 %v10709_v36  ;;  %8203 = vmatprep.subr.bf16.mxu0 %v10716_v4  ;;  %v10755_v36 = vcombine.low %v5165_v17, %v5169_v0  ;;  %v10757_v10 = vcombine.low %v5166_v1, %v5170_v34  ;;  %v10758_v29 = vcombine.high %v5166_v1, %v5170_v34  ;;  %v5174_v4 = vld [vmem:[#allocation12 + $0x308] sm:$0xff]  ;;  %v12490_v0 = vsub.s32 4, %v12251_v7 }
 0x321   :  { %8367 = vmatprep.subr.bf16.mxu1 %v10718_v13  ;;  %v13300_v1 = vlaneseq  ;;  %v12496_v34 = vsub.s32 6, %v12251_v7 }
 0x323   :  { %8204 = vmatpush1.bf16.msra.mxu0 %v10715_v49  ;;  %v5178_v49 = vld [vmem:[#allocation12 + $0x328] sm:$0xff] }
 0x324   :  { %8368 = vmatpush1.bf16.msra.mxu1 %v10717_v50  ;;  %8205 = vmatprep.subr.bf16.mxu0 %v10724_v40  ;;  %v10763_v50 = vcombine.low %v5173_v43, %v5177_v48  ;;  %v10765_v13 = vcombine.low %v5174_v4, %v5178_v49  ;;  %v10766_v54 = vcombine.high %v5174_v4, %v5178_v49  ;;  %v5186_v40 = vld [vmem:[#allocation12 + $0x368] sm:$0xff]  ;;  %v12506_v48 = vmul.u32 1024, %v12251_v7 }
 0x325   :  { %8369 = vmatprep.subr.bf16.mxu1 %v10726_v46  ;;  %v10773_v46 = vcombine.low %v5182_v28, %v5186_v40  ;;  %v10774_v59 = vcombine.high %v5182_v28, %v5186_v40 }
 0x326   :  { %13302 = vst [vmem:[#allocation31_spill] sm:$0xff] %v12506_v48 }
 0x327   :  { %8206 = vmatpush1.bf16.msra.mxu0 %v10723_v39  ;;  %v10772_v39 = vcombine.high %v5181_v53, %v5185_v27 }
 0x328   :  { %8370 = vmatpush1.bf16.msra.mxu1 %v10725_v2  ;;  %8207 = vmatprep.subr.bf16.mxu0 %v10732_v52  ;;  %v10771_v2 = vcombine.low %v5181_v53, %v5185_v27  ;;  %v5190_v52 = vld [vmem:[#allocation12 + $0x388] sm:$0xff] }
 0x329   :  { %8371 = vmatprep.subr.bf16.mxu1 %v10734_v23  ;;  %v5197_v23 = vld [vmem:[#allocation12 + $0x3c0] sm:$0xff] }
 0x32b   :  { %8208 = vmatpush1.bf16.msra.mxu0 %v10731_v51  ;;  %v10780_v51 = vcombine.high %v5189_v45, %v5193_v6 }
 0x32c   :  { %8372 = vmatpush1.bf16.msra.mxu1 %v10733_v31  ;;  %8209 = vmatprep.subr.bf16.mxu0 %v10740_v60  ;;  %v5194_v31 = vld [vmem:[#allocation12 + $0x3a8] sm:$0xff]  ;;  %v10788_v60 = vcombine.high %v5197_v23, %v5201_v56 }
 0x32d   :  { %8373 = vmatprep.subr.bf16.mxu1 %v10742_v44  ;;  %v10781_v35 = vcombine.low %v5190_v52, %v5194_v31  ;;  %v10782_v55 = vcombine.high %v5190_v52, %v5194_v31  ;;  %v10787_v44 = vcombine.low %v5197_v23, %v5201_v56 }
 0x32f   :  { %8210 = vmatpush1.bf16.msra.mxu0 %v10739_v3  ;;  %v5202_v3 = vld [vmem:[#allocation12 + $0x3e8] sm:$0xff] }
 0x330   :  { %8374 = vmatpush1.bf16.msra.mxu1 %v10741_v62  ;;  %8211 = vmatprep.subr.bf16.mxu0 %v10748_v30  ;;  %v10790_v62 = vcombine.high %v5198_v8, %v5202_v3  ;;  %v10789_v37 = vcombine.low %v5198_v8, %v5202_v3  ;;  %v12477_v30 = vld [vmem:[#allocation12 + $0x408] sm:$0xff] }
 0x331   :  { %8375 = vmatprep.subr.bf16.mxu1 %v10750_v61 }
 0x333   :  { %8212 = vmatpush1.bf16.msra.mxu0 %v10747_v41  ;;  %v12481_v41 = vld [vmem:[#allocation12 + $0x428] sm:$0xff] }
 0x334   :  { %8376 = vmatpush1.bf16.msra.mxu1 %v10749_v42  ;;  %8213 = vmatprep.subr.bf16.mxu0 %v10756_v20  ;;  %v10798_v17 = vcombine.high %v12477_v30, %v12481_v41  ;;  %v12493_v20 = vand.u32 127, %v13300_v1 }
 0x335   :  { %8377 = vmatprep.subr.bf16.mxu1 %v10758_v29  ;;  %v11698_v29 = vld [vmem:[#allocation8] sm:$0xff] }
 0x336   :  { %13301 = vst [vmem:[#allocation30_spill] sm:$0xff] %v12493_v20  ;;  %v793_v43 = vrot.slane %v11698_v29, %v12490_v0  ;;  %v4940_v4 = vadd.s32 128, %v12493_v20  ;;  %v12529_v45 = vadd.s32 %v12493_v20, %v12506_v48 }
 0x337   :  { %8214 = vmatpush1.bf16.msra.mxu0 %v10755_v36  ;;  %v12499_v36 = vsub.s32 5, %v12251_v7 }
 0x338   :  { %8378 = vmatpush1.bf16.msra.mxu1 %v10757_v10  ;;  %8215 = vmatprep.subr.bf16.mxu0 %v10764_v12  ;;  %v12502_v10 = vsub.s32 7, %v12251_v7  ;;  %v801_v12 = vrot.slane %v11698_v29, %v12496_v34  ;;  %v12519_v28 = vadd.s32 %v4940_v4, %v12506_v48 }
 0x339   :  { %8379 = vmatprep.subr.bf16.mxu1 %v10766_v54  ;;  %v797_v49 = vrot.slane %v11698_v29, %v12499_v36 }
 0x33b   :  { %8216 = vmatpush1.bf16.msra.mxu0 %v10763_v50  ;;  %v805_v50 = vrot.slane %v11698_v29, %v12502_v10 }
 0x33c   :  { %8380 = vmatpush1.bf16.msra.mxu1 %v10765_v13  ;;  %8217 = vmatprep.subr.bf16.mxu0 %v10772_v39  ;;  %v4942_v13 = vadd.s32 384, %v12493_v20 }
 0x33d   :  { %8381 = vmatprep.subr.bf16.mxu1 %v10774_v59  ;;  %v12525_v59 = vstv %s4955_s5 }
 0x33e   :  { %v12537_v23 = vadd.s32 %v4942_v13, %v12506_v48 }
 0x33f   :  { %8218 = vmatpush1.bf16.msra.mxu0 %v10771_v2 }
 0x340   :  { %8382 = vmatpush1.bf16.msra.mxu1 %v10773_v46  ;;  %8219 = vmatprep.subr.bf16.mxu0 %v10780_v51 }
 0x341   :  { %8383 = vmatprep.subr.bf16.mxu1 %v10782_v55 }
 0x343   :  { %8220 = vmatpush1.bf16.msra.mxu0 %v10779_v33 }
 0x344   :  { %8384 = vmatpush1.bf16.msra.mxu1 %v10781_v35  ;;  %8221 = vmatprep.subr.bf16.mxu0 %v10788_v60 }
 0x345   :  { %8385 = vmatprep.subr.bf16.mxu1 %v10790_v62 }
 0x347   :  { %8222 = vmatpush1.bf16.msra.mxu0 %v10787_v44 }
 0x348   :  { %8386 = vmatpush1.bf16.msra.mxu1 %v10789_v37  ;;  %8232 = vmatprep.subr.bf16.mxu0 %v10796_v47 }
 0x349   :  { %8396 = vmatprep.subr.bf16.mxu1 %v10798_v17 }
 0x3dd   :  { %v4302_v54 = vpop.f32.mrb[4].mxu0 }
 0x3de   :  { %v12516_v53 = vadd.f32 %v4302_v54, %v793_v43  ;;  %v4507_v27 = vpop.f32.mrb[4].mxu1  ;;  %v4304_v7 = vpop.f32.mrb[5].mxu0 }
 0x3df   :  { %v12521_v39 = vadd.f32 %v4507_v27, %v801_v12  ;;  %v12523_v40 = vadd.f32 %v4304_v7, %v797_v49  ;;  %v4509_v2 = vpop.f32.mrb[5].mxu1  ;;  %v4306_v46 = vpop.f32.mrb[6].mxu0 }
 0x3e0   :  { %v4540_v6 = vrot.slane %v12516_v53, 4  ;;  %v4568_v52 = vmul.f32 %v12516_v53, %v12516_v53  ;;  %v12534_v33 = vadd.f32 %v4509_v2, %v805_v50  ;;  %v4511_v51 = vpop.f32.mrb[6].mxu1  ;;  %v4307_v31 = vpop.f32.mrb[7].mxu0 }
 0x3e1   :  { %v4552_v56 = vrot.slane %v12521_v39, 4  ;;  %v4570_v35 = vmul.f32 %v12521_v39, %v12521_v39  ;;  %v4546_v55 = vrot.slane %v12523_v40, 4  ;;  %v4569_v60 = vmul.f32 %v12523_v40, %v12523_v40  ;;  %v4512_v8 = vpop.f32.mrb[7].mxu1 }
 0x3e2   :  { %v4541_v3 = vadd.f32 %v12516_v53, %v4540_v6  ;;  %v4596_v62 = vrot.slane %v4568_v52, 4  ;;  %v4558_v44 = vrot.slane %v12534_v33, 4  ;;  %v4571_v37 = vmul.f32 %v12534_v33, %v12534_v33 }
 0x3e3   :  { %v4553_v47 = vadd.f32 %v12521_v39, %v4552_v56  ;;  %v4608_v17 = vrot.slane %v4570_v35, 4  ;;  %v4547_v1 = vadd.f32 %v12523_v40, %v4546_v55  ;;  %v4602_v29 = vrot.slane %v4569_v60, 4 }
 0x3e4   :  { %v4542_v43 = vrot.slane %v4541_v3, 2  ;;  %v4597_v4 = vadd.f32 %v4596_v62, %v4568_v52  ;;  %v4559_v12 = vadd.f32 %v12534_v33, %v4558_v44  ;;  %v4614_v49 = vrot.slane %v4571_v37, 4 }
 0x3e5   :  { %v4554_v50 = vrot.slane %v4553_v47, 2  ;;  %v4609_v13 = vadd.f32 %v4608_v17, %v4570_v35  ;;  %v4548_v54 = vrot.slane %v4547_v1, 2  ;;  %v4603_v27 = vadd.f32 %v4602_v29, %v4569_v60 }
 0x3e6   :  { %v4543_v7 = vadd.f32 %v4542_v43, %v4541_v3  ;;  %v4598_v2 = vrot.slane %v4597_v4, 2  ;;  %v4560_v46 = vrot.slane %v4559_v12, 2  ;;  %v4615_v6 = vadd.f32 %v4614_v49, %v4571_v37 }
 0x3e7   :  { %v4555_v51 = vadd.f32 %v4554_v50, %v4553_v47  ;;  %v4610_v31 = vrot.slane %v4609_v13, 2  ;;  %v4549_v56 = vadd.f32 %v4548_v54, %v4547_v1  ;;  %v4604_v8 = vrot.slane %v4603_v27, 2 }
 0x3e8   :  { %v4544_v61 = vrot.slane %v4543_v7, 1  ;;  %v4599_v55 = vadd.f32 %v4598_v2, %v4597_v4  ;;  %v4561_v42 = vadd.f32 %v4560_v46, %v4559_v12  ;;  %v4616_v16 = vrot.slane %v4615_v6, 2 }
 0x3e9   :  { %v4556_v52 = vrot.slane %v4555_v51, 1  ;;  %v4611_v62 = vadd.f32 %v4610_v31, %v4609_v13  ;;  %v4550_v44 = vrot.slane %v4549_v56, 1  ;;  %v4605_v48 = vadd.f32 %v4604_v8, %v4603_v27 }
 0x3ea   :  { %v4545_v20 = vadd.f32 %v4544_v61, %v4543_v7  ;;  %v4600_v35 = vrot.slane %v4599_v55, 1  ;;  %v4562_v17 = vrot.slane %v4561_v42, 1  ;;  %v4617_v60 = vadd.f32 %v4616_v16, %v4615_v6 }
 0x3eb   :  { %v4557_v3 = vadd.f32 %v4556_v52, %v4555_v51  ;;  %v4612_v29 = vrot.slane %v4611_v62, 1  ;;  %v4551_v43 = vadd.f32 %v4550_v44, %v4549_v56  ;;  %v4606_v37 = vrot.slane %v4605_v48, 1 }
 0x3ec   :  { %v4601_v47 = vadd.f32 %v4600_v35, %v4599_v55  ;;  %v12552_v49 = vmul.f32 0.125, %v4545_v20  ;;  %v4563_v1 = vadd.f32 %v4562_v17, %v4561_v42  ;;  %v4618_v50 = vrot.slane %v4617_v60, 1 }
 0x3ed   :  { %v4613_v4 = vadd.f32 %v4612_v29, %v4611_v62  ;;  %v12554_v12 = vmul.f32 0.125, %v4557_v3  ;;  %v4607_v54 = vadd.f32 %v4606_v37, %v4605_v48  ;;  %v12556_v13 = vmul.f32 0.125, %v4551_v43 }
 0x3ee   :  { %v4632_v27 = vmul.f32 0.125, %v4601_v47  ;;  %v4640_v61 = vmul.f32 %v12552_v49, %v12552_v49  ;;  %v4619_v16 = vadd.f32 %v4618_v50, %v4617_v60  ;;  %v12560_v7 = vmul.f32 0.125, %v4563_v1 }
 0x3ef   :  { %v4634_v2 = vmul.f32 0.125, %v4613_v4  ;;  %v4642_v20 = vmul.f32 %v12554_v12, %v12554_v12  ;;  %v4633_v46 = vmul.f32 0.125, %v4607_v54  ;;  %v4641_v42 = vmul.f32 %v12556_v13, %v12556_v13 }
 0x3f0   :  { %v4648_v6 = vsub.f32 %v4632_v27, %v4640_v61  ;;  %v4635_v51 = vmul.f32 0.125, %v4619_v16  ;;  %v4643_v48 = vmul.f32 %v12560_v7, %v12560_v7  ;;  %v12570_v31 = vadd.s32 %v12525_v59, %v12519_v28 }
 0x3f1   :  { %v4650_v56 = vsub.f32 %v4634_v2, %v4642_v20  ;;  %v4649_v8 = vsub.f32 %v4633_v46, %v4641_v42  ;;  %v12574_v55 = vadd.s32 %v12525_v59, %v12529_v45  ;;  %v12578_v52 = vadd.s32 %v12525_v59, %v12537_v23 }
 0x3f2   :  { %v4656_v62 = vadd.f32 1e-05, %v4648_v6  ;;  %v4651_v44 = vsub.f32 %v4635_v51, %v4643_v48  ;;  %v4966_v3 = vadd.s32 4660, %v12570_v31 }
 0x3f3   :  { %v4658_v35 = vadd.f32 1e-05, %v4650_v56  ;;  %v4657_v17 = vadd.f32 1e-05, %v4649_v8  ;;  %v4965_v28 = vadd.s32 4660, %v12574_v55  ;;  %v4968_v29 = vadd.s32 4660, %v12578_v52 }
 0x3f4   :  { %11670 = vrsqrt.f32 %v4656_v62  ;;  %v4659_v60 = vadd.f32 1e-05, %v4651_v44  ;;  %v4974_v45 = vshrl.u32 %v4966_v3, 16  ;;  %v13303_v62 = vcombine.low %v12460_v63, %v12463_v58 }
 0x3f5   :  { %11672 = vrsqrt.f32 %v4658_v35  ;;  %v4973_v43 = vshrl.u32 %v4965_v28, 16  ;;  %v4976_v37 = vshrl.u32 %v4968_v29, 16 }
 0x3f6   :  { %11674 = vrsqrt.f32 %v4657_v17  ;;  %v4982_v23 = vxor.u32 %v4974_v45, %v4966_v3  ;;  %v4716_v44 = vrot.slane %v13303_v62, %v12457_v32 }
 0x3f7   :  { %11676 = vrsqrt.f32 %v4659_v60  ;;  %v4981_v47 = vxor.u32 %v4973_v43, %v4965_v28  ;;  %v4984_v1 = vxor.u32 %v4976_v37, %v4968_v29  ;;  %v4514_v60 = vld [vmem:[#allocation9] sm:$0xff] }
 0x3f8   :  { %v4990_v27 = vmul.u32 2146121005, %v4982_v23 }
 0x3f9   :  { %v4989_v2 = vmul.u32 2146121005, %v4981_v47  ;;  %v4992_v20 = vmul.u32 2146121005, %v4984_v1 }
 0x3fa   :  { %v4998_v51 = vshrl.u32 %v4990_v27, 15 }
 0x3fb   :  { %v4997_v48 = vshrl.u32 %v4989_v2, 15  ;;  %v5000_v56 = vshrl.u32 %v4992_v20, 15 }
 0x3fc   :  { %v5006_v17 = vxor.u32 %v4998_v51, %v4990_v27 }
 0x3fd   :  { %v5005_v3 = vxor.u32 %v4997_v48, %v4989_v2  ;;  %v5008_v28 = vxor.u32 %v5000_v56, %v4992_v20 }
 0x3fe   :  { %v11671_v50 = vpop.eup %11670  ;;  %v5014_v43 = vmul.u32 2221713035, %v5006_v17 }
 0x3ff   :  { %v11673_v4 = vpop.eup %11672  ;;  %v5013_v37 = vmul.u32 2221713035, %v5005_v3  ;;  %v5016_v23 = vmul.u32 2221713035, %v5008_v28 }
 0x400   :  { %v11675_v54 = vpop.eup %11674 }
 0x401   :  { %v11677_v61 = vpop.eup %11676  ;;  %v4678_v16 = vcombine.low %v11671_v50, %v11675_v54 }
 0x402   :  { %v4679_v46 = vcombine.low %v11673_v4, %v11677_v61 }
 0x403   :  { %v4700_v42 = vrot.slane %v4678_v16, %v12457_v32 }
 0x404   :  { %v4707_v6 = vrot.slane %v4679_v46, %v12457_v32 }
 0x406   :  { %v4709_v8 = vcombine.low %v4700_v42, %v4707_v6 }
 0x408   :  { %v4723_v35 = vrot.slane %v4709_v8, %v12457_v32 }
 0x40a   :  { %v4724_v29 = vcombine.low %v4716_v44, %v4723_v35 }
 0x40c   :  { %v4726_v45 = vmul.f32 %v4724_v29, %v4514_v60 }
 0x40e   :  { %v4727_v47 = vadd.f32 %v4726_v45, %v4726_v45  ;;  %v4732_v1 = vrot.slane %v4726_v45, %v12256_v18  ;;  %v4736_v50 = vrot.slane %v4726_v45, %v12264_v22  ;;  %v4740_v4 = vrot.slane %v4726_v45, %v12259_v19 }
 0x40f   :  { %v4744_v63 = vrot.slane %v4726_v45, %v12267_v24  ;;  %v4748_v58 = vrot.slane %v4726_v45, %v12490_v0  ;;  %v4752_v54 = vrot.slane %v4726_v45, %v12499_v36  ;;  %v4756_v27 = vrot.slane %v4726_v45, %v12496_v34 }
 0x410   :  { %v4760_v61 = vrot.slane %v4726_v45, %v12502_v10  ;;  %v4769_v16 = vmul.f32 %v4732_v1, %v12413_v5  ;;  %v4770_v2 = vmul.f32 %v4736_v50, %v12423_v15  ;;  %v4771_v20 = vmul.f32 %v4740_v4, %v12421_v11 }
 0x411   :  { %v4772_v46 = vmul.f32 %v4744_v63, %v12430_v9  ;;  %v4773_v42 = vmul.f32 %v4748_v58, %v12552_v49  ;;  %v4774_v6 = vmul.f32 %v4752_v54, %v12556_v13  ;;  %v4775_v51 = vmul.f32 %v4756_v27, %v12554_v12  ;;  %v4515_v58 = vld [vmem:[#allocation11] sm:$0xff] }
 0x412   :  { %v4776_v48 = vmul.f32 %v4760_v61, %v12560_v7  ;;  %v4785_v56 = vcombine.low %v4769_v16, %v4770_v2  ;;  %v4869_v8 = vrot.slane %v4727_v47, %v12502_v10  ;;  %v4845_v62 = vrot.slane %v4727_v47, %v12264_v22 }
 0x413   :  { %v4786_v5 = vcombine.low %v4771_v20, %v4772_v46  ;;  %v4787_v44 = vcombine.low %v4773_v42, %v4774_v6  ;;  %v4841_v15 = vrot.slane %v4727_v47, %v12256_v18  ;;  %v4853_v11 = vrot.slane %v4727_v47, %v12267_v24 }
 0x414   :  { %v4788_v9 = vcombine.low %v4775_v51, %v4776_v48  ;;  %v4795_v49 = vrot.slane %v4785_v56, %v12457_v32  ;;  %v12612_v13 = vmul.f32 %v12534_v33, %v4869_v8  ;;  %v4879_v12 = vmul.f32 %v12369_v26, %v4845_v62 }
 0x415   :  { %v4802_v7 = vrot.slane %v4786_v5, %v12457_v32  ;;  %v4809_v35 = vrot.slane %v4787_v44, %v12457_v32  ;;  %v4878_v17 = vmul.f32 %v12359_v14, %v4841_v15  ;;  %v4881_v60 = vmul.f32 %v12378_v38, %v4853_v11 }
 0x416   :  { %v4816_v3 = vrot.slane %v4788_v9, %v12457_v32  ;;  %v4861_v28 = vrot.slane %v4727_v47, %v12499_v36  ;;  %v5022_v45 = vshrl.u32 %v5014_v43, 16  ;;  %v5021_v26 = vshrl.u32 %v5013_v37, 16  ;;  %v5213_v9 = vld [vmem:[#allocation12 + $0x440] sm:$0xff] }
 0x417   :  { %v4817_v29 = vcombine.low %v4795_v49, %v4802_v7  ;;  %v5024_v4 = vshrl.u32 %v5016_v23, 16  ;;  %v4857_v38 = vrot.slane %v4727_v47, %v12490_v0  ;;  %v4849_v16 = vrot.slane %v4727_v47, %v12259_v19  ;;  %v5217_v49 = vld [vmem:[#allocation12 + $0x460] sm:$0xff]  ;;  %v5116_v7 = vld [vmem:[#allocation12 + $0x138] sm:$0xff] }
 0x418   :  { %v4818_v1 = vcombine.low %v4809_v35, %v4816_v3  ;;  %v4883_v33 = vmul.f32 %v12523_v40, %v4861_v28  ;;  %v5030_v54 = vxor.u32 %v5022_v45, %v5014_v43  ;;  %v5029_v27 = vxor.u32 %v5021_v26, %v5013_v37  ;;  %v5225_v26 = vld [vmem:[#allocation12 + $0x4a0] sm:$0xff]  ;;  %v5232_v3 = vld [vmem:[#allocation12 + $0x4d8] sm:$0xff] }
 0x419   :  { %v4825_v50 = vrot.slane %v4817_v29, %v12457_v32  ;;  %v5032_v61 = vxor.u32 %v5024_v4, %v5016_v23  ;;  %v4865_v2 = vrot.slane %v4727_v47, %v12496_v34  ;;  %v4882_v40 = vmul.f32 %v12516_v53, %v4857_v38  ;;  %v5222_v4 = vld [vmem:[#allocation12 + $0x488] sm:$0xff]  ;;  %v5244_v29 = vld [vmem:[#allocation12 + $0x538] sm:$0xff] }
 0x41a   :  { %v4832_v63 = vrot.slane %v4818_v1, %v12457_v32  ;;  %v5038_v46 = vshrl.u32 %v5030_v54, 31  ;;  %v5037_v51 = vshrl.u32 %v5029_v27, 31  ;;  %v4880_v43 = vmul.f32 %v12367_v21, %v4849_v16  ;;  %v5221_v1 = vld [vmem:[#allocation12 + $0x480] sm:$0xff] }
 0x41b   :  { %v4884_v6 = vmul.f32 %v12521_v39, %v4865_v2  ;;  %v5040_v48 = vshrl.u32 %v5032_v61, 31  ;;  %v10804_v45 = vcombine.high %v5213_v9, %v5217_v49  ;;  %v13310_v38 = vcombine.low %v12473_v57, %v12475_v25  ;;  %v5229_v25 = vld [vmem:[#allocation12 + $0x4c0] sm:$0xff] }
 0x41c   :  { %v4833_v14 = vcombine.low %v4825_v50, %v4832_v63  ;;  %vm5046_vm0 = vcmp.eq.s32.totalorder %v5038_v46, 1  ;;  %vm5045_vm1 = vcmp.eq.s32.totalorder %v5037_v51, 1  ;;  %v5226_v63 = vld [vmem:[#allocation12 + $0x4a8] sm:$0xff]  ;;  %v13311_v27 = vcombine.low %v12477_v30, %v12481_v41  ;;  %v5233_v30 = vld [vmem:[#allocation12 + $0x4e0] sm:$0xff] }
 0x41d   :  { %vm5048_vm2 = vcmp.eq.s32.totalorder %v5040_v48, 1  ;;  %vm12640_vm3 = vmpackc.low %vm5046_vm0, %vm5046_vm0  ;;  %v10803_v61 = vcombine.low %v5213_v9, %v5217_v49  ;;  %v10814_v57 = vcombine.high %v5222_v4, %v5226_v63  ;;  %v5230_v41 = vld [vmem:[#allocation12 + $0x4c8] sm:$0xff]  ;;  %v10820_v51 = vcombine.high %v5229_v25, %v5233_v30  ;;  %v5249_v49 = vld [vmem:[#allocation12 + $0x560] sm:$0xff] }
 0x41e   :  { %v4835_v20 = vsub.f32 %v4515_v58, %v4833_v14  ;;  %vm12646_vm4 = vmpackc.low %vm5045_vm1, %vm5045_vm1 }
 0x41f   :  { %vm12652_vm5 = vmpackc.low %vm5048_vm2, %vm5048_vm2 }
 0x420   :  { %v4836_v42 = vmul.f32 2.0, %v4835_v20  ;;  %v10812_v20 = vcombine.high %v5221_v1, %v5225_v26 }
 0x422   :  { %v4894_v56 = vrot.slane %v4836_v42, %v12264_v22  ;;  %v4890_v37 = vrot.slane %v4836_v42, %v12256_v18  ;;  %v4902_v23 = vrot.slane %v4836_v42, %v12267_v24  ;;  %v4898_v8 = vrot.slane %v4836_v42, %v12259_v19 }
 0x423   :  { %v4910_v47 = vrot.slane %v4836_v42, %v12499_v36  ;;  %v4906_v21 = vrot.slane %v4836_v42, %v12490_v0  ;;  %v4918_v58 = vrot.slane %v4836_v42, %v12502_v10  ;;  %v4914_v54 = vrot.slane %v4836_v42, %v12496_v34 }
 0x424   :  { %v4928_v53 = vadd.f32 %v4894_v56, %v4879_v12  ;;  %v4927_v62 = vadd.f32 %v4890_v37, %v4878_v17  ;;  %v4930_v5 = vadd.f32 %v4902_v23, %v4881_v60  ;;  %v12635_v44 = vadd.f32 %v4898_v8, %v4880_v43  ;;  %v5214_v12 = vld [vmem:[#allocation12 + $0x448] sm:$0xff]  ;;  %v5237_v43 = vld [vmem:[#allocation12 + $0x500] sm:$0xff] }
 0x425   :  { %v12637_v39 = vadd.f32 %v4910_v47, %v4883_v33  ;;  %v5218_v17 = vld [vmem:[#allocation12 + $0x468] sm:$0xff]  ;;  %v12656_v33 = vadd.f32 %v4906_v21, %v4882_v40  ;;  %v12681_v2 = vadd.f32 %v4918_v58, %v12612_v13  ;;  %v12689_v46 = vadd.f32 %v4914_v54, %v4884_v6  ;;  %v5241_v23 = vld [vmem:[#allocation12 + $0x520] sm:$0xff] }
 0x426   :  { %v5054_v15 = vmax.f32 %v4928_v53, 0.0  ;;  %v5053_v11 = vmax.f32 %v4927_v62, 0.0  ;;  %v5056_v35 = vmax.f32 %v4930_v5, 0.0  ;;  %v10806_v50 = vcombine.high %v5214_v12, %v5218_v17  ;;  %v5234_v40 = vld [vmem:[#allocation12 + $0x4e8] sm:$0xff]  ;;  %v5257_v58 = vld [vmem:[#allocation12 + $0x5a0] sm:$0xff] }
 0x427   :  { %v10805_v16 = vcombine.low %v5214_v12, %v5218_v17  ;;  %v10811_v13 = vcombine.low %v5221_v1, %v5225_v26  ;;  %v10813_v42 = vcombine.low %v5222_v4, %v5226_v63  ;;  %v10822_v48 = vcombine.high %v5230_v41, %v5234_v40  ;;  %v13312_v56 = vld [vmem:[#allocation30_spill] sm:$0xff]  ;;  %v5253_v4 = vld [vmem:[#allocation12 + $0x580] sm:$0xff] }
 0x428   :  { %v12644_v60 = vpack.c.bf16 %v5054_v15, %v5054_v15  ;;  %v12650_v28 = vpack.c.bf16 %v5053_v11, %v5053_v11  ;;  %v12672_v14 = vpack.c.bf16 %v5056_v35, %v5056_v35  ;;  %v4941_v37 = vadd.s32 256, %v13312_v56  ;;  %v5238_v8 = vld [vmem:[#allocation12 + $0x508] sm:$0xff]  ;;  %v5245_v15 = vld [vmem:[#allocation12 + $0x540] sm:$0xff]  ;;  %v13313_v11 = vld [vmem:[#allocation31_spill] sm:$0xff] }
 0x429   :  { %v5242_v47 = vld [vmem:[#allocation12 + $0x528] sm:$0xff]  ;;  %v4944_v53 = vadd.s32 640, %v13312_v56  ;;  %v10819_v6 = vcombine.low %v5229_v25, %v5233_v30  ;;  %v10821_v62 = vcombine.low %v5230_v41, %v5234_v40  ;;  %v10828_v5 = vcombine.high %v5237_v43, %v5241_v23  ;;  %v5261_v25 = vld [vmem:[#allocation12 + $0x5c0] sm:$0xff] }
 0x42a   :  { %11181 = vmatprep.mubr.msk.bf16.mxu0 %vm12640_vm3, %v12644_v60  ;;  %11205 = vmatprep.mubr.msk.bf16.mxu1 %vm12640_vm3, %v12644_v60  ;;  %v10830_v21 = vcombine.high %v5238_v8, %v5242_v47  ;;  %v4949_v9 = vadd.s32 %v4941_v37, %v13313_v11  ;;  %v5246_v35 = vld [vmem:[#allocation12 + $0x548] sm:$0xff]  ;;  %v10829_v1 = vcombine.low %v5238_v8, %v5242_v47  ;;  %v5265_v41 = vld [vmem:[#allocation12 + $0x5e0] sm:$0xff] }
 0x42b   :  { %11184 = vmatmul.mubr.msk.bf16.vlgmr.msra.gmra.mrb[8].mxu0 %vm12646_vm4, %v12650_v28  ;;  %11208 = vmatmul.mubr.msk.bf16.vlgmr.msra.gmra.mrb[8].mxu1 %vm12646_vm4, %v12650_v28  ;;  %v5250_v12 = vld [vmem:[#allocation12 + $0x568] sm:$0xff]  ;;  %v4952_v17 = vadd.s32 %v4944_v53, %v13313_v11  ;;  %v5273_v47 = vld [vmem:[#allocation12 + $0x620] sm:$0xff] }
 0x42c   :  { %8233 = vmatpush1.bf16.msra.mxu0 %v13310_v38  ;;  %8397 = vmatpush1.bf16.msra.mxu1 %v13311_v27  ;;  %v10838_v26 = vcombine.high %v5246_v35, %v5250_v12  ;;  %v12696_v63 = vadd.s32 %v12525_v59, %v4949_v9  ;;  %v5254_v54 = vld [vmem:[#allocation12 + $0x588] sm:$0xff] }
 0x42d   :  { %11187 = vmatprep.mubr.msk.bf16.mxu0 %vm12652_vm5, %v12672_v14  ;;  %11211 = vmatprep.mubr.msk.bf16.mxu1 %vm12652_vm5, %v12672_v14  ;;  %v5258_v38 = vld [vmem:[#allocation12 + $0x5a8] sm:$0xff]  ;;  %v12699_v27 = vadd.s32 %v12525_v59, %v4952_v17 }
 0x42e   :  { %8234 = vmatprep.subr.bf16.mxu0 %v10804_v45  ;;  %8398 = vmatprep.subr.bf16.mxu1 %v10806_v50  ;;  %v10827_v45 = vcombine.low %v5237_v43, %v5241_v23  ;;  %v10836_v50 = vcombine.high %v5245_v15, %v5249_v49  ;;  %v4967_v30 = vadd.s32 4660, %v12696_v63  ;;  %v5262_v40 = vld [vmem:[#allocation12 + $0x5c8] sm:$0xff]  ;;  %v10852_v43 = vcombine.high %v5261_v25, %v5265_v41  ;;  %v5269_v23 = vld [vmem:[#allocation12 + $0x600] sm:$0xff] }
 0x42f   :  { %v5270_v53 = vld [vmem:[#allocation12 + $0x608] sm:$0xff] }
 0x430   :  { %8235 = vmatpush1.bf16.msra.mxu0 %v10803_v61  ;;  %8399 = vmatpush1.bf16.msra.mxu1 %v10805_v16  ;;  %v10835_v61 = vcombine.low %v5245_v15, %v5249_v49  ;;  %v10837_v16 = vcombine.low %v5246_v35, %v5250_v12  ;;  %v4975_v8 = vshrl.u32 %v4967_v30, 16  ;;  %v10860_v15 = vcombine.high %v5269_v23, %v5273_v47  ;;  %v5277_v49 = vld [vmem:[#allocation12 + $0x640] sm:$0xff]  ;;  %v5278_v17 = vld [vmem:[#allocation12 + $0x648] sm:$0xff] }
 0x431   :  { %8236 = vmatprep.subr.bf16.mxu0 %v10812_v20  ;;  %8400 = vmatprep.subr.bf16.mxu1 %v10814_v57  ;;  %v10844_v20 = vcombine.high %v5253_v4, %v5257_v58  ;;  %v10846_v57 = vcombine.high %v5254_v54, %v5258_v38  ;;  %v5281_v12 = vld [vmem:[#allocation12 + $0x660] sm:$0xff] }
 0x432   :  { %v4983_v35 = vxor.u32 %v4975_v8, %v4967_v30 }
 0x434   :  { %8237 = vmatpush1.bf16.msra.mxu0 %v10811_v13  ;;  %8401 = vmatpush1.bf16.msra.mxu1 %v10813_v42  ;;  %v5266_v13 = vld [vmem:[#allocation12 + $0x5e8] sm:$0xff]  ;;  %v4970_v42 = vadd.s32 4660, %v12699_v27 }
 0x435   :  { %8238 = vmatprep.subr.bf16.mxu0 %v10820_v51  ;;  %8402 = vmatprep.subr.bf16.mxu1 %v10822_v48  ;;  %v10843_v51 = vcombine.low %v5253_v4, %v5257_v58  ;;  %v10845_v48 = vcombine.low %v5254_v54, %v5258_v38  ;;  %v10854_v37 = vcombine.high %v5262_v40, %v5266_v13  ;;  %v5285_v54 = vld [vmem:[#allocation12 + $0x680] sm:$0xff]  ;;  %v4991_v38 = vmul.u32 2146121005, %v4983_v35 }
 0x436   :  { %v10868_v4 = vcombine.high %v5277_v49, %v5281_v12 }
 0x438   :  { %8239 = vmatpush1.bf16.msra.mxu0 %v10819_v6  ;;  %8403 = vmatpush1.bf16.msra.mxu1 %v10821_v62  ;;  %v5274_v6 = vld [vmem:[#allocation12 + $0x628] sm:$0xff]  ;;  %v4978_v62 = vshrl.u32 %v4970_v42, 16 }
 0x439   :  { %8240 = vmatprep.subr.bf16.mxu0 %v10828_v5  ;;  %8404 = vmatprep.subr.bf16.mxu1 %v10830_v21  ;;  %v10851_v5 = vcombine.low %v5261_v25, %v5265_v41  ;;  %v10853_v21 = vcombine.low %v5262_v40, %v5266_v13  ;;  %v10862_v9 = vcombine.high %v5270_v53, %v5274_v6  ;;  %v5293_v13 = vld [vmem:[#allocation12 + $0x6c0] sm:$0xff] }
 0x43a   :  { %v10867_v25 = vcombine.low %v5277_v49, %v5281_v12 }
 0x43c   :  { %8241 = vmatpush1.bf16.msra.mxu0 %v10827_v45  ;;  %8405 = vmatpush1.bf16.msra.mxu1 %v10829_v1  ;;  %v5282_v45 = vld [vmem:[#allocation12 + $0x668] sm:$0xff]  ;;  %v4986_v1 = vxor.u32 %v4978_v62, %v4970_v42  ;;  %v4999_v42 = vshrl.u32 %v4991_v38, 15 }
 0x43d   :  { %8242 = vmatprep.subr.bf16.mxu0 %v10836_v50  ;;  %8406 = vmatprep.subr.bf16.mxu1 %v10838_v26  ;;  %v10859_v50 = vcombine.low %v5269_v23, %v5273_v47  ;;  %v10861_v26 = vcombine.low %v5270_v53, %v5274_v6  ;;  %v10870_v58 = vcombine.high %v5278_v17, %v5282_v45  ;;  %v5301_v6 = vld [vmem:[#allocation12 + $0x700] sm:$0xff] }
 0x43e   :  { %v10869_v30 = vcombine.low %v5278_v17, %v5282_v45  ;;  %v5007_v62 = vxor.u32 %v4999_v42, %v4991_v38  ;;  %v5309_v45 = vld [vmem:[#allocation12 + $0x740] sm:$0xff] }
 0x440   :  { %8243 = vmatpush1.bf16.msra.mxu0 %v10835_v61  ;;  %8407 = vmatpush1.bf16.msra.mxu1 %v10837_v16  ;;  %v5289_v61 = vld [vmem:[#allocation12 + $0x6a0] sm:$0xff]  ;;  %v5286_v16 = vld [vmem:[#allocation12 + $0x688] sm:$0xff] }
 0x441   :  { %8244 = vmatprep.subr.bf16.mxu0 %v10844_v20  ;;  %8408 = vmatprep.subr.bf16.mxu1 %v10846_v57  ;;  %v5290_v20 = vld [vmem:[#allocation12 + $0x6a8] sm:$0xff]  ;;  %v4994_v57 = vmul.u32 2146121005, %v4986_v1  ;;  %v10876_v41 = vcombine.high %v5285_v54, %v5289_v61  ;;  %v10875_v23 = vcombine.low %v5285_v54, %v5289_v61  ;;  %v5015_v1 = vmul.u32 2221713035, %v5007_v62 }
 0x442   :  { %v10878_v40 = vcombine.high %v5286_v16, %v5290_v20  ;;  %v10877_v8 = vcombine.low %v5286_v16, %v5290_v20  ;;  %v5317_v20 = vld [vmem:[#allocation12 + $0x780] sm:$0xff] }
 0x444   :  { %8245 = vmatpush1.bf16.msra.mxu0 %v10843_v51  ;;  %8409 = vmatpush1.bf16.msra.mxu1 %v10845_v48  ;;  %v5297_v51 = vld [vmem:[#allocation12 + $0x6e0] sm:$0xff]  ;;  %v5294_v48 = vld [vmem:[#allocation12 + $0x6c8] sm:$0xff] }
 0x445   :  { %8246 = vmatprep.subr.bf16.mxu0 %v10852_v43  ;;  %8410 = vmatprep.subr.bf16.mxu1 %v10854_v37  ;;  %v5298_v43 = vld [vmem:[#allocation12 + $0x6e8] sm:$0xff]  ;;  %v5002_v37 = vshrl.u32 %v4994_v57, 15  ;;  %v10884_v47 = vcombine.high %v5293_v13, %v5297_v51  ;;  %v10883_v49 = vcombine.low %v5293_v13, %v5297_v51 }
 0x446   :  { %v10886_v53 = vcombine.high %v5294_v48, %v5298_v43  ;;  %v10885_v35 = vcombine.low %v5294_v48, %v5298_v43  ;;  %v5325_v43 = vld [vmem:[#allocation12 + $0x7c0] sm:$0xff] }
 0x448   :  { %8247 = vmatpush1.bf16.msra.mxu0 %v10851_v5  ;;  %8411 = vmatpush1.bf16.msra.mxu1 %v10853_v21  ;;  %v5305_v5 = vld [vmem:[#allocation12 + $0x720] sm:$0xff]  ;;  %v5302_v21 = vld [vmem:[#allocation12 + $0x708] sm:$0xff] }
 0x449   :  { %8248 = vmatprep.subr.bf16.mxu0 %v10860_v15  ;;  %8412 = vmatprep.subr.bf16.mxu1 %v10862_v9  ;;  %v5306_v15 = vld [vmem:[#allocation12 + $0x728] sm:$0xff]  ;;  %v5010_v9 = vxor.u32 %v5002_v37, %v4994_v57  ;;  %v10892_v12 = vcombine.high %v5301_v6, %v5305_v5  ;;  %v10891_v54 = vcombine.low %v5301_v6, %v5305_v5  ;;  %v5023_v57 = vshrl.u32 %v5015_v1, 16 }
 0x44a   :  { %v10894_v17 = vcombine.high %v5302_v21, %v5306_v15  ;;  %v10893_v38 = vcombine.low %v5302_v21, %v5306_v15 }
 0x44b   :  { %v5031_v37 = vxor.u32 %v5023_v57, %v5015_v1 }
 0x44c   :  { %8249 = vmatpush1.bf16.msra.mxu0 %v10859_v50  ;;  %8413 = vmatpush1.bf16.msra.mxu1 %v10861_v26  ;;  %v5313_v50 = vld [vmem:[#allocation12 + $0x760] sm:$0xff]  ;;  %v5310_v26 = vld [vmem:[#allocation12 + $0x748] sm:$0xff] }
 0x44d   :  { %8250 = vmatprep.subr.bf16.mxu0 %v10868_v4  ;;  %8414 = vmatprep.subr.bf16.mxu1 %v10870_v58  ;;  %v5314_v4 = vld [vmem:[#allocation12 + $0x768] sm:$0xff]  ;;  %v5018_v58 = vmul.u32 2221713035, %v5010_v9  ;;  %v10900_v61 = vcombine.high %v5309_v45, %v5313_v50  ;;  %v10899_v13 = vcombine.low %v5309_v45, %v5313_v50  ;;  %v5039_v15 = vshrl.u32 %v5031_v37, 31  ;;  %v5333_v9 = vld [vmem:[#allocation12 + $0x800] sm:$0xff] }
 0x44e   :  { %v10902_v16 = vcombine.high %v5310_v26, %v5314_v4  ;;  %v10901_v42 = vcombine.low %v5310_v26, %v5314_v4  ;;  %v5055_v50 = vmax.f32 %v12635_v44, 0.0 }
 0x44f   :  { %vm5047_vm6 = vcmp.eq.s32.totalorder %v5039_v15, 1 }
 0x450   :  { %8251 = vmatpush1.bf16.msra.mxu0 %v10867_v25  ;;  %8415 = vmatpush1.bf16.msra.mxu1 %v10869_v30  ;;  %v5321_v25 = vld [vmem:[#allocation12 + $0x7a0] sm:$0xff]  ;;  %v5318_v30 = vld [vmem:[#allocation12 + $0x788] sm:$0xff]  ;;  %vm12705_vm8 = vmpackc.low %vm5047_vm6, %vm5047_vm6 }
 0x451   :  { %8252 = vmatprep.subr.bf16.mxu0 %v10876_v41  ;;  %8416 = vmatprep.subr.bf16.mxu1 %v10878_v40  ;;  %v5322_v41 = vld [vmem:[#allocation12 + $0x7a8] sm:$0xff]  ;;  %v5026_v40 = vshrl.u32 %v5018_v58, 16  ;;  %v10908_v51 = vcombine.high %v5317_v20, %v5321_v25  ;;  %v10907_v6 = vcombine.low %v5317_v20, %v5321_v25  ;;  %v12709_v25 = vpack.c.bf16 %v5055_v50, %v5055_v50  ;;  %v5360_v20 = vld [vmem:[#allocation12 + $0x8d8] sm:$0xff] }
 0x452   :  { %v10910_v48 = vcombine.high %v5318_v30, %v5322_v41  ;;  %v10909_v62 = vcombine.low %v5318_v30, %v5322_v41  ;;  %v5372_v30 = vld [vmem:[#allocation12 + $0x938] sm:$0xff] }
 0x454   :  { %8253 = vmatpush1.bf16.msra.mxu0 %v10875_v23  ;;  %8417 = vmatpush1.bf16.msra.mxu1 %v10877_v8  ;;  %v5329_v23 = vld [vmem:[#allocation12 + $0x7e0] sm:$0xff]  ;;  %v5326_v8 = vld [vmem:[#allocation12 + $0x7c8] sm:$0xff] }
 0x455   :  { %8254 = vmatprep.subr.bf16.mxu0 %v10884_v47  ;;  %8418 = vmatprep.subr.bf16.mxu1 %v10886_v53  ;;  %v5330_v47 = vld [vmem:[#allocation12 + $0x7e8] sm:$0xff]  ;;  %v5034_v53 = vxor.u32 %v5026_v40, %v5018_v58  ;;  %v10916_v5 = vcombine.high %v5325_v43, %v5329_v23  ;;  %v10915_v45 = vcombine.low %v5325_v43, %v5329_v23  ;;  %v5058_v58 = vmax.f32 %v12637_v39, 0.0 }
 0x456   :  { %v10918_v21 = vcombine.high %v5326_v8, %v5330_v47  ;;  %v10917_v1 = vcombine.low %v5326_v8, %v5330_v47  ;;  %v5357_v47 = vld [vmem:[#allocation12 + $0x8c0] sm:$0xff] }
 0x457   :  { %v12715_v39 = vpack.c.bf16 %v5058_v58, %v5058_v58 }
 0x458   :  { %8255 = vmatpush1.bf16.msra.mxu0 %v10883_v49  ;;  %8419 = vmatpush1.bf16.msra.mxu1 %v10885_v35  ;;  %v5337_v49 = vld [vmem:[#allocation12 + $0x820] sm:$0xff]  ;;  %v5334_v35 = vld [vmem:[#allocation12 + $0x808] sm:$0xff] }
 0x459   :  { %8256 = vmatprep.subr.bf16.mxu0 %v10892_v12  ;;  %8420 = vmatprep.subr.bf16.mxu1 %v10894_v17  ;;  %v5338_v12 = vld [vmem:[#allocation12 + $0x828] sm:$0xff]  ;;  %v5042_v17 = vshrl.u32 %v5034_v53, 31  ;;  %v10924_v26 = vcombine.high %v5333_v9, %v5337_v49  ;;  %v10923_v57 = vcombine.low %v5333_v9, %v5337_v49  ;;  %v5361_v53 = vld [vmem:[#allocation12 + $0x8e0] sm:$0xff]  ;;  %v4943_v9 = vadd.s32 512, %v13312_v56 }
 0x45a   :  { %v10926_v4 = vcombine.high %v5334_v35, %v5338_v12  ;;  %v10925_v44 = vcombine.low %v5334_v35, %v5338_v12  ;;  %v10948_v15 = vcombine.high %v5357_v47, %v5361_v53  ;;  %v5365_v35 = vld [vmem:[#allocation12 + $0x900] sm:$0xff]  ;;  %v10947_v50 = vcombine.low %v5357_v47, %v5361_v53 }
 0x45b   :  { %vm5050_vm7 = vcmp.eq.s32.totalorder %v5042_v17, 1  ;;  %v5369_v12 = vld [vmem:[#allocation12 + $0x920] sm:$0xff]  ;;  %v5366_v17 = vld [vmem:[#allocation12 + $0x908] sm:$0xff]  ;;  %v4951_v58 = vadd.s32 %v4943_v9, %v13313_v11 }
 0x45c   :  { %8257 = vmatpush1.bf16.msra.mxu0 %v10891_v54  ;;  %8421 = vmatpush1.bf16.msra.mxu1 %v10893_v38  ;;  %v5341_v54 = vld [vmem:[#allocation12 + $0x840] sm:$0xff]  ;;  %vm12711_vm9 = vmpackc.low %vm5050_vm7, %vm5050_vm7  ;;  %v5390_v9 = vld [vmem:[#allocation12 + $0x9c8] sm:$0xff] }
 0x45d   :  { %8258 = vmatprep.subr.bf16.mxu0 %v10900_v61  ;;  %8422 = vmatprep.subr.bf16.mxu1 %v10902_v16  ;;  %v5345_v38 = vld [vmem:[#allocation12 + $0x860] sm:$0xff]  ;;  %v5342_v61 = vld [vmem:[#allocation12 + $0x848] sm:$0xff] }
 0x45e   :  { %v5346_v16 = vld [vmem:[#allocation12 + $0x868] sm:$0xff]  ;;  %v10932_v41 = vcombine.high %v5341_v54, %v5345_v38  ;;  %v10931_v43 = vcombine.low %v5341_v54, %v5345_v38  ;;  %v5373_v38 = vld [vmem:[#allocation12 + $0x940] sm:$0xff] }
 0x45f   :  { %v10934_v40 = vcombine.high %v5342_v61, %v5346_v16  ;;  %v10933_v37 = vcombine.low %v5342_v61, %v5346_v16  ;;  %v5377_v61 = vld [vmem:[#allocation12 + $0x960] sm:$0xff]  ;;  %v5374_v16 = vld [vmem:[#allocation12 + $0x948] sm:$0xff] }
 0x460   :  { %8259 = vmatpush1.bf16.msra.mxu0 %v10899_v13  ;;  %8423 = vmatpush1.bf16.msra.mxu1 %v10901_v42  ;;  %v5349_v13 = vld [vmem:[#allocation12 + $0x880] sm:$0xff]  ;;  %v10963_v47 = vcombine.low %v5373_v38, %v5377_v61 }
 0x461   :  { %8260 = vmatprep.subr.bf16.mxu0 %v10908_v51  ;;  %8424 = vmatprep.subr.bf16.mxu1 %v10910_v48  ;;  %v5353_v42 = vld [vmem:[#allocation12 + $0x8a0] sm:$0xff]  ;;  %v5350_v51 = vld [vmem:[#allocation12 + $0x888] sm:$0xff] }
 0x462   :  { %v5354_v48 = vld [vmem:[#allocation12 + $0x8a8] sm:$0xff]  ;;  %v10940_v23 = vcombine.high %v5349_v13, %v5353_v42 }
 0x463   :  { %v10942_v8 = vcombine.high %v5350_v51, %v5354_v48 }
 0x464   :  { %8261 = vmatpush1.bf16.msra.mxu0 %v10907_v6  ;;  %8425 = vmatpush1.bf16.msra.mxu1 %v10909_v62  ;;  %v5358_v6 = vld [vmem:[#allocation12 + $0x8c8] sm:$0xff] }
 0x465   :  { %8262 = vmatprep.subr.bf16.mxu0 %v10916_v5  ;;  %8426 = vmatprep.subr.bf16.mxu1 %v10918_v21  ;;  %v5362_v62 = vld [vmem:[#allocation12 + $0x8e8] sm:$0xff]  ;;  %v10939_v5 = vcombine.low %v5349_v13, %v5353_v42  ;;  %v10941_v21 = vcombine.low %v5350_v51, %v5354_v48  ;;  %v10964_v13 = vcombine.high %v5373_v38, %v5377_v61  ;;  %v5381_v48 = vld [vmem:[#allocation12 + $0x980] sm:$0xff] }
 0x466   :  { %v10950_v49 = vcombine.high %v5358_v6, %v5362_v62  ;;  %v12734_v42 = vadd.s32 %v12525_v59, %v4951_v58  ;;  %v5398_v58 = vld [vmem:[#allocation12 + $0xa08] sm:$0xff] }
 0x468   :  { %8263 = vmatpush1.bf16.msra.mxu0 %v10915_v45  ;;  %8427 = vmatpush1.bf16.msra.mxu1 %v10917_v1  ;;  %v5370_v45 = vld [vmem:[#allocation12 + $0x928] sm:$0xff]  ;;  %v4946_v1 = vadd.s32 896, %v13312_v56  ;;  %13318 = vst [vmem:[#allocation30_spill] sm:$0xff] %v12734_v42 }
 0x469   :  { %8273 = vmatprep.subr.bf16.mxu0 %v10924_v26  ;;  %8437 = vmatprep.subr.bf16.mxu1 %v10926_v4  ;;  %v10949_v26 = vcombine.low %v5358_v6, %v5362_v62  ;;  %v10956_v4 = vcombine.high %v5365_v35, %v5369_v12  ;;  %v10958_v54 = vcombine.high %v5366_v17, %v5370_v45  ;;  %v4969_v62 = vadd.s32 4660, %v12734_v42 }
 0x46b   :  { %11190 = vmatmul.mubr.msk.bf16.vlgmr.msra.gmra.mrb[8].mxu0 %vm12705_vm8, %v12709_v25  ;;  %11214 = vmatmul.mubr.msk.bf16.vlgmr.msra.gmra.mrb[8].mxu1 %vm12705_vm8, %v12709_v25 }
 0x46c   :  { %8274 = vmatpush1.bf16.msra.mxu0 %v10923_v57  ;;  %11193 = vmatprep.mubr.msk.bf16.mxu0 %vm12711_vm9, %v12715_v39  ;;  %v5378_v57 = vld [vmem:[#allocation12 + $0x968] sm:$0xff] }
 0x46d   :  { %8438 = vmatpush1.bf16.msra.mxu1 %v10925_v44  ;;  %11217 = vmatprep.mubr.msk.bf16.mxu1 %vm12711_vm9, %v12715_v39  ;;  %v4954_v44 = vadd.s32 %v4946_v1, %v13313_v11  ;;  %v10966_v51 = vcombine.high %v5374_v16, %v5378_v57  ;;  %v10965_v53 = vcombine.low %v5374_v16, %v5378_v57  ;;  %v4977_v1 = vshrl.u32 %v4969_v62, 16 }
 0x46e   :  { %8275 = vmatprep.subr.bf16.mxu0 %v10932_v41  ;;  %8439 = vmatprep.subr.bf16.mxu1 %v10934_v40  ;;  %v10955_v41 = vcombine.low %v5365_v35, %v5369_v12  ;;  %v10957_v40 = vcombine.low %v5366_v17, %v5370_v45 }
 0x470   :  { %8276 = vmatpush1.bf16.msra.mxu0 %v10931_v43  ;;  %v5385_v43 = vld [vmem:[#allocation12 + $0x9a0] sm:$0xff] }
 0x471   :  { %8440 = vmatpush1.bf16.msra.mxu1 %v10933_v37  ;;  %8277 = vmatprep.subr.bf16.mxu0 %v10940_v23  ;;  %v5382_v37 = vld [vmem:[#allocation12 + $0x988] sm:$0xff]  ;;  %v10972_v6 = vcombine.high %v5381_v48, %v5385_v43  ;;  %v10971_v12 = vcombine.low %v5381_v48, %v5385_v43 }
 0x472   :  { %8441 = vmatprep.subr.bf16.mxu1 %v10942_v8  ;;  %v5386_v23 = vld [vmem:[#allocation12 + $0x9a8] sm:$0xff]  ;;  %v12737_v8 = vadd.s32 %v12525_v59, %v4954_v44  ;;  %v4985_v44 = vxor.u32 %v4977_v1, %v4969_v62  ;;  %v5421_v1 = vld [vmem:[#allocation12 + $0xac0] sm:$0xff] }
 0x473   :  { %v10973_v17 = vcombine.low %v5382_v37, %v5386_v23  ;;  %v5410_v48 = vld [vmem:[#allocation12 + $0xa68] sm:$0xff] }
 0x474   :  { %8278 = vmatpush1.bf16.msra.mxu0 %v10939_v5  ;;  %v10974_v5 = vcombine.high %v5382_v37, %v5386_v23  ;;  %v4972_v35 = vadd.s32 4660, %v12737_v8  ;;  %v5418_v62 = vld [vmem:[#allocation12 + $0xaa8] sm:$0xff] }
 0x475   :  { %8442 = vmatpush1.bf16.msra.mxu1 %v10941_v21  ;;  %8279 = vmatprep.subr.bf16.mxu0 %v10948_v15  ;;  %v5389_v21 = vld [vmem:[#allocation12 + $0x9c0] sm:$0xff] }
 0x476   :  { %8443 = vmatprep.subr.bf16.mxu1 %v10950_v49  ;;  %v5393_v15 = vld [vmem:[#allocation12 + $0x9e0] sm:$0xff]  ;;  %v5394_v49 = vld [vmem:[#allocation12 + $0x9e8] sm:$0xff]  ;;  %v4980_v38 = vshrl.u32 %v4972_v35, 16 }
 0x477   :  { %v10980_v45 = vcombine.high %v5389_v21, %v5393_v15  ;;  %v10979_v61 = vcombine.low %v5389_v21, %v5393_v15  ;;  %v10981_v16 = vcombine.low %v5390_v9, %v5394_v49  ;;  %v5417_v21 = vld [vmem:[#allocation12 + $0xaa0] sm:$0xff]  ;;  %v5414_v15 = vld [vmem:[#allocation12 + $0xa88] sm:$0xff] }
 0x478   :  { %8280 = vmatpush1.bf16.msra.mxu0 %v10947_v50  ;;  %v10982_v50 = vcombine.high %v5390_v9, %v5394_v49  ;;  %v4988_v43 = vxor.u32 %v4980_v38, %v4972_v35  ;;  %v11005_v38 = vcombine.low %v5414_v15, %v5418_v62 }
 0x479   :  { %8444 = vmatpush1.bf16.msra.mxu1 %v10949_v26  ;;  %8281 = vmatprep.subr.bf16.mxu0 %v10956_v4  ;;  %v5397_v26 = vld [vmem:[#allocation12 + $0xa00] sm:$0xff] }
 0x47a   :  { %8445 = vmatprep.subr.bf16.mxu1 %v10958_v54  ;;  %v5401_v4 = vld [vmem:[#allocation12 + $0xa20] sm:$0xff]  ;;  %v5402_v54 = vld [vmem:[#allocation12 + $0xa28] sm:$0xff]  ;;  %v4996_v9 = vmul.u32 2146121005, %v4988_v43 }
 0x47b   :  { %v10988_v57 = vcombine.high %v5397_v26, %v5401_v4  ;;  %v10987_v37 = vcombine.low %v5397_v26, %v5401_v4  ;;  %v10989_v23 = vcombine.low %v5398_v58, %v5402_v54  ;;  %v5422_v26 = vld [vmem:[#allocation12 + $0xac8] sm:$0xff] }
 0x47c   :  { %8282 = vmatpush1.bf16.msra.mxu0 %v10955_v41  ;;  %v10990_v41 = vcombine.high %v5398_v58, %v5402_v54  ;;  %v5426_v4 = vld [vmem:[#allocation12 + $0xae8] sm:$0xff]  ;;  %v5004_v58 = vshrl.u32 %v4996_v9, 15 }
 0x47d   :  { %8446 = vmatpush1.bf16.msra.mxu1 %v10957_v40  ;;  %8283 = vmatprep.subr.bf16.mxu0 %v10964_v13  ;;  %v5405_v40 = vld [vmem:[#allocation12 + $0xa40] sm:$0xff]  ;;  %v11013_v43 = vcombine.low %v5422_v26, %v5426_v4 }
 0x47e   :  { %8447 = vmatprep.subr.bf16.mxu1 %v10966_v51  ;;  %v5409_v13 = vld [vmem:[#allocation12 + $0xa60] sm:$0xff]  ;;  %v5406_v51 = vld [vmem:[#allocation12 + $0xa48] sm:$0xff] }
 0x47f   :  { %v10995_v49 = vcombine.low %v5405_v40, %v5409_v13 }
 0x480   :  { %8284 = vmatpush1.bf16.msra.mxu0 %v10963_v47  ;;  %v10996_v47 = vcombine.high %v5405_v40, %v5409_v13  ;;  %v5430_v40 = vld [vmem:[#allocation12 + $0xb08] sm:$0xff] }
 0x481   :  { %8448 = vmatpush1.bf16.msra.mxu1 %v10965_v53  ;;  %8285 = vmatprep.subr.bf16.mxu0 %v10972_v6  ;;  %v4993_v53 = vmul.u32 2146121005, %v4985_v44  ;;  %v10998_v6 = vcombine.high %v5406_v51, %v5410_v48  ;;  %v5429_v44 = vld [vmem:[#allocation12 + $0xb00] sm:$0xff]  ;;  %v5434_v13 = vld [vmem:[#allocation12 + $0xb28] sm:$0xff] }
 0x482   :  { %8449 = vmatprep.subr.bf16.mxu1 %v10974_v5  ;;  %v5413_v5 = vld [vmem:[#allocation12 + $0xa80] sm:$0xff] }
 0x483   :  { %v11004_v35 = vcombine.high %v5413_v5, %v5417_v21  ;;  %v11003_v54 = vcombine.low %v5413_v5, %v5417_v21  ;;  %v5441_v5 = vld [vmem:[#allocation12 + $0xb60] sm:$0xff]  ;;  %v5438_v21 = vld [vmem:[#allocation12 + $0xb48] sm:$0xff] }
 0x484   :  { %8286 = vmatpush1.bf16.msra.mxu0 %v10971_v12  ;;  %v10997_v12 = vcombine.low %v5406_v51, %v5410_v48  ;;  %v5012_v51 = vxor.u32 %v5004_v58, %v4996_v9 }
 0x485   :  { %8450 = vmatpush1.bf16.msra.mxu1 %v10973_v17  ;;  %8287 = vmatprep.subr.bf16.mxu0 %v10980_v45  ;;  %v5001_v17 = vshrl.u32 %v4993_v53, 15  ;;  %v11006_v45 = vcombine.high %v5414_v15, %v5418_v62 }
 0x486   :  { %8451 = vmatprep.subr.bf16.mxu1 %v10982_v50  ;;  %v5425_v50 = vld [vmem:[#allocation12 + $0xae0] sm:$0xff]  ;;  %v5020_v15 = vmul.u32 2221713035, %v5012_v51 }
 0x487   :  { %v11011_v48 = vcombine.low %v5421_v1, %v5425_v50 }
 0x488   :  { %8288 = vmatpush1.bf16.msra.mxu0 %v10979_v61  ;;  %v11012_v61 = vcombine.high %v5421_v1, %v5425_v50  ;;  %v5446_v1 = vld [vmem:[#allocation12 + $0xb88] sm:$0xff] }
 0x489   :  { %8452 = vmatpush1.bf16.msra.mxu1 %v10981_v16  ;;  %8289 = vmatprep.subr.bf16.mxu0 %v10988_v57  ;;  %v5009_v16 = vxor.u32 %v5001_v17, %v4993_v53  ;;  %v11014_v57 = vcombine.high %v5422_v26, %v5426_v4  ;;  %v5442_v53 = vld [vmem:[#allocation12 + $0xb68] sm:$0xff]  ;;  %v5445_v17 = vld [vmem:[#allocation12 + $0xb80] sm:$0xff]  ;;  %v5028_v26 = vshrl.u32 %v5020_v15, 16 }
 0x48a   :  { %8453 = vmatprep.subr.bf16.mxu1 %v10990_v41  ;;  %v5433_v41 = vld [vmem:[#allocation12 + $0xb20] sm:$0xff]  ;;  %v5450_v50 = vld [vmem:[#allocation12 + $0xba8] sm:$0xff]  ;;  %v11029_v58 = vcombine.low %v5438_v21, %v5442_v53 }
 0x48b   :  { %v11019_v62 = vcombine.low %v5429_v44, %v5433_v41  ;;  %v11037_v51 = vcombine.low %v5446_v1, %v5450_v50 }
 0x48c   :  { %8290 = vmatpush1.bf16.msra.mxu0 %v10987_v37  ;;  %v11020_v37 = vcombine.high %v5429_v44, %v5433_v41  ;;  %v5454_v44 = vld [vmem:[#allocation12 + $0xbc8] sm:$0xff] }
 0x48d   :  { %8454 = vmatpush1.bf16.msra.mxu1 %v10989_v23  ;;  %8291 = vmatprep.subr.bf16.mxu0 %v10996_v47  ;;  %v5017_v23 = vmul.u32 2221713035, %v5009_v16  ;;  %v11022_v47 = vcombine.high %v5430_v40, %v5434_v13  ;;  %v5453_v16 = vld [vmem:[#allocation12 + $0xbc0] sm:$0xff]  ;;  %v5458_v41 = vld [vmem:[#allocation12 + $0xbe8] sm:$0xff] }
 0x48e   :  { %8455 = vmatprep.subr.bf16.mxu1 %v10998_v6  ;;  %v5437_v6 = vld [vmem:[#allocation12 + $0xb40] sm:$0xff] }
 0x48f   :  { %v11028_v9 = vcombine.high %v5437_v6, %v5441_v5  ;;  %v11027_v4 = vcombine.low %v5437_v6, %v5441_v5  ;;  %v5465_v6 = vld [vmem:[#allocation12 + $0xc20] sm:$0xff]  ;;  %v5462_v5 = vld [vmem:[#allocation12 + $0xc08] sm:$0xff] }
 0x490   :  { %8292 = vmatpush1.bf16.msra.mxu0 %v10995_v49  ;;  %v11021_v49 = vcombine.low %v5430_v40, %v5434_v13  ;;  %v5036_v40 = vxor.u32 %v5028_v26, %v5020_v15  ;;  %v5057_v15 = vmax.f32 %v12656_v33, 0.0  ;;  %v5474_v26 = vld [vmem:[#allocation12 + $0xc68] sm:$0xff] }
 0x491   :  { %8456 = vmatpush1.bf16.msra.mxu1 %v10997_v12  ;;  %8293 = vmatprep.subr.bf16.mxu0 %v11004_v35  ;;  %v5025_v12 = vshrl.u32 %v5017_v23, 16  ;;  %v11030_v35 = vcombine.high %v5438_v21, %v5442_v53 }
 0x492   :  { %8457 = vmatprep.subr.bf16.mxu1 %v11006_v45  ;;  %v5449_v45 = vld [vmem:[#allocation12 + $0xba0] sm:$0xff]  ;;  %v5044_v21 = vshrl.u32 %v5036_v40, 31 }
 0x493   :  { %v11035_v13 = vcombine.low %v5445_v17, %v5449_v45 }
 0x494   :  { %8294 = vmatpush1.bf16.msra.mxu0 %v11003_v54  ;;  %v11036_v54 = vcombine.high %v5445_v17, %v5449_v45  ;;  %vm5052_vm11 = vcmp.eq.s32.totalorder %v5044_v21, 1  ;;  %v5473_v17 = vld [vmem:[#allocation12 + $0xc60] sm:$0xff]  ;;  %v4945_v21 = vadd.s32 768, %v13312_v56  ;;  %v5506_v56 = vld [vmem:[#allocation12 + $0xd68] sm:$0xff]  ;;  %v5488_v45 = vld [vmem:[#allocation12 + $0xcd8] sm:$0xff] }
 0x495   :  { %8458 = vmatpush1.bf16.msra.mxu1 %v11005_v38  ;;  %8295 = vmatprep.subr.bf16.mxu0 %v11012_v61  ;;  %v5033_v38 = vxor.u32 %v5025_v12, %v5017_v23  ;;  %v11038_v61 = vcombine.high %v5446_v1, %v5450_v50  ;;  %v5466_v23 = vld [vmem:[#allocation12 + $0xc28] sm:$0xff]  ;;  %v5060_v12 = vmax.f32 %v12681_v2, 0.0  ;;  %vm12749_vm13 = vmpackc.low %vm5052_vm11, %vm5052_vm11 }
 0x496   :  { %8459 = vmatprep.subr.bf16.mxu1 %v11014_v57  ;;  %v5457_v57 = vld [vmem:[#allocation12 + $0xbe0] sm:$0xff]  ;;  %v5470_v50 = vld [vmem:[#allocation12 + $0xc48] sm:$0xff]  ;;  %v11053_v33 = vcombine.low %v5462_v5, %v5466_v23 }
 0x497   :  { %v11043_v53 = vcombine.low %v5453_v16, %v5457_v57  ;;  %v11061_v40 = vcombine.low %v5470_v50, %v5474_v26 }
 0x498   :  { %8296 = vmatpush1.bf16.msra.mxu0 %v11011_v48  ;;  %v11044_v48 = vcombine.high %v5453_v16, %v5457_v57  ;;  %v11062_v16 = vcombine.high %v5470_v50, %v5474_v26  ;;  %v5478_v57 = vld [vmem:[#allocation12 + $0xc88] sm:$0xff]  ;;  %v5501_v26 = vld [vmem:[#allocation12 + $0xd40] sm:$0xff] }
 0x499   :  { %8460 = vmatpush1.bf16.msra.mxu1 %v11013_v43  ;;  %8297 = vmatprep.subr.bf16.mxu0 %v11020_v37  ;;  %v5041_v43 = vshrl.u32 %v5033_v38, 31  ;;  %v11046_v37 = vcombine.high %v5454_v44, %v5458_v41  ;;  %v5481_v38 = vld [vmem:[#allocation12 + $0xca0] sm:$0xff] }
 0x49a   :  { %8461 = vmatprep.subr.bf16.mxu1 %v11022_v47  ;;  %v5461_v47 = vld [vmem:[#allocation12 + $0xc00] sm:$0xff] }
 0x49b   :  { %vm5049_vm10 = vcmp.eq.s32.totalorder %v5041_v43, 1  ;;  %v11051_v1 = vcombine.low %v5461_v47, %v5465_v6  ;;  %v5489_v43 = vld [vmem:[#allocation12 + $0xce0] sm:$0xff] }
 0x49c   :  { %8298 = vmatpush1.bf16.msra.mxu0 %v11019_v62  ;;  %v11045_v62 = vcombine.low %v5454_v44, %v5458_v41  ;;  %vm12743_vm12 = vmpackc.low %vm5049_vm10, %vm5049_vm10  ;;  %v5482_v44 = vld [vmem:[#allocation12 + $0xca8] sm:$0xff] }
 0x49d   :  { %8462 = vmatpush1.bf16.msra.mxu1 %v11021_v49  ;;  %8299 = vmatprep.subr.bf16.mxu0 %v11028_v9  ;;  %v11052_v49 = vcombine.high %v5461_v47, %v5465_v6  ;;  %v11054_v9 = vcombine.high %v5462_v5, %v5466_v23  ;;  %v5490_v47 = vld [vmem:[#allocation12 + $0xce8] sm:$0xff]  ;;  %v11069_v5 = vcombine.low %v5478_v57, %v5482_v44 }
 0x49e   :  { %8463 = vmatprep.subr.bf16.mxu1 %v11030_v35  ;;  %v5469_v35 = vld [vmem:[#allocation12 + $0xc40] sm:$0xff] }
 0x49f   :  { %v11060_v2 = vcombine.high %v5469_v35, %v5473_v17  ;;  %v11059_v41 = vcombine.low %v5469_v35, %v5473_v17 }
 0x4a0   :  { %8300 = vmatpush1.bf16.msra.mxu0 %v11027_v4  ;;  %v12747_v4 = vpack.c.bf16 %v5057_v15, %v5057_v15  ;;  %v5497_v15 = vld [vmem:[#allocation12 + $0xd20] sm:$0xff] }
 0x4a1   :  { %8464 = vmatpush1.bf16.msra.mxu1 %v11029_v58  ;;  %8301 = vmatprep.subr.bf16.mxu0 %v11036_v54  ;;  %v5477_v54 = vld [vmem:[#allocation12 + $0xc80] sm:$0xff]  ;;  %v5500_v58 = vld [vmem:[#allocation12 + $0xd38] sm:$0xff] }
 0x4a2   :  { %8465 = vmatprep.subr.bf16.mxu1 %v11038_v61  ;;  %v12756_v61 = vpack.c.bf16 %v5060_v12, %v5060_v12  ;;  %v11067_v6 = vcombine.low %v5477_v54, %v5481_v38 }
 0x4a4   :  { %8302 = vmatpush1.bf16.msra.mxu0 %v11035_v13  ;;  %v11068_v13 = vcombine.high %v5477_v54, %v5481_v38 }
 0x4a5   :  { %8466 = vmatpush1.bf16.msra.mxu1 %v11037_v51  ;;  %8303 = vmatprep.subr.bf16.mxu0 %v11044_v48  ;;  %v11070_v51 = vcombine.high %v5478_v57, %v5482_v44  ;;  %v5485_v48 = vld [vmem:[#allocation12 + $0xcc0] sm:$0xff] }
 0x4a6   :  { %8467 = vmatprep.subr.bf16.mxu1 %v11046_v37  ;;  %v5486_v37 = vld [vmem:[#allocation12 + $0xcc8] sm:$0xff]  ;;  %v11076_v23 = vcombine.high %v5485_v48, %v5489_v43  ;;  %v11075_v12 = vcombine.low %v5485_v48, %v5489_v43 }
 0x4a7   :  { %v11077_v35 = vcombine.low %v5486_v37, %v5490_v47 }
 0x4a8   :  { %8304 = vmatpush1.bf16.msra.mxu0 %v11043_v53  ;;  %v11078_v53 = vcombine.high %v5486_v37, %v5490_v47 }
 0x4a9   :  { %8468 = vmatpush1.bf16.msra.mxu1 %v11045_v62  ;;  %8314 = vmatprep.subr.bf16.mxu0 %v11052_v49  ;;  %v5493_v62 = vld [vmem:[#allocation12 + $0xd00] sm:$0xff]  ;;  %v5494_v49 = vld [vmem:[#allocation12 + $0xd08] sm:$0xff] }
 0x4aa   :  { %8478 = vmatprep.subr.bf16.mxu1 %v11054_v9  ;;  %v5498_v9 = vld [vmem:[#allocation12 + $0xd28] sm:$0xff]  ;;  %v11084_v17 = vcombine.high %v5493_v62, %v5497_v15  ;;  %v11083_v54 = vcombine.low %v5493_v62, %v5497_v15 }
 0x4ab   :  { %11196 = vmatmul.mubr.msk.bf16.vlgmr.msra.gmra.mrb[8].mxu0 %vm12743_vm12, %v12747_v4  ;;  %v11086_v50 = vcombine.high %v5494_v49, %v5498_v9  ;;  %v11085_v38 = vcombine.low %v5494_v49, %v5498_v9  ;;  %v5525_v9 = vld [vmem:[#allocation12 + $0xe00] sm:$0xff] }
 0x4ac   :  { %11220 = vmatmul.mubr.msk.bf16.vlgmr.msra.gmra.mrb[8].mxu1 %vm12743_vm12, %v12747_v4  ;;  %8315 = vmatpush1.bf16.msra.mxu0 %v11051_v1  ;;  %v4953_v1 = vadd.s32 %v4945_v21, %v13313_v11  ;;  %v5510_v11 = vld [vmem:[#allocation12 + $0xd88] sm:$0xff] }
 0x4ad   :  { %11199 = vmatprep.mubr.msk.bf16.mxu0 %vm12749_vm13, %v12756_v61  ;;  %8479 = vmatpush1.bf16.msra.mxu1 %v11053_v33  ;;  %v5505_v33 = vld [vmem:[#allocation12 + $0xd60] sm:$0xff] }
 0x4ae   :  { %11223 = vmatprep.mubr.msk.bf16.mxu1 %vm12749_vm13, %v12756_v61  ;;  %8316 = vmatprep.subr.bf16.mxu0 %v11060_v2  ;;  %v5502_v2 = vld [vmem:[#allocation12 + $0xd48] sm:$0xff]  ;;  %v12770_v57 = vadd.s32 %v12525_v59, %v4953_v1 }
 0x4af   :  { %8480 = vmatprep.subr.bf16.mxu1 %v11062_v16  ;;  %v11092_v16 = vcombine.high %v5501_v26, %v5505_v33  ;;  %v11094_v44 = vcombine.high %v5502_v2, %v5506_v56  ;;  %v11093_v48 = vcombine.low %v5502_v2, %v5506_v56  ;;  %v5518_v59 = vld [vmem:[#allocation12 + $0xdc8] sm:$0xff]  ;;  %v5533_v56 = vld [vmem:[#allocation12 + $0xe40] sm:$0xff] }
 0x4b0   :  { %8317 = vmatpush1.bf16.msra.mxu0 %v11059_v41  ;;  %13323 = vst [vmem:[#allocation31_spill] sm:$0xff] %v12770_v57  ;;  %v5509_v41 = vld [vmem:[#allocation12 + $0xd80] sm:$0xff]  ;;  %v4971_v37 = vadd.s32 4660, %v12770_v57 }
 0x4b1   :  { %8481 = vmatpush1.bf16.msra.mxu1 %v11061_v40  ;;  %8318 = vmatprep.subr.bf16.mxu0 %v11068_v13  ;;  %v5513_v40 = vld [vmem:[#allocation12 + $0xda0] sm:$0xff]  ;;  %v5514_v13 = vld [vmem:[#allocation12 + $0xda8] sm:$0xff] }
 0x4b2   :  { %8482 = vmatprep.subr.bf16.mxu1 %v11070_v51  ;;  %v11091_v51 = vcombine.low %v5501_v26, %v5505_v33  ;;  %v11100_v43 = vcombine.high %v5509_v41, %v5513_v40  ;;  %v11102_v47 = vcombine.high %v5510_v11, %v5514_v13  ;;  %v11099_v21 = vcombine.low %v5509_v41, %v5513_v40 }
 0x4b3   :  { %v4979_v15 = vshrl.u32 %v4971_v37, 16 }
 0x4b4   :  { %8319 = vmatpush1.bf16.msra.mxu0 %v11067_v6  ;;  %v5517_v6 = vld [vmem:[#allocation12 + $0xdc0] sm:$0xff] }
 0x4b5   :  { %8483 = vmatpush1.bf16.msra.mxu1 %v11069_v5  ;;  %8320 = vmatprep.subr.bf16.mxu0 %v11076_v23  ;;  %v5521_v5 = vld [vmem:[#allocation12 + $0xde0] sm:$0xff]  ;;  %v5522_v23 = vld [vmem:[#allocation12 + $0xde8] sm:$0xff]  ;;  %v4987_v33 = vxor.u32 %v4979_v15, %v4971_v37 }
 0x4b6   :  { %8484 = vmatprep.subr.bf16.mxu1 %v11078_v53  ;;  %v11101_v53 = vcombine.low %v5510_v11, %v5514_v13  ;;  %v11108_v62 = vcombine.high %v5517_v6, %v5521_v5  ;;  %v11110_v49 = vcombine.high %v5518_v59, %v5522_v23  ;;  %v11107_v1 = vcombine.low %v5517_v6, %v5521_v5  ;;  %v5554_v15 = vld [vmem:[#allocation12 + $0xee8] sm:$0xff] }
 0x4b7   :  { %v4995_v11 = vmul.u32 2146121005, %v4987_v33  ;;  %v5562_v33 = vld [vmem:[#allocation12 + $0xf28] sm:$0xff] }
 0x4b8   :  { %8321 = vmatpush1.bf16.msra.mxu0 %v11075_v12  ;;  %v5529_v12 = vld [vmem:[#allocation12 + $0xe20] sm:$0xff] }
 0x4b9   :  { %8485 = vmatpush1.bf16.msra.mxu1 %v11077_v35  ;;  %8322 = vmatprep.subr.bf16.mxu0 %v11084_v17  ;;  %v5526_v35 = vld [vmem:[#allocation12 + $0xe08] sm:$0xff]  ;;  %v11116_v26 = vcombine.high %v5525_v9, %v5529_v12 }
 0x4ba   :  { %8486 = vmatprep.subr.bf16.mxu1 %v11086_v50  ;;  %v5530_v17 = vld [vmem:[#allocation12 + $0xe28] sm:$0xff]  ;;  %v11109_v50 = vcombine.low %v5518_v59, %v5522_v23  ;;  %v5003_v59 = vshrl.u32 %v4995_v11, 15 }
 0x4bb   :  { %v11118_v2 = vcombine.high %v5526_v35, %v5530_v17  ;;  %v11117_v41 = vcombine.low %v5526_v35, %v5530_v17 }
 0x4bc   :  { %8323 = vmatpush1.bf16.msra.mxu0 %v11083_v54  ;;  %v5537_v54 = vld [vmem:[#allocation12 + $0xe60] sm:$0xff]  ;;  %v5011_v35 = vxor.u32 %v5003_v59, %v4995_v11  ;;  %v5578_v59 = vld [vmem:[#allocation12 + $0xfa8] sm:$0xff] }
 0x4bd   :  { %8487 = vmatpush1.bf16.msra.mxu1 %v11085_v38  ;;  %8324 = vmatprep.subr.bf16.mxu0 %v11092_v16  ;;  %v5534_v38 = vld [vmem:[#allocation12 + $0xe48] sm:$0xff]  ;;  %v11124_v40 = vcombine.high %v5533_v56, %v5537_v54  ;;  %v11123_v37 = vcombine.low %v5533_v56, %v5537_v54 }
 0x4be   :  { %8488 = vmatprep.subr.bf16.mxu1 %v11094_v44  ;;  %v5538_v16 = vld [vmem:[#allocation12 + $0xe68] sm:$0xff]  ;;  %v11115_v44 = vcombine.low %v5525_v9, %v5529_v12 }
 0x4bf   :  { %v11126_v13 = vcombine.high %v5534_v38, %v5538_v16  ;;  %v11125_v6 = vcombine.low %v5534_v38, %v5538_v16  ;;  %v5019_v38 = vmul.u32 2221713035, %v5011_v35  ;;  %v5586_v35 = vld [vmem:[#allocation12 + $0xfe8] sm:$0xff] }
 0x4c0   :  { %8325 = vmatpush1.bf16.msra.mxu0 %v11091_v51  ;;  %v5541_v51 = vld [vmem:[#allocation12 + $0xe80] sm:$0xff] }
 0x4c1   :  { %8489 = vmatpush1.bf16.msra.mxu1 %v11093_v48  ;;  %8326 = vmatprep.subr.bf16.mxu0 %v11100_v43  ;;  %v5545_v48 = vld [vmem:[#allocation12 + $0xea0] sm:$0xff]  ;;  %v5542_v43 = vld [vmem:[#allocation12 + $0xe88] sm:$0xff] }
 0x4c2   :  { %8490 = vmatprep.subr.bf16.mxu1 %v11102_v47  ;;  %v5546_v47 = vld [vmem:[#allocation12 + $0xea8] sm:$0xff]  ;;  %v11132_v5 = vcombine.high %v5541_v51, %v5545_v48 }
 0x4c3   :  { %v11134_v23 = vcombine.high %v5542_v43, %v5546_v47  ;;  %v11133_v9 = vcombine.low %v5542_v43, %v5546_v47  ;;  %v5027_v43 = vshrl.u32 %v5019_v38, 16 }
 0x4c4   :  { %8327 = vmatpush1.bf16.msra.mxu0 %v11099_v21  ;;  %v5549_v21 = vld [vmem:[#allocation12 + $0xec0] sm:$0xff] }
 0x4c5   :  { %8491 = vmatpush1.bf16.msra.mxu1 %v11101_v53  ;;  %8328 = vmatprep.subr.bf16.mxu0 %v11108_v62  ;;  %v5553_v53 = vld [vmem:[#allocation12 + $0xee0] sm:$0xff]  ;;  %v5550_v62 = vld [vmem:[#allocation12 + $0xec8] sm:$0xff] }
 0x4c6   :  { %8492 = vmatprep.subr.bf16.mxu1 %v11110_v49  ;;  %v11131_v49 = vcombine.low %v5541_v51, %v5545_v48  ;;  %v11140_v12 = vcombine.high %v5549_v21, %v5553_v53  ;;  %v11142_v17 = vcombine.high %v5550_v62, %v5554_v15  ;;  %v11141_v56 = vcombine.low %v5550_v62, %v5554_v15 }
 0x4c7   :  { %v5035_v62 = vxor.u32 %v5027_v43, %v5019_v38 }
 0x4c8   :  { %8329 = vmatpush1.bf16.msra.mxu0 %v11107_v1  ;;  %v5557_v1 = vld [vmem:[#allocation12 + $0xf00] sm:$0xff] }
 0x4c9   :  { %8493 = vmatpush1.bf16.msra.mxu1 %v11109_v50  ;;  %8330 = vmatprep.subr.bf16.mxu0 %v11116_v26  ;;  %v5561_v50 = vld [vmem:[#allocation12 + $0xf20] sm:$0xff]  ;;  %v5558_v26 = vld [vmem:[#allocation12 + $0xf08] sm:$0xff] }
 0x4ca   :  { %8494 = vmatprep.subr.bf16.mxu1 %v11118_v2  ;;  %v11139_v2 = vcombine.low %v5549_v21, %v5553_v53  ;;  %v11148_v54 = vcombine.high %v5557_v1, %v5561_v50  ;;  %v11150_v16 = vcombine.high %v5558_v26, %v5562_v33  ;;  %v11147_v11 = vcombine.low %v5557_v1, %v5561_v50 }
 0x4cb   :  { %v11149_v51 = vcombine.low %v5558_v26, %v5562_v33  ;;  %v5043_v26 = vshrl.u32 %v5035_v62, 31  ;;  %v5100_v62 = vld [vmem:[#allocation12 + $0xb8] sm:$0xff] }
 0x4cc   :  { %8331 = vmatpush1.bf16.msra.mxu0 %v11115_v44  ;;  %v5565_v44 = vld [vmem:[#allocation12 + $0xf40] sm:$0xff] }
 0x4cd   :  { %8495 = vmatpush1.bf16.msra.mxu1 %v11117_v41  ;;  %8332 = vmatprep.subr.bf16.mxu0 %v11124_v40  ;;  %v5569_v41 = vld [vmem:[#allocation12 + $0xf60] sm:$0xff]  ;;  %v5566_v40 = vld [vmem:[#allocation12 + $0xf48] sm:$0xff]  ;;  %vm5051_vm14 = vcmp.eq.s32.totalorder %v5043_v26, 1 }
 0x4ce   :  { %8496 = vmatprep.subr.bf16.mxu1 %v11126_v13  ;;  %v5570_v13 = vld [vmem:[#allocation12 + $0xf68] sm:$0xff]  ;;  %v11156_v48 = vcombine.high %v5565_v44, %v5569_v41  ;;  %vm12774_vm15 = vmpackc.low %vm5051_vm14, %vm5051_vm14 }
 0x4cf   :  { %v11158_v47 = vcombine.high %v5566_v40, %v5570_v13  ;;  %v11157_v21 = vcombine.low %v5566_v40, %v5570_v13 }
 0x4d0   :  { %8333 = vmatpush1.bf16.msra.mxu0 %v11123_v37  ;;  %v5573_v37 = vld [vmem:[#allocation12 + $0xf80] sm:$0xff] }
 0x4d1   :  { %8497 = vmatpush1.bf16.msra.mxu1 %v11125_v6  ;;  %8334 = vmatprep.subr.bf16.mxu0 %v11132_v5  ;;  %v5577_v6 = vld [vmem:[#allocation12 + $0xfa0] sm:$0xff]  ;;  %v5574_v5 = vld [vmem:[#allocation12 + $0xf88] sm:$0xff] }
 0x4d2   :  { %8498 = vmatprep.subr.bf16.mxu1 %v11134_v23  ;;  %v11155_v23 = vcombine.low %v5565_v44, %v5569_v41  ;;  %v11164_v53 = vcombine.high %v5573_v37, %v5577_v6  ;;  %v11166_v15 = vcombine.high %v5574_v5, %v5578_v59  ;;  %v11165_v1 = vcombine.low %v5574_v5, %v5578_v59  ;;  %v5095_v59 = vld [vmem:[#allocation12 + $0x90] sm:$0xff] }
 0x4d3   :  { %v5059_v41 = vmax.f32 %v12689_v46, 0.0 }
 0x4d4   :  { %8335 = vmatpush1.bf16.msra.mxu0 %v11131_v49  ;;  %v5581_v49 = vld [vmem:[#allocation12 + $0xfc0] sm:$0xff] }
 0x4d5   :  { %8499 = vmatpush1.bf16.msra.mxu1 %v11133_v9  ;;  %8336 = vmatprep.subr.bf16.mxu0 %v11140_v12  ;;  %v5585_v9 = vld [vmem:[#allocation12 + $0xfe0] sm:$0xff]  ;;  %v5582_v12 = vld [vmem:[#allocation12 + $0xfc8] sm:$0xff] }
 0x4d6   :  { %8500 = vmatprep.subr.bf16.mxu1 %v11142_v17  ;;  %v11163_v17 = vcombine.low %v5573_v37, %v5577_v6  ;;  %v11172_v50 = vcombine.high %v5581_v49, %v5585_v9  ;;  %v11174_v33 = vcombine.high %v5582_v12, %v5586_v35  ;;  %v11171_v38 = vcombine.low %v5581_v49, %v5585_v9  ;;  %v5092_v37 = vld [vmem:[#allocation12 + $0x78] sm:$0xff] }
 0x4d7   :  { %v11173_v44 = vcombine.low %v5582_v12, %v5586_v35  ;;  %v12778_v6 = vpack.c.bf16 %v5059_v41, %v5059_v41  ;;  %v5103_v35 = vld [vmem:[#allocation12 + $0xd0] sm:$0xff] }
 0x4d8   :  { %8337 = vmatpush1.bf16.msra.mxu0 %v11139_v2  ;;  %v5079_v2 = vld [vmem:[#allocation12 + $0x10] sm:$0xff] }
 0x4d9   :  { %8501 = vmatpush1.bf16.msra.mxu1 %v11141_v56  ;;  %8338 = vmatprep.subr.bf16.mxu0 %v11148_v54  ;;  %v5083_v56 = vld [vmem:[#allocation12 + $0x30] sm:$0xff]  ;;  %v5080_v54 = vld [vmem:[#allocation12 + $0x18] sm:$0xff] }
 0x4da   :  { %8502 = vmatprep.subr.bf16.mxu1 %v11150_v16  ;;  %v5084_v16 = vld [vmem:[#allocation12 + $0x38] sm:$0xff]  ;;  %v10672_v40 = vcombine.high %v5079_v2, %v5083_v56  ;;  %v10671_v43 = vcombine.low %v5079_v2, %v5083_v56 }
 0x4db   :  { %v10674_v13 = vcombine.high %v5080_v54, %v5084_v16  ;;  %v10673_v5 = vcombine.low %v5080_v54, %v5084_v16  ;;  %v5111_v54 = vld [vmem:[#allocation12 + $0x110] sm:$0xff] }
 0x4dc   :  { %8339 = vmatpush1.bf16.msra.mxu0 %v11147_v11  ;;  %v5087_v11 = vld [vmem:[#allocation12 + $0x50] sm:$0xff] }
 0x4dd   :  { %8503 = vmatpush1.bf16.msra.mxu1 %v11149_v51  ;;  %8340 = vmatprep.subr.bf16.mxu0 %v11156_v48  ;;  %v5091_v51 = vld [vmem:[#allocation12 + $0x70] sm:$0xff]  ;;  %v11608_v48 = vld [vmem:[#allocation18 + $0x10] sm:$0xff]  }
 0x4de   :  { %8504 = vmatprep.subr.bf16.mxu1 %v11158_v47  ;;  %v5088_v47 = vld [vmem:[#allocation12 + $0x58] sm:$0xff]  ;;  %v10680_v46 = vcombine.high %v5087_v11, %v5091_v51  ;;  %v5115_v16 = vld [vmem:[#allocation12 + $0x130] sm:$0xff] }
 0x4df   :  { %v10681_v49 = vcombine.low %v5088_v47, %v5092_v37  ;;  %v10704_v41 = vcombine.high %v5111_v54, %v5115_v16 }
 0x4e0   :  { %8341 = vmatpush1.bf16.msra.mxu0 %v11155_v23  ;;  %v5099_v23 = vld [vmem:[#allocation12 + $0xb0] sm:$0xff] }
 0x4e1   :  { %8505 = vmatpush1.bf16.msra.mxu1 %v11157_v21  ;;  %8342 = vmatprep.subr.bf16.mxu0 %v11164_v53  ;;  %v10682_v21 = vcombine.high %v5088_v47, %v5092_v37  ;;  %v5096_v53 = vld [vmem:[#allocation12 + $0x98] sm:$0xff]  ;;  %v10688_v9 = vcombine.high %v5095_v59, %v5099_v23  ;;  %v10687_v26 = vcombine.low %v5095_v59, %v5099_v23  ;;  %v5127_v59 = vld [vmem:[#allocation12 + $0x190] sm:$0xff] }
 0x4e2   :  { %8506 = vmatprep.subr.bf16.mxu1 %v11166_v15  ;;  %v10679_v15 = vcombine.low %v5087_v11, %v5091_v51  ;;  %v10690_v12 = vcombine.high %v5096_v53, %v5100_v62  ;;  %v5123_v11 = vld [vmem:[#allocation12 + $0x170] sm:$0xff]  ;;  %v5120_v51 = vld [vmem:[#allocation12 + $0x158] sm:$0xff]  ;;  %v10703_v47 = vcombine.low %v5111_v54, %v5115_v16 }
 0x4e3   :  { %v5131_v23 = vld [vmem:[#allocation12 + $0x1b0] sm:$0xff]  ;;  %v5144_v16 = vld [vmem:[#allocation12 + $0x218] sm:$0xff] }
 0x4e4   :  { %8343 = vmatpush1.bf16.msra.mxu0 %v11163_v17  ;;  %v5107_v17 = vld [vmem:[#allocation12 + $0xf0] sm:$0xff] }
 0x4e5   :  { %8507 = vmatpush1.bf16.msra.mxu1 %v11165_v1  ;;  %8344 = vmatprep.subr.bf16.mxu0 %v11172_v50  ;;  %v5104_v1 = vld [vmem:[#allocation12 + $0xd8] sm:$0xff]  ;;  %v10696_v2 = vcombine.high %v5103_v35, %v5107_v17  ;;  %v5147_v54 = vld [vmem:[#allocation12 + $0x230] sm:$0xff] }
 0x4e6   :  { %8508 = vmatprep.subr.bf16.mxu1 %v11174_v33  ;;  %v5108_v50 = vld [vmem:[#allocation12 + $0xf8] sm:$0xff]  ;;  %v10689_v33 = vcombine.low %v5096_v53, %v5100_v62 }
 0x4e7   :  { %v10698_v56 = vcombine.high %v5104_v1, %v5108_v50  ;;  %v5132_v53 = vld [vmem:[#allocation12 + $0x1b8] sm:$0xff] }
 0x4e8   :  { %8345 = vmatpush1.bf16.msra.mxu0 %v11171_v38  ;;  %v5112_v38 = vld [vmem:[#allocation12 + $0x118] sm:$0xff] }
 0x4e9   :  { %8509 = vmatpush1.bf16.msra.mxu1 %v11173_v44  ;;  %8519 = vmatprep.subr.bf16.mxu0 %v10672_v40  ;;  %v10697_v44 = vcombine.low %v5104_v1, %v5108_v50  ;;  %v10706_v40 = vcombine.high %v5112_v38, %v5116_v7  ;;  %v10705_v37 = vcombine.low %v5112_v38, %v5116_v7  ;;  %v5140_v1 = vld [vmem:[#allocation12 + $0x1f8] sm:$0xff] }
 0x4ea   :  { %8683 = vmatprep.subr.bf16.mxu1 %v10674_v13  ;;  %v5119_v13 = vld [vmem:[#allocation12 + $0x150] sm:$0xff]  ;;  %v10719_v50 = vcombine.low %v5127_v59, %v5131_v23  ;;  %v5148_v38 = vld [vmem:[#allocation12 + $0x238] sm:$0xff] }
 0x4eb   :  { %11202 = vmatmul.mubr.msk.bf16.vlgmr.msra.gmra.mrb[8].mxu0 %vm12774_vm15, %v12778_v6  ;;  %v10711_v62 = vcombine.low %v5119_v13, %v5123_v11 }
 0x4ec   :  { %11226 = vmatmul.mubr.msk.bf16.vlgmr.msra.gmra.mrb[8].mxu1 %vm12774_vm15, %v12778_v6  ;;  %8520 = vmatpush1.bf16.msra.mxu0 %v10671_v43  ;;  %v5124_v43 = vld [vmem:[#allocation12 + $0x178] sm:$0xff] }
 0x4ed   :  { %11229 = vmatprep.mubr.msk.bf16.mxu0 %vm12640_vm3, %v12644_v60  ;;  %8684 = vmatpush1.bf16.msra.mxu1 %v10673_v5  ;;  %v10712_v5 = vcombine.high %v5119_v13, %v5123_v11  ;;  %v5155_v13 = vld [vmem:[#allocation12 + $0x270] sm:$0xff]  ;;  %v5152_v11 = vld [vmem:[#allocation12 + $0x258] sm:$0xff] }
 0x4ee   :  { %11253 = vmatprep.mubr.msk.bf16.mxu1 %vm12640_vm3, %v12644_v60  ;;  %8521 = vmatprep.subr.bf16.mxu0 %v10680_v46  ;;  %v10695_v60 = vcombine.low %v5103_v35, %v5107_v17  ;;  %v10714_v46 = vcombine.high %v5120_v51, %v5124_v43  ;;  %v5139_v35 = vld [vmem:[#allocation12 + $0x1f0] sm:$0xff]  ;;  %v5136_v17 = vld [vmem:[#allocation12 + $0x1d8] sm:$0xff] }
 0x4ef   :  { %8685 = vmatprep.subr.bf16.mxu1 %v10682_v21  ;;  %v5128_v21 = vld [vmem:[#allocation12 + $0x198] sm:$0xff] }
 0x4f0   :  { %8522 = vmatpush1.bf16.msra.mxu0 %v10679_v15  ;;  %v10713_v15 = vcombine.low %v5120_v51, %v5124_v43  ;;  %v5156_v51 = vld [vmem:[#allocation12 + $0x278] sm:$0xff] }
 0x4f1   :  { %8686 = vmatpush1.bf16.msra.mxu1 %v10681_v49  ;;  %8523 = vmatprep.subr.bf16.mxu0 %v10688_v9  ;;  %v10720_v49 = vcombine.high %v5127_v59, %v5131_v23  ;;  %v10722_v9 = vcombine.high %v5128_v21, %v5132_v53  ;;  %v5163_v59 = vld [vmem:[#allocation12 + $0x2b0] sm:$0xff]  ;;  %v5160_v23 = vld [vmem:[#allocation12 + $0x298] sm:$0xff] }
 0x4f2   :  { %8687 = vmatprep.subr.bf16.mxu1 %v10690_v12  ;;  %v5135_v12 = vld [vmem:[#allocation12 + $0x1d0] sm:$0xff] }
 0x4f3   :  { %v10727_v7 = vcombine.low %v5135_v12, %v5139_v35 }
 0x4f4   :  { %8524 = vmatpush1.bf16.msra.mxu0 %v10687_v26  ;;  %v10721_v26 = vcombine.low %v5128_v21, %v5132_v53  ;;  %v5164_v21 = vld [vmem:[#allocation12 + $0x2b8] sm:$0xff] }
 0x4f5   :  { %8688 = vmatpush1.bf16.msra.mxu1 %v10689_v33  ;;  %8525 = vmatprep.subr.bf16.mxu0 %v10696_v2  ;;  %v10728_v33 = vcombine.high %v5135_v12, %v5139_v35  ;;  %v10730_v2 = vcombine.high %v5136_v17, %v5140_v1  ;;  %v5171_v12 = vld [vmem:[#allocation12 + $0x2f0] sm:$0xff]  ;;  %v5168_v35 = vld [vmem:[#allocation12 + $0x2d8] sm:$0xff] }
 0x4f6   :  { %8689 = vmatprep.subr.bf16.mxu1 %v10698_v56  ;;  %v5143_v56 = vld [vmem:[#allocation12 + $0x210] sm:$0xff] }
 0x4f7   :  { %v10735_v43 = vcombine.low %v5143_v56, %v5147_v54 }
 0x4f8   :  { %8526 = vmatpush1.bf16.msra.mxu0 %v10695_v60  ;;  %v10729_v60 = vcombine.low %v5136_v17, %v5140_v1  ;;  %v5172_v17 = vld [vmem:[#allocation12 + $0x2f8] sm:$0xff] }
 0x4f9   :  { %8690 = vmatpush1.bf16.msra.mxu1 %v10697_v44  ;;  %8527 = vmatprep.subr.bf16.mxu0 %v10704_v41  ;;  %v10736_v44 = vcombine.high %v5143_v56, %v5147_v54  ;;  %v10738_v41 = vcombine.high %v5144_v16, %v5148_v38  ;;  %v5179_v56 = vld [vmem:[#allocation12 + $0x330] sm:$0xff]  ;;  %v5176_v54 = vld [vmem:[#allocation12 + $0x318] sm:$0xff] }
 0x4fa   :  { %8691 = vmatprep.subr.bf16.mxu1 %v10706_v40  ;;  %v5151_v40 = vld [vmem:[#allocation12 + $0x250] sm:$0xff] }
 0x4fb   :  { %v10743_v53 = vcombine.low %v5151_v40, %v5155_v13 }
 0x4fc   :  { %8528 = vmatpush1.bf16.msra.mxu0 %v10703_v47  ;;  %v10737_v47 = vcombine.low %v5144_v16, %v5148_v38  ;;  %v5180_v16 = vld [vmem:[#allocation12 + $0x338] sm:$0xff] }
 0x4fd   :  { %8692 = vmatpush1.bf16.msra.mxu1 %v10705_v37  ;;  %8529 = vmatprep.subr.bf16.mxu0 %v10712_v5  ;;  %v10744_v37 = vcombine.high %v5151_v40, %v5155_v13  ;;  %v10746_v5 = vcombine.high %v5152_v11, %v5156_v51  ;;  %v5187_v40 = vld [vmem:[#allocation12 + $0x370] sm:$0xff]  ;;  %v5184_v13 = vld [vmem:[#allocation12 + $0x358] sm:$0xff] }
 0x4fe   :  { %8693 = vmatprep.subr.bf16.mxu1 %v10714_v46  ;;  %v5159_v46 = vld [vmem:[#allocation12 + $0x290] sm:$0xff] }
 0x4ff   :  { %v10751_v1 = vcombine.low %v5159_v46, %v5163_v59 }
 0x500   :  { %8530 = vmatpush1.bf16.msra.mxu0 %v10711_v62  ;;  %v10745_v62 = vcombine.low %v5152_v11, %v5156_v51  ;;  %v5188_v11 = vld [vmem:[#allocation12 + $0x378] sm:$0xff] }
 0x501   :  { %8694 = vmatpush1.bf16.msra.mxu1 %v10713_v15  ;;  %8531 = vmatprep.subr.bf16.mxu0 %v10720_v49  ;;  %v10752_v15 = vcombine.high %v5159_v46, %v5163_v59  ;;  %v10754_v49 = vcombine.high %v5160_v23, %v5164_v21  ;;  %v5195_v46 = vld [vmem:[#allocation12 + $0x3b0] sm:$0xff]  ;;  %v5192_v59 = vld [vmem:[#allocation12 + $0x398] sm:$0xff] }
 0x502   :  { %8695 = vmatprep.subr.bf16.mxu1 %v10722_v9  ;;  %v5167_v9 = vld [vmem:[#allocation12 + $0x2d0] sm:$0xff] }
 0x503   :  { %v10759_v38 = vcombine.low %v5167_v9, %v5171_v12 }
 0x504   :  { %8532 = vmatpush1.bf16.msra.mxu0 %v10719_v50  ;;  %v10753_v50 = vcombine.low %v5160_v23, %v5164_v21  ;;  %v5196_v23 = vld [vmem:[#allocation12 + $0x3b8] sm:$0xff] }
 0x505   :  { %8696 = vmatpush1.bf16.msra.mxu1 %v10721_v26  ;;  %8533 = vmatprep.subr.bf16.mxu0 %v10728_v33  ;;  %v10760_v26 = vcombine.high %v5167_v9, %v5171_v12  ;;  %v10762_v33 = vcombine.high %v5168_v35, %v5172_v17  ;;  %v5203_v9 = vld [vmem:[#allocation12 + $0x3f0] sm:$0xff]  ;;  %v5200_v12 = vld [vmem:[#allocation12 + $0x3d8] sm:$0xff] }
 0x506   :  { %8697 = vmatprep.subr.bf16.mxu1 %v10730_v2  ;;  %v5175_v2 = vld [vmem:[#allocation12 + $0x310] sm:$0xff] }
 0x507   :  { %v10767_v51 = vcombine.low %v5175_v2, %v5179_v56 }
 0x508   :  { %8534 = vmatpush1.bf16.msra.mxu0 %v10727_v7  ;;  %v10761_v7 = vcombine.low %v5168_v35, %v5172_v17  ;;  %v5204_v35 = vld [vmem:[#allocation12 + $0x3f8] sm:$0xff] }
 0x509   :  { %8698 = vmatpush1.bf16.msra.mxu1 %v10729_v60  ;;  %8535 = vmatprep.subr.bf16.mxu0 %v10736_v44  ;;  %v10768_v60 = vcombine.high %v5175_v2, %v5179_v56  ;;  %v10770_v44 = vcombine.high %v5176_v54, %v5180_v16  ;;  %v5211_v2 = vld [vmem:[#allocation12 + $0x430] sm:$0xff]  ;;  %v5208_v56 = vld [vmem:[#allocation12 + $0x418] sm:$0xff] }
 0x50a   :  { %8699 = vmatprep.subr.bf16.mxu1 %v10738_v41  ;;  %v5183_v41 = vld [vmem:[#allocation12 + $0x350] sm:$0xff] }
 0x50b   :  { %v10775_v21 = vcombine.low %v5183_v41, %v5187_v40 }
 0x50c   :  { %8536 = vmatpush1.bf16.msra.mxu0 %v10735_v43  ;;  %v10769_v43 = vcombine.low %v5176_v54, %v5180_v16  ;;  %v5212_v54 = vld [vmem:[#allocation12 + $0x438] sm:$0xff] }
 0x50d   :  { %8700 = vmatpush1.bf16.msra.mxu1 %v10737_v47  ;;  %8537 = vmatprep.subr.bf16.mxu0 %v10744_v37  ;;  %v10776_v47 = vcombine.high %v5183_v41, %v5187_v40  ;;  %v10778_v37 = vcombine.high %v5184_v13, %v5188_v11  ;;  %v5219_v41 = vld [vmem:[#allocation12 + $0x470] sm:$0xff] }
 0x50e   :  { %8701 = vmatprep.subr.bf16.mxu1 %v10746_v5  ;;  %v5191_v5 = vld [vmem:[#allocation12 + $0x390] sm:$0xff] }
 0x50f   :  { %v10783_v17 = vcombine.low %v5191_v5, %v5195_v46 }
 0x510   :  { %8538 = vmatpush1.bf16.msra.mxu0 %v10743_v53  ;;  %v10777_v53 = vcombine.low %v5184_v13, %v5188_v11  ;;  %v5216_v13 = vld [vmem:[#allocation12 + $0x458] sm:$0xff] }
 0x511   :  { %8702 = vmatpush1.bf16.msra.mxu1 %v10745_v62  ;;  %8539 = vmatprep.subr.bf16.mxu0 %v10752_v15  ;;  %v10784_v62 = vcombine.high %v5191_v5, %v5195_v46  ;;  %v10786_v15 = vcombine.high %v5192_v59, %v5196_v23  ;;  %v5220_v11 = vld [vmem:[#allocation12 + $0x478] sm:$0xff] }
 0x512   :  { %8703 = vmatprep.subr.bf16.mxu1 %v10754_v49  ;;  %v5199_v49 = vld [vmem:[#allocation12 + $0x3d0] sm:$0xff]  ;;  %v10810_v5 = vcombine.high %v5216_v13, %v5220_v11  ;;  %v5224_v46 = vld [vmem:[#allocation12 + $0x498] sm:$0xff] }
 0x513   :  { %v10791_v16 = vcombine.low %v5199_v49, %v5203_v9 }
 0x514   :  { %8540 = vmatpush1.bf16.msra.mxu0 %v10751_v1  ;;  %v10785_v1 = vcombine.low %v5192_v59, %v5196_v23  ;;  %v5228_v59 = vld [vmem:[#allocation12 + $0x4b8] sm:$0xff] }
 0x515   :  { %8704 = vmatpush1.bf16.msra.mxu1 %v10753_v50  ;;  %8541 = vmatprep.subr.bf16.mxu0 %v10760_v26  ;;  %v10792_v50 = vcombine.high %v5199_v49, %v5203_v9  ;;  %v10794_v26 = vcombine.high %v5200_v12, %v5204_v35  ;;  %v5235_v49 = vld [vmem:[#allocation12 + $0x4f0] sm:$0xff] }
 0x516   :  { %8705 = vmatprep.subr.bf16.mxu1 %v10762_v33  ;;  %v5207_v33 = vld [vmem:[#allocation12 + $0x410] sm:$0xff] }
 0x517   :  { %v10799_v40 = vcombine.low %v5207_v33, %v5211_v2 }
 0x518   :  { %8542 = vmatpush1.bf16.msra.mxu0 %v10759_v38  ;;  %v10793_v38 = vcombine.low %v5200_v12, %v5204_v35  ;;  %v10817_v12 = vcombine.low %v5224_v46, %v5228_v59 }
 0x519   :  { %8706 = vmatpush1.bf16.msra.mxu1 %v10761_v7  ;;  %8543 = vmatprep.subr.bf16.mxu0 %v10768_v60  ;;  %v10800_v7 = vcombine.high %v5207_v33, %v5211_v2  ;;  %v10802_v60 = vcombine.high %v5208_v56, %v5212_v54 }
 0x51a   :  { %8707 = vmatprep.subr.bf16.mxu1 %v10770_v44  ;;  %v5215_v44 = vld [vmem:[#allocation12 + $0x450] sm:$0xff] }
 0x51b   :  { %v10807_v23 = vcombine.low %v5215_v44, %v5219_v41 }
 0x51c   :  { %8544 = vmatpush1.bf16.msra.mxu0 %v10767_v51  ;;  %v10801_v51 = vcombine.low %v5208_v56, %v5212_v54  ;;  %v5247_v54 = vld [vmem:[#allocation12 + $0x550] sm:$0xff] }
 0x51d   :  { %8708 = vmatpush1.bf16.msra.mxu1 %v10769_v43  ;;  %8545 = vmatprep.subr.bf16.mxu0 %v10776_v47  ;;  %v10808_v43 = vcombine.high %v5215_v44, %v5219_v41  ;;  %v5223_v47 = vld [vmem:[#allocation12 + $0x490] sm:$0xff] }
 0x51e   :  { %8709 = vmatprep.subr.bf16.mxu1 %v10778_v37  ;;  %v5227_v37 = vld [vmem:[#allocation12 + $0x4b0] sm:$0xff] }
 0x51f   :  { %v10815_v9 = vcombine.low %v5223_v47, %v5227_v37 }
 0x520   :  { %8546 = vmatpush1.bf16.msra.mxu0 %v10775_v21  ;;  %v10809_v21 = vcombine.low %v5216_v13, %v5220_v11  ;;  %v5255_v13 = vld [vmem:[#allocation12 + $0x590] sm:$0xff] }
 0x521   :  { %8710 = vmatpush1.bf16.msra.mxu1 %v10777_v53  ;;  %8547 = vmatprep.subr.bf16.mxu0 %v10784_v62  ;;  %v10816_v53 = vcombine.high %v5223_v47, %v5227_v37  ;;  %v10818_v62 = vcombine.high %v5224_v46, %v5228_v59  ;;  %v5259_v11 = vld [vmem:[#allocation12 + $0x5b0] sm:$0xff] }
 0x522   :  { %8711 = vmatprep.subr.bf16.mxu1 %v10786_v15  ;;  %v5231_v15 = vld [vmem:[#allocation12 + $0x4d0] sm:$0xff] }
 0x523   :  { %v10824_v35 = vcombine.high %v5231_v15, %v5235_v49  ;;  %v5263_v59 = vld [vmem:[#allocation12 + $0x5d0] sm:$0xff] }
 0x524   :  { %8548 = vmatpush1.bf16.msra.mxu0 %v10783_v17 }
 0x525   :  { %8712 = vmatpush1.bf16.msra.mxu1 %v10785_v1  ;;  %8549 = vmatprep.subr.bf16.mxu0 %v10792_v50  ;;  %v5239_v1 = vld [vmem:[#allocation12 + $0x510] sm:$0xff] }
 0x526   :  { %8713 = vmatprep.subr.bf16.mxu1 %v10794_v26  ;;  %v5243_v50 = vld [vmem:[#allocation12 + $0x530] sm:$0xff]  ;;  %v5240_v26 = vld [vmem:[#allocation12 + $0x518] sm:$0xff] }
 0x527   :  { %v10832_v2 = vcombine.high %v5239_v1, %v5243_v50  ;;  %v10834_v56 = vcombine.high %v5240_v26, %v5244_v29  ;;  %v10833_v44 = vcombine.low %v5240_v26, %v5244_v29  ;;  %v5279_v29 = vld [vmem:[#allocation12 + $0x650] sm:$0xff] }
 0x528   :  { %8550 = vmatpush1.bf16.msra.mxu0 %v10791_v16  ;;  %v5251_v16 = vld [vmem:[#allocation12 + $0x570] sm:$0xff] }
 0x529   :  { %8714 = vmatpush1.bf16.msra.mxu1 %v10793_v38  ;;  %8560 = vmatprep.subr.bf16.mxu0 %v10800_v7  ;;  %v5248_v38 = vld [vmem:[#allocation12 + $0x558] sm:$0xff]  ;;  %v10840_v41 = vcombine.high %v5247_v54, %v5251_v16  ;;  %v10839_v47 = vcombine.low %v5247_v54, %v5251_v16 }
 0x52a   :  { %8724 = vmatprep.subr.bf16.mxu1 %v10802_v60  ;;  %v5252_v7 = vld [vmem:[#allocation12 + $0x578] sm:$0xff]  ;;  %v10831_v60 = vcombine.low %v5239_v1, %v5243_v50 }
 0x52b   :  { %11232 = vmatmul.mubr.msk.bf16.vlgmr.msra.gmra.mrb[12].mxu0 %vm12646_vm4, %v12650_v28  ;;  %v10841_v37 = vcombine.low %v5248_v38, %v5252_v7 }
 0x52c   :  { %11256 = vmatmul.mubr.msk.bf16.vlgmr.msra.gmra.mrb[12].mxu1 %vm12646_vm4, %v12650_v28  ;;  %8561 = vmatpush1.bf16.msra.mxu0 %v10799_v40  ;;  %v5236_v28 = vld [vmem:[#allocation12 + $0x4f8] sm:$0xff]  ;;  %v10842_v40 = vcombine.high %v5248_v38, %v5252_v7  ;;  %v5287_v7 = vld [vmem:[#allocation12 + $0x690] sm:$0xff] }
 0x52d   :  { %11235 = vmatprep.mubr.msk.bf16.mxu0 %vm12652_vm5, %v12672_v14  ;;  %8725 = vmatpush1.bf16.msra.mxu1 %v10801_v51  ;;  %v10826_v17 = vcombine.high %v5232_v3, %v5236_v28  ;;  %v10825_v33 = vcombine.low %v5232_v3, %v5236_v28  ;;  %v5256_v51 = vld [vmem:[#allocation12 + $0x598] sm:$0xff]  ;;  %v5271_v28 = vld [vmem:[#allocation12 + $0x610] sm:$0xff] }
 0x52e   :  { %11259 = vmatprep.mubr.msk.bf16.mxu1 %vm12652_vm5, %v12672_v14  ;;  %8562 = vmatprep.subr.bf16.mxu0 %v10808_v43  ;;  %v10823_v14 = vcombine.low %v5231_v15, %v5235_v49  ;;  %v5260_v43 = vld [vmem:[#allocation12 + $0x5b8] sm:$0xff] }
 0x52f   :  { %8726 = vmatprep.subr.bf16.mxu1 %v10810_v5  ;;  %v10848_v5 = vcombine.high %v5255_v13, %v5259_v11  ;;  %v10850_v46 = vcombine.high %v5256_v51, %v5260_v43  ;;  %v10849_v15 = vcombine.low %v5256_v51, %v5260_v43  ;;  %v5295_v43 = vld [vmem:[#allocation12 + $0x6d0] sm:$0xff] }
 0x530   :  { %8563 = vmatpush1.bf16.msra.mxu0 %v10807_v23  ;;  %v5267_v23 = vld [vmem:[#allocation12 + $0x5f0] sm:$0xff] }
 0x531   :  { %8727 = vmatpush1.bf16.msra.mxu1 %v10809_v21  ;;  %8564 = vmatprep.subr.bf16.mxu0 %v10816_v53  ;;  %v5264_v21 = vld [vmem:[#allocation12 + $0x5d8] sm:$0xff]  ;;  %v10856_v49 = vcombine.high %v5263_v59, %v5267_v23 }
 0x532   :  { %8728 = vmatprep.subr.bf16.mxu1 %v10818_v62  ;;  %v5268_v53 = vld [vmem:[#allocation12 + $0x5f8] sm:$0xff]  ;;  %v10847_v62 = vcombine.low %v5255_v13, %v5259_v11 }
 0x533   :  { %v10858_v3 = vcombine.high %v5264_v21, %v5268_v53  ;;  %v10857_v1 = vcombine.low %v5264_v21, %v5268_v53  ;;  %v5303_v53 = vld [vmem:[#allocation12 + $0x710] sm:$0xff] }
 0x534   :  { %8565 = vmatpush1.bf16.msra.mxu0 %v10815_v9  ;;  %v5275_v9 = vld [vmem:[#allocation12 + $0x630] sm:$0xff] }
 0x535   :  { %8729 = vmatpush1.bf16.msra.mxu1 %v10817_v12  ;;  %8566 = vmatprep.subr.bf16.mxu0 %v10824_v35  ;;  %v5272_v12 = vld [vmem:[#allocation12 + $0x618] sm:$0xff]  ;;  %v10864_v50 = vcombine.high %v5271_v28, %v5275_v9 }
 0x536   :  { %8730 = vmatprep.subr.bf16.mxu1 %v10826_v17  ;;  %v5276_v35 = vld [vmem:[#allocation12 + $0x638] sm:$0xff]  ;;  %v10855_v17 = vcombine.low %v5263_v59, %v5267_v23 }
 0x537   :  { %v10866_v26 = vcombine.high %v5272_v12, %v5276_v35  ;;  %v10865_v54 = vcombine.low %v5272_v12, %v5276_v35  ;;  %v5311_v35 = vld [vmem:[#allocation12 + $0x750] sm:$0xff] }
 0x538   :  { %8567 = vmatpush1.bf16.msra.mxu0 %v10823_v14  ;;  %v5283_v14 = vld [vmem:[#allocation12 + $0x670] sm:$0xff] }
 0x539   :  { %8731 = vmatpush1.bf16.msra.mxu1 %v10825_v33  ;;  %8568 = vmatprep.subr.bf16.mxu0 %v10832_v2  ;;  %v5280_v33 = vld [vmem:[#allocation12 + $0x658] sm:$0xff]  ;;  %v10872_v16 = vcombine.high %v5279_v29, %v5283_v14 }
 0x53a   :  { %8732 = vmatprep.subr.bf16.mxu1 %v10834_v56  ;;  %v5284_v2 = vld [vmem:[#allocation12 + $0x678] sm:$0xff]  ;;  %v10863_v56 = vcombine.low %v5271_v28, %v5275_v9 }
 0x53b   :  { %v10874_v38 = vcombine.high %v5280_v33, %v5284_v2  ;;  %v10873_v13 = vcombine.low %v5280_v33, %v5284_v2  ;;  %v5319_v2 = vld [vmem:[#allocation12 + $0x790] sm:$0xff] }
 0x53c   :  { %8569 = vmatpush1.bf16.msra.mxu0 %v10831_v60  ;;  %v5291_v60 = vld [vmem:[#allocation12 + $0x6b0] sm:$0xff] }
 0x53d   :  { %8733 = vmatpush1.bf16.msra.mxu1 %v10833_v44  ;;  %8570 = vmatprep.subr.bf16.mxu0 %v10840_v41  ;;  %v5288_v44 = vld [vmem:[#allocation12 + $0x698] sm:$0xff]  ;;  %v10880_v11 = vcombine.high %v5287_v7, %v5291_v60 }
 0x53e   :  { %8734 = vmatprep.subr.bf16.mxu1 %v10842_v40  ;;  %v5292_v41 = vld [vmem:[#allocation12 + $0x6b8] sm:$0xff]  ;;  %v10871_v40 = vcombine.low %v5279_v29, %v5283_v14 }
 0x53f   :  { %v10882_v51 = vcombine.high %v5288_v44, %v5292_v41  ;;  %v10881_v59 = vcombine.low %v5288_v44, %v5292_v41  ;;  %v5327_v41 = vld [vmem:[#allocation12 + $0x7d0] sm:$0xff] }
 0x540   :  { %8571 = vmatpush1.bf16.msra.mxu0 %v10839_v47  ;;  %v5299_v47 = vld [vmem:[#allocation12 + $0x6f0] sm:$0xff] }
 0x541   :  { %8735 = vmatpush1.bf16.msra.mxu1 %v10841_v37  ;;  %8572 = vmatprep.subr.bf16.mxu0 %v10848_v5  ;;  %v5296_v37 = vld [vmem:[#allocation12 + $0x6d8] sm:$0xff]  ;;  %v10888_v23 = vcombine.high %v5295_v43, %v5299_v47 }
 0x542   :  { %8736 = vmatprep.subr.bf16.mxu1 %v10850_v46  ;;  %v5300_v5 = vld [vmem:[#allocation12 + $0x6f8] sm:$0xff]  ;;  %v10879_v46 = vcombine.low %v5287_v7, %v5291_v60 }
 0x543   :  { %v10890_v21 = vcombine.high %v5296_v37, %v5300_v5  ;;  %v10889_v28 = vcombine.low %v5296_v37, %v5300_v5  ;;  %v5335_v5 = vld [vmem:[#allocation12 + $0x810] sm:$0xff] }
 0x544   :  { %8573 = vmatpush1.bf16.msra.mxu0 %v10847_v62  ;;  %v5307_v62 = vld [vmem:[#allocation12 + $0x730] sm:$0xff] }
 0x545   :  { %8737 = vmatpush1.bf16.msra.mxu1 %v10849_v15  ;;  %8574 = vmatprep.subr.bf16.mxu0 %v10856_v49  ;;  %v5304_v15 = vld [vmem:[#allocation12 + $0x718] sm:$0xff]  ;;  %v10896_v9 = vcombine.high %v5303_v53, %v5307_v62 }
 0x546   :  { %8738 = vmatprep.subr.bf16.mxu1 %v10858_v3  ;;  %v5308_v49 = vld [vmem:[#allocation12 + $0x738] sm:$0xff]  ;;  %v10887_v3 = vcombine.low %v5295_v43, %v5299_v47 }
 0x547   :  { %v10898_v12 = vcombine.high %v5304_v15, %v5308_v49  ;;  %v10897_v29 = vcombine.low %v5304_v15, %v5308_v49  ;;  %v5343_v49 = vld [vmem:[#allocation12 + $0x850] sm:$0xff] }
 0x548   :  { %8575 = vmatpush1.bf16.msra.mxu0 %v10855_v17  ;;  %v5315_v17 = vld [vmem:[#allocation12 + $0x770] sm:$0xff] }
 0x549   :  { %8739 = vmatpush1.bf16.msra.mxu1 %v10857_v1  ;;  %8576 = vmatprep.subr.bf16.mxu0 %v10864_v50  ;;  %v5312_v1 = vld [vmem:[#allocation12 + $0x758] sm:$0xff]  ;;  %v10904_v14 = vcombine.high %v5311_v35, %v5315_v17 }
 0x54a   :  { %8740 = vmatprep.subr.bf16.mxu1 %v10866_v26  ;;  %v5316_v50 = vld [vmem:[#allocation12 + $0x778] sm:$0xff]  ;;  %v10895_v26 = vcombine.low %v5303_v53, %v5307_v62 }
 0x54b   :  { %v10906_v33 = vcombine.high %v5312_v1, %v5316_v50  ;;  %v10905_v7 = vcombine.low %v5312_v1, %v5316_v50  ;;  %v5351_v1 = vld [vmem:[#allocation12 + $0x890] sm:$0xff] }
 0x54c   :  { %8577 = vmatpush1.bf16.msra.mxu0 %v10863_v56  ;;  %v5323_v56 = vld [vmem:[#allocation12 + $0x7b0] sm:$0xff] }
 0x54d   :  { %8741 = vmatpush1.bf16.msra.mxu1 %v10865_v54  ;;  %8578 = vmatprep.subr.bf16.mxu0 %v10872_v16  ;;  %v5320_v54 = vld [vmem:[#allocation12 + $0x798] sm:$0xff]  ;;  %v10912_v60 = vcombine.high %v5319_v2, %v5323_v56  ;;  %v5355_v50 = vld [vmem:[#allocation12 + $0x8b0] sm:$0xff] }
 0x54e   :  { %8742 = vmatprep.subr.bf16.mxu1 %v10874_v38  ;;  %v5324_v16 = vld [vmem:[#allocation12 + $0x7b8] sm:$0xff]  ;;  %v10903_v38 = vcombine.low %v5311_v35, %v5315_v17 }
 0x54f   :  { %v10914_v44 = vcombine.high %v5320_v54, %v5324_v16  ;;  %v10913_v43 = vcombine.low %v5320_v54, %v5324_v16  ;;  %v5359_v16 = vld [vmem:[#allocation12 + $0x8d0] sm:$0xff] }
 0x550   :  { %8579 = vmatpush1.bf16.msra.mxu0 %v10871_v40  ;;  %v5331_v40 = vld [vmem:[#allocation12 + $0x7f0] sm:$0xff] }
 0x551   :  { %8743 = vmatpush1.bf16.msra.mxu1 %v10873_v13  ;;  %8580 = vmatprep.subr.bf16.mxu0 %v10880_v11  ;;  %v5328_v13 = vld [vmem:[#allocation12 + $0x7d8] sm:$0xff]  ;;  %v10920_v47 = vcombine.high %v5327_v41, %v5331_v40 }
 0x552   :  { %8744 = vmatprep.subr.bf16.mxu1 %v10882_v51  ;;  %v5332_v11 = vld [vmem:[#allocation12 + $0x7f8] sm:$0xff]  ;;  %v10911_v51 = vcombine.low %v5319_v2, %v5323_v56  ;;  %v10944_v56 = vcombine.high %v5351_v1, %v5355_v50 }
 0x553   :  { %v10922_v37 = vcombine.high %v5328_v13, %v5332_v11  ;;  %v10921_v53 = vcombine.low %v5328_v13, %v5332_v11  ;;  %v5371_v13 = vld [vmem:[#allocation12 + $0x930] sm:$0xff]  ;;  %v5368_v11 = vld [vmem:[#allocation12 + $0x918] sm:$0xff] }
 0x554   :  { %8581 = vmatpush1.bf16.msra.mxu0 %v10879_v46  ;;  %v5339_v46 = vld [vmem:[#allocation12 + $0x830] sm:$0xff] }
 0x555   :  { %8745 = vmatpush1.bf16.msra.mxu1 %v10881_v59  ;;  %8582 = vmatprep.subr.bf16.mxu0 %v10888_v23  ;;  %v5336_v59 = vld [vmem:[#allocation12 + $0x818] sm:$0xff]  ;;  %v10928_v62 = vcombine.high %v5335_v5, %v5339_v46 }
 0x556   :  { %8746 = vmatprep.subr.bf16.mxu1 %v10890_v21  ;;  %v5340_v23 = vld [vmem:[#allocation12 + $0x838] sm:$0xff]  ;;  %v10919_v21 = vcombine.low %v5327_v41, %v5331_v40  ;;  %v5367_v40 = vld [vmem:[#allocation12 + $0x910] sm:$0xff] }
 0x557   :  { %v10930_v15 = vcombine.high %v5336_v59, %v5340_v23  ;;  %v10929_v35 = vcombine.low %v5336_v59, %v5340_v23  ;;  %v5380_v59 = vld [vmem:[#allocation12 + $0x978] sm:$0xff]  ;;  %v10959_v23 = vcombine.low %v5367_v40, %v5371_v13 }
 0x558   :  { %8583 = vmatpush1.bf16.msra.mxu0 %v10887_v3  ;;  %v5347_v3 = vld [vmem:[#allocation12 + $0x870] sm:$0xff] }
 0x559   :  { %8747 = vmatpush1.bf16.msra.mxu1 %v10889_v28  ;;  %8584 = vmatprep.subr.bf16.mxu0 %v10896_v9  ;;  %v10927_v28 = vcombine.low %v5335_v5, %v5339_v46  ;;  %v5344_v9 = vld [vmem:[#allocation12 + $0x858] sm:$0xff]  ;;  %v10936_v17 = vcombine.high %v5343_v49, %v5347_v3  ;;  %v5379_v5 = vld [vmem:[#allocation12 + $0x970] sm:$0xff] }
 0x55a   :  { %8748 = vmatprep.subr.bf16.mxu1 %v10898_v12  ;;  %v5348_v12 = vld [vmem:[#allocation12 + $0x878] sm:$0xff] }
 0x55b   :  { %v10937_v2 = vcombine.low %v5344_v9, %v5348_v12  ;;  %v5376_v46 = vld [vmem:[#allocation12 + $0x958] sm:$0xff] }
 0x55c   :  { %8585 = vmatpush1.bf16.msra.mxu0 %v10895_v26  ;;  %v10938_v26 = vcombine.high %v5344_v9, %v5348_v12  ;;  %v10969_v12 = vcombine.low %v5376_v46, %v5380_v59 }
 0x55d   :  { %8749 = vmatpush1.bf16.msra.mxu1 %v10897_v29  ;;  %8586 = vmatprep.subr.bf16.mxu0 %v10904_v14  ;;  %v5352_v29 = vld [vmem:[#allocation12 + $0x898] sm:$0xff] }
 0x55e   :  { %8750 = vmatprep.subr.bf16.mxu1 %v10906_v33  ;;  %v5356_v14 = vld [vmem:[#allocation12 + $0x8b8] sm:$0xff]  ;;  %v10935_v33 = vcombine.low %v5343_v49, %v5347_v3  ;;  %v5387_v49 = vld [vmem:[#allocation12 + $0x9b0] sm:$0xff] }
 0x55f   :  { %v10946_v54 = vcombine.high %v5352_v29, %v5356_v14  ;;  %v5384_v3 = vld [vmem:[#allocation12 + $0x998] sm:$0xff] }
 0x560   :  { %8587 = vmatpush1.bf16.msra.mxu0 %v10903_v38  ;;  %v5363_v38 = vld [vmem:[#allocation12 + $0x8f0] sm:$0xff] }
 0x561   :  { %8751 = vmatpush1.bf16.msra.mxu1 %v10905_v7  ;;  %8588 = vmatprep.subr.bf16.mxu0 %v10912_v60  ;;  %v10943_v7 = vcombine.low %v5351_v1, %v5355_v50  ;;  %v10945_v60 = vcombine.low %v5352_v29, %v5356_v14  ;;  %v5391_v1 = vld [vmem:[#allocation12 + $0x9d0] sm:$0xff]  ;;  %v5396_v29 = vld [vmem:[#allocation12 + $0x9f8] sm:$0xff] }
 0x562   :  { %8752 = vmatprep.subr.bf16.mxu1 %v10914_v44  ;;  %v10952_v44 = vcombine.high %v5359_v16, %v5363_v38  ;;  %v5395_v50 = vld [vmem:[#allocation12 + $0x9f0] sm:$0xff] }
 0x564   :  { %8589 = vmatpush1.bf16.msra.mxu0 %v10911_v51 }
 0x565   :  { %8753 = vmatpush1.bf16.msra.mxu1 %v10913_v43  ;;  %8590 = vmatprep.subr.bf16.mxu0 %v10920_v47  ;;  %v10960_v43 = vcombine.high %v5367_v40, %v5371_v13  ;;  %v10962_v47 = vcombine.high %v5368_v11, %v5372_v30  ;;  %v5411_v40 = vld [vmem:[#allocation12 + $0xa70] sm:$0xff]  ;;  %v5408_v13 = vld [vmem:[#allocation12 + $0xa58] sm:$0xff] }
 0x566   :  { %8754 = vmatprep.subr.bf16.mxu1 %v10922_v37  ;;  %v5375_v37 = vld [vmem:[#allocation12 + $0x950] sm:$0xff] }
 0x567   :  { %v10967_v9 = vcombine.low %v5375_v37, %v5379_v5 }
 0x568   :  { %8591 = vmatpush1.bf16.msra.mxu0 %v10919_v21  ;;  %v10961_v21 = vcombine.low %v5368_v11, %v5372_v30  ;;  %v5412_v11 = vld [vmem:[#allocation12 + $0xa78] sm:$0xff] }
 0x569   :  { %8755 = vmatpush1.bf16.msra.mxu1 %v10921_v53  ;;  %8601 = vmatprep.subr.bf16.mxu0 %v10928_v62  ;;  %v10968_v53 = vcombine.high %v5375_v37, %v5379_v5  ;;  %v10970_v62 = vcombine.high %v5376_v46, %v5380_v59  ;;  %v5419_v37 = vld [vmem:[#allocation12 + $0xab0] sm:$0xff]  ;;  %v5416_v5 = vld [vmem:[#allocation12 + $0xa98] sm:$0xff] }
 0x56a   :  { %8765 = vmatprep.subr.bf16.mxu1 %v10930_v15  ;;  %v5383_v15 = vld [vmem:[#allocation12 + $0x990] sm:$0xff]  ;;  %v5420_v46 = vld [vmem:[#allocation12 + $0xab8] sm:$0xff] }
 0x56b   :  { %11238 = vmatmul.mubr.msk.bf16.vlgmr.msra.gmra.mrb[12].mxu0 %vm12705_vm8, %v12709_v25  ;;  %v10975_v14 = vcombine.low %v5383_v15, %v5387_v49 }
 0x56c   :  { %11262 = vmatmul.mubr.msk.bf16.vlgmr.msra.gmra.mrb[12].mxu1 %vm12705_vm8, %v12709_v25  ;;  %8602 = vmatpush1.bf16.msra.mxu0 %v10927_v28  ;;  %v5364_v25 = vld [vmem:[#allocation12 + $0x8f8] sm:$0xff] }
 0x56d   :  { %11241 = vmatprep.mubr.msk.bf16.mxu0 %vm12711_vm9, %v12715_v39  ;;  %8766 = vmatpush1.bf16.msra.mxu1 %v10929_v35  ;;  %v10954_v41 = vcombine.high %v5360_v20, %v5364_v25  ;;  %v10953_v51 = vcombine.low %v5360_v20, %v5364_v25  ;;  %v5388_v28 = vld [vmem:[#allocation12 + $0x9b8] sm:$0xff]  ;;  %v10976_v35 = vcombine.high %v5383_v15, %v5387_v49  ;;  %v5427_v15 = vld [vmem:[#allocation12 + $0xaf0] sm:$0xff] }
 0x56e   :  { %11265 = vmatprep.mubr.msk.bf16.mxu1 %vm12711_vm9, %v12715_v39  ;;  %8603 = vmatprep.subr.bf16.mxu0 %v10936_v17  ;;  %v10951_v39 = vcombine.low %v5359_v16, %v5363_v38  ;;  %v10978_v17 = vcombine.high %v5384_v3, %v5388_v28  ;;  %v5403_v16 = vld [vmem:[#allocation12 + $0xa30] sm:$0xff]  ;;  %v5400_v38 = vld [vmem:[#allocation12 + $0xa18] sm:$0xff]  ;;  %v10983_v25 = vcombine.low %v5391_v1, %v5395_v50 }
 0x56f   :  { %8767 = vmatprep.subr.bf16.mxu1 %v10938_v26  ;;  %v5392_v26 = vld [vmem:[#allocation12 + $0x9d8] sm:$0xff] }
 0x570   :  { %8604 = vmatpush1.bf16.msra.mxu0 %v10935_v33  ;;  %v10977_v33 = vcombine.low %v5384_v3, %v5388_v28  ;;  %v5404_v20 = vld [vmem:[#allocation12 + $0xa38] sm:$0xff] }
 0x571   :  { %8768 = vmatpush1.bf16.msra.mxu1 %v10937_v2  ;;  %8605 = vmatprep.subr.bf16.mxu0 %v10944_v56  ;;  %v10984_v2 = vcombine.high %v5391_v1, %v5395_v50  ;;  %v10986_v56 = vcombine.high %v5392_v26, %v5396_v29  ;;  %v5424_v49 = vld [vmem:[#allocation12 + $0xad8] sm:$0xff]  ;;  %v5435_v1 = vld [vmem:[#allocation12 + $0xb30] sm:$0xff] }
 0x572   :  { %8769 = vmatprep.subr.bf16.mxu1 %v10946_v54  ;;  %v5399_v54 = vld [vmem:[#allocation12 + $0xa10] sm:$0xff]  ;;  %v5428_v3 = vld [vmem:[#allocation12 + $0xaf8] sm:$0xff] }
 0x573   :  { %v10991_v30 = vcombine.low %v5399_v54, %v5403_v16  ;;  %v5432_v50 = vld [vmem:[#allocation12 + $0xb18] sm:$0xff] }
 0x574   :  { %8606 = vmatpush1.bf16.msra.mxu0 %v10943_v7  ;;  %v10985_v7 = vcombine.low %v5392_v26, %v5396_v29  ;;  %v5436_v26 = vld [vmem:[#allocation12 + $0xb38] sm:$0xff] }
 0x575   :  { %8770 = vmatpush1.bf16.msra.mxu1 %v10945_v60  ;;  %8607 = vmatprep.subr.bf16.mxu0 %v10952_v44  ;;  %v10992_v60 = vcombine.high %v5399_v54, %v5403_v16  ;;  %v10994_v44 = vcombine.high %v5400_v38, %v5404_v20  ;;  %v5443_v54 = vld [vmem:[#allocation12 + $0xb70] sm:$0xff]  ;;  %v5440_v16 = vld [vmem:[#allocation12 + $0xb58] sm:$0xff] }
 0x576   :  { %8771 = vmatprep.subr.bf16.mxu1 %v10954_v41  ;;  %v5407_v41 = vld [vmem:[#allocation12 + $0xa50] sm:$0xff] }
 0x577   :  { %v10999_v59 = vcombine.low %v5407_v41, %v5411_v40 }
 0x578   :  { %8608 = vmatpush1.bf16.msra.mxu0 %v10951_v39  ;;  %v10993_v39 = vcombine.low %v5400_v38, %v5404_v20  ;;  %v5444_v38 = vld [vmem:[#allocation12 + $0xb78] sm:$0xff] }
 0x579   :  { %8772 = vmatpush1.bf16.msra.mxu1 %v10953_v51  ;;  %8609 = vmatprep.subr.bf16.mxu0 %v10960_v43  ;;  %v11000_v51 = vcombine.high %v5407_v41, %v5411_v40  ;;  %v11002_v43 = vcombine.high %v5408_v13, %v5412_v11  ;;  %v5451_v41 = vld [vmem:[#allocation12 + $0xbb0] sm:$0xff]  ;;  %v5448_v40 = vld [vmem:[#allocation12 + $0xb98] sm:$0xff] }
 0x57a   :  { %8773 = vmatprep.subr.bf16.mxu1 %v10962_v47  ;;  %v5415_v47 = vld [vmem:[#allocation12 + $0xa90] sm:$0xff] }
 0x57b   :  { %v11007_v28 = vcombine.low %v5415_v47, %v5419_v37 }
 0x57c   :  { %8610 = vmatpush1.bf16.msra.mxu0 %v10959_v23  ;;  %v11001_v23 = vcombine.low %v5408_v13, %v5412_v11  ;;  %v5452_v13 = vld [vmem:[#allocation12 + $0xbb8] sm:$0xff] }
 0x57d   :  { %8774 = vmatpush1.bf16.msra.mxu1 %v10961_v21  ;;  %8611 = vmatprep.subr.bf16.mxu0 %v10968_v53  ;;  %v11008_v21 = vcombine.high %v5415_v47, %v5419_v37  ;;  %v11010_v53 = vcombine.high %v5416_v5, %v5420_v46  ;;  %v5459_v47 = vld [vmem:[#allocation12 + $0xbf0] sm:$0xff]  ;;  %v5456_v37 = vld [vmem:[#allocation12 + $0xbd8] sm:$0xff] }
 0x57e   :  { %8775 = vmatprep.subr.bf16.mxu1 %v10970_v62  ;;  %v5423_v62 = vld [vmem:[#allocation12 + $0xad0] sm:$0xff] }
 0x57f   :  { %v11015_v29 = vcombine.low %v5423_v62, %v5427_v15 }
 0x580   :  { %8612 = vmatpush1.bf16.msra.mxu0 %v10967_v9  ;;  %v11009_v9 = vcombine.low %v5416_v5, %v5420_v46  ;;  %v5460_v5 = vld [vmem:[#allocation12 + $0xbf8] sm:$0xff] }
 0x581   :  { %8776 = vmatpush1.bf16.msra.mxu1 %v10969_v12  ;;  %8613 = vmatprep.subr.bf16.mxu0 %v10976_v35  ;;  %v11016_v12 = vcombine.high %v5423_v62, %v5427_v15  ;;  %v11018_v35 = vcombine.high %v5424_v49, %v5428_v3  ;;  %v5467_v62 = vld [vmem:[#allocation12 + $0xc30] sm:$0xff]  ;;  %v5464_v15 = vld [vmem:[#allocation12 + $0xc18] sm:$0xff] }
 0x582   :  { %8777 = vmatprep.subr.bf16.mxu1 %v10978_v17  ;;  %v5431_v17 = vld [vmem:[#allocation12 + $0xb10] sm:$0xff] }
 0x583   :  { %v11023_v20 = vcombine.low %v5431_v17, %v5435_v1 }
 0x584   :  { %8614 = vmatpush1.bf16.msra.mxu0 %v10975_v14  ;;  %v11017_v14 = vcombine.low %v5424_v49, %v5428_v3  ;;  %v5468_v49 = vld [vmem:[#allocation12 + $0xc38] sm:$0xff] }
 0x585   :  { %8778 = vmatpush1.bf16.msra.mxu1 %v10977_v33  ;;  %8615 = vmatprep.subr.bf16.mxu0 %v10984_v2  ;;  %v11024_v33 = vcombine.high %v5431_v17, %v5435_v1  ;;  %v11026_v2 = vcombine.high %v5432_v50, %v5436_v26  ;;  %v5475_v17 = vld [vmem:[#allocation12 + $0xc70] sm:$0xff] }
 0x586   :  { %8779 = vmatprep.subr.bf16.mxu1 %v10986_v56  ;;  %v5439_v56 = vld [vmem:[#allocation12 + $0xb50] sm:$0xff] }
 0x587   :  { %v11031_v11 = vcombine.low %v5439_v56, %v5443_v54 }
 0x588   :  { %8616 = vmatpush1.bf16.msra.mxu0 %v10983_v25  ;;  %v11025_v25 = vcombine.low %v5432_v50, %v5436_v26  ;;  %v5472_v50 = vld [vmem:[#allocation12 + $0xc58] sm:$0xff] }
 0x589   :  { %8780 = vmatpush1.bf16.msra.mxu1 %v10985_v7  ;;  %8617 = vmatprep.subr.bf16.mxu0 %v10992_v60  ;;  %v11032_v7 = vcombine.high %v5439_v56, %v5443_v54  ;;  %v11034_v60 = vcombine.high %v5440_v16, %v5444_v38  ;;  %v5476_v26 = vld [vmem:[#allocation12 + $0xc78] sm:$0xff] }
 0x58a   :  { %8781 = vmatprep.subr.bf16.mxu1 %v10994_v44  ;;  %v5447_v44 = vld [vmem:[#allocation12 + $0xb90] sm:$0xff]  ;;  %v11066_v56 = vcombine.high %v5472_v50, %v5476_v26  ;;  %v5480_v54 = vld [vmem:[#allocation12 + $0xc98] sm:$0xff] }
 0x58b   :  { %v11039_v46 = vcombine.low %v5447_v44, %v5451_v41 }
 0x58c   :  { %8618 = vmatpush1.bf16.msra.mxu0 %v10991_v30  ;;  %v11033_v30 = vcombine.low %v5440_v16, %v5444_v38  ;;  %v5484_v16 = vld [vmem:[#allocation12 + $0xcb8] sm:$0xff] }
 0x58d   :  { %8782 = vmatpush1.bf16.msra.mxu1 %v10993_v39  ;;  %8619 = vmatprep.subr.bf16.mxu0 %v11000_v51  ;;  %v11040_v39 = vcombine.high %v5447_v44, %v5451_v41  ;;  %v11042_v51 = vcombine.high %v5448_v40, %v5452_v13  ;;  %v5491_v44 = vld [vmem:[#allocation12 + $0xcf0] sm:$0xff] }
 0x58e   :  { %8783 = vmatprep.subr.bf16.mxu1 %v11002_v43  ;;  %v5455_v43 = vld [vmem:[#allocation12 + $0xbd0] sm:$0xff] }
 0x58f   :  { %v11047_v3 = vcombine.low %v5455_v43, %v5459_v47 }
 0x590   :  { %8620 = vmatpush1.bf16.msra.mxu0 %v10999_v59  ;;  %v11041_v59 = vcombine.low %v5448_v40, %v5452_v13  ;;  %v11073_v40 = vcombine.low %v5480_v54, %v5484_v16 }
 0x591   :  { %8784 = vmatpush1.bf16.msra.mxu1 %v11001_v23  ;;  %8621 = vmatprep.subr.bf16.mxu0 %v11008_v21  ;;  %v11048_v23 = vcombine.high %v5455_v43, %v5459_v47  ;;  %v11050_v21 = vcombine.high %v5456_v37, %v5460_v5 }
 0x592   :  { %8785 = vmatprep.subr.bf16.mxu1 %v11010_v53  ;;  %v5463_v53 = vld [vmem:[#allocation12 + $0xc10] sm:$0xff] }
 0x593   :  { %v11055_v1 = vcombine.low %v5463_v53, %v5467_v62 }
 0x594   :  { %8622 = vmatpush1.bf16.msra.mxu0 %v11007_v28  ;;  %v11049_v28 = vcombine.low %v5456_v37, %v5460_v5  ;;  %v12828_v37 = vld [vmem:[#allocation14] sm:$0xff]  ;;  %v12830_v5 = vld [vmem:[#allocation12 + $0xd50] sm:$0xff] }
 0x595   :  { %8786 = vmatpush1.bf16.msra.mxu1 %v11009_v9  ;;  %8623 = vmatprep.subr.bf16.mxu0 %v11016_v12  ;;  %v11056_v9 = vcombine.high %v5463_v53, %v5467_v62  ;;  %v11058_v12 = vcombine.high %v5464_v15, %v5468_v49  ;;  %v12838_v53 = vld [vmem:[#allocation12 + $0xd90] sm:$0xff] }
 0x596   :  { %8787 = vmatprep.subr.bf16.mxu1 %v11018_v35  ;;  %v5471_v35 = vld [vmem:[#allocation12 + $0xc50] sm:$0xff] }
 0x597   :  { %v11063_v38 = vcombine.low %v5471_v35, %v5475_v17  ;;  %v12840_v62 = vld [vmem:[#allocation12 + $0xdb0] sm:$0xff] }
 0x598   :  { %8624 = vmatpush1.bf16.msra.mxu0 %v11015_v29  ;;  %v11057_v29 = vcombine.low %v5464_v15, %v5468_v49  ;;  %v12842_v15 = vld [vmem:[#allocation12 + $0xd98] sm:$0xff] }
 0x599   :  { %8788 = vmatpush1.bf16.msra.mxu1 %v11017_v14  ;;  %8625 = vmatprep.subr.bf16.mxu0 %v11024_v33  ;;  %v11064_v14 = vcombine.high %v5471_v35, %v5475_v17  ;;  %v5479_v33 = vld [vmem:[#allocation12 + $0xc90] sm:$0xff]  ;;  %v5594_v35 = vrot.slane %v12828_v37, %v12256_v18  ;;  %v5602_v17 = vrot.slane %v12828_v37, %v12259_v19 }
 0x59a   :  { %8789 = vmatprep.subr.bf16.mxu1 %v11026_v2  ;;  %v5483_v2 = vld [vmem:[#allocation12 + $0xcb0] sm:$0xff] }
 0x59b   :  { %v11071_v41 = vcombine.low %v5479_v33, %v5483_v2 }
 0x59c   :  { %8626 = vmatpush1.bf16.msra.mxu0 %v11023_v20  ;;  %v11065_v20 = vcombine.low %v5472_v50, %v5476_v26  ;;  %v12856_v50 = vld [vmem:[#allocation12 + $0xdd8] sm:$0xff] }
 0x59d   :  { %8790 = vmatpush1.bf16.msra.mxu1 %v11025_v25  ;;  %8627 = vmatprep.subr.bf16.mxu0 %v11032_v7  ;;  %v11072_v25 = vcombine.high %v5479_v33, %v5483_v2  ;;  %v11074_v7 = vcombine.high %v5480_v54, %v5484_v16  ;;  %v12858_v26 = vld [vmem:[#allocation12 + $0xdf8] sm:$0xff]  ;;  %v5606_v33 = vrot.slane %v12828_v37, %v12267_v24  ;;  %v12870_v54 = vld [vmem:[#allocation12 + $0xe30] sm:$0xff] }
 0x59e   :  { %8791 = vmatprep.subr.bf16.mxu1 %v11034_v60  ;;  %v5487_v60 = vld [vmem:[#allocation12 + $0xcd0] sm:$0xff]  ;;  %v12872_v16 = vld [vmem:[#allocation12 + $0xe18] sm:$0xff] }
 0x59f   :  { %v11080_v13 = vcombine.high %v5487_v60, %v5491_v44 }
 0x5a0   :  { %8628 = vmatpush1.bf16.msra.mxu0 %v11031_v11 }
 0x5a1   :  { %8792 = vmatpush1.bf16.msra.mxu1 %v11033_v30  ;;  %8629 = vmatprep.subr.bf16.mxu0 %v11040_v39  ;;  %v5495_v30 = vld [vmem:[#allocation12 + $0xd10] sm:$0xff] }
 0x5a2   :  { %8793 = vmatprep.subr.bf16.mxu1 %v11042_v51  ;;  %v5499_v39 = vld [vmem:[#allocation12 + $0xd30] sm:$0xff]  ;;  %v5496_v51 = vld [vmem:[#allocation12 + $0xd18] sm:$0xff] }
 0x5a3   :  { %v11088_v47 = vcombine.high %v5495_v30, %v5499_v39  ;;  %v11087_v49 = vcombine.low %v5495_v30, %v5499_v39  ;;  %v12898_v30 = vld [vmem:[#allocation12 + $0xe78] sm:$0xff]  ;;  %v12900_v39 = vld [vmem:[#allocation12 + $0xe90] sm:$0xff] }
 0x5a4   :  { %8630 = vmatpush1.bf16.msra.mxu0 %v11039_v46  ;;  %v11090_v46 = vcombine.high %v5496_v51, %v5500_v58 }
 0x5a5   :  { %8794 = vmatpush1.bf16.msra.mxu1 %v11041_v59  ;;  %8631 = vmatprep.subr.bf16.mxu0 %v11048_v23  ;;  %v12832_v59 = vld [vmem:[#allocation12 + $0xd70] sm:$0xff]  ;;  %v12834_v23 = vld [vmem:[#allocation12 + $0xd58] sm:$0xff] }
 0x5a6   :  { %8795 = vmatprep.subr.bf16.mxu1 %v11050_v21  ;;  %v12836_v21 = vld [vmem:[#allocation12 + $0xd78] sm:$0xff]  ;;  %v11095_v2 = vcombine.low %v12830_v5, %v12832_v59 }
 0x5a8   :  { %8632 = vmatpush1.bf16.msra.mxu0 %v11047_v3  ;;  %v11089_v3 = vcombine.low %v5496_v51, %v5500_v58  ;;  %v12902_v51 = vld [vmem:[#allocation12 + $0xeb0] sm:$0xff]  ;;  %v11114_v58 = vcombine.high %v12856_v50, %v12858_v26 }
 0x5a9   :  { %8796 = vmatpush1.bf16.msra.mxu1 %v11049_v28  ;;  %8642 = vmatprep.subr.bf16.mxu0 %v11056_v9  ;;  %v12844_v28 = vld [vmem:[#allocation12 + $0xdb8] sm:$0xff]  ;;  %v12846_v9 = vld [vmem:[#allocation12 + $0xdd0] sm:$0xff] }
 0x5aa   :  { %8806 = vmatprep.subr.bf16.mxu1 %v11058_v12  ;;  %v12848_v12 = vld [vmem:[#allocation12 + $0xdf0] sm:$0xff] }
 0x5ab   :  { %11244 = vmatmul.mubr.msk.bf16.vlgmr.msra.gmra.mrb[12].mxu0 %vm12743_vm12, %v12747_v4 }
 0x5ac   :  { %11268 = vmatmul.mubr.msk.bf16.vlgmr.msra.gmra.mrb[12].mxu1 %vm12743_vm12, %v12747_v4  ;;  %8643 = vmatpush1.bf16.msra.mxu0 %v11055_v1  ;;  %v5492_v4 = vld [vmem:[#allocation12 + $0xcf8] sm:$0xff]  ;;  %v11096_v1 = vcombine.high %v12830_v5, %v12832_v59 }
 0x5ad   :  { %11247 = vmatprep.mubr.msk.bf16.mxu0 %vm12749_vm13, %v12756_v61  ;;  %8807 = vmatpush1.bf16.msra.mxu1 %v11057_v29  ;;  %v11082_v11 = vcombine.high %v5488_v45, %v5492_v4  ;;  %v11081_v43 = vcombine.low %v5488_v45, %v5492_v4  ;;  %v12860_v29 = vld [vmem:[#allocation12 + $0xe10] sm:$0xff]  ;;  %v12888_v4 = vld [vmem:[#allocation12 + $0xe58] sm:$0xff] }
 0x5ae   :  { %11271 = vmatprep.mubr.msk.bf16.mxu1 %vm12749_vm13, %v12756_v61  ;;  %8644 = vmatprep.subr.bf16.mxu0 %v11064_v14  ;;  %v11079_v61 = vcombine.low %v5487_v60, %v5491_v44  ;;  %v5598_v14 = vrot.slane %v12828_v37, %v12264_v22  ;;  %v11105_v60 = vcombine.low %v12842_v15, %v12844_v28  ;;  %v12884_v44 = vld [vmem:[#allocation12 + $0xe50] sm:$0xff]  ;;  %v12912_v5 = vld [vmem:[#allocation12 + $0xeb8] sm:$0xff] }
 0x5af   :  { %8808 = vmatprep.subr.bf16.mxu1 %v11066_v56  ;;  %v11098_v56 = vcombine.high %v12834_v23, %v12836_v21  ;;  %v12886_v45 = vld [vmem:[#allocation12 + $0xe70] sm:$0xff] }
 0x5b0   :  { %8645 = vmatpush1.bf16.msra.mxu0 %v11063_v38  ;;  %v12874_v38 = vld [vmem:[#allocation12 + $0xe38] sm:$0xff] }
 0x5b1   :  { %8809 = vmatpush1.bf16.msra.mxu1 %v11065_v20  ;;  %8646 = vmatprep.subr.bf16.mxu0 %v11072_v25  ;;  %v11097_v20 = vcombine.low %v12834_v23, %v12836_v21  ;;  %v11103_v25 = vcombine.low %v12838_v53, %v12840_v62 }
 0x5b2   :  { %8810 = vmatprep.subr.bf16.mxu1 %v11074_v7  ;;  %v11104_v7 = vcombine.high %v12838_v53, %v12840_v62 }
 0x5b4   :  { %8647 = vmatpush1.bf16.msra.mxu0 %v11071_v41  ;;  %v11106_v41 = vcombine.high %v12842_v15, %v12844_v28 }
 0x5b5   :  { %8811 = vmatpush1.bf16.msra.mxu1 %v11073_v40  ;;  %8648 = vmatprep.subr.bf16.mxu0 %v11080_v13  ;;  %v11112_v13 = vcombine.high %v12846_v9, %v12848_v12 }
 0x5b6   :  { %8812 = vmatprep.subr.bf16.mxu1 %v11082_v11 }
 0x5b8   :  { %8649 = vmatpush1.bf16.msra.mxu0 %v11079_v61 }
 0x5b9   :  { %8813 = vmatpush1.bf16.msra.mxu1 %v11081_v43  ;;  %8650 = vmatprep.subr.bf16.mxu0 %v11088_v47  ;;  %v12910_v47 = vld [vmem:[#allocation12 + $0xe98] sm:$0xff] }
 0x5ba   :  { %8814 = vmatprep.subr.bf16.mxu1 %v11090_v46 }
 0x5bc   :  { %8651 = vmatpush1.bf16.msra.mxu0 %v11087_v49 }
 0x5bd   :  { %8815 = vmatpush1.bf16.msra.mxu1 %v11089_v3  ;;  %8652 = vmatprep.subr.bf16.mxu0 %v11096_v1 }
 0x5be   :  { %v8348_v46 = vpop.f32.mrb[8].mxu0  ;;  %8816 = vmatprep.subr.bf16.mxu1 %v11098_v56 }
 0x5bf   :  { %v12922_v62 = vadd.f32 %v8348_v46, %v5594_v35  ;;  %v8512_v49 = vpop.f32.mrb[8].mxu1  ;;  %v8350_v3 = vpop.f32.mrb[9].mxu0 }
 0x5c0   :  { %v12930_v61 = vadd.f32 %v8512_v49, %v5602_v17  ;;  %v12932_v23 = vadd.f32 %v8350_v3, %v5598_v14  ;;  %v8514_v21 = vpop.f32.mrb[9].mxu1  ;;  %v8352_v43 = vpop.f32.mrb[10].mxu0  ;;  %8653 = vmatpush1.bf16.msra.mxu0 %v11095_v2 }
 0x5c1   :  { %13326 = vst [vmem:[#allocation32_spill] sm:$0xff] %v12922_v62  ;;  %v8849_v1 = vrot.slane %v12922_v62, 4  ;;  %v8897_v56 = vmul.f32 %v12922_v62, %v12922_v62  ;;  %v12941_v53 = vadd.f32 %v8514_v21, %v5606_v33  ;;  %v8516_v17 = vpop.f32.mrb[10].mxu1  ;;  %8817 = vmatpush1.bf16.msra.mxu1 %v11097_v20  ;;  %v8353_v14 = vpop.f32.mrb[11].mxu0  ;;  %8654 = vmatprep.subr.bf16.mxu0 %v11104_v7 }
 0x5c2   :  { %13327 = vst [vmem:[#allocation33_spill] sm:$0xff] %v12930_v61  ;;  %13328 = vst [vmem:[#allocation34_spill] sm:$0xff] %v12932_v23  ;;  %v8861_v43 = vrot.slane %v12930_v61, 4  ;;  %v8899_v49 = vmul.f32 %v12930_v61, %v12930_v61  ;;  %v8855_v3 = vrot.slane %v12932_v23, 4  ;;  %v8898_v46 = vmul.f32 %v12932_v23, %v12932_v23  ;;  %v8517_v35 = vpop.f32.mrb[11].mxu1  ;;  %8818 = vmatprep.subr.bf16.mxu1 %v11106_v41 }
 0x5c3   :  { %v8850_v33 = vadd.f32 %v12922_v62, %v8849_v1  ;;  %v8905_v20 = vrot.slane %v8897_v56, 4  ;;  %v8867_v7 = vrot.slane %v12941_v53, 4  ;;  %v8900_v21 = vmul.f32 %v12941_v53, %v12941_v53 }
 0x5c4   :  { %v8862_v17 = vadd.f32 %v12930_v61, %v8861_v43  ;;  %v8917_v14 = vrot.slane %v8899_v49, 4  ;;  %v8856_v2 = vadd.f32 %v12932_v23, %v8855_v3  ;;  %v8911_v59 = vrot.slane %v8898_v46, 4  ;;  %8655 = vmatpush1.bf16.msra.mxu0 %v11103_v25 }
 0x5c5   :  { %v8851_v11 = vrot.slane %v8850_v33, 2  ;;  %v8906_v40 = vadd.f32 %v8905_v20, %v8897_v56  ;;  %v8868_v35 = vadd.f32 %v12941_v53, %v8867_v7  ;;  %v8923_v41 = vrot.slane %v8900_v21, 4  ;;  %8819 = vmatpush1.bf16.msra.mxu1 %v11105_v60  ;;  %8656 = vmatprep.subr.bf16.mxu0 %v11112_v13 }
 0x5c6   :  { %v8863_v1 = vrot.slane %v8862_v17, 2  ;;  %v8918_v57 = vadd.f32 %v8917_v14, %v8899_v49  ;;  %v8857_v42 = vrot.slane %v8856_v2, 2  ;;  %v8912_v62 = vadd.f32 %v8911_v59, %v8898_v46  ;;  %8820 = vmatprep.subr.bf16.mxu1 %v11114_v58 }
 0x5c7   :  { %v8852_v43 = vadd.f32 %v8851_v11, %v8850_v33  ;;  %v8907_v61 = vrot.slane %v8906_v40, 2  ;;  %v8869_v3 = vrot.slane %v8868_v35, 2  ;;  %v8924_v23 = vadd.f32 %v8923_v41, %v8900_v21 }
 0x5c8   :  { %v8864_v25 = vadd.f32 %v8863_v1, %v8862_v17  ;;  %v8919_v24 = vrot.slane %v8918_v57, 2  ;;  %v8858_v56 = vadd.f32 %v8857_v42, %v8856_v2  ;;  %v8913_v20 = vrot.slane %v8912_v62, 2 }
 0x5c9   :  { %v13329_v7 = vcombine.low %v12846_v9, %v12848_v12  ;;  %v8853_v15 = vrot.slane %v8852_v43, 1  ;;  %v8908_v28 = vadd.f32 %v8907_v61, %v8906_v40  ;;  %v8870_v60 = vadd.f32 %v8869_v3, %v8868_v35 }
 0x5ca   :  { %v8925_v13 = vrot.slane %v8924_v23, 2  ;;  %v13330_v59 = vcombine.low %v12856_v50, %v12858_v26  ;;  %v13331_v11 = vcombine.high %v12860_v29, %v12870_v54  ;;  %v8865_v58 = vrot.slane %v8864_v25, 1 }
 0x5cb   :  { %8657 = vmatpush1.bf16.msra.mxu0 %v13329_v7  ;;  %v8920_v46 = vadd.f32 %v8919_v24, %v8918_v57  ;;  %v8859_v42 = vrot.slane %v8858_v56, 1  ;;  %v8914_v2 = vadd.f32 %v8913_v20, %v8912_v62  ;;  %v13332_v9 = vcombine.high %v12872_v16, %v12874_v38  ;;  %v5552_v7 = vld [vmem:[#allocation12 + $0xed8] sm:$0xff] }
 0x5cc   :  { %8821 = vmatpush1.bf16.msra.mxu1 %v13330_v59  ;;  %8658 = vmatprep.subr.bf16.mxu0 %v13331_v11  ;;  %v8854_v12 = vadd.f32 %v8853_v15, %v8852_v43  ;;  %v8909_v40 = vrot.slane %v8908_v28, 1  ;;  %v8871_v61 = vrot.slane %v8870_v60, 1  ;;  %v8926_v49 = vadd.f32 %v8925_v13, %v8924_v23  ;;  %v5556_v15 = vld [vmem:[#allocation12 + $0xef8] sm:$0xff] }
 0x5cd   :  { %8822 = vmatprep.subr.bf16.mxu1 %v13332_v9  ;;  %v8866_v33 = vadd.f32 %v8865_v58, %v8864_v25  ;;  %v8921_v21 = vrot.slane %v8920_v46, 1  ;;  %v8860_v50 = vadd.f32 %v8859_v42, %v8858_v56  ;;  %v8915_v26 = vrot.slane %v8914_v2, 1  ;;  %v5555_v25 = vld [vmem:[#allocation12 + $0xef0] sm:$0xff] }
 0x5ce   :  { %v13333_v17 = vcombine.low %v12860_v29, %v12870_v54  ;;  %v8910_v14 = vadd.f32 %v8909_v40, %v8908_v28  ;;  %v12976_v24 = vmul.f32 0.125, %v8854_v12  ;;  %v8872_v57 = vadd.f32 %v8871_v61, %v8870_v60  ;;  %v5551_v54 = vld [vmem:[#allocation12 + $0xed0] sm:$0xff] }
 0x5cf   :  { %v8927_v62 = vrot.slane %v8926_v49, 1  ;;  %v13334_v35 = vcombine.low %v12872_v16, %v12874_v38  ;;  %v13335_v23 = vcombine.high %v12884_v44, %v12886_v45  ;;  %v8922_v41 = vadd.f32 %v8921_v21, %v8920_v46 }
 0x5d0   :  { %8659 = vmatpush1.bf16.msra.mxu0 %v13333_v17  ;;  %v12984_v1 = vmul.f32 0.125, %v8866_v33  ;;  %v8916_v43 = vadd.f32 %v8915_v26, %v8914_v2  ;;  %v12986_v3 = vmul.f32 0.125, %v8860_v50  ;;  %v13336_v29 = vcombine.high %v12888_v4, %v12898_v30  ;;  %v5563_v33 = vld [vmem:[#allocation12 + $0xf30] sm:$0xff]  ;;  %v5560_v26 = vld [vmem:[#allocation12 + $0xf18] sm:$0xff] }
 0x5d1   :  { %8823 = vmatpush1.bf16.msra.mxu1 %v13334_v35  ;;  %8660 = vmatprep.subr.bf16.mxu0 %v13335_v23  ;;  %v8961_v56 = vmul.f32 0.125, %v8910_v14  ;;  %v8969_v16 = vmul.f32 %v12976_v24, %v12976_v24  ;;  %v8928_v38 = vadd.f32 %v8927_v62, %v8926_v49  ;;  %v12993_v20 = vmul.f32 0.125, %v8872_v57  ;;  %v5559_v49 = vld [vmem:[#allocation12 + $0xf10] sm:$0xff]  ;;  %v5564_v17 = vld [vmem:[#allocation12 + $0xf38] sm:$0xff] }
 0x5d2   :  { %8824 = vmatprep.subr.bf16.mxu1 %v13336_v29  ;;  %v8963_v28 = vmul.f32 0.125, %v8922_v41  ;;  %v8971_v60 = vmul.f32 %v12984_v1, %v12984_v1  ;;  %v8962_v13 = vmul.f32 0.125, %v8916_v43  ;;  %v8970_v59 = vmul.f32 %v12986_v3, %v12986_v3  ;;  %v5567_v29 = vld [vmem:[#allocation12 + $0xf50] sm:$0xff] }
 0x5d3   :  { %v13337_v11 = vcombine.low %v12884_v44, %v12886_v45  ;;  %v8977_v58 = vsub.f32 %v8961_v56, %v8969_v16  ;;  %v8964_v46 = vmul.f32 0.125, %v8928_v38  ;;  %v8972_v42 = vmul.f32 %v12993_v20, %v12993_v20  ;;  %v5571_v56 = vld [vmem:[#allocation12 + $0xf70] sm:$0xff]  ;;  %v5568_v16 = vld [vmem:[#allocation12 + $0xf58] sm:$0xff] }
 0x5d4   :  { %v13338_v2 = vcombine.low %v12888_v4, %v12898_v30  ;;  %v13339_v9 = vcombine.high %v12900_v39, %v12902_v51  ;;  %v11144_v12 = vcombine.high %v5551_v54, %v5555_v25  ;;  %v8979_v40 = vsub.f32 %v8963_v28, %v8971_v60  ;;  %v5572_v38 = vld [vmem:[#allocation12 + $0xf78] sm:$0xff] }
 0x5d5   :  { %8661 = vmatpush1.bf16.msra.mxu0 %v13337_v11  ;;  %v8978_v61 = vsub.f32 %v8962_v13, %v8970_v59  ;;  %v13340_v44 = vcombine.high %v12910_v47, %v12912_v5  ;;  %v11146_v45 = vcombine.high %v5552_v7, %v5556_v15  ;;  %v8985_v21 = vadd.f32 1e-05, %v8977_v58  ;;  %v5583_v11 = vld [vmem:[#allocation12 + $0xfd0] sm:$0xff] }
 0x5d6   :  { %8825 = vmatpush1.bf16.msra.mxu1 %v13338_v2  ;;  %8662 = vmatprep.subr.bf16.mxu0 %v13339_v9  ;;  %v8980_v50 = vsub.f32 %v8964_v46, %v8972_v42  ;;  %v8987_v4 = vadd.f32 1e-05, %v8979_v40  ;;  %v13341_v14 = vcombine.low %v12900_v39, %v12902_v51  ;;  %v11143_v57 = vcombine.low %v5551_v54, %v5555_v25  ;;  %v5579_v25 = vld [vmem:[#allocation12 + $0xfb0] sm:$0xff]  ;;  %v5584_v42 = vld [vmem:[#allocation12 + $0xfd8] sm:$0xff] }
 0x5d7   :  { %8826 = vmatprep.subr.bf16.mxu1 %v13340_v44  ;;  %v8986_v30 = vadd.f32 1e-05, %v8978_v61  ;;  %11678 = vrsqrt.f32 %v8985_v21  ;;  %v13342_v35 = vcombine.low %v12910_v47, %v12912_v5  ;;  %v11145_v23 = vcombine.low %v5552_v7, %v5556_v15  ;;  %v5575_v5 = vld [vmem:[#allocation12 + $0xf90] sm:$0xff]  ;;  %v5576_v7 = vld [vmem:[#allocation12 + $0xf98] sm:$0xff] }
 0x5d8   :  { %v8988_v62 = vadd.f32 1e-05, %v8980_v50  ;;  %v11152_v41 = vcombine.high %v5559_v49, %v5563_v33  ;;  %11680 = vrsqrt.f32 %v8987_v4  ;;  %v11154_v43 = vcombine.high %v5560_v26, %v5564_v17  ;;  %v5580_v15 = vld [vmem:[#allocation12 + $0xfb8] sm:$0xff]  ;;  %v5587_v58 = vld [vmem:[#allocation12 + $0xff0] sm:$0xff] }
 0x5d9   :  { %8663 = vmatpush1.bf16.msra.mxu0 %v13341_v14  ;;  %11682 = vrsqrt.f32 %v8986_v30  ;;  %v11151_v39 = vcombine.low %v5559_v49, %v5563_v33  ;;  %v11153_v51 = vcombine.low %v5560_v26, %v5564_v17  ;;  %v11160_v54 = vcombine.high %v5567_v29, %v5571_v56  ;;  %v5588_v2 = vld [vmem:[#allocation12 + $0xff8] sm:$0xff] }
 0x5da   :  { %8827 = vmatpush1.bf16.msra.mxu1 %v13342_v35  ;;  %8664 = vmatprep.subr.bf16.mxu0 %v11144_v12  ;;  %11684 = vrsqrt.f32 %v8988_v62  ;;  %v11162_v47 = vcombine.high %v5568_v16, %v5572_v38  ;;  %v11159_v28 = vcombine.low %v5567_v29, %v5571_v56  ;;  %v11161_v60 = vcombine.low %v5568_v16, %v5572_v38  ;;  %v11598_v14 = vld [vmem:[#allocation18 + $0x40] sm:$0xff]   ;;  %v11605_v29 = vld [vmem:[#allocation18 + $0x88] sm:$0xff]   ;;  %v11606_v56 = vld [vmem:[#allocation18 + $0x50] sm:$0xff]  }
 0x5db   :  { %8828 = vmatprep.subr.bf16.mxu1 %v11146_v45  ;;  %v11168_v13 = vcombine.high %v5575_v5, %v5579_v25  ;;  %v11170_v59 = vcombine.high %v5576_v7, %v5580_v15  ;;  %v11167_v12 = vcombine.low %v5575_v5, %v5579_v25  ;;  %v11169_v61 = vcombine.low %v5576_v7, %v5580_v15  ;;  %v11600_v62 = vld [vmem:[#allocation18] sm:$0xff]   ;;  %v11607_v16 = vld [vmem:[#allocation18 + $0xd0] sm:$0xff]   ;;  %v11610_v38 = vld [vmem:[#allocation18 + $0x58] sm:$0xff]  }
 0x5dc   :  { %v11176_v44 = vcombine.high %v5583_v11, %v5587_v58  ;;  %v11178_v33 = vcombine.high %v5584_v42, %v5588_v2  ;;  %v11175_v26 = vcombine.low %v5583_v11, %v5587_v58  ;;  %v11177_v4 = vcombine.low %v5584_v42, %v5588_v2  ;;  %v11601_v35 = vld [vmem:[#allocation18 + $0x80] sm:$0xff]   ;;  %v11618_v15 = vld [vmem:[#allocation18 + $0x68] sm:$0xff]   ;;  %v11623_v11 = vld [vmem:[#allocation18 + $0xf0] sm:$0xff]  }
 0x5dd   :  { %8665 = vmatpush1.bf16.msra.mxu0 %v11143_v57  ;;  %v11599_v57 = vld [vmem:[#allocation18 + $0xc0] sm:$0xff]   ;;  %v11624_v58 = vld [vmem:[#allocation18 + $0x30] sm:$0xff]   ;;  %v11626_v42 = vld [vmem:[#allocation18 + $0x78] sm:$0xff]  }
 0x5de   :  { %8829 = vmatpush1.bf16.msra.mxu1 %v11145_v23  ;;  %8666 = vmatprep.subr.bf16.mxu0 %v11152_v41  ;;  %v11602_v23 = vld [vmem:[#allocation18 + $0x48] sm:$0xff]   ;;  %v11615_v5 = vld [vmem:[#allocation18 + $0xe0] sm:$0xff]   ;;  %v11627_v2 = vld [vmem:[#allocation18 + $0xf8] sm:$0xff]  }
 0x5df   :  { %8830 = vmatprep.subr.bf16.mxu1 %v11154_v43  ;;  %v11603_v41 = vld [vmem:[#allocation18 + $0xc8] sm:$0xff]   ;;  %v11616_v25 = vld [vmem:[#allocation18 + $0x20] sm:$0xff]  }
 0x5e0   :  { %v11604_v43 = vld [vmem:[#allocation18 + $0x8] sm:$0xff]   ;;  %v11617_v7 = vld [vmem:[#allocation18 + $0xa0] sm:$0xff]  }
 0x5e1   :  { %8667 = vmatpush1.bf16.msra.mxu0 %v11151_v39  ;;  %v11679_v46 = vpop.eup %11678  ;;  %v11611_v39 = vld [vmem:[#allocation18 + $0xd8] sm:$0xff]  }
 0x5e2   :  { %8831 = vmatpush1.bf16.msra.mxu1 %v11153_v51  ;;  %8668 = vmatprep.subr.bf16.mxu0 %v11160_v54  ;;  %v11681_v9 = vpop.eup %11680  ;;  %v11612_v51 = vld [vmem:[#allocation18 + $0x18] sm:$0xff]  }
 0x5e3   :  { %8832 = vmatprep.subr.bf16.mxu1 %v11162_v47  ;;  %v11683_v40 = vpop.eup %11682  ;;  %v11613_v54 = vld [vmem:[#allocation18 + $0x98] sm:$0xff]   ;;  %v11614_v47 = vld [vmem:[#allocation18 + $0x60] sm:$0xff]  }
 0x5e4   :  { %v11685_v45 = vpop.eup %11684  ;;  %v9009_v49 = vcombine.low %v11679_v46, %v11683_v40  ;;  %v11625_v46 = vld [vmem:[#allocation18 + $0xb0] sm:$0xff]   ;;  %v11630_v40 = vld [vmem:[#allocation18 + $0x140] sm:$0xff]  }
 0x5e5   :  { %8669 = vmatpush1.bf16.msra.mxu0 %v11159_v28  ;;  %v9010_v21 = vcombine.low %v11681_v9, %v11685_v45  ;;  %v11619_v28 = vld [vmem:[#allocation18 + $0xe8] sm:$0xff]   ;;  %v11628_v9 = vld [vmem:[#allocation18 + $0x38] sm:$0xff]   ;;  %v5618_v45 = vrot.slane %v12828_v37, %v12496_v34 }
 0x5e6   :  { %8833 = vmatpush1.bf16.msra.mxu1 %v11161_v60  ;;  %8670 = vmatprep.subr.bf16.mxu0 %v11168_v13  ;;  %v13020_v50 = vrot.slane %v9009_v49, %v12457_v32  ;;  %v11620_v60 = vld [vmem:[#allocation18 + $0x28] sm:$0xff]   ;;  %v5614_v49 = vrot.slane %v12828_v37, %v12499_v36 }
 0x5e7   :  { %8834 = vmatprep.subr.bf16.mxu1 %v11170_v59  ;;  %v13023_v17 = vrot.slane %v9010_v21, %v12457_v32  ;;  %v11621_v13 = vld [vmem:[#allocation18 + $0xa8] sm:$0xff]   ;;  %v11622_v59 = vld [vmem:[#allocation18 + $0x70] sm:$0xff]   ;;  %v5622_v21 = vrot.slane %v12828_v37, %v12502_v10 }
 0x5e9   :  { %8671 = vmatpush1.bf16.msra.mxu0 %v11167_v12  ;;  %v9041_v30 = vcombine.low %v13020_v50, %v13023_v17  ;;  %v11629_v12 = vld [vmem:[#allocation18 + $0xb8] sm:$0xff]  }
 0x5ea   :  { %8835 = vmatpush1.bf16.msra.mxu1 %v11169_v61  ;;  %8672 = vmatprep.subr.bf16.mxu0 %v11176_v44  ;;  %v11631_v61 = vld [vmem:[#allocation18 + $0x1c0] sm:$0xff]   ;;  %v5610_v44 = vrot.slane %v12828_v37, %v12490_v0  ;;  %v13058_v37 = vadd.s32 22136, %v12696_v63 }
 0x5eb   :  { %8836 = vmatprep.subr.bf16.mxu1 %v11178_v33  ;;  %v13040_v33 = vadd.s32 22136, %v12570_v31 }
 0x5ed   :  { %8673 = vmatpush1.bf16.msra.mxu0 %v11175_v26  ;;  %v13045_v26 = vadd.s32 22136, %v12578_v52 }
 0x5ee   :  { %8837 = vmatpush1.bf16.msra.mxu1 %v11177_v4  ;;  %11364 = vmatprep.subr.bf16.mxu0 %v11598_v14 }
 0x5ef   :  { %11386 = vmatprep.subr.bf16.mxu1 %v11599_v57 }
 0x5f0   :  { %11250 = vmatmul.mubr.msk.bf16.vlgmr.msra.gmra.mrb[12].mxu0 %vm12774_vm15, %v12778_v6 }
 0x5f1   :  { %11274 = vmatmul.mubr.msk.bf16.vlgmr.msra.gmra.mrb[12].mxu1 %vm12774_vm15, %v12778_v6  ;;  %11365 = vmatpush3.bf16.msra.mxu0 %v11600_v62  ;;  %v11609_v6 = vld [vmem:[#allocation18 + $0x90] sm:$0xff]  }
 0x5f2   :  { %11387 = vmatpush3.bf16.msra.mxu1 %v11601_v35  ;;  %11366 = vmatprep.subr.bf16.mxu0 %v11602_v23  ;;  %v13050_v35 = vadd.s32 22136, %v12574_v55 }
 0x5f3   :  { %11388 = vmatprep.subr.bf16.mxu1 %v11603_v41 }
 0x5f5   :  { %11367 = vmatpush3.bf16.msra.mxu0 %v11604_v43 }
 0x5f6   :  { %11389 = vmatpush3.bf16.msra.mxu1 %v11605_v29  ;;  %11368 = vmatprep.subr.bf16.mxu0 %v11606_v56  ;;  %v9277_v29 = vshrl.u32 %v13040_v33, 16 }
 0x5f7   :  { %11390 = vmatprep.subr.bf16.mxu1 %v11607_v16 }
 0x5f9   :  { %11369 = vmatpush3.bf16.msra.mxu0 %v11608_v48 }
 0x5fa   :  { %11391 = vmatpush3.bf16.msra.mxu1 %v11609_v6  ;;  %11370 = vmatprep.subr.bf16.mxu0 %v11610_v38  ;;  %v9279_v6 = vshrl.u32 %v13045_v26, 16 }
 0x5fb   :  { %11392 = vmatprep.subr.bf16.mxu1 %v11611_v39 }
 0x5fd   :  { %11371 = vmatpush3.bf16.msra.mxu0 %v11612_v51 }
 0x5fe   :  { %11393 = vmatpush3.bf16.msra.mxu1 %v11613_v54  ;;  %11372 = vmatprep.subr.bf16.mxu0 %v11614_v47 }
 0x5ff   :  { %11394 = vmatprep.subr.bf16.mxu1 %v11615_v5 }
 0x601   :  { %11373 = vmatpush3.bf16.msra.mxu0 %v11616_v25 }
 0x602   :  { %11395 = vmatpush3.bf16.msra.mxu1 %v11617_v7  ;;  %11374 = vmatprep.subr.bf16.mxu0 %v11618_v15 }
 0x603   :  { %11396 = vmatprep.subr.bf16.mxu1 %v11619_v28 }
 0x605   :  { %11375 = vmatpush3.bf16.msra.mxu0 %v11620_v60 }
 0x606   :  { %11397 = vmatpush3.bf16.msra.mxu1 %v11621_v13  ;;  %11376 = vmatprep.subr.bf16.mxu0 %v11622_v59 }
 0x607   :  { %11398 = vmatprep.subr.bf16.mxu1 %v11623_v11 }
 0x609   :  { %11377 = vmatpush3.bf16.msra.mxu0 %v11624_v58 }
 0x60a   :  { %11399 = vmatpush3.bf16.msra.mxu1 %v11625_v46  ;;  %11378 = vmatprep.subr.bf16.mxu0 %v11626_v42 }
 0x60b   :  { %11400 = vmatprep.subr.bf16.mxu1 %v11627_v2 }
 0x60d   :  { %11379 = vmatpush3.bf16.msra.mxu0 %v11628_v9 }
 0x60e   :  { %11401 = vmatpush3.bf16.msra.mxu1 %v11629_v12  ;;  %11408 = vmatprep.subr.bf16.mxu0 %v11630_v40 }
 0x60f   :  { %11430 = vmatprep.subr.bf16.mxu1 %v11631_v61 }
 0x6c3   :  { %v8676_v4 = vpop.f32.mrb[12].mxu0 }
 0x6c4   :  { %v13047_v14 = vadd.f32 %v8676_v4, %v5610_v44  ;;  %v8840_v57 = vpop.f32.mrb[12].mxu1  ;;  %v8678_v62 = vpop.f32.mrb[13].mxu0 }
 0x6c5   :  { %v13052_v23 = vadd.f32 %v8840_v57, %v5618_v45  ;;  %v13054_v41 = vadd.f32 %v8678_v62, %v5614_v49  ;;  %v8842_v31 = vpop.f32.mrb[13].mxu1  ;;  %v8680_v43 = vpop.f32.mrb[14].mxu0 }
 0x6c6   :  { %v8873_v52 = vrot.slane %v13047_v14, 4  ;;  %v8901_v56 = vmul.f32 %v13047_v14, %v13047_v14  ;;  %v13063_v16 = vadd.f32 %v8842_v31, %v5622_v21  ;;  %v8844_v55 = vpop.f32.mrb[14].mxu1  ;;  %v8681_v48 = vpop.f32.mrb[15].mxu0 }
 0x6c7   :  { %v8885_v38 = vrot.slane %v13052_v23, 4  ;;  %v8903_v39 = vmul.f32 %v13052_v23, %v13052_v23  ;;  %v8879_v51 = vrot.slane %v13054_v41, 4  ;;  %v8902_v63 = vmul.f32 %v13054_v41, %v13054_v41  ;;  %v8845_v54 = vpop.f32.mrb[15].mxu1 }
 0x6c8   :  { %v8874_v47 = vadd.f32 %v13047_v14, %v8873_v52  ;;  %v8929_v5 = vrot.slane %v8901_v56, 4  ;;  %v8891_v25 = vrot.slane %v13063_v16, 4  ;;  %v8904_v7 = vmul.f32 %v13063_v16, %v13063_v16 }
 0x6c9   :  { %v8886_v15 = vadd.f32 %v13052_v23, %v8885_v38  ;;  %v8941_v28 = vrot.slane %v8903_v39, 4  ;;  %v8880_v60 = vadd.f32 %v13054_v41, %v8879_v51  ;;  %v8935_v13 = vrot.slane %v8902_v63, 4 }
 0x6ca   :  { %v8875_v59 = vrot.slane %v8874_v47, 2  ;;  %v8930_v11 = vadd.f32 %v8929_v5, %v8901_v56  ;;  %v8892_v58 = vadd.f32 %v13063_v16, %v8891_v25  ;;  %v8947_v46 = vrot.slane %v8904_v7, 4 }
 0x6cb   :  { %v8887_v42 = vrot.slane %v8886_v15, 2  ;;  %v8942_v2 = vadd.f32 %v8941_v28, %v8903_v39  ;;  %v8881_v9 = vrot.slane %v8880_v60, 2  ;;  %v8936_v12 = vadd.f32 %v8935_v13, %v8902_v63 }
 0x6cc   :  { %v8876_v40 = vadd.f32 %v8875_v59, %v8874_v47  ;;  %v8931_v61 = vrot.slane %v8930_v11, 2  ;;  %v8893_v44 = vrot.slane %v8892_v58, 2  ;;  %v8948_v45 = vadd.f32 %v8947_v46, %v8904_v7 }
 0x6cd   :  { %v8888_v49 = vadd.f32 %v8887_v42, %v8886_v15  ;;  %v8943_v21 = vrot.slane %v8942_v2, 2  ;;  %v8882_v4 = vadd.f32 %v8881_v9, %v8880_v60  ;;  %v8937_v57 = vrot.slane %v8936_v12, 2 }
 0x6ce   :  { %v8877_v62 = vrot.slane %v8876_v40, 1  ;;  %v8932_v31 = vadd.f32 %v8931_v61, %v8930_v11  ;;  %v8894_v43 = vadd.f32 %v8893_v44, %v8892_v58  ;;  %v8949_v52 = vrot.slane %v8948_v45, 2 }
 0x6cf   :  { %v8889_v56 = vrot.slane %v8888_v49, 1  ;;  %v8944_v55 = vadd.f32 %v8943_v21, %v8942_v2  ;;  %v8883_v48 = vrot.slane %v8882_v4, 1  ;;  %v8938_v38 = vadd.f32 %v8937_v57, %v8936_v12 }
 0x6d0   :  { %v8878_v51 = vadd.f32 %v8877_v62, %v8876_v40  ;;  %v8933_v39 = vrot.slane %v8932_v31, 1  ;;  %v8895_v54 = vrot.slane %v8894_v43, 1  ;;  %v8950_v63 = vadd.f32 %v8949_v52, %v8948_v45 }
 0x6d1   :  { %v8890_v47 = vadd.f32 %v8889_v56, %v8888_v49  ;;  %v8945_v5 = vrot.slane %v8944_v55, 1  ;;  %v8884_v25 = vadd.f32 %v8883_v48, %v8882_v4  ;;  %v8939_v7 = vrot.slane %v8938_v38, 1 }
 0x6d2   :  { %v8934_v15 = vadd.f32 %v8933_v39, %v8932_v31  ;;  %v13079_v28 = vmul.f32 0.125, %v8878_v51  ;;  %v8896_v60 = vadd.f32 %v8895_v54, %v8894_v43  ;;  %v8951_v13 = vrot.slane %v8950_v63, 1 }
 0x6d3   :  { %v8946_v59 = vadd.f32 %v8945_v5, %v8944_v55  ;;  %v13081_v11 = vmul.f32 0.125, %v8890_v47  ;;  %v8940_v58 = vadd.f32 %v8939_v7, %v8938_v38  ;;  %v13083_v46 = vmul.f32 0.125, %v8884_v25 }
 0x6d4   :  { %v8965_v42 = vmul.f32 0.125, %v8934_v15  ;;  %v8973_v2 = vmul.f32 %v13079_v28, %v13079_v28  ;;  %v8952_v9 = vadd.f32 %v8951_v13, %v8950_v63  ;;  %v13087_v12 = vmul.f32 0.125, %v8896_v60 }
 0x6d5   :  { %v8967_v40 = vmul.f32 0.125, %v8946_v59  ;;  %v8975_v61 = vmul.f32 %v13081_v11, %v13081_v11  ;;  %v8966_v44 = vmul.f32 0.125, %v8940_v58  ;;  %v8974_v45 = vmul.f32 %v13083_v46, %v13083_v46 }
 0x6d6   :  { %v8981_v49 = vsub.f32 %v8965_v42, %v8973_v2  ;;  %v8968_v21 = vmul.f32 0.125, %v8952_v9  ;;  %v8976_v4 = vmul.f32 %v13087_v12, %v13087_v12  ;;  %v9273_v57 = vadd.s32 22136, %v12699_v27 }
 0x6d7   :  { %v8983_v62 = vsub.f32 %v8967_v40, %v8975_v61  ;;  %v8982_v31 = vsub.f32 %v8966_v44, %v8974_v45  ;;  %v9276_v43 = vshrl.u32 %v13050_v35, 16  ;;  %v9275_v52 = vadd.s32 22136, %v12737_v8 }
 0x6d8   :  { %v8989_v56 = vadd.f32 1e-05, %v8981_v49  ;;  %v8984_v55 = vsub.f32 %v8968_v21, %v8976_v4  ;;  %v9278_v51 = vshrl.u32 %v13058_v37, 16  ;;  %v9285_v54 = vxor.u32 %v9277_v29, %v13040_v33 }
 0x6d9   :  { %v8991_v48 = vadd.f32 1e-05, %v8983_v62  ;;  %v8990_v38 = vadd.f32 1e-05, %v8982_v31  ;;  %v9287_v27 = vxor.u32 %v9279_v6, %v13045_v26  ;;  %v9284_v63 = vxor.u32 %v9276_v43, %v13050_v35 }
 0x6da   :  { %11686 = vrsqrt.f32 %v8989_v56  ;;  %v8992_v39 = vadd.f32 1e-05, %v8984_v55  ;;  %v9281_v8 = vshrl.u32 %v9273_v57, 16  ;;  %v9283_v47 = vshrl.u32 %v9275_v52, 16 }
 0x6db   :  { %11688 = vrsqrt.f32 %v8991_v48  ;;  %v9293_v5 = vmul.u32 2146121005, %v9285_v54  ;;  %v9295_v25 = vmul.u32 2146121005, %v9287_v27  ;;  %v9286_v7 = vxor.u32 %v9278_v51, %v13058_v37 }
 0x6dc   :  { %11690 = vrsqrt.f32 %v8990_v38  ;;  %v9292_v15 = vmul.u32 2146121005, %v9284_v63  ;;  %v9289_v60 = vxor.u32 %v9281_v8, %v9273_v57  ;;  %v9291_v13 = vxor.u32 %v9283_v47, %v9275_v52  ;;  %v8847_v8 = vld [vmem:[#allocation15] sm:$0xff] }
 0x6dd   :  { %11692 = vrsqrt.f32 %v8992_v39  ;;  %v9301_v59 = vshrl.u32 %v9293_v5, 15  ;;  %v9303_v33 = vshrl.u32 %v9295_v25, 15  ;;  %v9294_v29 = vmul.u32 2146121005, %v9286_v7 }
 0x6de   :  { %v9300_v58 = vshrl.u32 %v9292_v15, 15  ;;  %v9297_v42 = vmul.u32 2146121005, %v9289_v60  ;;  %v9299_v26 = vmul.u32 2146121005, %v9291_v13  ;;  %v9049_v51 = vrot.slane %v9041_v30, %v12457_v32 }
 0x6df   :  { %v9309_v9 = vxor.u32 %v9301_v59, %v9293_v5  ;;  %v9311_v40 = vxor.u32 %v9303_v33, %v9295_v25  ;;  %v9302_v61 = vshrl.u32 %v9294_v29, 15 }
 0x6e0   :  { %v9308_v49 = vxor.u32 %v9300_v58, %v9292_v15  ;;  %v9305_v21 = vshrl.u32 %v9297_v42, 15  ;;  %v9307_v37 = vshrl.u32 %v9299_v26, 15 }
 0x6e1   :  { %v9317_v31 = vmul.u32 2221713035, %v9309_v9  ;;  %v9319_v43 = vmul.u32 2221713035, %v9311_v40  ;;  %v9310_v52 = vxor.u32 %v9302_v61, %v9294_v29 }
 0x6e2   :  { %v9316_v56 = vmul.u32 2221713035, %v9308_v49  ;;  %v9313_v55 = vxor.u32 %v9305_v21, %v9297_v42  ;;  %v13109_v48 = vxor.u32 %v9307_v37, %v9299_v26  ;;  %v13343_v26 = vld [vmem:[#allocation29_spill] sm:$0xff] }
 0x6e3   :  { %v9325_v54 = vshrl.u32 %v9317_v31, 16  ;;  %v9327_v27 = vshrl.u32 %v9319_v43, 16  ;;  %v9318_v63 = vmul.u32 2221713035, %v9310_v52 }
 0x6e4   :  { %v11687_v6 = vpop.eup %11686  ;;  %v9324_v47 = vshrl.u32 %v9316_v56, 16  ;;  %v9321_v5 = vmul.u32 2221713035, %v9313_v55  ;;  %v9323_v25 = vmul.u32 2221713035, %v13109_v48 }
 0x6e5   :  { %v11689_v2 = vpop.eup %11688  ;;  %v13117_v60 = vxor.u32 %v9325_v54, %v9317_v31  ;;  %v13119_v13 = vxor.u32 %v9327_v27, %v9319_v43  ;;  %v9326_v50 = vshrl.u32 %v9318_v63, 16 }
 0x6e6   :  { %v11691_v35 = vpop.eup %11690  ;;  %v13121_v59 = vxor.u32 %v9324_v47, %v9316_v56  ;;  %v9329_v17 = vshrl.u32 %v9321_v5, 16  ;;  %v9331_v30 = vshrl.u32 %v9323_v25, 16  ;;  %v13344_v56 = vld [vmem:[#allocation34_spill] sm:$0xff] }
 0x6e7   :  { %v11693_v44 = vpop.eup %11692  ;;  %v9011_v45 = vcombine.low %v11687_v6, %v11691_v35 }
 0x6e8   :  { %v9012_v4 = vcombine.low %v11689_v2, %v11693_v44 }
 0x6e9   :  { %v9033_v57 = vrot.slane %v9011_v45, %v12457_v32 }
 0x6ea   :  { %v9040_v62 = vrot.slane %v9012_v4, %v12457_v32 }
 0x6ec   :  { %v9042_v38 = vcombine.low %v9033_v57, %v9040_v62 }
 0x6ee   :  { %v9056_v39 = vrot.slane %v9042_v38, %v12457_v32 }
 0x6f0   :  { %v9057_v7 = vcombine.low %v9049_v51, %v9056_v39  ;;  %v13345_v51 = vld [vmem:[#allocation32_spill] sm:$0xff] }
 0x6f2   :  { %v9059_v15 = vmul.f32 %v9057_v7, %v8847_v8 }
 0x6f4   :  { %v9060_v33 = vadd.f32 %v9059_v15, %v9059_v15  ;;  %v9065_v29 = vrot.slane %v9059_v15, %v12256_v18  ;;  %v9069_v58 = vrot.slane %v9059_v15, %v12264_v22  ;;  %v9073_v42 = vrot.slane %v9059_v15, %v12259_v19 }
 0x6f5   :  { %v9077_v6 = vrot.slane %v9059_v15, %v13343_v26  ;;  %v9081_v2 = vrot.slane %v9059_v15, %v12490_v0  ;;  %v9085_v35 = vrot.slane %v9059_v15, %v12499_v36  ;;  %v9089_v9 = vrot.slane %v9059_v15, %v12496_v34 }
 0x6f6   :  { %v9093_v40 = vrot.slane %v9059_v15, %v12502_v10  ;;  %v9102_v61 = vmul.f32 %v9065_v29, %v12976_v24  ;;  %v9103_v44 = vmul.f32 %v9069_v58, %v12986_v3  ;;  %v9104_v45 = vmul.f32 %v9073_v42, %v12984_v1  ;;  %v13346_v42 = vld [vmem:[#allocation33_spill] sm:$0xff] }
 0x6f7   :  { %v9105_v49 = vmul.f32 %v9077_v6, %v12993_v20  ;;  %v9106_v21 = vmul.f32 %v9081_v2, %v13079_v28  ;;  %v9107_v37 = vmul.f32 %v9085_v35, %v13083_v46  ;;  %v9108_v4 = vmul.f32 %v9089_v9, %v13081_v11  ;;  %v13347_v9 = vld [vmem:[#allocation30_spill] sm:$0xff] }
 0x6f8   :  { %v9109_v57 = vmul.f32 %v9093_v40, %v13087_v12  ;;  %v9118_v62 = vcombine.low %v9102_v61, %v9103_v44  ;;  %v9202_v31 = vrot.slane %v9060_v33, %v12502_v10  ;;  %v9178_v43 = vrot.slane %v9060_v33, %v12264_v22  ;;  %v13348_v44 = vld [vmem:[#allocation31_spill] sm:$0xff] }
 0x6f9   :  { %v9119_v24 = vcombine.low %v9104_v45, %v9105_v49  ;;  %v9120_v52 = vcombine.low %v9106_v21, %v9107_v37  ;;  %v9186_v3 = vrot.slane %v9060_v33, %v13343_v26  ;;  %v9174_v1 = vrot.slane %v9060_v33, %v12256_v18 }
 0x6fa   :  { %v9121_v20 = vcombine.low %v9108_v4, %v9109_v57  ;;  %v9128_v28 = vrot.slane %v9118_v62, %v12457_v32  ;;  %v9218_v46 = vmul.f32 %v13063_v16, %v9202_v31  ;;  %v9212_v11 = vmul.f32 %v13344_v56, %v9178_v43 }
 0x6fb   :  { %v9135_v12 = vrot.slane %v9119_v24, %v12457_v32  ;;  %v9142_v55 = vrot.slane %v9120_v52, %v12457_v32  ;;  %v9214_v38 = vmul.f32 %v12941_v53, %v9186_v3  ;;  %v9211_v39 = vmul.f32 %v13345_v51, %v9174_v1 }
 0x6fc   :  { %v9149_v54 = vrot.slane %v9121_v20, %v12457_v32  ;;  %v9182_v27 = vrot.slane %v9060_v33, %v12259_v19  ;;  %v9194_v8 = vrot.slane %v9060_v33, %v12499_v36  ;;  %v9190_v47 = vrot.slane %v9060_v33, %v12490_v0 }
 0x6fd   :  { %v9150_v7 = vcombine.low %v9128_v28, %v9135_v12  ;;  %v9334_v16 = vxor.u32 %v9326_v50, %v9318_v63  ;;  %v9337_v15 = vxor.u32 %v9329_v17, %v9321_v5  ;;  %v9198_v29 = vrot.slane %v9060_v33, %v12496_v34  ;;  %v8848_v5 = vld [vmem:[#allocation17] sm:$0xff] }
 0x6fe   :  { %v9151_v58 = vcombine.low %v9142_v55, %v9149_v54  ;;  %v9213_v6 = vmul.f32 %v13346_v42, %v9182_v27  ;;  %v9216_v53 = vmul.f32 %v13054_v41, %v9194_v8  ;;  %v9215_v2 = vmul.f32 %v13047_v14, %v9190_v47 }
 0x6ff   :  { %v9158_v35 = vrot.slane %v9150_v7, %v12457_v32  ;;  %v9272_v40 = vadd.s32 22136, %v13347_v9  ;;  %v9217_v61 = vmul.f32 %v13052_v23, %v9198_v29  ;;  %v9274_v45 = vadd.s32 22136, %v13348_v44  ;;  %v11632_v7 = vld [vmem:[#allocation18 + $0x100] sm:$0xff]   ;;  %v11634_v29 = vld [vmem:[#allocation18 + $0x148] sm:$0xff]   ;;  %v11638_v9 = vld [vmem:[#allocation18 + $0x150] sm:$0xff]  }
 0x700   :  { %v9165_v63 = vrot.slane %v9151_v58, %v12457_v32  ;;  %v9341_v50 = vshrl.u32 %v13117_v60, 31  ;;  %v9343_v33 = vshrl.u32 %v13119_v13, 31  ;;  %v9340_v41 = vshrl.u32 %v13121_v59, 31  ;;  %v11635_v58 = vld [vmem:[#allocation18 + $0x1c8] sm:$0xff]   ;;  %v11640_v44 = vld [vmem:[#allocation18 + $0x110] sm:$0xff]  }
 0x701   :  { %v9339_v14 = vxor.u32 %v9331_v30, %v9323_v25  ;;  %v9342_v49 = vshrl.u32 %v9334_v16, 31  ;;  %v9345_v21 = vshrl.u32 %v9337_v15, 31  ;;  %v9280_v37 = vshrl.u32 %v9272_v40, 16  ;;  %v11633_v16 = vld [vmem:[#allocation18 + $0x180] sm:$0xff]   ;;  %v11651_v60 = vld [vmem:[#allocation18 + $0x1e8] sm:$0xff]  }
 0x702   :  { %v9166_v17 = vcombine.low %v9158_v35, %v9165_v63  ;;  %v9282_v4 = vshrl.u32 %v9274_v45, 16  ;;  %vm13170_vm0 = vcmp.eq.s32.totalorder %v9341_v50, 1  ;;  %vm13174_vm1 = vcmp.eq.s32.totalorder %v9343_v33, 1  ;;  %v11643_v50 = vld [vmem:[#allocation18 + $0x1d8] sm:$0xff]   ;;  %v11653_v25 = vld [vmem:[#allocation18 + $0x1a8] sm:$0xff]  }
 0x703   :  { %vm13178_vm2 = vcmp.eq.s32.totalorder %v9340_v41, 1  ;;  %v9347_v48 = vshrl.u32 %v9339_v14, 31  ;;  %vm13182_vm3 = vcmp.eq.s32.totalorder %v9342_v49, 1  ;;  %vm13186_vm4 = vcmp.eq.s32.totalorder %v9345_v21, 1  ;;  %vm11340_vm5 = vmpackc.low %vm13170_vm0, %vm13170_vm0  ;;  %v11644_v33 = vld [vmem:[#allocation18 + $0x118] sm:$0xff]   ;;  %v11646_v49 = vld [vmem:[#allocation18 + $0x160] sm:$0xff]  }
 0x704   :  { %v9168_v23 = vsub.f32 %v8848_v5, %v9166_v17  ;;  %v13190_v30 = vxor.u32 %v9280_v37, %v9272_v40  ;;  %v13192_v62 = vxor.u32 %v9282_v4, %v9274_v45  ;;  %vm11346_vm6 = vmpackc.low %vm13174_vm1, %vm13174_vm1  ;;  %v11639_v40 = vld [vmem:[#allocation18 + $0x1d0] sm:$0xff]   ;;  %v11642_v5 = vld [vmem:[#allocation18 + $0x158] sm:$0xff]  }
 0x705   :  { %vm11343_vm7 = vmpackc.low %vm13178_vm2, %vm13178_vm2  ;;  %vm13215_vm8 = vcmp.eq.s32.totalorder %v9347_v48, 1  ;;  %v11641_v45 = vld [vmem:[#allocation18 + $0x190] sm:$0xff]   ;;  %v11645_v41 = vld [vmem:[#allocation18 + $0x198] sm:$0xff]  }
 0x706   :  { %v9169_v32 = vmul.f32 2.0, %v9168_v23  ;;  %vm11349_vm9 = vmpackc.low %vm13182_vm3, %vm13182_vm3  ;;  %v9298_v15 = vmul.u32 2146121005, %v13192_v62  ;;  %v11647_v21 = vld [vmem:[#allocation18 + $0x1e0] sm:$0xff]   ;;  %v11652_v48 = vld [vmem:[#allocation18 + $0x128] sm:$0xff]  }
 0x707   :  { %vm11352_vm10 = vmpackc.low %vm13186_vm4, %vm13186_vm4  ;;  %v11648_v4 = vld [vmem:[#allocation18 + $0x120] sm:$0xff]   ;;  %v11655_v62 = vld [vmem:[#allocation18 + $0x1f0] sm:$0xff]  }
 0x708   :  { %v9227_v31 = vrot.slane %v9169_v32, %v12264_v22  ;;  %v9235_v43 = vrot.slane %v9169_v32, %v13343_v26  ;;  %v9223_v24 = vrot.slane %v9169_v32, %v12256_v18  ;;  %v9231_v52 = vrot.slane %v9169_v32, %v12259_v19  ;;  %vm11358_vm11 = vmpackc.low %vm13215_vm8, %vm13215_vm8  ;;  %v11649_v23 = vld [vmem:[#allocation18 + $0x1a0] sm:$0xff]  }
 0x709   :  { %v9243_v3 = vrot.slane %v9169_v32, %v12499_v36  ;;  %v9251_v1 = vrot.slane %v9169_v32, %v12502_v10  ;;  %v9239_v20 = vrot.slane %v9169_v32, %v12490_v0  ;;  %v9247_v28 = vrot.slane %v9169_v32, %v12496_v34  ;;  %v11650_v32 = vld [vmem:[#allocation18 + $0x168] sm:$0xff]  }
 0x70a   :  { %v9261_v56 = vadd.f32 %v9227_v31, %v9212_v11  ;;  %v9263_v12 = vadd.f32 %v9235_v43, %v9214_v38  ;;  %v9260_v55 = vadd.f32 %v9223_v24, %v9211_v39  ;;  %v9262_v51 = vadd.f32 %v9231_v52, %v9213_v6  ;;  %v11656_v43 = vld [vmem:[#allocation18 + $0x130] sm:$0xff]  }
 0x70b   :  { %v9265_v22 = vadd.f32 %v9243_v3, %v9216_v53  ;;  %v9267_v18 = vadd.f32 %v9251_v1, %v9218_v46  ;;  %v13205_v26 = vadd.f32 %v9239_v20, %v9215_v2  ;;  %v13207_v19 = vadd.f32 %v9247_v28, %v9217_v61  ;;  %v11636_v53 = vld [vmem:[#allocation18 + $0x108] sm:$0xff]   ;;  %v11657_v24 = vld [vmem:[#allocation18 + $0x1b0] sm:$0xff]   ;;  %v11658_v3 = vld [vmem:[#allocation18 + $0x178] sm:$0xff]  }
 0x70c   :  { %v9357_v36 = vmax.f32 %v9261_v56, 0.0  ;;  %v9359_v10 = vmax.f32 %v9263_v12, 0.0  ;;  %v9356_v0 = vmax.f32 %v9260_v55, 0.0  ;;  %v9358_v34 = vmax.f32 %v9262_v51, 0.0  ;;  %v11637_v2 = vld [vmem:[#allocation18 + $0x188] sm:$0xff]   ;;  %v11659_v1 = vld [vmem:[#allocation18 + $0x1f8] sm:$0xff]  }
 0x70d   :  { %v9361_v11 = vmax.f32 %v9265_v22, 0.0  ;;  %v9363_v46 = vmax.f32 %v9267_v18, 0.0  ;;  %v9296_v39 = vmul.u32 2146121005, %v13190_v30  ;;  %v9306_v61 = vshrl.u32 %v9298_v15, 15  ;;  %v11654_v30 = vld [vmem:[#allocation18 + $0x170] sm:$0xff]  }
 0x70e   :  { %v11341_v54 = vpack.c.bf16 %v9357_v36, %v9357_v36  ;;  %v11347_v27 = vpack.c.bf16 %v9359_v10, %v9359_v10  ;;  %v11344_v8 = vpack.c.bf16 %v9356_v0, %v9356_v0  ;;  %v11350_v47 = vpack.c.bf16 %v9358_v34, %v9358_v34  ;;  %v11660_v28 = vld [vmem:[#allocation18 + $0x138] sm:$0xff]   ;;  %v11275_v10 = vld [vmem:[#allocation20] ss:$0 sm:$0xff] }
 0x70f   :  { %v11353_v42 = vpack.c.bf16 %v9361_v11, %v9361_v11  ;;  %v11359_v6 = vpack.c.bf16 %v9363_v46, %v9363_v46  ;;  %v9304_v35 = vshrl.u32 %v9296_v39, 15  ;;  %v9314_v17 = vxor.u32 %v9306_v61, %v9298_v15  ;;  %v11661_v56 = vld [vmem:[#allocation18 + $0x1b8] sm:$0xff]  }
 0x710   :  { %11342 = vmatprep.mubr.msk.bf16.mxu0 %vm11340_vm5, %v11341_v54  ;;  %11348 = vmatprep.mubr.msk.bf16.mxu1 %vm11346_vm6, %v11347_v27  ;;  %v9360_v12 = vmax.f32 %v13205_v26, 0.0  ;;  %v9362_v55 = vmax.f32 %v13207_v19, 0.0 }
 0x711   :  { %11345 = vmatmul.mubr.msk.bf16.vlgmr.msra.gmra.mrb[16].mxu0 %vm11343_vm7, %v11344_v8  ;;  %11351 = vmatmul.mubr.msk.bf16.vlgmr.msra.gmra.mrb[16].mxu1 %vm11349_vm9, %v11350_v47  ;;  %v9312_v63 = vxor.u32 %v9304_v35, %v9296_v39  ;;  %v9322_v37 = vmul.u32 2221713035, %v9314_v17 }
 0x712   :  { %11409 = vmatpush3.bf16.msra.mxu0 %v11632_v7  ;;  %11431 = vmatpush3.bf16.msra.mxu1 %v11633_v16  ;;  %v11356_v51 = vpack.c.bf16 %v9360_v12, %v9360_v12  ;;  %v11362_v22 = vpack.c.bf16 %v9362_v55, %v9362_v55 }
 0x713   :  { %11354 = vmatprep.mubr.msk.bf16.mxu0 %vm11352_vm10, %v11353_v42  ;;  %11360 = vmatprep.mubr.msk.bf16.mxu1 %vm11358_vm11, %v11359_v6  ;;  %v9320_v14 = vmul.u32 2221713035, %v9312_v63  ;;  %v9330_v13 = vshrl.u32 %v9322_v37, 16 }
 0x714   :  { %11410 = vmatprep.subr.bf16.mxu0 %v11634_v29  ;;  %11432 = vmatprep.subr.bf16.mxu1 %v11635_v58 }
 0x715   :  { %v9328_v57 = vshrl.u32 %v9320_v14, 16  ;;  %v9338_v31 = vxor.u32 %v9330_v13, %v9322_v37 }
 0x716   :  { %11411 = vmatpush3.bf16.msra.mxu0 %v11636_v53  ;;  %11433 = vmatpush3.bf16.msra.mxu1 %v11637_v2 }
 0x717   :  { %11412 = vmatprep.subr.bf16.mxu0 %v11638_v9  ;;  %11434 = vmatprep.subr.bf16.mxu1 %v11639_v40  ;;  %v9336_v59 = vxor.u32 %v9328_v57, %v9320_v14  ;;  %v9346_v20 = vshrl.u32 %v9338_v31, 31 }
 0x719   :  { %v9344_v52 = vshrl.u32 %v9336_v59, 31  ;;  %vm9354_vm13 = vcmp.eq.s32.totalorder %v9346_v20, 1 }
 0x71a   :  { %11413 = vmatpush3.bf16.msra.mxu0 %v11640_v44  ;;  %11435 = vmatpush3.bf16.msra.mxu1 %v11641_v45  ;;  %vm11361_vm15 = vmpackc.low %vm9354_vm13, %vm9354_vm13 }
 0x71b   :  { %11414 = vmatprep.subr.bf16.mxu0 %v11642_v5  ;;  %11436 = vmatprep.subr.bf16.mxu1 %v11643_v50  ;;  %vm9352_vm12 = vcmp.eq.s32.totalorder %v9344_v52, 1 }
 0x71c   :  { %vm11355_vm14 = vmpackc.low %vm9352_vm12, %vm9352_vm12 }
 0x71e   :  { %11415 = vmatpush3.bf16.msra.mxu0 %v11644_v33  ;;  %11437 = vmatpush3.bf16.msra.mxu1 %v11645_v41 }
 0x71f   :  { %11416 = vmatprep.subr.bf16.mxu0 %v11646_v49  ;;  %11438 = vmatprep.subr.bf16.mxu1 %v11647_v21 }
 0x722   :  { %11417 = vmatpush3.bf16.msra.mxu0 %v11648_v4  ;;  %11439 = vmatpush3.bf16.msra.mxu1 %v11649_v23 }
 0x723   :  { %11418 = vmatprep.subr.bf16.mxu0 %v11650_v32  ;;  %11440 = vmatprep.subr.bf16.mxu1 %v11651_v60 }
 0x726   :  { %11419 = vmatpush3.bf16.msra.mxu0 %v11652_v48  ;;  %11441 = vmatpush3.bf16.msra.mxu1 %v11653_v25 }
 0x727   :  { %11420 = vmatprep.subr.bf16.mxu0 %v11654_v30  ;;  %11442 = vmatprep.subr.bf16.mxu1 %v11655_v62 }
 0x72a   :  { %11421 = vmatpush3.bf16.msra.mxu0 %v11656_v43  ;;  %11443 = vmatpush3.bf16.msra.mxu1 %v11657_v24 }
 0x72b   :  { %11422 = vmatprep.subr.bf16.mxu0 %v11658_v3  ;;  %11444 = vmatprep.subr.bf16.mxu1 %v11659_v1 }
 0x72e   :  { %11423 = vmatpush3.bf16.msra.mxu0 %v11660_v28  ;;  %11445 = vmatpush3.bf16.msra.mxu1 %v11661_v56 }
 0x731   :  { %11357 = vmatmul.mubr.msk.bf16.vlgmr.msra.gmra.mrb[20].mxu0 %vm11355_vm14, %v11356_v51  ;;  %11363 = vmatmul.mubr.msk.bf16.vlgmr.msra.gmra.mrb[20].mxu1 %vm11361_vm15, %v11362_v22 }
 0x7e4   :  { %v11380_v18 = vpop.f32.mrb[16].mxu0  ;;  %v11402_v36 = vpop.f32.mrb[16].mxu1 }
 0x7e5   :  { %v11381_v0 = vpop.f32.mrb[17].mxu0  ;;  %v11403_v34 = vpop.f32.mrb[17].mxu1 }
 0x7e6   :  { %v11382_v11 = vadd.f32 %v11381_v0, %v11380_v18  ;;  %v11404_v38 = vadd.f32 %v11403_v34, %v11402_v36  ;;  %v11383_v46 = vpop.f32.mrb[18].mxu0  ;;  %v11405_v26 = vpop.f32.mrb[18].mxu1 }
 0x7e7   :  { %v11384_v39 = vpop.f32.mrb[19].mxu0  ;;  %v11406_v54 = vpop.f32.mrb[19].mxu1 }
 0x7e8   :  { %v9934_v19 = vadd.f32 %v11382_v11, %v11275_v10 }
 0x7ea   :  { %v9974_v27 = vadd.f32 %v11404_v38, %v9934_v19 }
 0x804   :  { %v11424_v8 = vpop.f32.mrb[20].mxu0  ;;  %v11446_v47 = vpop.f32.mrb[20].mxu1 }
 0x805   :  { %v11425_v7 = vpop.f32.mrb[21].mxu0  ;;  %v11447_v16 = vpop.f32.mrb[21].mxu1 }
 0x806   :  { %v11426_v15 = vadd.f32 %v11425_v7, %v11424_v8  ;;  %v11448_v29 = vadd.f32 %v11447_v16, %v11446_v47  ;;  %v11427_v58 = vpop.f32.mrb[22].mxu0  ;;  %v11449_v42 = vpop.f32.mrb[22].mxu1 }
 0x807   :  { %v11428_v6 = vpop.f32.mrb[23].mxu0  ;;  %v11450_v53 = vpop.f32.mrb[23].mxu1 }
 0x808   :  { %v10014_v2 = vadd.f32 %v11426_v15, %v9974_v27 }
 0x80a   :  { %v10054_v35 = vadd.f32 %v11448_v29, %v10014_v2 }
 0x80c   :  { %10059 = vmax.xlane.f32.xlu0 %v10054_v35 }
 0x899   :  { %v10060_v9 = vpop.xlane.xlu0 %10059 }
 0x89a   :  { %v10061_v40 = vsub.f32 %v10054_v35, %v10060_v9 }
 0x89c   :  { %v10062_v61 = vmul.f32 1.442695, %v10061_v40 }
 0x89e   :  { %11694 = vpow2.f32 %v10062_v61 }
 0x8a8   :  { %v11695_v44 = vpop.eup %11694 }
 0x8a9   :  { %10064 = vadd.xlane.f32.xlu0 %v11695_v44 }
 0x936   :  { %v10065_v45 = vpop.xlane.xlu0 %10064 }
 0x937   :  { %11696 = vlog2.f32 %v10065_v45 }
 0x941   :  { %v11697_v63 = vpop.eup %11696 }
 0x942   :  { %v10067_v5 = vmul.f32 0.6931472, %v11697_v63 }
 0x944   :  { %v10068_v50 = vadd.f32 %v10067_v5, %v10060_v9 }
 0x946   :  { %v10069_v17 = vsub.f32 %v10054_v35, %v10068_v50 }
 0x948   :  { %10070 = vst [vmem:[#allocation21] sm:$0xff] %v10069_v17 }
 0x949   :  { %11952 = shalt.err (!%p11949_p8)
}
 0x94a   :  { %s11953_s29 = scalar_lea.hbm %s13276_s12, 128 }
 0x94b   :  { %p11954_p9 = scmp.ne.s32.totalorder %s13276_s12, %s11953_s29  ;;  %p11957_p10 = scmp.lt.u32.totalorder %s11953_s29, %s13276_s12 }
 0x94d   :  { %p11959_p11 = pnand %p11957_p10, %p11954_p9 }
 0x94f   :  { %11962 = shalt.err (!%p11959_p11)
}
 0x950   :  { %10080 = dma.vmem_to_hbm [thread:$0]  %s10078_s27, 128, %s13276_s12, [#allocation5]  }
 0x951   :  { %11975 = dma.done.wait [#allocation5], 128  }
 0x952   :  { %11976 = vsyncadd [#allocation5], 4294967168 }
 0x953   :  { %10084 = vsyncpa [#allocation4], 1 }
 0x954   :  { %10085 = vsyncpa [#allocation7], 1 }
 0x955   :  { %10086 = vsyncpa [#allocation10], 1 }
 0x956   :  { %10087 = vsyncpa [#allocation13], 1 }
 0x957   :  { %10088 = vsyncpa [#allocation16], 1 }
 0x958   :  { %10089 = vsyncpa [#allocation19], 1 }
 0x959   :  { %10090 = vsyncpa [#allocation5], 1 }

</bundles_post_ra>
